<compile_context>
chip_gen: v7x
topology: tpu7x:2x2x1
jax: 0.10.0
libtpu: 0.0.40
codegen_flags: <defaults>
</compile_context>

<pallas_src>
import functools

import jax
import jax.numpy as jnp
from jax.experimental import pallas as pl
from jax.experimental.pallas import tpu as pltpu


def _im2col_3x3(src_ref, H, W, C):
    """Gather the nine 3x3-tap windows of a (H+2, W+2, C) zero-halo'd ref into a single
    (H*W, 9*C) bf16 im2col operand (columns ordered tap-major (dy, dx), then c_in)."""
    cols = []
    for dy in range(3):
        for dx in range(3):
            cols.append(src_ref[dy:dy + H, dx:dx + W, :])        # (H, W, C) bf16
    patch = jnp.concatenate(cols, axis=-1)                        # (H, W, 9*C)
    # Merge the two leading dims only (lane dim unchanged) -> (H*W, 9*C).
    return patch.reshape(H * W, 9 * C)


def _resblock_kernel(x_ref, w1_ref, b1_ref, w2_ref, b2_ref, o_ref,
                     pad_s, *, res_scale):
    # Block shapes:
    #   x_ref   : (1, H, W, C)  f32   one batch element (NHWC) — identity + conv input
    #   w*_ref  : (9*C, C)      bf16  3x3 conv weights, flattened tap-major (im2col layout)
    #   b*_ref  : (1, C)        f32   conv biases
    #   o_ref   : (1, H, W, C)  f32
    #   pad_s   : (H+2, W+2, C) bf16  VMEM scratch: shared zero-halo staging buffer
    _, H, W, C = x_ref.shape

    zero_row = jnp.zeros((1, W + 2, C), jnp.bfloat16)
    zero_col = jnp.zeros((H + 2, 1, C), jnp.bfloat16)

    # ---- zero the 1-pixel halo once per step (interior is fully overwritten below) ----
    pad_s[0:1, :, :] = zero_row
    pad_s[H + 1:H + 2, :, :] = zero_row
    pad_s[:, 0:1, :] = zero_col
    pad_s[:, W + 1:W + 2, :] = zero_col

    # ---- conv1 + bias + ReLU : single (H*W, 9C) x (9C, C) MXU matmul, f32 accumulation ----
    pad_s[1:H + 1, 1:W + 1, :] = x_ref[0].astype(jnp.bfloat16)
    p1 = _im2col_3x3(pad_s, H, W, C)                               # (H*W, 9C) bf16
    acc1 = jnp.dot(p1, w1_ref[...], preferred_element_type=jnp.float32)
    act1 = jnp.maximum(acc1 + b1_ref[0], 0.0)                      # (H*W, C) f32

    # ---- conv2 + bias : reuse the same halo buffer (borders still zero) ----
    pad_s[1:H + 1, 1:W + 1, :] = act1.reshape(H, W, C).astype(jnp.bfloat16)
    p2 = _im2col_3x3(pad_s, H, W, C)                               # (H*W, 9C) bf16
    acc2 = jnp.dot(p2, w2_ref[...], preferred_element_type=jnp.float32)
    acc2 = acc2 + b2_ref[0]                                        # (H*W, C) f32

    # ---- scaled residual add (identity path kept in f32) ----
    out = x_ref[0].astype(jnp.float32) + acc2.reshape(H, W, C) * res_scale
    o_ref[0] = out.astype(o_ref.dtype)


def residual_block_no_bn(x_nchw, w1, b1, w2, b2, *, res_scale=1.0):
    """x_nchw: (N, C, H, W) f32.  w1, w2: (3, 3, C, C) HWIO f32.  b1, b2: (C,) f32."""
    # layout: NCHW (PyTorch) -> NHWC (lane-dense channels) for the kernel.
    x = jnp.transpose(x_nchw, (0, 2, 3, 1))
    N, H, W, C = x.shape

    # Flatten 3x3 weights to the im2col K-layout (tap-major (dy, dx), then c_in) and cast
    # MXU operands to bf16 once in the wrapper; accumulation stays f32 inside the kernel.
    w1f = w1.reshape(9 * C, C).astype(jnp.bfloat16)
    w2f = w2.reshape(9 * C, C).astype(jnp.bfloat16)
    b1v = b1.reshape(1, C).astype(jnp.float32)
    b2v = b2.reshape(1, C).astype(jnp.float32)

    kernel = functools.partial(_resblock_kernel, res_scale=float(res_scale))

    out_nhwc = pl.pallas_call(
        kernel,
        out_shape=jax.ShapeDtypeStruct((N, H, W, C), x.dtype),
        grid=(N,),
        in_specs=[
            pl.BlockSpec((1, H, W, C), lambda n: (n, 0, 0, 0)),   # x (single input stream)
            pl.BlockSpec((9 * C, C), lambda n: (0, 0)),           # w1 (im2col layout, bf16)
            pl.BlockSpec((1, C), lambda n: (0, 0)),               # b1
            pl.BlockSpec((9 * C, C), lambda n: (0, 0)),           # w2 (im2col layout, bf16)
            pl.BlockSpec((1, C), lambda n: (0, 0)),               # b2
        ],
        out_specs=pl.BlockSpec((1, H, W, C), lambda n: (n, 0, 0, 0)),
        scratch_shapes=[
            pltpu.VMEM((H + 2, W + 2, C), jnp.bfloat16),          # shared zero-halo buffer
        ],
        compiler_params=pltpu.CompilerParams(
            dimension_semantics=("parallel",)),                   # batch elems independent (v7x: 2 TCs)
    )(x, w1f, b1v, w2f, b2v)

    return jnp.transpose(out_nhwc, (0, 3, 1, 2))                  # back to NCHW


def _reference_forward(x_nchw, w1, b1, w2, b2, res_scale=1.0):
    """Plain-JAX f32 reference (mirrors the PyTorch forward)."""
    dn = ("NCHW", "HWIO", "NCHW")
    y = jax.lax.conv_general_dilated(x_nchw, w1, (1, 1), "SAME", dimension_numbers=dn)
    y = y + b1[None, :, None, None]
    y = jax.nn.relu(y)
    y = jax.lax.conv_general_dilated(y, w2, (1, 1), "SAME", dimension_numbers=dn)
    y = y + b2[None, :, None, None]
    return x_nchw + y * res_scale


if __name__ == "__main__":
    # Module config: mid_channels=64 (default), res_scale=1.0 -> init_weights() with scale 0.1.
    N, C, H, W = 2, 64, 16, 16
    res_scale = 1.0

    key = jax.random.PRNGKey(0)
    kx, kw1, kw2 = jax.random.split(key, 3)

    # Kaiming-normal (fan_in mode, a=0): std = sqrt(2 / fan_in), then scaled by 0.1
    # per default_init_weights; biases initialized to 0.
    fan_in = 3 * 3 * C
    std = (2.0 / fan_in) ** 0.5
    w1 = (jax.random.normal(kw1, (3, 3, C, C), jnp.float32) * std) * 0.1
    w2 = (jax.random.normal(kw2, (3, 3, C, C), jnp.float32) * std) * 0.1
    b1 = jnp.zeros((C,), jnp.float32)
    b2 = jnp.zeros((C,), jnp.float32)

    x = jax.random.normal(kx, (N, C, H, W), jnp.float32)

    out = residual_block_no_bn(x, w1, b1, w2, b2, res_scale=res_scale)
    out = jax.block_until_ready(out)

    ref = jax.block_until_ready(_reference_forward(x, w1, b1, w2, b2, res_scale))
    assert out.shape == (N, C, H, W)
    # MXU operands are bf16 (f32 accumulation), so allow bf16-rounding-level error vs the
    # f32 reference (observed max-abs error ~3e-4 at these shapes).
    max_err = jnp.max(jnp.abs(out - ref))
    assert max_err < 2e-3, f"Pallas kernel mismatch vs reference conv: {max_err}"

    print("KERNEL_OK")
</pallas_src>

<mosaic_0001>
module attributes {stable_mosaic.version = 11 : i64} {
  func.func @_resblock_kernel(%arg0: i32, %arg1: memref<1x16x16x64xf32, #tpu.memory_space<vmem>>, %arg2: memref<576x64xbf16, #tpu.memory_space<vmem>>, %arg3: memref<1x64xf32, #tpu.memory_space<vmem>>, %arg4: memref<576x64xbf16, #tpu.memory_space<vmem>>, %arg5: memref<1x64xf32, #tpu.memory_space<vmem>>, %arg6: memref<1x16x16x64xf32, #tpu.memory_space<vmem>>, %arg7: memref<18x18x64xbf16, #tpu.memory_space<vmem>>) attributes {dimension_semantics = [#tpu.dimension_semantics<parallel>], iteration_bounds = array<i64: 2>, scalar_prefetch = 0 : i64, scratch_operands = 1 : i64, tpu.core_type = #tpu.core_type<tc>, window_params = [{transform_indices = @transform_0, window_bounds = array<i64: 1, 16, 16, 64>}, {pipeline_mode = #tpu.pipeline_mode<synchronous>, transform_indices = @transform_1, window_bounds = array<i64: 576, 64>}, {pipeline_mode = #tpu.pipeline_mode<synchronous>, transform_indices = @transform_2, window_bounds = array<i64: 1, 64>}, {pipeline_mode = #tpu.pipeline_mode<synchronous>, transform_indices = @transform_3, window_bounds = array<i64: 576, 64>}, {pipeline_mode = #tpu.pipeline_mode<synchronous>, transform_indices = @transform_4, window_bounds = array<i64: 1, 64>}, {transform_indices = @transform_5, window_bounds = array<i64: 1, 16, 16, 64>}]} {
    %cst = arith.constant 0.000000e+00 : bf16
    %0 = vector.broadcast %cst : bf16 to vector<1x18x64xbf16>
    %cst_0 = arith.constant 0.000000e+00 : bf16
    %1 = vector.broadcast %cst_0 : bf16 to vector<18x1x64xbf16>
    %c0 = arith.constant 0 : index
    %c0_1 = arith.constant 0 : index
    %c0_2 = arith.constant 0 : index
    %2 = vector.load %arg7[%c0, %c0_1, %c0_2] : memref<18x18x64xbf16, #tpu.memory_space<vmem>>, vector<1x18x64xbf16>
    tpu.vector_store %arg7[%c0, %c0_1, %c0_2], %0 {strides = array<i32>} : memref<18x18x64xbf16, #tpu.memory_space<vmem>>, vector<1x18x64xbf16>,
    %c17 = arith.constant 17 : index
    %c0_3 = arith.constant 0 : index
    %c0_4 = arith.constant 0 : index
    %3 = vector.load %arg7[%c17, %c0_3, %c0_4] : memref<18x18x64xbf16, #tpu.memory_space<vmem>>, vector<1x18x64xbf16>
    tpu.vector_store %arg7[%c17, %c0_3, %c0_4], %0 {strides = array<i32>} : memref<18x18x64xbf16, #tpu.memory_space<vmem>>, vector<1x18x64xbf16>,
    %c0_5 = arith.constant 0 : index
    %c0_6 = arith.constant 0 : index
    %c0_7 = arith.constant 0 : index
    %4 = vector.load %arg7[%c0_5, %c0_6, %c0_7] : memref<18x18x64xbf16, #tpu.memory_space<vmem>>, vector<18x1x64xbf16>
    tpu.vector_store %arg7[%c0_5, %c0_6, %c0_7], %1 {strides = array<i32>} : memref<18x18x64xbf16, #tpu.memory_space<vmem>>, vector<18x1x64xbf16>,
    %c0_8 = arith.constant 0 : index
    %c17_9 = arith.constant 17 : index
    %c0_10 = arith.constant 0 : index
    %5 = vector.load %arg7[%c0_8, %c17_9, %c0_10] : memref<18x18x64xbf16, #tpu.memory_space<vmem>>, vector<18x1x64xbf16>
    tpu.vector_store %arg7[%c0_8, %c17_9, %c0_10], %1 {strides = array<i32>} : memref<18x18x64xbf16, #tpu.memory_space<vmem>>, vector<18x1x64xbf16>,
    %c0_11 = arith.constant 0 : index
    %c0_12 = arith.constant 0 : index
    %c0_13 = arith.constant 0 : index
    %c0_14 = arith.constant 0 : index
    %6 = vector.load %arg1[%c0_11, %c0_12, %c0_13, %c0_14] : memref<1x16x16x64xf32, #tpu.memory_space<vmem>>, vector<1x16x16x64xf32>
    %7 = vector.shape_cast %6 : vector<1x16x16x64xf32> to vector<16x16x64xf32>
    %8 = arith.truncf %7 : vector<16x16x64xf32> to vector<16x16x64xbf16>
    %c1 = arith.constant 1 : index
    %c1_15 = arith.constant 1 : index
    %c0_16 = arith.constant 0 : index
    %9 = vector.load %arg7[%c1, %c1_15, %c0_16] : memref<18x18x64xbf16, #tpu.memory_space<vmem>>, vector<16x16x64xbf16>
    tpu.vector_store %arg7[%c1, %c1_15, %c0_16], %8 {strides = array<i32>} : memref<18x18x64xbf16, #tpu.memory_space<vmem>>, vector<16x16x64xbf16>,
    %c0_17 = arith.constant 0 : index
    %c0_18 = arith.constant 0 : index
    %c0_19 = arith.constant 0 : index
    %10 = vector.load %arg7[%c0_17, %c0_18, %c0_19] : memref<18x18x64xbf16, #tpu.memory_space<vmem>>, vector<16x16x64xbf16>
    %c0_20 = arith.constant 0 : index
    %c1_21 = arith.constant 1 : index
    %c0_22 = arith.constant 0 : index
    %11 = vector.load %arg7[%c0_20, %c1_21, %c0_22] : memref<18x18x64xbf16, #tpu.memory_space<vmem>>, vector<16x16x64xbf16>
    %c0_23 = arith.constant 0 : index
    %c2 = arith.constant 2 : index
    %c0_24 = arith.constant 0 : index
    %12 = vector.load %arg7[%c0_23, %c2, %c0_24] : memref<18x18x64xbf16, #tpu.memory_space<vmem>>, vector<16x16x64xbf16>
    %c1_25 = arith.constant 1 : index
    %c0_26 = arith.constant 0 : index
    %c0_27 = arith.constant 0 : index
    %13 = vector.load %arg7[%c1_25, %c0_26, %c0_27] : memref<18x18x64xbf16, #tpu.memory_space<vmem>>, vector<16x16x64xbf16>
    %c1_28 = arith.constant 1 : index
    %c1_29 = arith.constant 1 : index
    %c0_30 = arith.constant 0 : index
    %14 = vector.load %arg7[%c1_28, %c1_29, %c0_30] : memref<18x18x64xbf16, #tpu.memory_space<vmem>>, vector<16x16x64xbf16>
    %c1_31 = arith.constant 1 : index
    %c2_32 = arith.constant 2 : index
    %c0_33 = arith.constant 0 : index
    %15 = vector.load %arg7[%c1_31, %c2_32, %c0_33] : memref<18x18x64xbf16, #tpu.memory_space<vmem>>, vector<16x16x64xbf16>
    %c2_34 = arith.constant 2 : index
    %c0_35 = arith.constant 0 : index
    %c0_36 = arith.constant 0 : index
    %16 = vector.load %arg7[%c2_34, %c0_35, %c0_36] : memref<18x18x64xbf16, #tpu.memory_space<vmem>>, vector<16x16x64xbf16>
    %c2_37 = arith.constant 2 : index
    %c1_38 = arith.constant 1 : index
    %c0_39 = arith.constant 0 : index
    %17 = vector.load %arg7[%c2_37, %c1_38, %c0_39] : memref<18x18x64xbf16, #tpu.memory_space<vmem>>, vector<16x16x64xbf16>
    %c2_40 = arith.constant 2 : index
    %c2_41 = arith.constant 2 : index
    %c0_42 = arith.constant 0 : index
    %18 = vector.load %arg7[%c2_40, %c2_41, %c0_42] : memref<18x18x64xbf16, #tpu.memory_space<vmem>>, vector<16x16x64xbf16>
    %19 = tpu.concatenate %10, %11, %12, %13, %14, %15, %16, %17, %18 in 2 : vector<16x16x64xbf16>, vector<16x16x64xbf16>, vector<16x16x64xbf16>, vector<16x16x64xbf16>, vector<16x16x64xbf16>, vector<16x16x64xbf16>, vector<16x16x64xbf16>, vector<16x16x64xbf16>, vector<16x16x64xbf16> -> vector<16x16x576xbf16>
    %20 = vector.shape_cast %19 : vector<16x16x576xbf16> to vector<256x576xbf16>
    %c0_43 = arith.constant 0 : index
    %c0_44 = arith.constant 0 : index
    %21 = vector.load %arg2[%c0_43, %c0_44] : memref<576x64xbf16, #tpu.memory_space<vmem>>, vector<576x64xbf16>
    %cst_45 = arith.constant dense<0.000000e+00> : vector<256x64xf32>
    %22 = tpu.matmul %20, %21, %cst_45 {dimension_numbers = #tpu.dot_dimension_numbers<[1], [0], [0], [1], [0, 0, 1, 1], [], []>} : vector<256x576xbf16>, vector<576x64xbf16>, vector<256x64xf32> -> vector<256x64xf32>
    %c0_46 = arith.constant 0 : index
    %c0_47 = arith.constant 0 : index
    %23 = vector.load %arg3[%c0_46, %c0_47] : memref<1x64xf32, #tpu.memory_space<vmem>>, vector<1x64xf32>
    %24 = vector.shape_cast %23 : vector<1x64xf32> to vector<64xf32>
    %25 = vector.shape_cast %24 : vector<64xf32> to vector<1x64xf32>
    %26 = vector.broadcast %25 : vector<1x64xf32> to vector<256x64xf32>
    %27 = arith.addf %22, %26 : vector<256x64xf32>
    %cst_48 = arith.constant 0.000000e+00 : f32
    %28 = vector.broadcast %cst_48 : f32 to vector<256x64xf32>
    %29 = arith.maximumf %27, %28 : vector<256x64xf32>
    %30 = vector.shape_cast %29 : vector<256x64xf32> to vector<16x16x64xf32>
    %31 = arith.truncf %30 : vector<16x16x64xf32> to vector<16x16x64xbf16>
    %c1_49 = arith.constant 1 : index
    %c1_50 = arith.constant 1 : index
    %c0_51 = arith.constant 0 : index
    %32 = vector.load %arg7[%c1_49, %c1_50, %c0_51] : memref<18x18x64xbf16, #tpu.memory_space<vmem>>, vector<16x16x64xbf16>
    tpu.vector_store %arg7[%c1_49, %c1_50, %c0_51], %31 {strides = array<i32>} : memref<18x18x64xbf16, #tpu.memory_space<vmem>>, vector<16x16x64xbf16>,
    %c0_52 = arith.constant 0 : index
    %c0_53 = arith.constant 0 : index
    %c0_54 = arith.constant 0 : index
    %33 = vector.load %arg7[%c0_52, %c0_53, %c0_54] : memref<18x18x64xbf16, #tpu.memory_space<vmem>>, vector<16x16x64xbf16>
    %c0_55 = arith.constant 0 : index
    %c1_56 = arith.constant 1 : index
    %c0_57 = arith.constant 0 : index
    %34 = vector.load %arg7[%c0_55, %c1_56, %c0_57] : memref<18x18x64xbf16, #tpu.memory_space<vmem>>, vector<16x16x64xbf16>
    %c0_58 = arith.constant 0 : index
    %c2_59 = arith.constant 2 : index
    %c0_60 = arith.constant 0 : index
    %35 = vector.load %arg7[%c0_58, %c2_59, %c0_60] : memref<18x18x64xbf16, #tpu.memory_space<vmem>>, vector<16x16x64xbf16>
    %c1_61 = arith.constant 1 : index
    %c0_62 = arith.constant 0 : index
    %c0_63 = arith.constant 0 : index
    %36 = vector.load %arg7[%c1_61, %c0_62, %c0_63] : memref<18x18x64xbf16, #tpu.memory_space<vmem>>, vector<16x16x64xbf16>
    %c1_64 = arith.constant 1 : index
    %c1_65 = arith.constant 1 : index
    %c0_66 = arith.constant 0 : index
    %37 = vector.load %arg7[%c1_64, %c1_65, %c0_66] : memref<18x18x64xbf16, #tpu.memory_space<vmem>>, vector<16x16x64xbf16>
    %c1_67 = arith.constant 1 : index
    %c2_68 = arith.constant 2 : index
    %c0_69 = arith.constant 0 : index
    %38 = vector.load %arg7[%c1_67, %c2_68, %c0_69] : memref<18x18x64xbf16, #tpu.memory_space<vmem>>, vector<16x16x64xbf16>
    %c2_70 = arith.constant 2 : index
    %c0_71 = arith.constant 0 : index
    %c0_72 = arith.constant 0 : index
    %39 = vector.load %arg7[%c2_70, %c0_71, %c0_72] : memref<18x18x64xbf16, #tpu.memory_space<vmem>>, vector<16x16x64xbf16>
    %c2_73 = arith.constant 2 : index
    %c1_74 = arith.constant 1 : index
    %c0_75 = arith.constant 0 : index
    %40 = vector.load %arg7[%c2_73, %c1_74, %c0_75] : memref<18x18x64xbf16, #tpu.memory_space<vmem>>, vector<16x16x64xbf16>
    %c2_76 = arith.constant 2 : index
    %c2_77 = arith.constant 2 : index
    %c0_78 = arith.constant 0 : index
    %41 = vector.load %arg7[%c2_76, %c2_77, %c0_78] : memref<18x18x64xbf16, #tpu.memory_space<vmem>>, vector<16x16x64xbf16>
    %42 = tpu.concatenate %33, %34, %35, %36, %37, %38, %39, %40, %41 in 2 : vector<16x16x64xbf16>, vector<16x16x64xbf16>, vector<16x16x64xbf16>, vector<16x16x64xbf16>, vector<16x16x64xbf16>, vector<16x16x64xbf16>, vector<16x16x64xbf16>, vector<16x16x64xbf16>, vector<16x16x64xbf16> -> vector<16x16x576xbf16>
    %43 = vector.shape_cast %42 : vector<16x16x576xbf16> to vector<256x576xbf16>
    %c0_79 = arith.constant 0 : index
    %c0_80 = arith.constant 0 : index
    %44 = vector.load %arg4[%c0_79, %c0_80] : memref<576x64xbf16, #tpu.memory_space<vmem>>, vector<576x64xbf16>
    %cst_81 = arith.constant dense<0.000000e+00> : vector<256x64xf32>
    %45 = tpu.matmul %43, %44, %cst_81 {dimension_numbers = #tpu.dot_dimension_numbers<[1], [0], [0], [1], [0, 0, 1, 1], [], []>} : vector<256x576xbf16>, vector<576x64xbf16>, vector<256x64xf32> -> vector<256x64xf32>
    %c0_82 = arith.constant 0 : index
    %c0_83 = arith.constant 0 : index
    %46 = vector.load %arg5[%c0_82, %c0_83] : memref<1x64xf32, #tpu.memory_space<vmem>>, vector<1x64xf32>
    %47 = vector.shape_cast %46 : vector<1x64xf32> to vector<64xf32>
    %48 = vector.shape_cast %47 : vector<64xf32> to vector<1x64xf32>
    %49 = vector.broadcast %48 : vector<1x64xf32> to vector<256x64xf32>
    %50 = arith.addf %45, %49 : vector<256x64xf32>
    %c0_84 = arith.constant 0 : index
    %c0_85 = arith.constant 0 : index
    %c0_86 = arith.constant 0 : index
    %c0_87 = arith.constant 0 : index
    %51 = vector.load %arg1[%c0_84, %c0_85, %c0_86, %c0_87] : memref<1x16x16x64xf32, #tpu.memory_space<vmem>>, vector<1x16x16x64xf32>
    %52 = vector.shape_cast %51 : vector<1x16x16x64xf32> to vector<16x16x64xf32>
    %53 = vector.shape_cast %50 : vector<256x64xf32> to vector<16x16x64xf32>
    %cst_88 = arith.constant 1.000000e+00 : f32
    %54 = vector.broadcast %cst_88 : f32 to vector<16x16x64xf32>
    %55 = arith.mulf %53, %54 : vector<16x16x64xf32>
    %56 = arith.addf %52, %55 : vector<16x16x64xf32>
    %c0_89 = arith.constant 0 : index
    %c0_90 = arith.constant 0 : index
    %c0_91 = arith.constant 0 : index
    %c0_92 = arith.constant 0 : index
    %57 = vector.load %arg6[%c0_89, %c0_90, %c0_91, %c0_92] : memref<1x16x16x64xf32, #tpu.memory_space<vmem>>, vector<1x16x16x64xf32>
    %58 = vector.shape_cast %57 : vector<1x16x16x64xf32> to vector<16x16x64xf32>
    %59 = vector.shape_cast %56 : vector<16x16x64xf32> to vector<1x16x16x64xf32>
    tpu.vector_store %arg6[%c0_89, %c0_90, %c0_91, %c0_92], %59 {strides = array<i32>} : memref<1x16x16x64xf32, #tpu.memory_space<vmem>>, vector<1x16x16x64xf32>,
    return
  }
  func.func @transform_0(%arg0: i32) -> (i32, i32, i32, i32) {
    %c0_i32 = arith.constant 0 : i32
    %c0_i32_0 = arith.constant 0 : i32
    %c0_i32_1 = arith.constant 0 : i32
    %c0_i32_2 = arith.constant 0 : i32
    return %arg0, %c0_i32, %c0_i32_0, %c0_i32_1 : i32, i32, i32, i32
  }
  func.func @transform_1(%arg0: i32) -> (i32, i32) {
    %c0_i32 = arith.constant 0 : i32
    %c0_i32_0 = arith.constant 0 : i32
    %c0_i32_1 = arith.constant 0 : i32
    return %c0_i32, %c0_i32_0 : i32, i32
  }
  func.func @transform_2(%arg0: i32) -> (i32, i32) {
    %c0_i32 = arith.constant 0 : i32
    %c0_i32_0 = arith.constant 0 : i32
    %c0_i32_1 = arith.constant 0 : i32
    return %c0_i32, %c0_i32_0 : i32, i32
  }
  func.func @transform_3(%arg0: i32) -> (i32, i32) {
    %c0_i32 = arith.constant 0 : i32
    %c0_i32_0 = arith.constant 0 : i32
    %c0_i32_1 = arith.constant 0 : i32
    return %c0_i32, %c0_i32_0 : i32, i32
  }
  func.func @transform_4(%arg0: i32) -> (i32, i32) {
    %c0_i32 = arith.constant 0 : i32
    %c0_i32_0 = arith.constant 0 : i32
    %c0_i32_1 = arith.constant 0 : i32
    return %c0_i32, %c0_i32_0 : i32, i32
  }
  func.func @transform_5(%arg0: i32) -> (i32, i32, i32, i32) {
    %c0_i32 = arith.constant 0 : i32
    %c0_i32_0 = arith.constant 0 : i32
    %c0_i32_1 = arith.constant 0 : i32
    %c0_i32_2 = arith.constant 0 : i32
    return %arg0, %c0_i32, %c0_i32_0, %c0_i32_1 : i32, i32, i32, i32
  }
}

</mosaic_0001>

<bundles_post_ra>
// kernel: tpu_custom_call.1
= control target key start
LH: loop header
LB: loop body
LE: loop exit
PB: predicated region body
PF: predicated region fallthrough
CT: control target
= control target key end

     0   :  { %10 = vsyncpa [#allocation4], 0  ;;  %s11403_s0 = inlined_call_operand.vmem [shape: f32[2,16,16,64], index: 0, kind: input, shape index: {}]   ;;  %s11404_s1 = inlined_call_operand.vmem [shape: bf16[576,64], index: 1, kind: input, shape index: {}]   ;;  %s11405_s2 = inlined_call_operand.vmem [shape: f32[1,64], index: 2, kind: input, shape index: {}]   ;;  %s11406_s3 = inlined_call_operand.vmem [shape: bf16[576,64], index: 3, kind: input, shape index: {}]   ;;  %s11407_s4 = inlined_call_operand.vmem [shape: f32[1,64], index: 4, kind: input, shape index: {}]   ;;  %s11408_s5 = inlined_call_operand.hbm [shape: f32[2,16,16,64], index: 5, kind: output, shape index: {}]  }
   0x1   :  { %12 = vsyncpa [#allocation4 + $0x1], 0  ;;  %s8591_s18 = smov 0   ;;  %s8593_s19 = smov 0  }
   0x2   :  { %s8595_s20 = smov 0   ;;  %s8597_s21 = smov 0  }
   0x3 LB: > { %s8612_s22 = sadd.s32 4294967295, %s8554_s21   ;;  %s6882_s23 = sadd.s32 4294967294, %s8554_s21   ;;  %s8554_s21 = sphi %s8597_s21, %s11659_s21   ;;  %s8550_s20 = sphi %s8595_s20, %s11658_s20   ;;  %s8546_s19 = sphi %s8593_s19, %s11657_s19   ;;  %s8542_s18 = sphi %s8591_s18, %s11656_s18  }
   0x4   : > { %s8616_s24 = sadd.s32 1, %s8554_s21   ;;  %s135_s25 = sadd.s32 1, %s8550_s20 }
   0x5   : > { %s132_s26 = ssub.s32 %s8554_s21, %s8616_s24  ;;  %p145_p0 = scmp.ne.s32.totalorder %s8550_s20, %s8546_s19 }
   0x6   : > { %p133_p1 = scmp.eq.s32.totalorder %s132_s26, 0  ;;  %p146_p2 = scmp.eq.s32.totalorder %s8612_s22, 1 }
   0x7   : > { %p151_p3 = scmp.ne.s32.totalorder %s8546_s19, %s8542_s18  ;;  %p152_p4 = scmp.eq.s32.totalorder %s6882_s23, 1 }
   0x8   : > { %s8627_s27 = scalar_select %p133_p1, %s8550_s20, %s135_s25  }
   0x9   : > { %p8629_p5 = por %p146_p2, %p145_p0  ;;  %p8633_p6 = por %p152_p4, %p151_p3 }
   0xa   : > { %p6885_p7 = scmp.ge.s32.totalorder %s8554_s21, 1  ;;  %p190_p8 = scmp.lt.s32.totalorder %s8554_s21, 3 }
   0xc   : > { %p191_p9 = pnand %p6885_p7, %p190_p8 }
   0xe   : > { %194 = sbr.rel (%p191_p9) target bundleno = 1137 (0x471), region = 40 }
  0x15   : > { %p218_p10 = scmp.lt.s32.totalorder %s8612_s22, 1  ;;  %vm224_vm0 = vcmask 519168   ;;  %vm227_vm1 = vcmask 516096   ;;  %vm234_vm2 = vsmask.f32 256  ;;  %v8556_v5 = vmov 0  }
  0x16   : > { %vm8642_vm3 = vmand %vm227_vm1, %vm234_vm2  ;;  %v239_v1 = vld [vmem:[#allocation2 + $0xc] sm:$0x1]  ;;  %vm290_vm4 = vsmask.f32 7938  ;;  %v242_v3 = vld [vmem:[#allocation2 + $0x18] sm:$0x1] }
  0x17   : > { %s219_s30 = scalar_select %p218_p10, %s8612_s22, 1  ;;  %v240_v2 = vsel %vm8642_vm3, 0, %v239_v1  ;;  %v243_v4 = vsel %vm8642_vm3, 0, %v242_v3  ;;  %225 = vst.msk [vmem:[#allocation2] sm:$0xf] %vm224_vm0, %v8556_v5  ;;  %vm8659_vm5 = vmand %vm227_vm1, %vm290_vm4  ;;  %v11499_v37 = vmov 0 }
  0x18   : > { %241 = vst [vmem:[#allocation2 + $0xc] sm:$0x1] %v240_v2  ;;  %226 = vst.msk [vmem:[#allocation2 + $0x4] sm:$0xf] %vm224_vm0, %v8556_v5  ;;  %v295_v6 = vld [vmem:[#allocation2 + $0x14] sm:$0x1] }
  0x19   : > { %228 = vst.msk [vmem:[#allocation2 + $0x8] sm:$0x1] %vm227_vm1, %v8556_v5  ;;  %232 = vst.msk [vmem:[#allocation2 + $0xd4] sm:$0x1] %vm227_vm1, %v8556_v5  ;;  %s7352_s6 = sshll.u32 %s219_s30, 8  ;;  %v296_v10 = vsel %vm8659_vm5, 0, %v295_v6 }
  0x1a   : > { %230 = vst.msk [vmem:[#allocation2 + $0xcc] sm:$0xf] %vm224_vm0, %v8556_v5  ;;  %231 = vst.msk [vmem:[#allocation2 + $0xd0] sm:$0xf] %vm224_vm0, %v8556_v5  ;;  %v245_v8 = vld [vmem:[#allocation2 + $0x24] sm:$0x1]  ;;  %s8666_s9 = scalar_lea.vmem %s11403_s0, %s7352_s6 }
  0x1b   : > { %244 = vst [vmem:[#allocation2 + $0x18] sm:$0x1] %v243_v4  ;;  %v298_v9 = vld [vmem:[#allocation2 + $0x20] sm:$0x1]  ;;  %v246_v11 = vsel %vm8642_vm3, 0, %v245_v8  ;;  %v347_v15 = vld [vmem:[%s8666_s9 + $0x8] sm:$0xff]  ;;  %vm8695_vm8 = vmand %vm224_vm0, %vm290_vm4 }
  0x1c   : > { %v299_v12 = vsel %vm8659_vm5, 0, %v298_v9  ;;  %v248_v13 = vld [vmem:[#allocation2 + $0x30] sm:$0x1]  ;;  %v346_v14 = vld [vmem:[%s8666_s9] sm:$0xff]  ;;  %297 = vst [vmem:[#allocation2 + $0x14] sm:$0x1] %v296_v10  ;;  %v7354_v19 = vpack.c.bf16 %v347_v15, %v347_v15 }
  0x1d   : > { %v348_v16 = vld [vmem:[%s8666_s9 + $0x10] sm:$0xff]  ;;  %247 = vst [vmem:[#allocation2 + $0x24] sm:$0x1] %v246_v11  ;;  %300 = vst [vmem:[#allocation2 + $0x20] sm:$0x1] %v299_v12  ;;  %v249_v17 = vsel %vm8642_vm3, 0, %v248_v13  ;;  %v7353_v18 = vpack.c.bf16 %v346_v14, %v346_v14 }
  0x1e   : > { %v349_v20 = vld [vmem:[%s8666_s9 + $0x18] sm:$0xff]  ;;  %v7355_v21 = vpack.c.bf16 %v348_v16, %v348_v16  ;;  %v350_v22 = vld [vmem:[%s8666_s9 + $0x20] sm:$0xff]  ;;  %v351_v23 = vld [vmem:[%s8666_s9 + $0x28] sm:$0xff]  ;;  %250 = vst [vmem:[#allocation2 + $0x30] sm:$0x1] %v249_v17  ;;  %v485_v31 = vshrl.u32 %v7354_v19, 16 }
  0x1f   : > { %vm474_vm6 = vsmask.f32 4368  ;;  %v7356_v24 = vpack.c.bf16 %v349_v20, %v349_v20  ;;  %v7357_v25 = vpack.c.bf16 %v350_v22, %v350_v22  ;;  %v8682_v26 = vpack.c.bf16 %v351_v23, %v351_v23  ;;  %v352_v27 = vld [vmem:[%s8666_s9 + $0x30] sm:$0xff]  ;;  %v353_v28 = vld [vmem:[%s8666_s9 + $0x38] sm:$0xff]  ;;  %v799_v40 = vld [vmem:[#allocation2 + $0xc] sm:$0xf] }
  0x20   : > { %v477_v29 = vshrl.u32 %v7353_v18, 16  ;;  %v480_v30 = vshll.u32 %v7353_v18, 16  ;;  %v488_v32 = vshll.u32 %v7354_v19, 16  ;;  %v494_v33 = vshrl.u32 %v7355_v21, 16  ;;  %vm8687_vm7 = vmor %vm234_vm2, %vm474_vm6  ;;  %v236_v41 = vld [vmem:[#allocation2] sm:$0x1] }
  0x21   : > { %v497_v34 = vshll.u32 %v7355_v21, 16  ;;  %v502_v35 = vshrl.u32 %v7356_v24, 16  ;;  %v505_v36 = vshll.u32 %v7356_v24, 16  ;;  %v11500_v37 = vsel %vm8687_vm7, 4294967295, %v11499_v37  ;;  %v292_v48 = vld [vmem:[#allocation2 + $0x8] sm:$0x1] }
  0x22   : > { %11501 = vst [vmem:[#allocation6_spill] sm:$0xff] %v11500_v37  ;;  %v479_v38 = vrot.slane %v477_v29, 7  ;;  %v487_v39 = vrot.slane %v485_v31, 7  ;;  %v7359_v42 = vpack.c.bf16 %v352_v27, %v352_v27  ;;  %v8691_v43 = vpack.c.bf16 %v353_v28, %v353_v28  ;;  %v806_v54 = vld [vmem:[#allocation2 + $0x18] sm:$0xf]  ;;  %v354_v23 = vld [vmem:[%s8666_s9 + $0x40] sm:$0xff] }
  0x23   : > { %v11502_v44 = vmov 0  ;;  %v496_v45 = vrot.slane %v494_v33, 7  ;;  %v504_v46 = vrot.slane %v502_v35, 7  ;;  %v237_v47 = vsel %vm8642_vm3, 0, %v236_v41  ;;  %v803_v55 = vld [vmem:[#allocation2 + $0x14] sm:$0x1] }
  0x24   : > { %v11503_v44 = vsel %vm8695_vm8, 4294967295, %v11502_v44  ;;  %v511_v49 = vshrl.u32 %v7357_v25, 16  ;;  %v482_v50 = vor.u32 %v480_v30, %v479_v38  ;;  %v483_v51 = vrot.slane %v479_v38, 4  ;;  %238 = vst [vmem:[#allocation2] sm:$0x1] %v237_v47  ;;  %s8557_s10 = smov 64  }
  0x25   : > { %11504 = vst [vmem:[#allocation7_spill] sm:$0xff] %v11503_v44  ;;  %v490_v52 = vor.u32 %v488_v32, %v487_v39  ;;  %v492_v53 = vrot.slane %v487_v39, 4  ;;  %v499_v56 = vor.u32 %v497_v34, %v496_v45  ;;  %v500_v57 = vrot.slane %v496_v45, 4  ;;  %v810_v60 = vld [vmem:[#allocation2 + $0x20] sm:$0x1]  ;;  %s215_s6 = sand.u32 1, %s8546_s19  }
  0x26   : > { %v507_v58 = vor.u32 %v505_v36, %v504_v46  ;;  %v509_v59 = vrot.slane %v504_v46, 4  ;;  %v800_v62 = vsel %vm8695_vm8, %v482_v50, %v799_v40  ;;  %v293_v63 = vsel %vm8659_vm5, 0, %v292_v48  ;;  %v301_v6 = vld [vmem:[#allocation2 + $0x2c] sm:$0x1]  ;;  %v251_v8 = vld [vmem:[#allocation2 + $0x3c] sm:$0x1] }
  0x27   : > { %v491_v61 = vsel %vm8687_vm7, %v483_v51, %v490_v52  ;;  %v804_v1 = vsel %vm8642_vm3, %v492_v53, %v803_v55  ;;  %801 = vst [vmem:[#allocation2 + $0xc] sm:$0xf] %v800_v62  ;;  %v807_v3 = vsel %vm8695_vm8, %v499_v56, %v806_v54  ;;  %294 = vst [vmem:[#allocation2 + $0x8] sm:$0x1] %v293_v63  ;;  %v513_v4 = vrot.slane %v511_v49, 7  ;;  %v355_v55 = vld [vmem:[%s8666_s9 + $0x48] sm:$0xff] }
  0x28   : > { %802 = vst.msk [vmem:[#allocation2 + $0x10] sm:$0xf] %vm224_vm0, %v491_v61  ;;  %v508_v2 = vsel %vm8687_vm7, %v500_v57, %v507_v58  ;;  %805 = vst [vmem:[#allocation2 + $0x14] sm:$0x1] %v804_v1  ;;  %v514_v5 = vshll.u32 %v7357_v25, 16  ;;  %v519_v9 = vshrl.u32 %v8682_v26, 16  ;;  %v811_v12 = vsel %vm8642_vm3, %v509_v59, %v810_v60 }
  0x29   : > { %808 = vst [vmem:[#allocation2 + $0x18] sm:$0xf] %v807_v3  ;;  %809 = vst.msk [vmem:[#allocation2 + $0x1c] sm:$0xf] %vm224_vm0, %v508_v2  ;;  %v522_v10 = vshll.u32 %v8682_v26, 16  ;;  %v528_v13 = vshrl.u32 %v7359_v42, 16  ;;  %v7361_v34 = vpack.c.bf16 %v354_v23, %v354_v23 }
  0x2a   : > { %v813_v11 = vld [vmem:[#allocation2 + $0x24] sm:$0xf]  ;;  %v516_v15 = vor.u32 %v514_v5, %v513_v4  ;;  %v517_v16 = vrot.slane %v513_v4, 4  ;;  %812 = vst [vmem:[#allocation2 + $0x20] sm:$0x1] %v811_v12  ;;  %v531_v17 = vshll.u32 %v7359_v42, 16 }
  0x2b   : > { %v912_v14 = vld [vmem:[#allocation2 + $0x4] sm:$0xf]  ;;  %v536_v18 = vshrl.u32 %v8691_v43, 16  ;;  %v8720_v19 = vrot.slane %v519_v9, 7  ;;  %v530_v20 = vrot.slane %v528_v13, 7  ;;  %v539_v21 = vshll.u32 %v8691_v43, 16 }
  0x2c   : > { %v302_v22 = vsel %vm8659_vm5, 0, %v301_v6  ;;  %v911_v24 = vld [vmem:[#allocation2] sm:$0xf]  ;;  %v814_v25 = vsel %vm8695_vm8, %v516_v15, %v813_v11  ;;  %v820_v27 = vld [vmem:[#allocation2 + $0x30] sm:$0xf]  ;;  %v252_v28 = vsel %vm8642_vm3, 0, %v251_v8  ;;  %v7362_v15 = vpack.c.bf16 %v355_v55, %v355_v55 }
  0x2d   : > { %v8728_v26 = vrot.slane %v536_v18, 7  ;;  %303 = vst [vmem:[#allocation2 + $0x2c] sm:$0x1] %v302_v22  ;;  %v8732_v29 = vcombine.low %v911_v24, %v912_v14  ;;  %v524_v30 = vor.u32 %v522_v10, %v8720_v19  ;;  %815 = vst [vmem:[#allocation2 + $0x24] sm:$0xf] %v814_v25  ;;  %v533_v31 = vor.u32 %v531_v17, %v530_v20  ;;  %s6886_s7 = sshll.u32 %s215_s6, 8 }
  0x2e   : > { %253 = vst [vmem:[#allocation2 + $0x3c] sm:$0x1] %v252_v28  ;;  %v534_v32 = vrot.slane %v530_v20, 4  ;;  %v975_v35 = vld [vmem:[#allocation2 + $0xc] sm:$0xf]  ;;  %v545_v52 = vshrl.u32 %v7361_v34, 16 }
  0x2f   : > { %v541_v33 = vor.u32 %v539_v21, %v8728_v26  ;;  %v976_v36 = vld [vmem:[#allocation2 + $0x10] sm:$0xf]  ;;  %v525_v38 = vsel %vm8687_vm7, %v517_v16, %v524_v30  ;;  %v821_v39 = vsel %vm8695_vm8, %v533_v31, %v820_v27  ;;  %v1234_v43 = vshrl.u32 %v8732_v29, 16  ;;  %v8032_v48 = vld [vmem:[#allocation2 + $0x8] ss:$0 sps:$4 sm:$0x11]  }
  0x30   : > { %v8740_v40 = vcombine.low %v975_v35, %v976_v36  ;;  %v977_v41 = vld [vmem:[#allocation2 + $0x18] sm:$0xf]  ;;  %v978_v42 = vld [vmem:[#allocation2 + $0x1c] sm:$0xf]  ;;  %v1236_v45 = vshll.u32 %v8732_v29, 16  ;;  %v1241_v53 = vshll.u32 %v8032_v48, 16 }
  0x31   : > { %816 = vst.msk [vmem:[#allocation2 + $0x28] sm:$0xf] %vm224_vm0, %v525_v38  ;;  %v542_v46 = vsel %vm8687_vm7, %v534_v32, %v541_v33  ;;  %822 = vst [vmem:[#allocation2 + $0x30] sm:$0xf] %v821_v39  ;;  %v8747_v47 = vcombine.low %v977_v41, %v978_v42  ;;  %v913_v49 = vld [vmem:[#allocation2 + $0xc] sm:$0xf] }
  0x32   : > { %823 = vst.msk [vmem:[#allocation2 + $0x34] sm:$0xf] %vm224_vm0, %v542_v46  ;;  %1634 = vrot.lane.b32.xlu0 %v8740_v40, %s8557_s10  ;;  %v1238_v50 = vrot.slane %v1236_v45, 1  ;;  %v914_v51 = vld [vmem:[#allocation2 + $0x10] sm:$0xf]  ;;  %v526_v58 = vrot.slane %v8720_v19, 4 }
  0x33   : > { %1636 = vrot.lane.b32.xlu1 %v8747_v47, %s8557_s10  ;;  %vm1232_vm9 = vsmask.f32 7424  ;;  %v8754_v54 = vcombine.low %v913_v49, %v914_v51  ;;  %v8034_v57 = vld [vmem:[#allocation2 + $0x14] ss:$0 sps:$4 sm:$0x11]   ;;  %v1243_v60 = vrot.slane %v1241_v53, 1 }
  0x34   : > { %v1239_v56 = vor.u32 %v1238_v50, %v1234_v43  ;;  %v979_v59 = vld [vmem:[#allocation2 + $0x24] sm:$0xf]  ;;  %v915_v63 = vld [vmem:[#allocation2 + $0x18] sm:$0xf]  ;;  %v548_v1 = vshll.u32 %v7361_v34, 16  ;;  %v1253_v2 = vshll.u32 %v8034_v57, 16 }
  0x35   : > { %v1246_v61 = vshrl.u32 %v8754_v54, 16  ;;  %v1248_v62 = vshll.u32 %v8754_v54, 16  ;;  %v916_v3 = vld [vmem:[#allocation2 + $0x1c] sm:$0xf]  ;;  %v8760_v4 = vrot.slane %v545_v52, 7  ;;  %v356_v21 = vld [vmem:[%s8666_s9 + $0x50] sm:$0xff] }
  0x36   : > { %v1244_v5 = vsel %vm1232_vm9, %v1239_v56, %v1243_v60  ;;  %v8763_v9 = vcombine.low %v915_v63, %v916_v3  ;;  %v8037_v10 = vld [vmem:[#allocation2 + $0x20] ss:$0 sps:$4 sm:$0x11]   ;;  %v1255_v11 = vrot.slane %v1253_v2, 1  ;;  %v817_v20 = vld [vmem:[#allocation2 + $0x2c] sm:$0x1]  ;;  %v7363_v39 = vpack.c.bf16 %v356_v21, %v356_v21 }
  0x37   : > { %v1250_v6 = vrot.slane %v1248_v62, 1  ;;  %1425 = vrot.lane.b32.xlu0 %v1244_v5, %s8557_s10  ;;  %v1265_v19 = vshll.u32 %v8037_v10, 16  ;;  %v818_v22 = vsel %vm8642_vm3, %v526_v58, %v817_v20  ;;  %v917_v23 = vld [vmem:[#allocation2 + $0x24] sm:$0xf]  ;;  %v550_v25 = vor.u32 %v548_v1, %v8760_v4  ;;  %v357_v27 = vld [vmem:[%s8666_s9 + $0x58] sm:$0xff]  ;;  %v359_v58 = vld [vmem:[%s8666_s9 + $0x68] sm:$0xff] }
  0x38   : > { %v980_v8 = vld [vmem:[#allocation2 + $0x28] sm:$0xf]  ;;  %v981_v13 = vld [vmem:[#allocation2 + $0x30] sm:$0xf]  ;;  %v1258_v17 = vshrl.u32 %v8763_v9, 16  ;;  %v1260_v18 = vshll.u32 %v8763_v9, 16  ;;  %v7364_v45 = vpack.c.bf16 %v357_v27, %v357_v27 }
  0x39   : > { %v8766_v12 = vcombine.low %v979_v59, %v980_v8  ;;  %v982_v14 = vld [vmem:[#allocation2 + $0x34] sm:$0xf]  ;;  %v1251_v16 = vor.u32 %v1250_v6, %v1246_v61  ;;  %v918_v24 = vld [vmem:[#allocation2 + $0x28] sm:$0xf]  ;;  %v1267_v31 = vrot.slane %v1265_v19, 1  ;;  %v553_v36 = vshrl.u32 %v7362_v15, 16 }
  0x3a   : > { %v1262_v30 = vrot.slane %v1260_v18, 1  ;;  %819 = vst [vmem:[#allocation2 + $0x2c] sm:$0x1] %v818_v22  ;;  %v8776_v32 = vcombine.low %v917_v23, %v918_v24  ;;  %v827_v33 = vld [vmem:[#allocation2 + $0x3c] sm:$0xf]  ;;  %v8781_v35 = vcombine.low %v981_v13, %v982_v14  ;;  %v556_v43 = vshll.u32 %v7362_v15, 16 }
  0x3b   : > { %v1256_v28 = vsel %vm1232_vm9, %v1251_v16, %v1255_v11  ;;  %v304_v34 = vld [vmem:[#allocation2 + $0x38] sm:$0x1]  ;;  %1638 = vrot.lane.b32.xlu0 %v8766_v12, %s8557_s10  ;;  %v254_v38 = vld [vmem:[#allocation2 + $0x48] sm:$0x1]  ;;  %v551_v46 = vrot.slane %v8760_v4, 4  ;;  %v8785_v48 = vrot.slane %v553_v36, 7  ;;  %v828_v49 = vsel %vm8695_vm8, %v550_v25, %v827_v33 }
  0x3c   : > { %1427 = vrot.lane.b32.xlu1 %v1256_v28, %s8557_s10  ;;  %v1263_v41 = vor.u32 %v1262_v30, %v1258_v17  ;;  %v1272_v42 = vshll.u32 %v8776_v32, 16  ;;  %v305_v50 = vsel %vm8659_vm5, 0, %v304_v34  ;;  %v358_v51 = vld [vmem:[%s8666_s9 + $0x60] sm:$0xff]  ;;  %v1270_v53 = vshrl.u32 %v8776_v32, 16  ;;  %829 = vst [vmem:[#allocation2 + $0x3c] sm:$0xf] %v828_v49 }
  0x3d   : > { %306 = vst [vmem:[#allocation2 + $0x38] sm:$0x1] %v305_v50  ;;  %v255_v56 = vsel %vm8642_vm3, 0, %v254_v38  ;;  %v307_v57 = vld [vmem:[#allocation2 + $0x44] sm:$0x1]  ;;  %v558_v59 = vor.u32 %v556_v43, %v8785_v48  ;;  %v562_v60 = vshrl.u32 %v7363_v39, 16  ;;  %v7365_v5 = vpack.c.bf16 %v358_v51, %v358_v51 }
  0x3e   : > { %v1268_v52 = vsel %vm1232_vm9, %v1263_v41, %v1267_v31  ;;  %v1274_v55 = vrot.slane %v1272_v42, 1  ;;  %256 = vst [vmem:[#allocation2 + $0x48] sm:$0x1] %v255_v56  ;;  %v565_v61 = vshll.u32 %v7363_v39, 16  ;;  %v257_v62 = vld [vmem:[#allocation2 + $0x54] sm:$0x1]  ;;  %v7366_v11 = vpack.c.bf16 %v359_v58, %v359_v58 }
  0x3f   : > { %1640 = vrot.lane.b32.xlu0 %v8781_v35, %s8557_s10  ;;  %v360_v63 = vld [vmem:[%s8666_s9 + $0x70] sm:$0xff]  ;;  %v543_v1 = vrot.slane %v8728_v26, 4  ;;  %v570_v4 = vshrl.u32 %v7364_v45, 16  ;;  %v559_v8 = vsel %vm8687_vm7, %v551_v46, %v558_v59  ;;  %v564_v10 = vrot.slane %v562_v60, 7  ;;  %v361_v26 = vld [vmem:[%s8666_s9 + $0x78] sm:$0xff]  ;;  %s11197_s8 = scalar_lea.vmem [#allocation3], %s6886_s7 }
  0x40   : > { %1429 = vrot.lane.b32.xlu1 %v1268_v52, %s8557_s10  ;;  %v919_v2 = vld [vmem:[#allocation2 + $0x30] sm:$0xf]  ;;  %v920_v3 = vld [vmem:[#allocation2 + $0x34] sm:$0xf]  ;;  %v1275_v13 = vor.u32 %v1274_v55, %v1270_v53  ;;  %830 = vst.msk [vmem:[#allocation2 + $0x40] sm:$0xf] %vm224_vm0, %v559_v8  ;;  %v7367_v27 = vpack.c.bf16 %v360_v63, %v360_v63  ;;  %v8817_v34 = vpack.c.bf16 %v361_v26, %v361_v26 }
  0x41   : > { %v8040_v6 = vld [vmem:[#allocation2 + $0x2c] ss:$0 sps:$4 sm:$0x11]   ;;  %v8806_v14 = vrot.slane %v570_v4, 7  ;;  %v573_v15 = vshll.u32 %v7364_v45, 16  ;;  %v308_v16 = vsel %vm8659_vm5, 0, %v307_v57  ;;  %v567_v18 = vor.u32 %v565_v61, %v564_v10 }
  0x42   : > { %v1277_v17 = vshll.u32 %v8040_v6, 16  ;;  %v568_v19 = vrot.slane %v564_v10, 4  ;;  %309 = vst [vmem:[#allocation2 + $0x44] sm:$0x1] %v308_v16  ;;  %v258_v20 = vsel %vm8642_vm3, 0, %v257_v62  ;;  %v8813_v21 = vcombine.low %v919_v2, %v920_v3  ;;  %s7417_s11 = sshll.u32 %s8612_s22, 12 }
  0x43   : > { %v575_v22 = vor.u32 %v573_v15, %v8806_v14  ;;  %259 = vst [vmem:[#allocation2 + $0x54] sm:$0x1] %v258_v20  ;;  %v579_v23 = vshrl.u32 %v7365_v5, 16  ;;  %v310_v24 = vld [vmem:[#allocation2 + $0x50] sm:$0x1]  ;;  %v560_v30 = vrot.slane %v8785_v48, 4  ;;  %s11348_s15 = scalar_lea.hbm %s11408_s5, %s7417_s11 }
  0x44   : > { %v260_v25 = vld [vmem:[#allocation2 + $0x60] sm:$0x1]  ;;  %v1279_v28 = vrot.slane %v1277_v17, 1  ;;  %v824_v31 = vld [vmem:[#allocation2 + $0x38] sm:$0x1]  ;;  %v582_v33 = vshll.u32 %v7365_v5, 16 }
  0x45   : > { %v825_v36 = vsel %vm8642_vm3, %v543_v1, %v824_v31  ;;  %v576_v38 = vsel %vm8687_vm7, %v568_v19, %v575_v22  ;;  %v834_v39 = vld [vmem:[#allocation2 + $0x48] sm:$0xf]  ;;  %v581_v41 = vrot.slane %v579_v23, 7  ;;  %v587_v42 = vshrl.u32 %v7366_v11, 16  ;;  %v983_v45 = vld [vmem:[#allocation2 + $0x3c] sm:$0xf] }
  0x46   : > { %v1280_v43 = vsel %vm1232_vm9, %v1275_v13, %v1279_v28  ;;  %826 = vst [vmem:[#allocation2 + $0x38] sm:$0x1] %v825_v36  ;;  %v835_v46 = vsel %vm8695_vm8, %v567_v18, %v834_v39  ;;  %837 = vst.msk [vmem:[#allocation2 + $0x4c] sm:$0xf] %vm224_vm0, %v576_v38  ;;  %v921_v48 = vld [vmem:[#allocation2 + $0x3c] sm:$0xf] }
  0x47   : > { %v590_v49 = vshll.u32 %v7366_v11, 16  ;;  %v311_v50 = vsel %vm8659_vm5, 0, %v310_v24  ;;  %1431 = vrot.lane.b32.xlu1 %v1280_v43, %s8557_s10  ;;  %v1284_v51 = vshll.u32 %v8813_v21, 16  ;;  %836 = vst [vmem:[#allocation2 + $0x48] sm:$0xf] %v835_v46  ;;  %v8831_v52 = vrot.slane %v587_v42, 7 }
  0x48   : > { %312 = vst [vmem:[#allocation2 + $0x50] sm:$0x1] %v311_v50  ;;  %v261_v53 = vsel %vm8642_vm3, 0, %v260_v25  ;;  %v984_v55 = vld [vmem:[#allocation2 + $0x40] sm:$0xf]  ;;  %v584_v57 = vor.u32 %v582_v33, %v581_v41  ;;  %v585_v58 = vrot.slane %v581_v41, 4 }
  0x49   : > { %v922_v56 = vld [vmem:[#allocation2 + $0x40] sm:$0xf]  ;;  %262 = vst [vmem:[#allocation2 + $0x60] sm:$0x1] %v261_v53  ;;  %v596_v59 = vshrl.u32 %v7367_v27, 16  ;;  %v8835_v60 = vcombine.low %v983_v45, %v984_v55  ;;  %v592_v63 = vor.u32 %v590_v49, %v8831_v52  ;;  %v599_v4 = vshll.u32 %v7367_v27, 16 }
  0x4a   : > { %v831_v61 = vld [vmem:[#allocation2 + $0x44] sm:$0x1]  ;;  %v8837_v62 = vcombine.low %v921_v48, %v922_v56  ;;  %v841_v2 = vld [vmem:[#allocation2 + $0x54] sm:$0xf]  ;;  %v604_v5 = vshrl.u32 %v8817_v34, 16  ;;  %v1282_v6 = vshrl.u32 %v8813_v21, 16 }
  0x4b   : > { %v832_v1 = vsel %vm8642_vm3, %v560_v30, %v831_v61  ;;  %v598_v3 = vrot.slane %v596_v59, 7  ;;  %1642 = vrot.lane.b32.xlu0 %v8835_v60, %s8557_s10  ;;  %v1286_v8 = vrot.slane %v1284_v51, 1  ;;  %v577_v10 = vrot.slane %v8806_v14, 4  ;;  %v313_v26 = vld [vmem:[#allocation2 + $0x5c] sm:$0x1]  ;;  %v362_v17 = vld [vmem:[%s8666_s9 + $0x80] sm:$0xff] }
  0x4c   : > { %833 = vst [vmem:[#allocation2 + $0x44] sm:$0x1] %v832_v1  ;;  %v1296_v11 = vshll.u32 %v8837_v62, 16  ;;  %v593_v13 = vsel %vm8687_vm7, %v585_v58, %v592_v63  ;;  %v842_v15 = vsel %vm8695_vm8, %v584_v57, %v841_v2  ;;  %v607_v16 = vshll.u32 %v8817_v34, 16  ;;  %v263_v14 = vld [vmem:[#allocation2 + $0x6c] sm:$0x1] }
  0x4d   : > { %v8043_v18 = vld [vmem:[#allocation2 + $0x38] ss:$0 sps:$4 sm:$0x11]   ;;  %v1294_v19 = vshrl.u32 %v8837_v62, 16  ;;  %843 = vst [vmem:[#allocation2 + $0x54] sm:$0xf] %v842_v15  ;;  %v601_v24 = vor.u32 %v599_v4, %v598_v3  ;;  %v1287_v28 = vor.u32 %v1286_v8, %v1282_v6  ;;  %v7369_v45 = vpack.c.bf16 %v362_v17, %v362_v17 }
  0x4e   : > { %844 = vst.msk [vmem:[#allocation2 + $0x58] sm:$0xf] %vm224_vm0, %v593_v13  ;;  %v363_v20 = vld [vmem:[%s8666_s9 + $0x88] sm:$0xff]  ;;  %v602_v25 = vrot.slane %v598_v3, 4  ;;  %v8857_v27 = vrot.slane %v604_v5, 7  ;;  %v1289_v30 = vshll.u32 %v8043_v18, 16 }
  0x4f   : > { %v985_v22 = vld [vmem:[#allocation2 + $0x48] sm:$0xf]  ;;  %v986_v23 = vld [vmem:[#allocation2 + $0x4c] sm:$0xf]  ;;  %v838_v33 = vld [vmem:[#allocation2 + $0x50] sm:$0x1]  ;;  %v7370_v57 = vpack.c.bf16 %v363_v20, %v363_v20 }
  0x50   : > { %v8859_v31 = vcombine.low %v985_v22, %v986_v23  ;;  %v923_v34 = vld [vmem:[#allocation2 + $0x48] sm:$0xf]  ;;  %v314_v36 = vsel %vm8659_vm5, 0, %v313_v26  ;;  %v1298_v38 = vrot.slane %v1296_v11, 1  ;;  %v839_v39 = vsel %vm8642_vm3, %v577_v10, %v838_v33  ;;  %v924_v41 = vld [vmem:[#allocation2 + $0x4c] sm:$0xf] }
  0x51   : > { %v609_v42 = vor.u32 %v607_v16, %v8857_v27  ;;  %v848_v43 = vld [vmem:[#allocation2 + $0x60] sm:$0xf]  ;;  %315 = vst [vmem:[#allocation2 + $0x5c] sm:$0x1] %v314_v36  ;;  %v1291_v48 = vrot.slane %v1289_v30, 1  ;;  %v8871_v49 = vcombine.low %v923_v34, %v924_v41  ;;  %v264_v56 = vsel %vm8642_vm3, 0, %v263_v14 }
  0x52   : > { %11505 = vst [vmem:[#allocation8_spill] sm:$0xff] %v8859_v31  ;;  %v8086_v46 = vld [vmem:[%s11404_s1 + $0x40] sm:$0xff]   ;;  %1644 = vrot.lane.b32.xlu0 %v8859_v31, %s8557_s10  ;;  %840 = vst [vmem:[#allocation2 + $0x50] sm:$0x1] %v839_v39  ;;  %v849_v55 = vsel %vm8695_vm8, %v601_v24, %v848_v43  ;;  %v594_v59 = vrot.slane %v8831_v52, 4  ;;  %v364_v1 = vld [vmem:[%s8666_s9 + $0x90] sm:$0xff]  ;;  %v1299_v3 = vor.u32 %v1298_v38, %v1294_v19 }
  0x53   : > { %v8087_v50 = vld [vmem:[%s11404_s1] sm:$0xff]   ;;  %v610_v53 = vsel %vm8687_vm7, %v602_v25, %v609_v42  ;;  %7418 = vmatprep.subr.bf16.mxu0 %v8086_v46  ;;  %v1292_v58 = vsel %vm1232_vm9, %v1287_v28, %v1291_v48  ;;  %v1306_v61 = vshrl.u32 %v8871_v49, 16  ;;  %v1308_v63 = vshll.u32 %v8871_v49, 16  ;;  %850 = vst [vmem:[#allocation2 + $0x60] sm:$0xf] %v849_v55  ;;  %v8090_v2 = vld [vmem:[%s11404_s1 + $0x48] sm:$0xff]  }
  0x54   : > { %v8046_v51 = vld [vmem:[#allocation2 + $0x44] ss:$0 sps:$4 sm:$0x11]   ;;  %851 = vst.msk [vmem:[#allocation2 + $0x64] sm:$0xf] %vm224_vm0, %v610_v53  ;;  %7419 = vmatpush3.bf16.msra.mxu0 %v8087_v50  ;;  %1433 = vrot.lane.b32.xlu1 %v1292_v58, %s8557_s10  ;;  %v613_v6 = vshrl.u32 %v7369_v45, 16  ;;  %v7371_v36 = vpack.c.bf16 %v364_v1, %v364_v1 }
  0x55   : > { %265 = vst [vmem:[#allocation2 + $0x6c] sm:$0x1] %v264_v56  ;;  %v1301_v4 = vshll.u32 %v8046_v51, 16  ;;  %v987_v5 = vld [vmem:[#allocation2 + $0x54] sm:$0xf]  ;;  %v1310_v10 = vrot.slane %v1308_v63, 1  ;;  %7420 = vmatprep.subr.bf16.mxu0 %v8090_v2 }
  0x56   : > { %v988_v52 = vld [vmem:[#allocation2 + $0x58] sm:$0xf]  ;;  %v925_v11 = vld [vmem:[#allocation2 + $0x54] sm:$0xf]  ;;  %v616_v15 = vshll.u32 %v7369_v45, 16  ;;  %v615_v17 = vrot.slane %v613_v6, 7 }
  0x57   : > { %v8892_v8 = vcombine.low %v987_v5, %v988_v52  ;;  %v926_v13 = vld [vmem:[#allocation2 + $0x58] sm:$0xf]  ;;  %v1303_v16 = vrot.slane %v1301_v4, 1  ;;  %v621_v18 = vshrl.u32 %v7370_v57, 16  ;;  %v316_v14 = vld [vmem:[#allocation2 + $0x68] sm:$0x1]  ;;  %v1311_v45 = vor.u32 %v1310_v10, %v1306_v61 }
  0x58   : > { %v8894_v26 = vcombine.low %v925_v11, %v926_v13  ;;  %v8092_v19 = vld [vmem:[%s11404_s1 + $0x8] sm:$0xff]   ;;  %v845_v20 = vld [vmem:[#allocation2 + $0x5c] sm:$0x1]  ;;  %v624_v22 = vshll.u32 %v7370_v57, 16  ;;  %v266_v23 = vld [vmem:[#allocation2 + $0x78] sm:$0x1]  ;;  %v618_v34 = vor.u32 %v616_v15, %v615_v17 }
  0x59   : > { %11506 = vst [vmem:[#allocation9_spill] sm:$0xff] %v8892_v8  ;;  %1646 = vrot.lane.b32.xlu0 %v8892_v8, %s8557_s10  ;;  %v365_v24 = vld [vmem:[%s8666_s9 + $0x98] sm:$0xff]  ;;  %v8093_v25 = vld [vmem:[%s11404_s1 + $0x50] sm:$0xff]   ;;  %v1304_v28 = vsel %vm1232_vm9, %v1299_v3, %v1303_v16  ;;  %v846_v33 = vsel %vm8642_vm3, %v594_v59, %v845_v20  ;;  %v366_v38 = vld [vmem:[%s8666_s9 + $0xa0] sm:$0xff]  ;;  %7421 = vmatpush3.bf16.msra.mxu0 %v8092_v19  ;;  %v619_v41 = vrot.slane %v615_v17, 4  ;;  %v8911_v42 = vrot.slane %v621_v18, 7 }
  0x5a   : > { %v8049_v30 = vld [vmem:[#allocation2 + $0x50] ss:$0 sps:$4 sm:$0x11]   ;;  %1435 = vrot.lane.b32.xlu1 %v1304_v28, %s8557_s10  ;;  %847 = vst [vmem:[#allocation2 + $0x5c] sm:$0x1] %v846_v33  ;;  %v1320_v39 = vshll.u32 %v8894_v26, 16  ;;  %7422 = vmatprep.subr.bf16.mxu0 %v8093_v25  ;;  %v7372_v58 = vpack.c.bf16 %v365_v24, %v365_v24  ;;  %v8919_v63 = vpack.c.bf16 %v366_v38, %v366_v38 }
  0x5b   : > { %v367_v43 = vld [vmem:[%s8666_s9 + $0xa8] sm:$0xff]  ;;  %v1313_v46 = vshll.u32 %v8049_v30, 16  ;;  %v989_v48 = vld [vmem:[#allocation2 + $0x60] sm:$0xf]  ;;  %v990_v50 = vld [vmem:[#allocation2 + $0x64] sm:$0xf]  ;;  %v626_v55 = vor.u32 %v624_v22, %v8911_v42 }
  0x5c   : > { %v317_v51 = vsel %vm8659_vm5, 0, %v316_v14  ;;  %v8916_v53 = vcombine.low %v989_v48, %v990_v50  ;;  %v855_v56 = vld [vmem:[#allocation2 + $0x6c] sm:$0xf]  ;;  %v927_v57 = vld [vmem:[#allocation2 + $0x60] sm:$0xf]  ;;  %v267_v3 = vsel %vm8642_vm3, 0, %v266_v23  ;;  %v8934_v13 = vpack.c.bf16 %v367_v43, %v367_v43 }
  0x5d   : > { %318 = vst [vmem:[#allocation2 + $0x68] sm:$0x1] %v317_v51  ;;  %v319_v59 = vld [vmem:[#allocation2 + $0x74] sm:$0x1]  ;;  %v1315_v1 = vrot.slane %v1313_v46, 1  ;;  %v856_v61 = vsel %vm8695_vm8, %v618_v34, %v855_v56  ;;  %v630_v4 = vshrl.u32 %v7371_v36, 16  ;;  %v627_v10 = vsel %vm8687_vm7, %v619_v41, %v626_v55 }
  0x5e   : > { %11507 = vst [vmem:[#allocation10_spill] sm:$0xff] %v8916_v53  ;;  %v928_v2 = vld [vmem:[#allocation2 + $0x64] sm:$0xf]  ;;  %v8094_v5 = vld [vmem:[%s11404_s1 + $0x10] sm:$0xff]   ;;  %v611_v52 = vrot.slane %v8857_v27, 4  ;;  %1648 = vrot.lane.b32.xlu0 %v8916_v53, %s8557_s10  ;;  %v1318_v6 = vshrl.u32 %v8894_v26, 16 }
  0x5f   : > { %857 = vst [vmem:[#allocation2 + $0x6c] sm:$0xf] %v856_v61  ;;  %268 = vst [vmem:[#allocation2 + $0x78] sm:$0x1] %v267_v3  ;;  %v269_v11 = vld [vmem:[#allocation2 + $0x84] sm:$0x1]  ;;  %v1316_v16 = vsel %vm1232_vm9, %v1311_v45, %v1315_v1  ;;  %7423 = vmatpush3.bf16.msra.mxu0 %v8094_v5  ;;  %v8942_v14 = vcombine.low %v927_v57, %v928_v2 }
  0x60   : > { %v8097_v15 = vld [vmem:[%s11404_s1 + $0x58] sm:$0xff]   ;;  %v1322_v27 = vrot.slane %v1320_v39, 1  ;;  %858 = vst.msk [vmem:[#allocation2 + $0x70] sm:$0xf] %vm224_vm0, %v627_v10  ;;  %v632_v17 = vrot.slane %v630_v4, 7  ;;  %v633_v18 = vshll.u32 %v7371_v36, 16  ;;  %1437 = vrot.lane.b32.xlu1 %v1316_v16, %s8557_s10 }
  0x61   : > { %v638_v19 = vshrl.u32 %v7372_v58, 16  ;;  %v641_v20 = vshll.u32 %v7372_v58, 16  ;;  %v320_v22 = vsel %vm8659_vm5, 0, %v319_v59  ;;  %7424 = vmatprep.subr.bf16.mxu0 %v8097_v15  ;;  %v8052_v23 = vld [vmem:[#allocation2 + $0x5c] ss:$0 sps:$4 sm:$0x11]  }
  0x62   : > { %v628_v24 = vrot.slane %v8911_v42, 4  ;;  %321 = vst [vmem:[#allocation2 + $0x74] sm:$0x1] %v320_v22  ;;  %v635_v25 = vor.u32 %v633_v18, %v632_v17  ;;  %v636_v28 = vrot.slane %v632_v17, 4  ;;  %v270_v33 = vsel %vm8642_vm3, 0, %v269_v11  ;;  %v368_v43 = vld [vmem:[%s8666_s9 + $0xb0] sm:$0xff] }
  0x63   : > { %v8947_v30 = vrot.slane %v638_v19, 7  ;;  %v1323_v34 = vor.u32 %v1322_v27, %v1318_v6  ;;  %v1325_v36 = vshll.u32 %v8052_v23, 16  ;;  %271 = vst [vmem:[#allocation2 + $0x84] sm:$0x1] %v270_v33  ;;  %v647_v39 = vshrl.u32 %v8919_v63, 16  ;;  %v369_v51 = vld [vmem:[%s8666_s9 + $0xb8] sm:$0xff] }
  0x64   : > { %v852_v38 = vld [vmem:[#allocation2 + $0x68] sm:$0x1]  ;;  %v650_v41 = vshll.u32 %v8919_v63, 16  ;;  %v1332_v45 = vshll.u32 %v8942_v14, 16  ;;  %v655_v48 = vshrl.u32 %v8934_v13, 16  ;;  %v8099_v55 = vld [vmem:[%s11404_s1 + $0x18] sm:$0xff]   ;;  %v8967_v4 = vpack.c.bf16 %v368_v43, %v368_v43 }
  0x65   : > { %v853_v42 = vsel %vm8642_vm3, %v611_v52, %v852_v38  ;;  %v643_v46 = vor.u32 %v641_v20, %v8947_v30  ;;  %v322_v50 = vld [vmem:[#allocation2 + $0x80] sm:$0x1]  ;;  %v1327_v56 = vrot.slane %v1325_v36, 1  ;;  %v649_v59 = vrot.slane %v647_v39, 7  ;;  %7425 = vmatpush3.bf16.msra.mxu0 %v8099_v55  ;;  %v272_v11 = vld [vmem:[#allocation2 + $0x90] sm:$0x1] }
  0x66   : > { %v991_v57 = vld [vmem:[#allocation2 + $0x6c] sm:$0xf]  ;;  %854 = vst [vmem:[#allocation2 + $0x68] sm:$0x1] %v853_v42  ;;  %v862_v58 = vld [vmem:[#allocation2 + $0x78] sm:$0xf] }
  0x67   : > { %v992_v63 = vld [vmem:[#allocation2 + $0x70] sm:$0xf]  ;;  %v644_v1 = vsel %vm8687_vm7, %v636_v28, %v643_v46  ;;  %v863_v61 = vsel %vm8695_vm8, %v635_v25, %v862_v58  ;;  %v929_v2 = vld [vmem:[#allocation2 + $0x6c] sm:$0xf]  ;;  %v1328_v5 = vsel %vm1232_vm9, %v1323_v34, %v1327_v56  ;;  %v652_v10 = vor.u32 %v650_v41, %v649_v59  ;;  %v8100_v15 = vld [vmem:[%s11404_s1 + $0x60] sm:$0xff]   ;;  %s6820_s12 = sshll.u32 %s11197_s8, 4  ;;  %s11350_s12 = int_to_ptr.vmem [resolvable:$true] %s6820_s12 }
  0x68   : > { %v930_v3 = vld [vmem:[#allocation2 + $0x70] sm:$0xf]  ;;  %v8970_v52 = vcombine.low %v991_v57, %v992_v63  ;;  %864 = vst [vmem:[#allocation2 + $0x78] sm:$0xf] %v863_v61  ;;  %865 = vst.msk [vmem:[#allocation2 + $0x7c] sm:$0xf] %vm224_vm0, %v644_v1  ;;  %1439 = vrot.lane.b32.xlu1 %v1328_v5, %s8557_s10  ;;  %v7376_v28 = vpack.c.bf16 %v369_v51, %v369_v51  ;;  %7426 = vmatprep.subr.bf16.mxu0 %v8100_v15 }
  0x69   : > { %v8973_v6 = vcombine.low %v929_v2, %v930_v3  ;;  %v859_v16 = vld [vmem:[#allocation2 + $0x74] sm:$0x1]  ;;  %v653_v27 = vrot.slane %v649_v59, 4  ;;  %v8979_v17 = vrot.slane %v655_v48, 7  ;;  %v658_v18 = vshll.u32 %v8934_v13, 16  ;;  %v370_v33 = vld [vmem:[%s8666_s9 + $0xc0] sm:$0xff] }
  0x6a   : > { %11508 = vst [vmem:[#allocation11_spill] sm:$0xff] %v8970_v52  ;;  %v323_v19 = vsel %vm8659_vm5, 0, %v322_v50  ;;  %v325_v20 = vld [vmem:[#allocation2 + $0x8c] sm:$0x1]  ;;  %1650 = vrot.lane.b32.xlu0 %v8970_v52, %s8557_s10  ;;  %v1330_v22 = vshrl.u32 %v8942_v14, 16  ;;  %v1334_v23 = vrot.slane %v1332_v45, 1  ;;  %v860_v25 = vsel %vm8642_vm3, %v628_v24, %v859_v16 }
  0x6b   : > { %324 = vst [vmem:[#allocation2 + $0x80] sm:$0x1] %v323_v19  ;;  %v8101_v13 = vld [vmem:[%s11404_s1 + $0x20] sm:$0xff]   ;;  %v645_v34 = vrot.slane %v8947_v30, 4  ;;  %861 = vst [vmem:[#allocation2 + $0x74] sm:$0x1] %v860_v25  ;;  %v660_v38 = vor.u32 %v658_v18, %v8979_v17  ;;  %v7377_v56 = vpack.c.bf16 %v370_v33, %v370_v33 }
  0x6c   : > { %v1344_v36 = vshll.u32 %v8973_v6, 16  ;;  %v869_v39 = vld [vmem:[#allocation2 + $0x84] sm:$0xf]  ;;  %v273_v41 = vsel %vm8642_vm3, 0, %v272_v11  ;;  %v8104_v24 = vld [vmem:[%s11404_s1 + $0x68] sm:$0xff]   ;;  %v1342_v43 = vshrl.u32 %v8973_v6, 16  ;;  %7427 = vmatpush3.bf16.msra.mxu0 %v8101_v13  ;;  %v1335_v61 = vor.u32 %v1334_v23, %v1330_v22 }
  0x6d   : > { %v870_v42 = vsel %vm8695_vm8, %v652_v10, %v869_v39  ;;  %274 = vst [vmem:[#allocation2 + $0x90] sm:$0x1] %v273_v41  ;;  %v664_v30 = vshrl.u32 %v8967_v4, 16  ;;  %v667_v45 = vshll.u32 %v8967_v4, 16  ;;  %v275_v46 = vld [vmem:[#allocation2 + $0x9c] sm:$0x1]  ;;  %v661_v55 = vsel %vm8687_vm7, %v653_v27, %v660_v38  ;;  %7428 = vmatprep.subr.bf16.mxu0 %v8104_v24 }
  0x6e   : > { %v8106_v48 = vld [vmem:[%s11404_s1 + $0x28] sm:$0xff]   ;;  %v1346_v51 = vrot.slane %v1344_v36, 1  ;;  %871 = vst [vmem:[#allocation2 + $0x84] sm:$0xf] %v870_v42  ;;  %872 = vst.msk [vmem:[#allocation2 + $0x88] sm:$0xf] %vm224_vm0, %v661_v55 }
  0x6f   : > { %v8055_v50 = vld [vmem:[#allocation2 + $0x68] ss:$0 sps:$4 sm:$0x11]   ;;  %v666_v57 = vrot.slane %v664_v30, 7  ;;  %v672_v58 = vshrl.u32 %v7376_v28, 16  ;;  %v675_v59 = vshll.u32 %v7376_v28, 16 }
  0x70   : > { %v326_v63 = vsel %vm8659_vm5, 0, %v325_v20  ;;  %v371_v1 = vld [vmem:[%s8666_s9 + $0xc8] sm:$0xff]  ;;  %v1337_v2 = vshll.u32 %v8055_v50, 16  ;;  %v993_v3 = vld [vmem:[#allocation2 + $0x78] sm:$0xf]  ;;  %v276_v5 = vsel %vm8642_vm3, 0, %v275_v46  ;;  %7429 = vmatpush3.bf16.msra.mxu0 %v8106_v48  ;;  %v1347_v48 = vor.u32 %v1346_v51, %v1342_v43 }
  0x71   : > { %v994_v4 = vld [vmem:[#allocation2 + $0x7c] sm:$0xf]  ;;  %327 = vst [vmem:[#allocation2 + $0x8c] sm:$0x1] %v326_v63  ;;  %v931_v11 = vld [vmem:[#allocation2 + $0x78] sm:$0xf]  ;;  %v669_v22 = vor.u32 %v667_v45, %v666_v57  ;;  %v7378_v13 = vpack.c.bf16 %v371_v1, %v371_v1 }
  0x72   : > { %v9017_v10 = vcombine.low %v993_v3, %v994_v4  ;;  %v932_v15 = vld [vmem:[#allocation2 + $0x7c] sm:$0xf]  ;;  %v670_v16 = vrot.slane %v666_v57, 4  ;;  %v9019_v27 = vrot.slane %v672_v58, 7  ;;  %277 = vst [vmem:[#allocation2 + $0x9c] sm:$0x1] %v276_v5 }
  0x73   : > { %v1339_v18 = vrot.slane %v1337_v2, 1  ;;  %v866_v19 = vld [vmem:[#allocation2 + $0x80] sm:$0x1]  ;;  %v9021_v20 = vcombine.low %v931_v11, %v932_v15  ;;  %v681_v23 = vshrl.u32 %v7377_v56, 16  ;;  %v8107_v25 = vld [vmem:[%s11404_s1 + $0x70] sm:$0xff]   ;;  %v684_v36 = vshll.u32 %v7377_v56, 16 }
  0x74   : > { %11509 = vst [vmem:[#allocation12_spill] sm:$0xff] %v9017_v10  ;;  %1652 = vrot.lane.b32.xlu0 %v9017_v10, %s8557_s10  ;;  %v867_v28 = vsel %vm8642_vm3, %v645_v34, %v866_v19  ;;  %v677_v33 = vor.u32 %v675_v59, %v9019_v27  ;;  %v8058_v39 = vld [vmem:[#allocation2 + $0x74] ss:$0 sps:$4 sm:$0x11]   ;;  %v662_v41 = vrot.slane %v8979_v17, 4  ;;  %7430 = vmatprep.subr.bf16.mxu0 %v8107_v25  ;;  %v689_v1 = vshrl.u32 %v7378_v13, 16 }
  0x75   : > { %v1340_v38 = vsel %vm1232_vm9, %v1335_v61, %v1339_v18  ;;  %868 = vst [vmem:[#allocation2 + $0x80] sm:$0x1] %v867_v28  ;;  %v372_v24 = vld [vmem:[%s8666_s9 + $0xd0] sm:$0xff]  ;;  %v995_v42 = vld [vmem:[#allocation2 + $0x84] sm:$0xf]  ;;  %v1356_v30 = vshll.u32 %v9021_v20, 16 }
  0x76   : > { %1441 = vrot.lane.b32.xlu1 %v1340_v38, %s8557_s10  ;;  %v678_v34 = vsel %vm8687_vm7, %v670_v16, %v677_v33  ;;  %v876_v45 = vld [vmem:[#allocation2 + $0x90] sm:$0xf]  ;;  %v683_v46 = vrot.slane %v681_v23, 7  ;;  %v1349_v50 = vshll.u32 %v8058_v39, 16  ;;  %v996_v55 = vld [vmem:[#allocation2 + $0x88] sm:$0xf]  ;;  %v7379_v3 = vpack.c.bf16 %v372_v24, %v372_v24 }
  0x77   : > { %v877_v17 = vsel %vm8695_vm8, %v669_v22, %v876_v45  ;;  %879 = vst.msk [vmem:[#allocation2 + $0x94] sm:$0xf] %vm224_vm0, %v678_v34  ;;  %v933_v56 = vld [vmem:[#allocation2 + $0x84] sm:$0xf]  ;;  %v9041_v57 = vcombine.low %v995_v42, %v996_v55  ;;  %v934_v59 = vld [vmem:[#allocation2 + $0x88] sm:$0xf] }
  0x78   : > { %878 = vst [vmem:[#allocation2 + $0x90] sm:$0xf] %v877_v17  ;;  %v873_v58 = vld [vmem:[#allocation2 + $0x8c] sm:$0x1]  ;;  %v686_v63 = vor.u32 %v684_v36, %v683_v46  ;;  %v328_v61 = vld [vmem:[#allocation2 + $0x98] sm:$0x1]  ;;  %v9047_v5 = vcombine.low %v933_v56, %v934_v59 }
  0x79   : > { %11510 = vst [vmem:[#allocation13_spill] sm:$0xff] %v9041_v57  ;;  %v373_v2 = vld [vmem:[%s8666_s9 + $0xd8] sm:$0xff]  ;;  %v1351_v4 = vrot.slane %v1349_v50, 1  ;;  %v1354_v43 = vshrl.u32 %v9021_v20, 16  ;;  %v874_v51 = vsel %vm8642_vm3, %v662_v41, %v873_v58  ;;  %v278_v15 = vld [vmem:[#allocation2 + $0xa8] sm:$0x1]  ;;  %1654 = vrot.lane.b32.xlu0 %v9041_v57, %s8557_s10 }
  0x7a   : > { %v883_v11 = vld [vmem:[#allocation2 + $0x9c] sm:$0xf]  ;;  %v1358_v16 = vrot.slane %v1356_v30, 1  ;;  %875 = vst [vmem:[#allocation2 + $0x8c] sm:$0x1] %v874_v51  ;;  %v687_v18 = vrot.slane %v683_v46, 4  ;;  %v7380_v33 = vpack.c.bf16 %v373_v2, %v373_v2 }
  0x7b   : > { %v9051_v19 = vrot.slane %v689_v1, 7  ;;  %v692_v22 = vshll.u32 %v7378_v13, 16  ;;  %v1352_v23 = vsel %vm1232_vm9, %v1347_v48, %v1351_v4  ;;  %v1368_v25 = vshll.u32 %v9047_v5, 16  ;;  %v8108_v36 = vld [vmem:[%s11404_s1 + $0x30] sm:$0xff]   ;;  %v374_v55 = vld [vmem:[%s8666_s9 + $0xe0] sm:$0xff]  ;;  %v375_v51 = vld [vmem:[%s8666_s9 + $0xe8] sm:$0xff] }
  0x7c   : > { %v884_v28 = vsel %vm8695_vm8, %v686_v63, %v883_v11  ;;  %1443 = vrot.lane.b32.xlu1 %v1352_v23, %s8557_s10  ;;  %v8061_v38 = vld [vmem:[#allocation2 + $0x80] ss:$0 sps:$4 sm:$0x11]   ;;  %v1366_v13 = vshrl.u32 %v9047_v5, 16  ;;  %v329_v24 = vsel %vm8659_vm5, 0, %v328_v61  ;;  %v279_v42 = vsel %vm8642_vm3, 0, %v278_v15  ;;  %7431 = vmatpush3.bf16.msra.mxu0 %v8108_v36 }
  0x7d   : > { %v694_v39 = vor.u32 %v692_v22, %v9051_v19  ;;  %885 = vst [vmem:[#allocation2 + $0x9c] sm:$0xf] %v884_v28  ;;  %v1370_v41 = vrot.slane %v1368_v25, 1  ;;  %v1359_v30 = vor.u32 %v1358_v16, %v1354_v43  ;;  %v1361_v34 = vshll.u32 %v8061_v38, 16  ;;  %330 = vst [vmem:[#allocation2 + $0x98] sm:$0x1] %v329_v24 }
  0x7e   : > { %v998_v45 = vld [vmem:[#allocation2 + $0x94] sm:$0xf]  ;;  %280 = vst [vmem:[#allocation2 + $0xa8] sm:$0x1] %v279_v42  ;;  %v698_v50 = vshrl.u32 %v7379_v3, 16  ;;  %v701_v58 = vshll.u32 %v7379_v3, 16  ;;  %v7381_v36 = vpack.c.bf16 %v374_v55, %v374_v55 }
  0x7f   : > { %v695_v46 = vsel %vm8687_vm7, %v687_v18, %v694_v39  ;;  %v936_v48 = vld [vmem:[#allocation2 + $0x94] sm:$0xf]  ;;  %v997_v17 = vld [vmem:[#allocation2 + $0x90] sm:$0xf]  ;;  %v706_v59 = vshrl.u32 %v7380_v33, 16  ;;  %v1363_v63 = vrot.slane %v1361_v34, 1  ;;  %v1371_v18 = vor.u32 %v1370_v41, %v1366_v13 }
  0x80   : > { %886 = vst.msk [vmem:[#allocation2 + $0xa0] sm:$0xf] %vm224_vm0, %v695_v46  ;;  %v935_v56 = vld [vmem:[#allocation2 + $0x90] sm:$0xf]  ;;  %v9071_v1 = vcombine.low %v997_v17, %v998_v45  ;;  %v700_v61 = vrot.slane %v698_v50, 7  ;;  %v679_v15 = vrot.slane %v9019_v27, 4 }
  0x81   : > { %v331_v2 = vld [vmem:[#allocation2 + $0xa4] sm:$0x1]  ;;  %v8064_v4 = vld [vmem:[#allocation2 + $0x8c] ss:$0 sps:$4 sm:$0x11]   ;;  %v9073_v43 = vcombine.low %v935_v56, %v936_v48  ;;  %v1364_v11 = vsel %vm1232_vm9, %v1359_v30, %v1363_v63  ;;  %v9080_v16 = vrot.slane %v706_v59, 7  ;;  %v7382_v30 = vpack.c.bf16 %v375_v51, %v375_v51 }
  0x82   : > { %11511 = vst [vmem:[#allocation14_spill] sm:$0xff] %v9071_v1  ;;  %1656 = vrot.lane.b32.xlu0 %v9071_v1, %s8557_s10  ;;  %v376_v3 = vld [vmem:[%s8666_s9 + $0xf0] sm:$0xff]  ;;  %1445 = vrot.lane.b32.xlu1 %v1364_v11, %s8557_s10  ;;  %v1373_v22 = vshll.u32 %v8064_v4, 16  ;;  %v703_v25 = vor.u32 %v701_v58, %v700_v61  ;;  %v8111_v38 = vld [vmem:[%s11404_s1 + $0x78] sm:$0xff]   ;;  %v704_v27 = vrot.slane %v700_v61, 4  ;;  %v709_v39 = vshll.u32 %v7380_v33, 16 }
  0x83   : > { %v281_v28 = vld [vmem:[#allocation2 + $0xb4] sm:$0x1]  ;;  %v332_v24 = vsel %vm8659_vm5, 0, %v331_v2  ;;  %v377_v34 = vld [vmem:[%s8666_s9 + $0xf8] sm:$0xff]  ;;  %v1380_v13 = vshll.u32 %v9073_v43, 16  ;;  %7432 = vmatprep.subr.bf16.mxu0 %v8111_v38  ;;  %v7383_v2 = vpack.c.bf16 %v376_v3, %v376_v3  ;;  %v715_v51 = vshrl.u32 %v7381_v36, 16 }
  0x84   : > { %v999_v23 = vld [vmem:[#allocation2 + $0x9c] sm:$0xf]  ;;  %v1375_v45 = vrot.slane %v1373_v22, 1  ;;  %v880_v46 = vld [vmem:[#allocation2 + $0x98] sm:$0x1]  ;;  %v711_v33 = vor.u32 %v709_v39, %v9080_v16  ;;  %v282_v58 = vsel %vm8642_vm3, 0, %v281_v28 }
  0x85   : > { %v937_v42 = vld [vmem:[#allocation2 + $0x9c] sm:$0xf]  ;;  %v890_v41 = vld [vmem:[#allocation2 + $0xa8] sm:$0xf]  ;;  %333 = vst [vmem:[#allocation2 + $0xa4] sm:$0x1] %v332_v24  ;;  %v881_v55 = vsel %vm8642_vm3, %v679_v15, %v880_v46 }
  0x86   : > { %v334_v48 = vld [vmem:[#allocation2 + $0xb0] sm:$0x1]  ;;  %v891_v17 = vsel %vm8695_vm8, %v703_v25, %v890_v41  ;;  %v8113_v59 = vld [vmem:[%s11404_s1 + $0x38] sm:$0xff]   ;;  %v1376_v63 = vsel %vm1232_vm9, %v1371_v18, %v1375_v45  ;;  %882 = vst [vmem:[#allocation2 + $0x98] sm:$0x1] %v881_v55  ;;  %v712_v4 = vsel %vm8687_vm7, %v704_v27, %v711_v33  ;;  %v718_v11 = vshll.u32 %v7381_v36, 16 }
  0x87   : > { %v1000_v50 = vld [vmem:[#allocation2 + $0xa0] sm:$0xf]  ;;  %892 = vst [vmem:[#allocation2 + $0xa8] sm:$0xf] %v891_v17  ;;  %283 = vst [vmem:[#allocation2 + $0xb4] sm:$0x1] %v282_v58  ;;  %1447 = vrot.lane.b32.xlu1 %v1376_v63, %s8557_s10  ;;  %7433 = vmatpush3.bf16.msra.mxu0 %v8113_v59  ;;  %v7384_v25 = vpack.c.bf16 %v377_v34, %v377_v34 }
  0x88   : > { %v938_v56 = vld [vmem:[#allocation2 + $0xa0] sm:$0xf]  ;;  %v9102_v61 = vcombine.low %v999_v23, %v1000_v50  ;;  %v723_v15 = vshrl.u32 %v7382_v30, 16  ;;  %v696_v23 = vrot.slane %v9051_v19, 4  ;;  %893 = vst.msk [vmem:[#allocation2 + $0xac] sm:$0xf] %vm224_vm0, %v712_v4 }
  0x89   : > { %v284_v22 = vld [vmem:[#allocation2 + $0xc0] sm:$0x1]  ;;  %v9116_v3 = vcombine.low %v937_v42, %v938_v56  ;;  %v717_v28 = vrot.slane %v715_v51, 7  ;;  %v726_v38 = vshll.u32 %v7382_v30, 16  ;;  %v335_v27 = vsel %vm8659_vm5, 0, %v334_v48  ;;  %s11362_s22 = scalar_lea.sflag [#allocation4], %s215_s6 }
  0x8a   : > { %11512 = vst [vmem:[#allocation15_spill] sm:$0xff] %v9102_v61  ;;  %v9110_v18 = vld [vmem:[%s11404_s1 + $0x100] sm:$0xff]   ;;  %1658 = vrot.lane.b32.xlu0 %v9102_v61, %s8557_s10  ;;  %v9118_v36 = vrot.slane %v723_v15, 7  ;;  %v1378_v39 = vshrl.u32 %v9073_v43, 16  ;;  %v713_v19 = vrot.slane %v9080_v16, 4  ;;  %v285_v24 = vsel %vm8642_vm3, 0, %v284_v22 }
  0x8b   : > { %7906 = vmatprep.subr.bf16.mxu0 %v9110_v18  ;;  %336 = vst [vmem:[#allocation2 + $0xb0] sm:$0x1] %v335_v27  ;;  %v732_v42 = vshrl.u32 %v7383_v2, 16  ;;  %v1040_v45 = vld [vmem:[#allocation2 + $0x18] sm:$0xf]  ;;  %v1382_v34 = vrot.slane %v1380_v13, 1  ;;  %v720_v41 = vor.u32 %v718_v11, %v717_v28 }
  0x8c   : > { %v887_v46 = vld [vmem:[#allocation2 + $0xa4] sm:$0x1]  ;;  %v721_v50 = vrot.slane %v717_v28, 4  ;;  %v728_v30 = vor.u32 %v726_v38, %v9118_v36  ;;  %286 = vst [vmem:[#allocation2 + $0xc0] sm:$0x1] %v285_v24  ;;  %v1392_v55 = vshll.u32 %v9116_v3, 16 }
  0x8d   : > { %v888_v48 = vsel %vm8642_vm3, %v696_v23, %v887_v46  ;;  %v734_v33 = vrot.slane %v732_v42, 7  ;;  %v735_v16 = vshll.u32 %v7383_v2, 16  ;;  %v337_v17 = vld [vmem:[#allocation2 + $0xbc] sm:$0x1]  ;;  %v8127_v58 = vld [vmem:[%s11404_s1 + $0xc0] sm:$0xff]   ;;  %v740_v63 = vshrl.u32 %v7384_v25, 16 }
  0x8e   : > { %v1041_v56 = vld [vmem:[#allocation2 + $0x1c] sm:$0xf]  ;;  %v8067_v13 = vld [vmem:[#allocation2 + $0x98] ss:$0 sps:$4 sm:$0x11]   ;;  %v729_v59 = vsel %vm8687_vm7, %v721_v50, %v728_v30  ;;  %7530 = vmatprep.subr.bf16.mxu1 %v8127_v58  ;;  %v1383_v15 = vor.u32 %v1382_v34, %v1378_v39  ;;  %v743_v46 = vshll.u32 %v7384_v25, 16 }
  0x8f   : > { %889 = vst [vmem:[#allocation2 + $0xa4] sm:$0x1] %v888_v48  ;;  %v1001_v4 = vld [vmem:[#allocation2 + $0xa8] sm:$0xf]  ;;  %v897_v51 = vld [vmem:[#allocation2 + $0xb4] sm:$0xf]  ;;  %v9141_v38 = vcombine.low %v1040_v45, %v1041_v56  ;;  %v737_v24 = vor.u32 %v735_v16, %v734_v33 }
  0x90   : > { %900 = vst.msk [vmem:[#allocation2 + $0xb8] sm:$0xf] %vm224_vm0, %v729_v59  ;;  %v939_v11 = vld [vmem:[#allocation2 + $0xa8] sm:$0xf]  ;;  %v1385_v2 = vshll.u32 %v8067_v13, 16  ;;  %v898_v23 = vsel %vm8695_vm8, %v720_v41, %v897_v51  ;;  %v9146_v42 = vrot.slane %v740_v63, 7 }
  0x91   : > { %v9137_v22 = vld [vmem:[#allocation2 + $0xac] sm:$0xf]  ;;  %899 = vst [vmem:[#allocation2 + $0xb4] sm:$0xf] %v898_v23  ;;  %v1042_v50 = vld [vmem:[#allocation2 + $0x24] sm:$0xf] }
  0x92   : > { %v940_v28 = vld [vmem:[#allocation2 + $0xac] sm:$0xf]  ;;  %v9144_v27 = vcombine.low %v1001_v4, %v9137_v22  ;;  %v1387_v30 = vrot.slane %v1385_v2, 1  ;;  %v894_v39 = vld [vmem:[#allocation2 + $0xb0] sm:$0x1]  ;;  %v738_v48 = vrot.slane %v734_v33, 4  ;;  %v745_v33 = vor.u32 %v743_v46, %v9146_v42 }
  0x93   : > { %v9148_v34 = vcombine.low %v939_v11, %v940_v28  ;;  %v338_v41 = vsel %vm8659_vm5, 0, %v337_v17  ;;  %v1390_v45 = vshrl.u32 %v9116_v3, 16  ;;  %v1394_v56 = vrot.slane %v1392_v55, 1  ;;  %v904_v58 = vld [vmem:[#allocation2 + $0xc0] sm:$0xf]  ;;  %s8558_s16 = smov [#allocation3]  }
  0x94   : > { %11513 = vst [vmem:[#allocation16_spill] sm:$0xff] %v9144_v27  ;;  %1660 = vrot.lane.b32.xlu0 %v9144_v27, %s8557_s10  ;;  %v895_v16 = vsel %vm8642_vm3, %v713_v19, %v894_v39  ;;  %339 = vst [vmem:[#allocation2 + $0xbc] sm:$0x1] %v338_v41  ;;  %v1043_v25 = vld [vmem:[#allocation2 + $0x28] sm:$0xf]  ;;  %v1388_v13 = vsel %vm1232_vm9, %v1383_v15, %v1387_v30  ;;  %v2165_v17 = vshll.u32 %v9141_v38, 16 }
  0x95   : > { %896 = vst [vmem:[#allocation2 + $0xb0] sm:$0x1] %v895_v16  ;;  %v8078_v59 = vld [vmem:[#allocation2 + $0x20] ss:$0 sps:$4 sm:$0x11]   ;;  %1449 = vrot.lane.b32.xlu1 %v1388_v13, %s8557_s10  ;;  %v905_v19 = vsel %vm8695_vm8, %v737_v24, %v904_v58  ;;  %v1404_v11 = vshll.u32 %v9148_v34, 16  ;;  %v746_v15 = vsel %vm8687_vm7, %v738_v48, %v745_v33  ;;  %v9171_v23 = vcombine.low %v1042_v50, %v1043_v25 }
  0x96   : > { %v8129_v63 = vld [vmem:[%s11404_s1 + $0x80] sm:$0xff]   ;;  %v1023_v4 = vld [vmem:[#allocation2 + $0xc] sm:$0xe]  ;;  %906 = vst [vmem:[#allocation2 + $0xc0] sm:$0xf] %v905_v19  ;;  %v1395_v39 = vor.u32 %v1394_v56, %v1390_v45  ;;  %v730_v24 = vrot.slane %v9118_v36, 4 }
  0x97   : > { %v8070_v55 = vld [vmem:[#allocation2 + $0xa4] ss:$0 sps:$4 sm:$0x11]   ;;  %v9166_v51 = vld [vmem:[#allocation2 + $0xb8] sm:$0xf]  ;;  %7531 = vmatpush3.bf16.msra.mxu1 %v8129_v63  ;;  %v2163_v16 = vshrl.u32 %v9141_v38, 16 }
  0x98   : > { %v942_v2 = vld [vmem:[#allocation2 + $0xb8] sm:$0xf]  ;;  %v8081_v28 = vld [vmem:[#allocation2 + $0x2c] ss:$0 sps:$4 sm:$0x11]   ;;  %v1397_v41 = vshll.u32 %v8070_v55, 16 }
  0x99   : > { %v1044_v46 = vld [vmem:[#allocation2 + $0x30] sm:$0xf]  ;;  %v1045_v30 = vld [vmem:[#allocation2 + $0x34] sm:$0xf]  ;;  %907 = vst.msk [vmem:[#allocation2 + $0xc4] sm:$0xf] %vm224_vm0, %v746_v15 }
  0x9a   : > { %v1024_v58 = vld [vmem:[#allocation2 + $0x18] sm:$0xe]  ;;  %v1003_v13 = vld [vmem:[#allocation2 + $0xb4] sm:$0xf]  ;;  %v2167_v48 = vrot.slane %v2165_v17, 1  ;;  %v2170_v33 = vshll.u32 %v8078_v59, 16 }
  0x9b   : > { %v941_v37 = vld [vmem:[#allocation2 + $0xb4] sm:$0xf]  ;;  %v1046_v50 = vld [vmem:[#allocation2 + $0x3c] sm:$0xf]  ;;  %v1047_v25 = vld [vmem:[#allocation2 + $0x40] sm:$0xf]  ;;  %v9179_v63 = vcombine.low %v1003_v13, %v9166_v51 }
  0x9c   : > { %v9176_v19 = vld [vmem:[#allocation2 + $0x14] ss:$0 sps:$4 sm:$0x11]   ;;  %v1399_v44 = vrot.slane %v1397_v41, 1  ;;  %v9181_v45 = vcombine.low %v941_v37, %v942_v2  ;;  %v1402_v36 = vshrl.u32 %v9148_v34, 16  ;;  %v1406_v56 = vrot.slane %v1404_v11, 1 }
  0x9d   : > { %11514 = vst [vmem:[#allocation17_spill] sm:$0xff] %v9179_v63  ;;  %v901_v55 = vld [vmem:[#allocation2 + $0xbc] sm:$0x1]  ;;  %v8351_v15 = vld [vmem:[#allocation2 + $0x10] sm:$0xf]  ;;  %v2177_v61 = vshll.u32 %v9171_v23, 16  ;;  %1662 = vrot.lane.b32.xlu0 %v9179_v63, %s8557_s10  ;;  %v9193_v2 = vcombine.low %v1044_v46, %v1045_v30 }
  0x9e   : > { %v7001_v27 = vcombine.low %v1023_v4, %v8351_v15  ;;  %v8132_v59 = vld [vmem:[%s11404_s1 + $0xc8] sm:$0xff]   ;;  %v1400_v17 = vsel %vm1232_vm9, %v1395_v39, %v1399_v44  ;;  %v902_v37 = vsel %vm8642_vm3, %v730_v24, %v901_v55  ;;  %v8073_v11 = vld [vmem:[#allocation2 + $0xb0] ss:$0 sps:$4 sm:$0x11]   ;;  %v2168_v4 = vor.u32 %v2167_v48, %v2163_v16  ;;  %v8352_v15 = vld [vmem:[#allocation2 + $0x1c] sm:$0xf] }
  0x9f   : > { %1451 = vrot.lane.b32.xlu1 %v1400_v17, %s8557_s10  ;;  %903 = vst [vmem:[#allocation2 + $0xbc] sm:$0x1] %v902_v37  ;;  %v2172_v41 = vrot.slane %v2170_v33, 1  ;;  %v2182_v13 = vshll.u32 %v8081_v28, 16  ;;  %v7002_v1 = vcombine.low %v1024_v58, %v8352_v15  ;;  %7532 = vmatprep.subr.bf16.mxu1 %v8132_v59  ;;  %v1005_v44 = vld [vmem:[#allocation2 + $0xc0] sm:$0xf]  ;;  %v9198_v24 = vcombine.low %v1046_v50, %v1047_v25 }
  0xa0   : > { %v8084_v57 = vld [vmem:[#allocation2 + $0x38] ss:$0 sps:$4 sm:$0x11]   ;;  %v1416_v39 = vshll.u32 %v9181_v45, 16  ;;  %v2175_v63 = vshrl.u32 %v9171_v23, 16  ;;  %v2179_v10 = vrot.slane %v2177_v61, 1  ;;  %v1407_v46 = vor.u32 %v1406_v56, %v1402_v36 }
  0xa1   : > { %v1409_v30 = vshll.u32 %v8073_v11, 16  ;;  %v9200_v55 = vld [vmem:[#allocation2 + $0xc4] sm:$0xf]  ;;  %v9202_v17 = vrot.slane %v7001_v27, 1  ;;  %v8134_v58 = vld [vmem:[%s11404_s1 + $0x88] sm:$0xff]   ;;  %v1414_v61 = vshrl.u32 %v9181_v45, 16  ;;  %v2173_v27 = vsel %vm1232_vm9, %v2168_v4, %v2172_v41 }
  0xa2   : > { %v1025_v16 = vld [vmem:[#allocation2 + $0x24] sm:$0xe]  ;;  %v9209_v48 = vcombine.low %v1005_v44, %v9200_v55  ;;  %v2189_v33 = vshll.u32 %v9193_v2, 16  ;;  %v8089_v50 = vld [vmem:[#allocation2 + $0x44] ss:$0 sps:$4 sm:$0x11]   ;;  %7533 = vmatpush3.bf16.msra.mxu1 %v8134_v58  ;;  %v2180_v15 = vor.u32 %v2179_v10, %v2175_v63 }
  0xa3   : > { %v1026_v25 = vld [vmem:[#allocation2 + $0x30] sm:$0xe]  ;;  %v1411_v36 = vrot.slane %v1409_v30, 1  ;;  %vm1505_vm10 = vcmask 1046528   ;;  %v2184_v56 = vrot.slane %v2182_v13, 1  ;;  %v1418_v11 = vrot.slane %v1416_v39, 1 }
  0xa4   : > { %11515 = vst [vmem:[#allocation18_spill] sm:$0xff] %v9209_v48  ;;  %v1048_v59 = vld [vmem:[#allocation2 + $0x48] sm:$0xf]  ;;  %v1049_v37 = vld [vmem:[#allocation2 + $0x4c] sm:$0xf]  ;;  %1664 = vrot.lane.b32.xlu0 %v9209_v48, %s8557_s10  ;;  %v9218_v28 = vrot.slane %v7002_v1, 1 }
  0xa5   : > { %v9216_v44 = vld [vmem:[#allocation2 + $0x20] ss:$0 sps:$4 sm:$0x11]   ;;  %v2187_v52 = vshrl.u32 %v9193_v2, 16  ;;  %v1412_v30 = vsel %vm1232_vm9, %v1407_v46, %v1411_v36  ;;  %v2191_v53 = vrot.slane %v2189_v33, 1  ;;  %v2194_v4 = vshll.u32 %v8084_v57, 16 }
  0xa6   : > { %v9222_v41 = vld [vmem:[#allocation2 + $0x2c] ss:$0 sps:$4 sm:$0x11]   ;;  %v2201_v13 = vshll.u32 %v9198_v24, 16  ;;  %1453 = vrot.lane.b32.xlu1 %v1412_v30, %s8557_s10  ;;  %v8353_v48 = vld [vmem:[#allocation2 + $0x28] sm:$0xf]  ;;  %v9227_v63 = vcombine.low %v1048_v59, %v1049_v37  ;;  %v1419_v46 = vor.u32 %v1418_v11, %v1414_v61 }
  0xa7   : > { %v8076_v58 = vld [vmem:[#allocation2 + $0xbc] ss:$0 sps:$4 sm:$0x11]   ;;  %v7003_v39 = vcombine.low %v1025_v16, %v8353_v48  ;;  %v2199_v10 = vshrl.u32 %v9198_v24, 16  ;;  %v8354_v1 = vld [vmem:[#allocation2 + $0x34] sm:$0xf]  ;;  %v2185_v48 = vsel %vm1232_vm9, %v2180_v15, %v2184_v56  ;;  %v2192_v59 = vor.u32 %v2191_v53, %v2187_v52 }
  0xa8   : > { %11516 = vst [vmem:[#allocation19_spill] sm:$0xff] %v9227_v63  ;;  %v7004_v8 = vcombine.low %v1026_v25, %v8354_v1  ;;  %v8096_v31 = vld [vmem:[#allocation2 + $0x50] ss:$0 sps:$4 sm:$0x11]   ;;  %v1421_v33 = vshll.u32 %v8076_v58, 16  ;;  %2354 = vrot.lane.b32.xlu0 %v2173_v27, %s8557_s10  ;;  %v2203_v36 = vrot.slane %v2201_v13, 1 }
  0xa9   : > { %v8135_v57 = vld [vmem:[%s11404_s1 + $0xd0] sm:$0xff]   ;;  %v2206_v30 = vshll.u32 %v8089_v50, 16  ;;  %v2196_v37 = vrot.slane %v2194_v4, 1  ;;  %v9237_v25 = vld [vmem:[#allocation2 + $0x38] ss:$0 sps:$4 sm:$0x11]  }
  0xaa   : > { %v8136_v16 = vld [vmem:[%s11404_s1 + $0x90] sm:$0xff]   ;;  %v2213_v1 = vshll.u32 %v9227_v63, 16  ;;  %7534 = vmatprep.subr.bf16.mxu1 %v8135_v57  ;;  %v8139_v61 = vld [vmem:[%s11404_s1 + $0xd8] sm:$0xff]   ;;  %v1423_v27 = vrot.slane %v1421_v33, 1  ;;  %v1958_v50 = vrot.slane %v9216_v44, 1  ;;  %v1960_v11 = vrot.slane %v7003_v39, 1 }
  0xab   : > { %v9244_v13 = vld [vmem:[#allocation2 + $0x44] ss:$0 sps:$4 sm:$0x11]   ;;  %7535 = vmatpush3.bf16.msra.mxu1 %v8136_v16  ;;  %v1961_v56 = vrot.slane %v9222_v41, 1  ;;  %v1963_v53 = vrot.slane %v7004_v8, 1  ;;  %v2204_v15 = vor.u32 %v2203_v36, %v2199_v10  ;;  %v2208_v4 = vrot.slane %v2206_v30, 1 }
  0xac   : > { %7536 = vmatprep.subr.bf16.mxu1 %v8139_v61  ;;  %v1424_v52 = vsel %vm1232_vm9, %v1419_v46, %v1423_v27  ;;  %2356 = vrot.lane.b32.xlu0 %v2185_v48, %s8557_s10  ;;  %v2218_v58 = vshll.u32 %v8096_v31, 16  ;;  %v2197_v57 = vsel %vm1232_vm9, %v2192_v59, %v2196_v37  ;;  %v2211_v44 = vshrl.u32 %v9227_v63, 16  ;;  %v1027_v41 = vld [vmem:[#allocation2 + $0x3c] sm:$0xe]  ;;  %v1050_v16 = vld [vmem:[#allocation2 + $0x54] sm:$0xf] }
  0xad   : > { %1455 = vrot.lane.b32.xlu1 %v1424_v52, %s8557_s10  ;;  %v2215_v39 = vrot.slane %v2213_v1, 1  ;;  %v11517_v33 = vrot.slane %v9176_v19, 1  ;;  %v1051_v46 = vld [vmem:[#allocation2 + $0x58] sm:$0xf]  ;;  %v1964_v48 = vrot.slane %v9237_v25, 1  ;;  %v2209_v36 = vsel %vm1232_vm9, %v2204_v15, %v2208_v4  ;;  %s8496_s17 = sshll.u32 %s8558_s16, 4  ;;  %s8497_s17 = int_to_ptr.vmem [resolvable:$false] %s8496_s17 }
  0xae   : > { %v9257_v10 = vcombine.low %v1050_v16, %v1051_v46  ;;  %v8103_v31 = vld [vmem:[#allocation2 + $0x5c] ss:$0 sps:$4 sm:$0x11]   ;;  %v2220_v30 = vrot.slane %v2218_v58, 1  ;;  %v1967_v59 = vrot.slane %v9244_v13, 1  ;;  %v1959_v25 = vsel %vm1505_vm10, %v9218_v28, %v1958_v50  ;;  %v1635_v16 = vpop.permute.xlu0 %1634  ;;  %s8498_s23 = scalar_lea.vmem %s8497_s17, 8192  ;;  %p8499_p0 = scmp.lt.s32.totalorder %s11350_s12, %s8497_s17 }
  0xaf   : > { %v1956_v8 = vsel %vm1505_vm10, %v9202_v17, %v11517_v33  ;;  %v2216_v19 = vor.u32 %v2215_v39, %v2211_v44  ;;  %v2230_v1 = vshll.u32 %v8103_v31, 16  ;;  %v8355_v61 = vld [vmem:[#allocation2 + $0x40] sm:$0xf]  ;;  %v1028_v33 = vld [vmem:[#allocation2 + $0x48] sm:$0xe]  ;;  %v1962_v39 = vsel %vm1505_vm10, %v1960_v11, %v1961_v56 }
  0xb0   : > { %11518 = vst [vmem:[#allocation20_spill] sm:$0xff] %v9257_v10  ;;  %2358 = vrot.lane.b32.xlu0 %v2197_v57, %s8557_s10  ;;  %v2223_v17 = vshrl.u32 %v9257_v10, 16  ;;  %v2225_v37 = vshll.u32 %v9257_v10, 16  ;;  %v7005_v27 = vcombine.low %v1027_v41, %v8355_v61  ;;  %v9268_v15 = vld [vmem:[#allocation2 + $0x50] ss:$0 sps:$4 sm:$0x11]   ;;  %v1965_v56 = vsel %vm1505_vm10, %v1963_v53, %v1964_v48 }
  0xb1   : > { %2002 = vrot.lane.b32.xlu1 %v1956_v8, %s8557_s10  ;;  %v2232_v57 = vrot.slane %v2230_v1, 1  ;;  %v1052_v13 = vld [vmem:[#allocation2 + $0x60] sm:$0xf]  ;;  %v2221_v4 = vsel %vm1232_vm9, %v2216_v19, %v2220_v30  ;;  %v1053_v44 = vld [vmem:[#allocation2 + $0x64] sm:$0xf]  ;;  %vm2482_vm11 = vcmask 523264  }
  0xb2   : > { %v2227_v52 = vrot.slane %v2225_v37, 1  ;;  %v8356_v8 = vld [vmem:[#allocation2 + $0x4c] sm:$0xf]  ;;  %v9273_v50 = vcombine.low %v1052_v13, %v1053_v44  ;;  %v8110_v41 = vld [vmem:[#allocation2 + $0x68] ss:$0 sps:$4 sm:$0x11]   ;;  %v1426_v53 = vpop.permute.xlu0 %1425 }
  0xb3   : > { %v7006_v28 = vcombine.low %v1028_v33, %v8356_v8  ;;  %v8357_v46 = vld [vmem:[#allocation2 + $0x8] ss:$0 sps:$4 sm:$0x11]   ;;  %v2242_v19 = vshll.u32 %v8110_v41, 16  ;;  %v959_v61 = vld [vmem:[#allocation2] sm:$0xe] }
  0xb4   : > { %2360 = vrot.lane.b32.xlu0 %v2209_v36, %s8557_s10  ;;  %v2228_v58 = vor.u32 %v2227_v52, %v2223_v17  ;;  %11519 = vst [vmem:[#allocation21_spill] sm:$0xff] %v9273_v50  ;;  %v1507_v31 = vrot.slane %v8357_v46, 1  ;;  %v1966_v36 = vrot.slane %v7005_v27, 1  ;;  %v2235_v37 = vshrl.u32 %v9273_v50, 16  ;;  %v1029_v17 = vld [vmem:[#allocation2 + $0x54] sm:$0xe] }
  0xb5   : > { %2004 = vrot.lane.b32.xlu1 %v1959_v25, %s8557_s10  ;;  %v2237_v30 = vshll.u32 %v9273_v50, 16  ;;  %v9278_v1 = vld [vmem:[#allocation2 + $0x14] ss:$0 sps:$4 sm:$0x11]   ;;  %v1969_v27 = vrot.slane %v7006_v28, 1  ;;  %v1970_v52 = vrot.slane %v9268_v15, 1 }
  0xb6   : > { %v2233_v25 = vsel %vm1232_vm9, %v2228_v58, %v2232_v57  ;;  %v2244_v13 = vrot.slane %v2242_v19, 1  ;;  %v8359_v44 = vld [vmem:[#allocation2 + $0x58] sm:$0xf]  ;;  %v8360_v41 = vld [vmem:[#allocation2 + $0x4] sm:$0xf]  ;;  %v1968_v28 = vsel %vm1505_vm10, %v1966_v36, %v1967_v59 }
  0xb7   : > { %v2239_v33 = vrot.slane %v2237_v30, 1  ;;  %v7007_v8 = vcombine.low %v1029_v17, %v8359_v44  ;;  %v6953_v46 = vcombine.low %v959_v61, %v8360_v41  ;;  %v1054_v50 = vld [vmem:[#allocation2 + $0x6c] sm:$0xf]  ;;  %v1055_v11 = vld [vmem:[#allocation2 + $0x70] sm:$0xf]  ;;  %v8141_v59 = vld [vmem:[%s11404_s1 + $0x98] sm:$0xff]  }
  0xb8   : > { %2362 = vrot.lane.b32.xlu0 %v2221_v4, %s8557_s10  ;;  %v9285_v4 = vld [vmem:[#allocation2 + $0x5c] ss:$0 sps:$4 sm:$0x11]   ;;  %v9288_v48 = vcombine.low %v1054_v50, %v1055_v11  ;;  %v8116_v57 = vld [vmem:[#allocation2 + $0x74] ss:$0 sps:$4 sm:$0x11]   ;;  %7537 = vmatpush3.bf16.msra.mxu1 %v8141_v59 }
  0xb9   : > { %2006 = vrot.lane.b32.xlu1 %v1962_v39, %s8557_s10  ;;  %v2240_v39 = vor.u32 %v2239_v33, %v2235_v37  ;;  %v9290_v58 = vld [vmem:[#allocation2 + $0x20] ss:$0 sps:$4 sm:$0x11]   ;;  %v1506_v30 = vrot.slane %v6953_v46, 1  ;;  %v1030_v19 = vld [vmem:[#allocation2 + $0x60] sm:$0xe] }
  0xba   : > { %11520 = vst [vmem:[#allocation22_spill] sm:$0xff] %v9288_v48  ;;  %v9295_v17 = vld [vmem:[#allocation2 + $0x68] ss:$0 sps:$4 sm:$0x11]   ;;  %v2247_v37 = vshrl.u32 %v9288_v48, 16  ;;  %v2249_v50 = vshll.u32 %v9288_v48, 16  ;;  %v1637_v48 = vpop.permute.xlu1 %1636 }
  0xbb   : > { %v2245_v61 = vsel %vm1232_vm9, %v2240_v39, %v2244_v13  ;;  %v2254_v11 = vshll.u32 %v8116_v57, 16  ;;  %v9303_v33 = vld [vmem:[%s11404_s1 + $0x108] sm:$0xff]   ;;  %v1972_v36 = vrot.slane %v7007_v8, 1  ;;  %v2484_v13 = vsel %vm2482_vm11, %v8732_v29, %v1426_v53  ;;  %v8362_v44 = vld [vmem:[#allocation2 + $0x10] sm:$0xf]  ;;  %v8142_v57 = vld [vmem:[%s11404_s1 + $0xe0] sm:$0xff]  }
  0xbc   : > { %2364 = vrot.lane.b32.xlu0 %v2233_v25, %s8557_s10  ;;  %v960_v25 = vld [vmem:[#allocation2 + $0xc] sm:$0xe]  ;;  %v1056_v46 = vld [vmem:[#allocation2 + $0x78] sm:$0xf]  ;;  %v1057_v39 = vld [vmem:[#allocation2 + $0x7c] sm:$0xf]  ;;  %7538 = vmatprep.subr.bf16.mxu1 %v8142_v57 }
  0xbd   : > { %2008 = vrot.lane.b32.xlu1 %v1965_v56, %s8557_s10  ;;  %v1508_v56 = vsel %vm1505_vm10, %v1506_v30, %v1507_v31  ;;  %v6954_v41 = vcombine.low %v960_v25, %v8362_v44  ;;  %v2251_v10 = vrot.slane %v2249_v50, 1  ;;  %v2256_v8 = vrot.slane %v2254_v11, 1  ;;  %v8363_v31 = vld [vmem:[#allocation2 + $0x64] sm:$0xf]  ;;  %v8366_v57 = vld [vmem:[#allocation2 + $0x1c] sm:$0xf] }
  0xbe   : > { %v2533_v15 = vsel %vm2482_vm11, %v1508_v56, %v1635_v16  ;;  %v9316_v63 = vcombine.low %v1056_v46, %v1057_v39  ;;  %v1973_v29 = vrot.slane %v9285_v4, 1  ;;  %v7008_v53 = vcombine.low %v1030_v19, %v8363_v31  ;;  %v8119_v25 = vld [vmem:[#allocation2 + $0x80] ss:$0 sps:$4 sm:$0x11]   ;;  %v961_v56 = vld [vmem:[#allocation2 + $0x18] sm:$0xe] }
  0xbf   : > { %3082 = vmatprep.mubr.bf16.mxu0 %v2533_v15  ;;  %v1509_v30 = vrot.slane %v6954_v41, 1  ;;  %v9320_v44 = vld [vmem:[#allocation2 + $0x2c] ss:$0 sps:$4 sm:$0x11]   ;;  %v1971_v16 = vsel %vm1505_vm10, %v1969_v27, %v1970_v52  ;;  %v2252_v50 = vor.u32 %v2251_v10, %v2247_v37  ;;  %v1976_v4 = vrot.slane %v9295_v17, 1 }
  0xc0   : > { %2366 = vrot.lane.b32.xlu0 %v2245_v61, %s8557_s10  ;;  %v1516_v61 = vrot.slane %v9320_v44, 1  ;;  %3083 = vmatmul.mubr.bf16.vlgmr.msra.gmra.mrb[0].mxu0 %v2484_v13  ;;  %v2259_v11 = vshrl.u32 %v9316_v63, 16  ;;  %v2261_v59 = vshll.u32 %v9316_v63, 16  ;;  %v11521_v15 = vrot.slane %v9278_v1, 1  ;;  %v8365_v46 = vld [vmem:[#allocation2 + $0x70] sm:$0xf] }
  0xc1   : > { %2010 = vrot.lane.b32.xlu1 %v1968_v28, %s8557_s10  ;;  %v1031_v28 = vld [vmem:[#allocation2 + $0x6c] sm:$0xe]  ;;  %7907 = vmatpush3.bf16.msra.mxu0 %v9110_v18  ;;  %v2266_v41 = vshll.u32 %v8119_v25, 16  ;;  %v1058_v52 = vld [vmem:[#allocation2 + $0x84] sm:$0xf]  ;;  %v2257_v10 = vsel %vm1232_vm9, %v2252_v50, %v2256_v8  ;;  %v6955_v31 = vcombine.low %v961_v56, %v8366_v57  ;;  %v1975_v17 = vrot.slane %v7008_v53, 1 }
  0xc2   : > { %v1511_v19 = vsel %vm1505_vm10, %v1509_v30, %v11521_v15  ;;  %v7009_v27 = vcombine.low %v1031_v28, %v8365_v46  ;;  %v2263_v13 = vrot.slane %v2261_v59, 1  ;;  %v9333_v39 = vld [vmem:[#allocation2 + $0x74] ss:$0 sps:$4 sm:$0x11]   ;;  %v1059_v18 = vld [vmem:[#allocation2 + $0x88] sm:$0xf]  ;;  %7908 = vmatprep.subr.bf16.mxu0 %v9303_v33  ;;  %v1974_v59 = vsel %vm1505_vm10, %v1972_v36, %v1973_v29  ;;  %v1428_v28 = vpop.permute.xlu1 %1427  ;;  %v1639_v36 = vpop.permute.xlu0 %1638 }
  0xc3   : > { %v2537_v37 = vsel %vm2482_vm11, %v1511_v19, %v1637_v48  ;;  %v8143_v1 = vld [vmem:[%s11404_s1 + $0xa0] sm:$0xff]   ;;  %v2268_v8 = vrot.slane %v2266_v41, 1  ;;  %v9341_v30 = vcombine.low %v1058_v52, %v1059_v18  ;;  %v8122_v48 = vld [vmem:[#allocation2 + $0x8c] ss:$0 sps:$4 sm:$0x11]   ;;  %v1512_v19 = vrot.slane %v6955_v31, 1 }
  0xc4   : > { %2368 = vrot.lane.b32.xlu0 %v2257_v10, %s8557_s10  ;;  %v9343_v25 = vld [vmem:[#allocation2 + $0x38] ss:$0 sps:$4 sm:$0x11]   ;;  %3090 = vmatprep.mubr.bf16.mxu0 %v2537_v37  ;;  %v2264_v56 = vor.u32 %v2263_v13, %v2259_v11  ;;  %v1978_v15 = vrot.slane %v7009_v27, 1  ;;  %v1032_v46 = vld [vmem:[#allocation2 + $0x78] sm:$0xe]  ;;  %v2487_v53 = vsel %vm2482_vm11, %v8754_v54, %v1428_v28 }
  0xc5   : > { %2012 = vrot.lane.b32.xlu1 %v1971_v16, %s8557_s10  ;;  %v1519_v50 = vrot.slane %v9343_v25, 1  ;;  %7539 = vmatpush3.bf16.msra.mxu1 %v8143_v1  ;;  %v2271_v16 = vshrl.u32 %v9341_v30, 16  ;;  %v2273_v41 = vshll.u32 %v9341_v30, 16  ;;  %v2278_v52 = vshll.u32 %v8122_v48, 16  ;;  %v962_v37 = vld [vmem:[#allocation2 + $0x24] sm:$0xe] }
  0xc6   : > { %v9351_v10 = vld [vmem:[#allocation2 + $0x80] ss:$0 sps:$4 sm:$0x11]   ;;  %7909 = vmatpush3.bf16.msra.mxu0 %v9303_v33  ;;  %v2269_v29 = vsel %vm1232_vm9, %v2264_v56, %v2268_v8  ;;  %v11522_v11 = vrot.slane %v9290_v58, 1  ;;  %v1060_v13 = vld [vmem:[#allocation2 + $0x90] sm:$0xf]  ;;  %v1977_v58 = vsel %vm1505_vm10, %v1975_v17, %v1976_v4 }
  0xc7   : > { %v1061_v57 = vld [vmem:[#allocation2 + $0x94] sm:$0xf]  ;;  %v2275_v31 = vrot.slane %v2273_v41, 1  ;;  %v2280_v18 = vrot.slane %v2278_v52, 1  ;;  %v8368_v1 = vld [vmem:[#allocation2 + $0x7c] sm:$0xf] }
  0xc8   : > { %v1514_v27 = vsel %vm1505_vm10, %v1512_v19, %v11522_v11  ;;  %2370 = vrot.lane.b32.xlu0 %v2269_v29, %s8557_s10  ;;  %v7010_v33 = vcombine.low %v1032_v46, %v8368_v1  ;;  %v8146_v8 = vld [vmem:[%s11404_s1 + $0xe8] sm:$0xff]   ;;  %3091 = vmatmul.mubr.bf16.gmra.mrb[4].mxu0 %v2487_v53  ;;  %v1979_v48 = vrot.slane %v9333_v39, 1  ;;  %v8125_v19 = vld [vmem:[#allocation2 + $0x98] ss:$0 sps:$4 sm:$0x11]   ;;  %v1982_v41 = vrot.slane %v9351_v10, 1 }
  0xc9   : > { %2014 = vrot.lane.b32.xlu1 %v1974_v59, %s8557_s10  ;;  %v2541_v54 = vsel %vm2482_vm11, %v1514_v27, %v1639_v36  ;;  %v8369_v28 = vld [vmem:[#allocation2 + $0x28] sm:$0xf]  ;;  %v9366_v59 = vcombine.low %v1060_v13, %v1061_v57  ;;  %v2276_v36 = vor.u32 %v2275_v31, %v2271_v16  ;;  %v1033_v52 = vld [vmem:[#allocation2 + $0x84] sm:$0xe]  ;;  %7540 = vmatprep.subr.bf16.mxu1 %v8146_v8  ;;  %v963_v17 = vld [vmem:[#allocation2 + $0x30] sm:$0xe]  ;;  %v1430_v13 = vpop.permute.xlu1 %1429  ;;  %v1641_v57 = vpop.permute.xlu0 %1640 }
  0xca   : > { %v6956_v56 = vcombine.low %v962_v37, %v8369_v28  ;;  %3098 = vmatprep.mubr.bf16.mxu0 %v2541_v54  ;;  %v8126_v46 = vld [vmem:[#allocation2 + $0x8c] ss:$0 sps:$4 sm:$0x11]   ;;  %v1981_v16 = vrot.slane %v7010_v33, 1  ;;  %v2290_v27 = vshll.u32 %v8125_v19, 16  ;;  %v1980_v54 = vsel %vm1505_vm10, %v1978_v15, %v1979_v48 }
  0xcb   : > { %v2283_v11 = vshrl.u32 %v9366_v59, 16  ;;  %v2285_v4 = vshll.u32 %v9366_v59, 16  ;;  %v8148_v39 = vld [vmem:[%s11404_s1 + $0xa8] sm:$0xff]   ;;  %v2281_v53 = vsel %vm1232_vm9, %v2276_v36, %v2280_v18  ;;  %v8371_v8 = vld [vmem:[#allocation2 + $0x34] sm:$0xf]  ;;  %v2490_v33 = vsel %vm2482_vm11, %v8763_v9, %v1430_v13 }
  0xcc   : > { %v1515_v29 = vrot.slane %v6956_v56, 1  ;;  %v8370_v10 = vld [vmem:[#allocation2 + $0x88] sm:$0xf]  ;;  %2372 = vrot.lane.b32.xlu0 %v2281_v53, %s8557_s10  ;;  %v6957_v28 = vcombine.low %v963_v17, %v8371_v8  ;;  %7541 = vmatpush3.bf16.msra.mxu1 %v8148_v39  ;;  %v8149_v18 = vld [vmem:[%s11404_s1 + $0xf0] sm:$0xff]   ;;  %v1985_v56 = vrot.slane %v8126_v46, 1  ;;  %v1983_v9 = vsel %vm1505_vm10, %v1981_v16, %v1982_v41  ;;  %v8155_v41 = vld [vmem:[%s11404_s1 + $0xb8] sm:$0xff]  }
  0xcd   : > { %2016 = vrot.lane.b32.xlu1 %v1977_v58, %s8557_s10  ;;  %v7011_v37 = vcombine.low %v1033_v52, %v8370_v10  ;;  %v2287_v1 = vrot.slane %v2285_v4, 1  ;;  %v2292_v58 = vrot.slane %v2290_v27, 1  ;;  %v1062_v36 = vld [vmem:[#allocation2 + $0x9c] sm:$0xf]  ;;  %7542 = vmatprep.subr.bf16.mxu1 %v8149_v18  ;;  %v8150_v4 = vld [vmem:[%s11404_s1 + $0xb0] sm:$0xff]   ;;  %v1643_v10 = vpop.permute.xlu0 %1642  ;;  %v1432_v8 = vpop.permute.xlu1 %1431 }
  0xce   : > { %v1517_v31 = vsel %vm1505_vm10, %v1515_v29, %v1516_v61  ;;  %v1518_v44 = vrot.slane %v6957_v28, 1  ;;  %v1063_v61 = vld [vmem:[#allocation2 + $0xa0] sm:$0xf]  ;;  %v8131_v29 = vld [vmem:[#allocation2 + $0xa4] ss:$0 sps:$4 sm:$0x11]  }
  0xcf   : > { %v2545_v15 = vsel %vm2482_vm11, %v1517_v31, %v1641_v57  ;;  %v2288_v48 = vor.u32 %v2287_v1, %v2283_v11  ;;  %v1984_v19 = vrot.slane %v7011_v37, 1  ;;  %v9388_v52 = vcombine.low %v1062_v36, %v1063_v61  ;;  %v1034_v53 = vld [vmem:[#allocation2 + $0x90] sm:$0xe]  ;;  %v8153_v27 = vld [vmem:[%s11404_s1 + $0xf8] sm:$0xff]   ;;  %v8372_v13 = vld [vmem:[#allocation2 + $0x94] sm:$0xf] }
  0xd0   : > { %3099 = vmatmul.mubr.bf16.gmra.mrb[8].mxu0 %v2490_v33  ;;  %v2302_v39 = vshll.u32 %v8131_v29, 16  ;;  %v8133_v37 = vld [vmem:[#allocation2 + $0x98] ss:$0 sps:$4 sm:$0x11]   ;;  %v7012_v57 = vcombine.low %v1034_v53, %v8372_v13  ;;  %7543 = vmatpush3.bf16.msra.mxu1 %v8150_v4  ;;  %v1520_v16 = vsel %vm1505_vm10, %v1518_v44, %v1519_v50  ;;  %v964_v1 = vld [vmem:[#allocation2 + $0x3c] sm:$0xe] }
  0xd1   : > { %2018 = vrot.lane.b32.xlu1 %v1980_v54, %s8557_s10  ;;  %v2293_v46 = vsel %vm1232_vm9, %v2288_v48, %v2292_v58  ;;  %3106 = vmatprep.mubr.bf16.mxu0 %v2545_v15  ;;  %v2295_v11 = vshrl.u32 %v9388_v52, 16  ;;  %v2297_v17 = vshll.u32 %v9388_v52, 16  ;;  %v1986_v28 = vsel %vm1505_vm10, %v1984_v19, %v1985_v56  ;;  %v8373_v58 = vld [vmem:[#allocation2 + $0x40] sm:$0xf]  ;;  %v1064_v61 = vld [vmem:[#allocation2 + $0xa8] sm:$0xf] }
  0xd2   : > { %2374 = vrot.lane.b32.xlu0 %v2293_v46, %s8557_s10  ;;  %v2304_v31 = vrot.slane %v2302_v39, 1  ;;  %7544 = vmatprep.subr.bf16.mxu1 %v8153_v27  ;;  %v1987_v18 = vrot.slane %v7012_v57, 1  ;;  %v1988_v33 = vrot.slane %v8133_v37, 1  ;;  %v6958_v15 = vcombine.low %v964_v1, %v8373_v58  ;;  %v8374_v50 = vld [vmem:[#allocation2 + $0x44] ss:$0 sps:$4 sm:$0x11]   ;;  %v1645_v46 = vpop.permute.xlu0 %1644 }
  0xd3   : > { %v2299_v54 = vrot.slane %v2297_v17, 1  ;;  %v2493_v48 = vsel %vm2482_vm11, %v8776_v32, %v1432_v8  ;;  %v2549_v25 = vsel %vm2482_vm11, %v1520_v16, %v1643_v10  ;;  %v1522_v44 = vrot.slane %v8374_v50, 1  ;;  %v1065_v4 = vld [vmem:[#allocation2 + $0xac] sm:$0xf]  ;;  %v8375_v37 = vld [vmem:[#allocation2 + $0xa0] sm:$0xf] }
  0xd4   : > { %v1521_v29 = vrot.slane %v6958_v15, 1  ;;  %7545 = vmatpush3.bf16.msra.mxu1 %v8155_v41  ;;  %v9414_v19 = vcombine.low %v1064_v61, %v1065_v4  ;;  %v1989_v32 = vsel %vm1505_vm10, %v1987_v18, %v1988_v33  ;;  %v8140_v27 = vld [vmem:[#allocation2 + $0xa4] ss:$0 sps:$4 sm:$0x11]   ;;  %v965_v57 = vld [vmem:[#allocation2 + $0x48] sm:$0xe]  ;;  %v1434_v41 = vpop.permute.xlu1 %1433 }
  0xd5   : > { %2020 = vrot.lane.b32.xlu1 %v1983_v9, %s8557_s10  ;;  %v2300_v36 = vor.u32 %v2299_v54, %v2295_v11  ;;  %v8138_v9 = vld [vmem:[#allocation2 + $0xb0] ss:$0 sps:$4 sm:$0x11]   ;;  %v1035_v11 = vld [vmem:[#allocation2 + $0x9c] sm:$0xe]  ;;  %v2496_v33 = vsel %vm2482_vm11, %v8813_v21, %v1434_v41 }
  0xd6   : > { %v2307_v17 = vshrl.u32 %v9414_v19, 16  ;;  %v2309_v39 = vshll.u32 %v9414_v19, 16  ;;  %v2314_v53 = vshll.u32 %v8138_v9, 16  ;;  %v1523_v10 = vsel %vm1505_vm10, %v1521_v29, %v1522_v44  ;;  %v8376_v1 = vld [vmem:[#allocation2 + $0x4c] sm:$0xf]  ;;  %v8161_v9 = vld [vmem:[%s11404_s1 + $0x118] sm:$0xff]  }
  0xd7   : > { %v2305_v56 = vsel %vm1232_vm9, %v2300_v36, %v2304_v31  ;;  %v7013_v13 = vcombine.low %v1035_v11, %v8375_v37  ;;  %v1991_v31 = vrot.slane %v8140_v27, 1  ;;  %v6959_v8 = vcombine.low %v965_v57, %v8376_v1  ;;  %v1066_v61 = vld [vmem:[#allocation2 + $0xb4] sm:$0xf]  ;;  %v9429_v44 = vld [vmem:[#allocation2 + $0xb8] sm:$0xf] }
  0xd8   : > { %3107 = vmatmul.mubr.bf16.gmra.mrb[12].mxu0 %v2493_v48  ;;  %2376 = vrot.lane.b32.xlu0 %v2305_v56, %s8557_s10  ;;  %v2311_v16 = vrot.slane %v2309_v39, 1  ;;  %v2316_v54 = vrot.slane %v2314_v53, 1  ;;  %v8377_v48 = vld [vmem:[#allocation2 + $0x50] ss:$0 sps:$4 sm:$0x11]   ;;  %v2553_v29 = vsel %vm2482_vm11, %v1523_v10, %v1645_v46  ;;  %v9434_v21 = vcombine.low %v1066_v61, %v9429_v44 }
  0xd9   : > { %2022 = vrot.lane.b32.xlu1 %v1986_v28, %s8557_s10  ;;  %3114 = vmatprep.mubr.bf16.mxu0 %v2549_v25  ;;  %v8156_v28 = vld [vmem:[%s11404_s1 + $0x110] sm:$0xff]   ;;  %v1990_v18 = vrot.slane %v7013_v13, 1  ;;  %v1524_v15 = vrot.slane %v6959_v8, 1  ;;  %v1525_v36 = vrot.slane %v8377_v48, 1  ;;  %v1647_v25 = vpop.permute.xlu0 %1646  ;;  %v1036_v46 = vld [vmem:[#allocation2 + $0xa8] sm:$0xe] }
  0xda   : > { %v2312_v58 = vor.u32 %v2311_v16, %v2307_v17  ;;  %7910 = vmatprep.subr.bf16.mxu0 %v8156_v28  ;;  %v9436_v56 = vld [vmem:[#allocation2 + $0xbc] ss:$0 sps:$4 sm:$0x11]   ;;  %v2319_v11 = vshrl.u32 %v9434_v21, 16  ;;  %v2321_v17 = vshll.u32 %v9434_v21, 16  ;;  %v7014_v27 = vcombine.low %v1036_v46, %v9137_v22 }
  0xdb   : > { %v1992_v50 = vsel %vm1505_vm10, %v1990_v18, %v1991_v31  ;;  %7911 = vmatpush3.bf16.msra.mxu0 %v8156_v28  ;;  %v2326_v39 = vshll.u32 %v9436_v56, 16  ;;  %v8147_v53 = vld [vmem:[#allocation2 + $0xb0] ss:$0 sps:$4 sm:$0x11]   ;;  %v1526_v10 = vsel %vm1505_vm10, %v1524_v15, %v1525_v36  ;;  %v966_v37 = vld [vmem:[#allocation2 + $0x54] sm:$0xe] }
  0xdc   : > { %v2317_v4 = vsel %vm1232_vm9, %v2312_v58, %v2316_v54  ;;  %7912 = vmatprep.subr.bf16.mxu0 %v8161_v9  ;;  %v2323_v13 = vrot.slane %v2321_v17, 1  ;;  %v1993_v41 = vrot.slane %v7014_v27, 1  ;;  %v1994_v16 = vrot.slane %v8147_v53, 1  ;;  %v8378_v31 = vld [vmem:[#allocation2 + $0x58] sm:$0xf] }
  0xdd   : > { %2024 = vrot.lane.b32.xlu1 %v1989_v32, %s8557_s10  ;;  %2378 = vrot.lane.b32.xlu0 %v2317_v4, %s8557_s10  ;;  %v1436_v32 = vpop.permute.xlu1 %1435  ;;  %v2328_v57 = vrot.slane %v2326_v39, 1  ;;  %v1649_v54 = vpop.permute.xlu0 %1648  ;;  %v6960_v1 = vcombine.low %v966_v37, %v8378_v31  ;;  %v340_v8 = vld [vmem:[#allocation2 + $0xc8] sm:$0x1]  ;;  %v2557_v58 = vsel %vm2482_vm11, %v1526_v10, %v1647_v25  ;;  %v8379_v48 = vld [vmem:[#allocation2 + $0x5c] ss:$0 sps:$4 sm:$0x11]  }
  0xde   : > { %v2499_v28 = vsel %vm2482_vm11, %v8837_v62, %v1436_v32  ;;  %v2324_v18 = vor.u32 %v2323_v13, %v2319_v11  ;;  %v341_v22 = vsel %vm8659_vm5, 0, %v340_v8  ;;  %v1528_v36 = vrot.slane %v8379_v48, 1  ;;  %v1037_v4 = vld [vmem:[#allocation2 + $0xb4] sm:$0xe]  ;;  %v9456_v62 = vld [vmem:[#allocation2 + $0xc4] sm:$0xf] }
  0xdf   : > { %7913 = vmatpush3.bf16.msra.mxu0 %v8161_v9  ;;  %v1527_v15 = vrot.slane %v6960_v1, 1  ;;  %342 = vst [vmem:[#allocation2 + $0xc8] sm:$0x1] %v341_v22  ;;  %v9458_v9 = vld [vmem:[#allocation2 + $0xbc] ss:$0 sps:$4 sm:$0x11]   ;;  %v7015_v25 = vcombine.low %v1037_v4, %v9166_v51 }
  0xe0   : > { %3115 = vmatmul.mubr.bf16.gmra.mrb[16].mxu0 %v2496_v33  ;;  %v1995_v33 = vsel %vm1505_vm10, %v1993_v41, %v1994_v16  ;;  %v967_v46 = vld [vmem:[#allocation2 + $0x60] sm:$0xe]  ;;  %v747_v32 = vrot.slane %v9146_v42, 4  ;;  %v1997_v39 = vrot.slane %v9458_v9, 1  ;;  %v8380_v27 = vld [vmem:[#allocation2 + $0x64] sm:$0xf] }
  0xe1   : > { %2026 = vrot.lane.b32.xlu1 %v1992_v50, %s8557_s10  ;;  %3122 = vmatprep.mubr.bf16.mxu0 %v2553_v29  ;;  %v1438_v61 = vpop.permute.xlu1 %1437  ;;  %v2329_v29 = vsel %vm1232_vm9, %v2324_v18, %v2328_v57  ;;  %v1068_v50 = vld [vmem:[#allocation2 + $0xc0] sm:$0xf]  ;;  %v1651_v11 = vpop.permute.xlu0 %1650  ;;  %v1996_v17 = vrot.slane %v7015_v25, 1  ;;  %v1529_v53 = vsel %vm1505_vm10, %v1527_v15, %v1528_v36  ;;  %v6961_v10 = vcombine.low %v967_v46, %v8380_v27  ;;  %v287_v37 = vld [vmem:[#allocation2 + $0xcc] sm:$0x1] }
  0xe2   : > { %2380 = vrot.lane.b32.xlu0 %v2329_v29, %s8557_s10  ;;  %v343_v13 = vld [vmem:[#allocation2 + $0xd4] sm:$0x1]  ;;  %v9465_v57 = vcombine.low %v1068_v50, %v9456_v62  ;;  %v288_v51 = vsel %vm8642_vm3, 0, %v287_v37  ;;  %v2502_v42 = vsel %vm2482_vm11, %v8871_v49, %v1438_v61  ;;  %v2561_v8 = vsel %vm2482_vm11, %v1529_v53, %v1649_v54  ;;  %v968_v15 = vld [vmem:[#allocation2 + $0x6c] sm:$0xe] }
  0xe3   : > { %v1998_v41 = vsel %vm1505_vm10, %v1996_v17, %v1997_v39  ;;  %289 = vst [vmem:[#allocation2 + $0xcc] sm:$0x1] %v288_v51  ;;  %v344_v1 = vsel %vm8659_vm5, 0, %v343_v13  ;;  %v1530_v18 = vrot.slane %v6961_v10, 1  ;;  %v1038_v48 = vld [vmem:[#allocation2 + $0xc0] sm:$0xe] }
  0xe4   : > { %345 = vst [vmem:[#allocation2 + $0xd4] sm:$0x1] %v344_v1  ;;  %v2333_v49 = vshll.u32 %v9465_v57, 16  ;;  %v9479_v36 = vld [vmem:[#allocation2 + $0xd0] sm:$0xf]  ;;  %v2331_v50 = vshrl.u32 %v9465_v57, 16  ;;  %v7016_v46 = vcombine.low %v1038_v48, %v9200_v55 }
  0xe5   : > { %2028 = vrot.lane.b32.xlu1 %v1995_v33, %s8557_s10  ;;  %v1440_v16 = vpop.permute.xlu1 %1439  ;;  %v8381_v33 = vld [vmem:[#allocation2 + $0x68] ss:$0 sps:$4 sm:$0x11]   ;;  %v8382_v61 = vld [vmem:[#allocation2 + $0x70] sm:$0xf] }
  0xe6   : > { %v908_v31 = vld [vmem:[#allocation2 + $0xc8] sm:$0x1]  ;;  %v1531_v22 = vrot.slane %v8381_v33, 1  ;;  %v6962_v29 = vcombine.low %v968_v15, %v8382_v61  ;;  %v2335_v4 = vrot.slane %v2333_v49, 1  ;;  %v8384_v48 = vld [vmem:[#allocation2 + $0x7c] sm:$0xf] }
  0xe7   : > { %v8383_v37 = vld [vmem:[#allocation2 + $0x74] ss:$0 sps:$4 sm:$0x11]  }
  0xe8   : > { %3123 = vmatmul.mubr.bf16.gmra.mrb[20].mxu0 %v2499_v28  ;;  %v909_v28 = vsel %vm8642_vm3, %v747_v32, %v908_v31  ;;  %v1532_v54 = vsel %vm1505_vm10, %v1530_v18, %v1531_v22  ;;  %v2505_v32 = vsel %vm2482_vm11, %v8894_v26, %v1440_v16  ;;  %v1534_v13 = vrot.slane %v8383_v37, 1  ;;  %v8385_v37 = vld [vmem:[#allocation2 + $0x80] ss:$0 sps:$4 sm:$0x11]  }
  0xe9   : > { %3130 = vmatprep.mubr.bf16.mxu0 %v2557_v58  ;;  %2030 = vrot.lane.b32.xlu1 %v1998_v41, %s8557_s10  ;;  %910 = vst [vmem:[#allocation2 + $0xc8] sm:$0x1] %v909_v28  ;;  %v1653_v58 = vpop.permute.xlu0 %1652  ;;  %v1442_v7 = vpop.permute.xlu1 %1441  ;;  %v2565_v10 = vsel %vm2482_vm11, %v1532_v54, %v1651_v11  ;;  %v969_v41 = vld [vmem:[#allocation2 + $0x78] sm:$0xe]  ;;  %v1533_v26 = vrot.slane %v6962_v29, 1  ;;  %v2336_v16 = vor.u32 %v2335_v4, %v2331_v50 }
  0xea   : > { %v1070_v25 = vld [vmem:[#allocation2 + $0xcc] sm:$0xf]  ;;  %v6963_v54 = vcombine.low %v969_v41, %v8384_v48  ;;  %v2508_v4 = vsel %vm2482_vm11, %v8942_v14, %v1442_v7  ;;  %v970_v41 = vld [vmem:[#allocation2 + $0x84] sm:$0xe] }
  0xeb   : > { %v9487_v17 = vcombine.low %v1070_v25, %v9479_v36  ;;  %v9489_v39 = vld [vmem:[#allocation2 + $0xd4] ss:$0 sps:$4 sm:$0x11]   ;;  %v1535_v15 = vsel %vm1505_vm10, %v1533_v26, %v1534_v13  ;;  %v1537_v13 = vrot.slane %v8385_v37, 1  ;;  %v8390_v37 = vld [vmem:[#allocation2 + $0xa0] sm:$0xf] }
  0xed   : > { %v1655_v53 = vpop.permute.xlu0 %1654  ;;  %v2343_v51 = vshrl.u32 %v9487_v17, 16  ;;  %v2345_v55 = vshll.u32 %v9487_v17, 16 }
  0xee   : > { %v1444_v28 = vpop.permute.xlu1 %1443 }
  0xef   : > { %v2347_v11 = vrot.slane %v2345_v55, 1  ;;  %v2511_v26 = vsel %vm2482_vm11, %v8973_v6, %v1444_v28 }
  0xf0   : > { %3131 = vmatmul.mubr.bf16.gmra.mrb[24].mxu0 %v2502_v42  ;;  %v9491_v27 = vld [vmem:[#allocation2 + $0xc8] ss:$0 sps:$4 sm:$0x11]   ;;  %v2350_v42 = vshll.u32 %v9489_v39, 16 }
  0xf1   : > { %3138 = vmatprep.mubr.bf16.mxu0 %v2561_v8  ;;  %v2338_v31 = vshll.u32 %v9491_v27, 16  ;;  %v9498_v1 = vld [vmem:[#allocation2 + $0xc8] ss:$0 sps:$4 sm:$0x11]   ;;  %v1999_v8 = vrot.slane %v7016_v46, 1  ;;  %v2348_v49 = vor.u32 %v2347_v11, %v2343_v51  ;;  %v2569_v46 = vsel %vm2482_vm11, %v1535_v15, %v1653_v58 }
  0xf2   : > { %v2352_v33 = vrot.slane %v2350_v42, 1  ;;  %v2000_v22 = vrot.slane %v9498_v1, 1  ;;  %v8386_v42 = vld [vmem:[#allocation2 + $0x88] sm:$0xf] }
  0xf3   : > { %v2340_v18 = vrot.slane %v2338_v31, 1  ;;  %v6964_v14 = vcombine.low %v970_v41, %v8386_v42  ;;  %v8387_v31 = vld [vmem:[#allocation2 + $0x8c] ss:$0 sps:$4 sm:$0x11]   ;;  %v973_v42 = vld [vmem:[#allocation2 + $0xa8] sm:$0xe] }
  0xf4   : > { %v1657_v61 = vpop.permute.xlu0 %1656  ;;  %v2001_v50 = vsel %vm1505_vm10, %v1999_v8, %v2000_v22  ;;  %v2353_v25 = vsel %vm1232_vm9, %v2348_v49, %v2352_v33  ;;  %v1540_v8 = vrot.slane %v8387_v31, 1  ;;  %v8388_v49 = vld [vmem:[#allocation2 + $0x94] sm:$0xf] }
  0xf5   : > { %v2341_v29 = vsel %vm1232_vm9, %v2336_v16, %v2340_v18  ;;  %2032 = vrot.lane.b32.xlu1 %v2001_v50, %s8557_s10  ;;  %v1539_v16 = vrot.slane %v6964_v14, 1  ;;  %v971_v18 = vld [vmem:[#allocation2 + $0x90] sm:$0xe] }
  0xf6   : > { %2382 = vrot.lane.b32.xlu0 %v2341_v29, %s8557_s10  ;;  %v6965_v15 = vcombine.low %v971_v18, %v8388_v49  ;;  %v8389_v29 = vld [vmem:[#allocation2 + $0x98] ss:$0 sps:$4 sm:$0x11]   ;;  %v1103_v18 = vld [vmem:[#allocation2 + $0xcc] sm:$0xe] }
  0xf7   : > { %v1541_v22 = vsel %vm1505_vm10, %v1539_v16, %v1540_v8  ;;  %v1543_v50 = vrot.slane %v8389_v29, 1 }
  0xf8   : > { %3139 = vmatmul.mubr.bf16.gmra.mrb[28].mxu0 %v2505_v32  ;;  %v1446_v32 = vpop.permute.xlu1 %1445  ;;  %v2577_v6 = vsel %vm2482_vm11, %v1541_v22, %v1657_v61  ;;  %v1542_v28 = vrot.slane %v6965_v15, 1  ;;  %v7064_v15 = vcombine.low %v1103_v18, %v9479_v36 }
  0xf9   : > { %3146 = vmatprep.mubr.bf16.mxu0 %v2565_v10  ;;  %v1536_v10 = vrot.slane %v6963_v54, 1  ;;  %v2514_v48 = vsel %vm2482_vm11, %v9021_v20, %v1446_v32  ;;  %v1727_v32 = vshrl.u32 %v8747_v47, 16 }
  0xfa   : > { %2384 = vrot.lane.b32.xlu0 %v2353_v25, %s8557_s10  ;;  %v1729_v25 = vshll.u32 %v8747_v47, 16  ;;  %v1544_v41 = vsel %vm1505_vm10, %v1542_v28, %v1543_v50  ;;  %v8393_v47 = vld [vmem:[#allocation2 + $0xac] sm:$0xf] }
  0xfb   : > { %v1538_v55 = vsel %vm1505_vm10, %v1536_v10, %v1537_v13  ;;  %v1715_v10 = vshrl.u32 %v8740_v40, 16  ;;  %v8391_v13 = vld [vmem:[#allocation2 + $0x14] ss:$0 sps:$4 sm:$0x11]   ;;  %v6967_v49 = vcombine.low %v973_v42, %v8393_v47 }
  0xfc   : > { %v1659_v51 = vpop.permute.xlu0 %1658  ;;  %v1448_v7 = vpop.permute.xlu1 %1447  ;;  %v2573_v58 = vsel %vm2482_vm11, %v1538_v55, %v1655_v53  ;;  %v972_v53 = vld [vmem:[#allocation2 + $0x9c] sm:$0xe]  ;;  %v1722_v61 = vshll.u32 %v8391_v13, 16 }
  0xfd   : > { %v6966_v20 = vcombine.low %v972_v53, %v8390_v37  ;;  %v2581_v16 = vsel %vm2482_vm11, %v1544_v41, %v1659_v51  ;;  %v8394_v53 = vld [vmem:[#allocation2 + $0x20] ss:$0 sps:$4 sm:$0x11]   ;;  %v2479_v51 = vrot.slane %v7064_v15, 1  ;;  %v974_v41 = vld [vmem:[#allocation2 + $0xb4] sm:$0xe] }
  0xfe   : > { %v1734_v28 = vshll.u32 %v8394_v53, 16 }
  0xff   : > { %v1545_v31 = vrot.slane %v6966_v20, 1 }
 0x100   : > { %3147 = vmatmul.mubr.bf16.gmra.mrb[32].mxu0 %v2508_v4  ;;  %v1717_v4 = vshll.u32 %v8740_v40, 16  ;;  %v8392_v40 = vld [vmem:[#allocation2 + $0xa4] ss:$0 sps:$4 sm:$0x11]  }
 0x101   : > { %3154 = vmatprep.mubr.bf16.mxu0 %v2569_v46  ;;  %v1546_v8 = vrot.slane %v8392_v40, 1  ;;  %v1739_v40 = vshrl.u32 %v8766_v12, 16 }
 0x102   : > { %v1719_v14 = vrot.slane %v1717_v4, 1  ;;  %v1548_v4 = vrot.slane %v6967_v49, 1  ;;  %v8397_v49 = vld [vmem:[#allocation2 + $0x2c] ss:$0 sps:$4 sm:$0x11]  }
 0x103   : > { %v1547_v50 = vsel %vm1505_vm10, %v1545_v31, %v1546_v8  ;;  %v1746_v15 = vshll.u32 %v8397_v49, 16 }
 0x104   : > { %v1720_v29 = vor.u32 %v1719_v14, %v1715_v10  ;;  %v1741_v10 = vshll.u32 %v8766_v12, 16 }
 0x106   : > { %v1661_v11 = vpop.permute.xlu0 %1660  ;;  %v1743_v8 = vrot.slane %v1741_v10, 1 }
 0x107   : > { %v1450_v33 = vpop.permute.xlu1 %1449 }
 0x108   : > { %3155 = vmatmul.mubr.bf16.gmra.mrb[36].mxu0 %v2511_v26  ;;  %v1731_v26 = vrot.slane %v1729_v25, 1  ;;  %v8395_v25 = vld [vmem:[#allocation2 + $0xb0] ss:$0 sps:$4 sm:$0x11]   ;;  %v2520_v13 = vsel %vm2482_vm11, %v9073_v43, %v1450_v33  ;;  %v8396_v33 = vld [vmem:[#allocation2 + $0xb8] sm:$0xf] }
 0x109   : > { %3162 = vmatprep.mubr.bf16.mxu0 %v2573_v58  ;;  %v2517_v58 = vsel %vm2482_vm11, %v9047_v5, %v1448_v7  ;;  %v2480_v7 = vrot.slane %v9489_v39, 1  ;;  %v1549_v37 = vrot.slane %v8395_v25, 1  ;;  %v8399_v25 = vld [vmem:[#allocation2 + $0x38] ss:$0 sps:$4 sm:$0x11]  }
 0x10b   : > { %v9541_v36 = vsel %vm1505_vm10, %v2479_v51, %v2480_v7  ;;  %v1550_v43 = vsel %vm1505_vm10, %v1548_v4, %v1549_v37  ;;  %v1744_v51 = vor.u32 %v1743_v8, %v1739_v40  ;;  %v1748_v7 = vrot.slane %v1746_v15, 1  ;;  %v8402_v40 = vld [vmem:[#allocation2 + $0x44] ss:$0 sps:$4 sm:$0x11]  }
 0x10c   : > { %v1758_v37 = vshll.u32 %v8399_v25, 16  ;;  %v1770_v8 = vshll.u32 %v8402_v40, 16  ;;  %v8411_v40 = vld [vmem:[#allocation2 + $0x50] ss:$0 sps:$4 sm:$0x11]  }
 0x10d   : > { %v1749_v4 = vsel %vm1232_vm9, %v1744_v51, %v1748_v7  ;;  %v8406_v7 = vld [vmem:[#allocation2 + $0x38] ss:$0 sps:$4 sm:$0x11]  }
 0x10e   : > { %v1772_v51 = vrot.slane %v1770_v8, 1  ;;  %v2447_v8 = vrot.slane %v8411_v40, 1 }
 0x10f   : > { %v9518_v54 = vpop.permute.xlu0 %1662 }
 0x110   : > { %3163 = vmatmul.mubr.bf16.gmra.mrb[40].mxu0 %v2514_v48 }
 0x111   : > { %v9523_v46 = vpop.permute.xlu1 %1451  ;;  %3170 = vmatprep.mubr.bf16.mxu0 %v2577_v6  ;;  %v1724_v6 = vrot.slane %v1722_v61, 1  ;;  %v2585_v61 = vsel %vm2482_vm11, %v1547_v50, %v1661_v11  ;;  %v6968_v11 = vcombine.low %v974_v41, %v8396_v33 }
 0x113   : > { %v1725_v39 = vsel %vm1232_vm9, %v1720_v29, %v1724_v6  ;;  %v8398_v6 = vld [vmem:[#allocation2 + $0xbc] ss:$0 sps:$4 sm:$0x11]  }
 0x114   : > { %v1552_v53 = vrot.slane %v8398_v6, 1 }
 0x116   : > { %v9528_v55 = vpop.permute.xlu0 %1664 }
 0x118   : > { %v9533_v22 = vpop.permute.xlu1 %1453  ;;  %3171 = vmatmul.mubr.bf16.gmra.mrb[44].mxu0 %v2517_v58  ;;  %v1732_v58 = vor.u32 %v1731_v26, %v1727_v32  ;;  %v2589_v26 = vsel %vm2482_vm11, %v1550_v43, %v9518_v54  ;;  %v1751_v54 = vshrl.u32 %v8781_v35, 16 }
 0x119   : > { %3178 = vmatprep.mubr.bf16.mxu0 %v2581_v16  ;;  %v1736_v16 = vrot.slane %v1734_v28, 1  ;;  %v1753_v28 = vshll.u32 %v8781_v35, 16 }
 0x11a   : > { %v2355_v48 = vpop.permute.xlu0 %2354 }
 0x11b   : > { %v2660_v5 = vsel %vm2482_vm11, %v9141_v38, %v2355_v48  ;;  %v1737_v47 = vsel %vm1232_vm9, %v1732_v58, %v1736_v16  ;;  %v1551_v48 = vrot.slane %v6968_v11, 1  ;;  %v1755_v29 = vrot.slane %v1753_v28, 1  ;;  %v8401_v16 = vld [vmem:[#allocation2 + $0x20] ss:$0 sps:$4 sm:$0x11]  }
 0x11c   : > { %3243 = vmatprep.mubr.bf16.mxu1 %v2660_v5 }
 0x11e   : > { %v2357_v38 = vpop.permute.xlu0 %2356 }
 0x11f   : > { %v9543_v20 = vpop.permute.xlu1 %1455  ;;  %v2663_v14 = vsel %vm2482_vm11, %v9171_v23, %v2357_v38  ;;  %v2523_v23 = vsel %vm2482_vm11, %v9116_v3, %v9523_v46  ;;  %v1553_v3 = vsel %vm1505_vm10, %v1551_v48, %v1552_v53  ;;  %v1088_v46 = vld [vmem:[#allocation2 + $0x18] sm:$0xe]  ;;  %v8405_v48 = vld [vmem:[#allocation2 + $0x2c] ss:$0 sps:$4 sm:$0x11]  }
 0x120   : > { %3179 = vmatmul.mubr.bf16.gmra.mrb[48].mxu0 %v2520_v13  ;;  %v2593_v38 = vsel %vm2482_vm11, %v1553_v3, %v9528_v55  ;;  %v1763_v55 = vshrl.u32 %v8835_v60, 16  ;;  %v2438_v6 = vrot.slane %v8405_v48, 1  ;;  %v2441_v3 = vrot.slane %v8406_v7, 1  ;;  %v8413_v48 = vld [vmem:[#allocation2 + $0x58] sm:$0xf] }
 0x121   : > { %3186 = vmatprep.mubr.bf16.mxu0 %v2585_v61  ;;  %v8400_v61 = vld [vmem:[#allocation2 + $0x1c] sm:$0xf] }
 0x122   : > { %v2359_v32 = vpop.permute.xlu0 %2358  ;;  %v7049_v41 = vcombine.low %v1088_v46, %v8400_v61  ;;  %v1091_v46 = vld [vmem:[#allocation2 + $0x3c] sm:$0xe] }
 0x123   : > { %v2003_v42 = vpop.permute.xlu1 %2002  ;;  %v2666_v5 = vsel %vm2482_vm11, %v9193_v2, %v2359_v32  ;;  %v2526_v2 = vsel %vm2482_vm11, %v9148_v34, %v9533_v22  ;;  %v2435_v34 = vrot.slane %v8401_v16, 1  ;;  %v1089_v22 = vld [vmem:[#allocation2 + $0x24] sm:$0xe] }
 0x124   : > { %v2597_v31 = vsel %vm2482_vm11, %v1725_v39, %v2003_v42  ;;  %v1765_v39 = vshll.u32 %v8835_v60, 16  ;;  %v1756_v42 = vor.u32 %v1755_v29, %v1751_v54  ;;  %v2434_v58 = vrot.slane %v7049_v41, 1  ;;  %v1092_v54 = vld [vmem:[#allocation2 + $0x48] sm:$0xe] }
 0x125   : > { %3244 = vmatmul.mubr.bf16.vlgmr.msra.gmra.mrb[0].mxu1 %v2597_v31  ;;  %v1090_v31 = vld [vmem:[#allocation2 + $0x30] sm:$0xe] }
 0x126   : > { %3251 = vmatprep.mubr.bf16.mxu1 %v2663_v14  ;;  %v2361_v13 = vpop.permute.xlu0 %2360  ;;  %v1760_v14 = vrot.slane %v1758_v37, 1  ;;  %v1767_v43 = vrot.slane %v1765_v39, 1  ;;  %v2436_v15 = vsel %vm1505_vm10, %v2434_v58, %v2435_v34  ;;  %v8407_v37 = vld [vmem:[#allocation2 + $0x50] ss:$0 sps:$4 sm:$0x11]   ;;  %v11526_v34 = vld [vmem:[#allocation20_spill] sm:$0xff] }
 0x127   : > { %v2005_v18 = vpop.permute.xlu1 %2004  ;;  %v2669_v10 = vsel %vm2482_vm11, %v9198_v24, %v2361_v13  ;;  %v2529_v24 = vsel %vm2482_vm11, %v9181_v45, %v9543_v20 }
 0x128   : > { %v2601_v12 = vsel %vm2482_vm11, %v1737_v47, %v2005_v18  ;;  %3187 = vmatmul.mubr.bf16.gmra.mrb[52].mxu0 %v2523_v23  ;;  %v1761_v11 = vsel %vm1232_vm9, %v1756_v42, %v1760_v14  ;;  %v8403_v18 = vld [vmem:[#allocation2 + $0x28] sm:$0xf]  ;;  %v8404_v23 = vld [vmem:[#allocation2 + $0x34] sm:$0xf] }
 0x129   : > { %3194 = vmatprep.mubr.bf16.mxu0 %v2589_v26  ;;  %v7050_v47 = vcombine.low %v1089_v22, %v8403_v18  ;;  %v7051_v32 = vcombine.low %v1090_v31, %v8404_v23  ;;  %v11523_v26 = vld [vmem:[#allocation8_spill] sm:$0xff]  ;;  %v11525_v42 = vld [vmem:[#allocation9_spill] sm:$0xff]  ;;  %v1094_v18 = vld [vmem:[#allocation2 + $0x60] sm:$0xe] }
 0x12a   : > { %v2363_v49 = vpop.permute.xlu0 %2362  ;;  %v1777_v60 = vshll.u32 %v11523_v26, 16  ;;  %v1775_v29 = vshrl.u32 %v11523_v26, 16  ;;  %v1789_v14 = vshll.u32 %v11525_v42, 16 }
 0x12b   : > { %v2007_v50 = vpop.permute.xlu1 %2006  ;;  %v2437_v45 = vrot.slane %v7050_v47, 1  ;;  %v2440_v20 = vrot.slane %v7051_v32, 1  ;;  %v1787_v47 = vshrl.u32 %v11525_v42, 16  ;;  %v8412_v32 = vld [vmem:[#allocation2 + $0x5c] ss:$0 sps:$4 sm:$0x11]  }
 0x12c   : > { %v2605_v35 = vsel %vm2482_vm11, %v1749_v4, %v2007_v50  ;;  %v1779_v50 = vrot.slane %v1777_v60, 1  ;;  %v1794_v26 = vshll.u32 %v8412_v32, 16  ;;  %v8421_v32 = vld [vmem:[#allocation2 + $0x80] ss:$0 sps:$4 sm:$0x11]  }
 0x12d   : > { %3252 = vmatmul.mubr.bf16.gmra.mrb[4].mxu1 %v2601_v12  ;;  %v11524_v12 = vld [vmem:[#allocation19_spill] sm:$0xff]  ;;  %v2439_v13 = vsel %vm1505_vm10, %v2437_v45, %v2438_v6  ;;  %v2442_v39 = vsel %vm1505_vm10, %v2440_v20, %v2441_v3  ;;  %v11528_v3 = vld [vmem:[#allocation21_spill] sm:$0xff] }
 0x12e   : > { %3259 = vmatprep.mubr.bf16.mxu1 %v2666_v5  ;;  %v2672_v28 = vsel %vm2482_vm11, %v11524_v12, %v2363_v49  ;;  %v1768_v5 = vor.u32 %v1767_v43, %v1763_v55  ;;  %v2365_v41 = vpop.permute.xlu0 %2364  ;;  %v1780_v16 = vor.u32 %v1779_v50, %v1775_v29  ;;  %v8410_v43 = vld [vmem:[#allocation2 + $0x44] ss:$0 sps:$4 sm:$0x11]   ;;  %v1791_v49 = vrot.slane %v1789_v14, 1 }
 0x12f   : > { %v2009_v33 = vpop.permute.xlu1 %2008  ;;  %v2675_v22 = vsel %vm2482_vm11, %v11526_v34, %v2365_v41  ;;  %v8415_v50 = vld [vmem:[#allocation2 + $0x5c] ss:$0 sps:$4 sm:$0x11]  }
 0x130   : > { %3195 = vmatmul.mubr.bf16.gmra.mrb[56].mxu0 %v2526_v2  ;;  %v2609_v53 = vsel %vm2482_vm11, %v1761_v11, %v2009_v33  ;;  %v1773_v25 = vsel %vm1232_vm9, %v1768_v5, %v1772_v51  ;;  %v1782_v2 = vshll.u32 %v8407_v37, 16  ;;  %v2444_v33 = vrot.slane %v8410_v43, 1  ;;  %v11527_v51 = vld [vmem:[#allocation10_spill] sm:$0xff]  ;;  %v8416_v37 = vld [vmem:[#allocation2 + $0x68] ss:$0 sps:$4 sm:$0x11]  }
 0x131   : > { %3202 = vmatprep.mubr.bf16.mxu0 %v2593_v38  ;;  %v8408_v38 = vld [vmem:[#allocation2 + $0x40] sm:$0xf]  ;;  %v1801_v45 = vshll.u32 %v11527_v51, 16  ;;  %v1792_v7 = vor.u32 %v1791_v49, %v1787_v47  ;;  %v8420_v49 = vld [vmem:[#allocation2 + $0x74] ss:$0 sps:$4 sm:$0x11]  }
 0x132   : > { %v7052_v61 = vcombine.low %v1091_v46, %v8408_v38  ;;  %v1784_v31 = vrot.slane %v1782_v2, 1  ;;  %v2453_v2 = vrot.slane %v8416_v37, 1  ;;  %v1096_v38 = vld [vmem:[#allocation2 + $0x78] sm:$0xe]  ;;  %v11529_v43 = vld [vmem:[#allocation11_spill] sm:$0xff] }
 0x133   : > { %v2011_v4 = vpop.permute.xlu1 %2010  ;;  %v1803_v41 = vrot.slane %v1801_v45, 1 }
 0x134   : > { %v2613_v58 = vsel %vm2482_vm11, %v1773_v25, %v2011_v4  ;;  %v2443_v55 = vrot.slane %v7052_v61, 1  ;;  %v1785_v23 = vsel %vm1232_vm9, %v1780_v16, %v1784_v31  ;;  %v2450_v4 = vrot.slane %v8415_v50, 1  ;;  %v8419_v31 = vld [vmem:[#allocation2 + $0x7c] sm:$0xf]  ;;  %v11531_v50 = vld [vmem:[#allocation12_spill] sm:$0xff] }
 0x135   : > { %3260 = vmatmul.mubr.bf16.gmra.mrb[8].mxu1 %v2605_v35  ;;  %v8409_v35 = vld [vmem:[#allocation2 + $0x4c] sm:$0xf]  ;;  %v1799_v61 = vshrl.u32 %v11527_v51, 16 }
 0x136   : > { %3267 = vmatprep.mubr.bf16.mxu1 %v2669_v10  ;;  %v7053_v10 = vcombine.low %v1092_v54, %v8409_v35  ;;  %v2445_v60 = vsel %vm1505_vm10, %v2443_v55, %v2444_v33  ;;  %v1796_v54 = vrot.slane %v1794_v26, 1  ;;  %v7057_v55 = vcombine.low %v1096_v38, %v8419_v31 }
 0x137   : > { %v1813_v33 = vshll.u32 %v11529_v43, 16  ;;  %v1804_v40 = vor.u32 %v1803_v41, %v1799_v61  ;;  %v2459_v26 = vrot.slane %v8421_v32, 1  ;;  %v8425_v61 = vld [vmem:[#allocation2 + $0x8c] ss:$0 sps:$4 sm:$0x11]  }
 0x138   : > { %3203 = vmatmul.mubr.bf16.gmra.mrb[60].mxu0 %v2529_v24  ;;  %v2446_v11 = vrot.slane %v7053_v10, 1  ;;  %v1093_v24 = vld [vmem:[#allocation2 + $0x54] sm:$0xe]  ;;  %v1797_v35 = vsel %vm1232_vm9, %v1792_v7, %v1796_v54  ;;  %v8417_v10 = vld [vmem:[#allocation2 + $0x68] ss:$0 sps:$4 sm:$0x11]  }
 0x139   : > { %7914 = vmatprep.mubr.msk.bf16.mxu0 %vm2482_vm11, %v2436_v15  ;;  %v2013_v15 = vpop.permute.xlu1 %2012  ;;  %v7054_v6 = vcombine.low %v1093_v24, %v8413_v48  ;;  %v1806_v42 = vshll.u32 %v8417_v10, 16  ;;  %v1098_v48 = vld [vmem:[#allocation2 + $0x90] sm:$0xe]  ;;  %v8424_v54 = vld [vmem:[#allocation2 + $0x94] sm:$0xf]  ;;  %v2462_v41 = vrot.slane %v8425_v61, 1 }
 0x13a   : > { %v2448_v12 = vsel %vm1505_vm10, %v2446_v11, %v2447_v8  ;;  %v2617_v20 = vsel %vm2482_vm11, %v1785_v23, %v2013_v15  ;;  %v11530_v8 = vld [vmem:[#allocation22_spill] sm:$0xff]  ;;  %v2456_v15 = vrot.slane %v8420_v49, 1  ;;  %v2458_v23 = vrot.slane %v7057_v55, 1 }
 0x13b   : > { %v2449_v29 = vrot.slane %v7054_v6, 1  ;;  %v1811_v6 = vshrl.u32 %v11529_v43, 16  ;;  %v8428_v43 = vld [vmem:[#allocation2 + $0xa0] sm:$0xf] }
 0x13d   : > { %3268 = vmatmul.mubr.bf16.gmra.mrb[12].mxu1 %v2609_v53  ;;  %v2367_v53 = vpop.permute.xlu0 %2366  ;;  %v2451_v14 = vsel %vm1505_vm10, %v2449_v29, %v2450_v4  ;;  %v7059_v29 = vcombine.low %v1098_v48, %v8424_v54  ;;  %v1825_v4 = vshll.u32 %v11531_v50, 16 }
 0x13e   : > { %3275 = vmatprep.mubr.bf16.mxu1 %v2672_v28  ;;  %v8414_v28 = vld [vmem:[#allocation2 + $0x64] sm:$0xf]  ;;  %v2678_v46 = vsel %vm2482_vm11, %v11528_v3, %v2367_v53  ;;  %v1815_v53 = vrot.slane %v1813_v33, 1 }
 0x13f   : > { %v7055_v5 = vcombine.low %v1094_v18, %v8414_v28  ;;  %v1808_v18 = vrot.slane %v1806_v42, 1  ;;  %v1099_v42 = vld [vmem:[#allocation2 + $0x9c] sm:$0xe] }
 0x140   : > { %7915 = vmatmul.mubr.msk.bf16.vlgmr.msra.gmra.mrb[64].mxu0 %vm2482_vm11, %v2439_v13  ;;  %v1095_v13 = vld [vmem:[#allocation2 + $0x6c] sm:$0xe]  ;;  %v1816_v37 = vor.u32 %v1815_v53, %v1811_v6  ;;  %v7060_v33 = vcombine.low %v1099_v42, %v8428_v43  ;;  %v8431_v53 = vld [vmem:[#allocation2 + $0xb0] ss:$0 sps:$4 sm:$0x11]  }
 0x141   : > { %7918 = vmatprep.mubr.msk.bf16.mxu0 %vm2482_vm11, %v2442_v39  ;;  %v2452_v25 = vrot.slane %v7055_v5, 1  ;;  %v2015_v39 = vpop.permute.xlu1 %2014  ;;  %v2369_v34 = vpop.permute.xlu0 %2368  ;;  %v1809_v28 = vsel %vm1232_vm9, %v1804_v40, %v1808_v18  ;;  %v8422_v5 = vld [vmem:[#allocation2 + $0x74] ss:$0 sps:$4 sm:$0x11]  }
 0x142   : > { %v2621_v11 = vsel %vm2482_vm11, %v1797_v35, %v2015_v39  ;;  %v2681_v24 = vsel %vm2482_vm11, %v11530_v8, %v2369_v34  ;;  %v1818_v51 = vshll.u32 %v8422_v5, 16  ;;  %v2464_v39 = vrot.slane %v7059_v29, 1  ;;  %v8426_v35 = vld [vmem:[#allocation2 + $0x98] ss:$0 sps:$4 sm:$0x11]   ;;  %v11532_v18 = vld [vmem:[#allocation13_spill] sm:$0xff] }
 0x143   : > { %v2465_v10 = vrot.slane %v8426_v35, 1  ;;  %v8429_v8 = vld [vmem:[#allocation2 + $0xac] sm:$0xf]  ;;  %v1102_v5 = vld [vmem:[#allocation2 + $0xc0] sm:$0xe]  ;;  %v2477_v35 = vrot.slane %v9491_v27, 1 }
 0x144   : > { %v11534_v27 = vld [vmem:[#allocation15_spill] sm:$0xff] }
 0x145   : > { %3276 = vmatmul.mubr.bf16.gmra.mrb[16].mxu1 %v2613_v58  ;;  %v8418_v58 = vld [vmem:[#allocation2 + $0x70] sm:$0xf]  ;;  %v2371_v3 = vpop.permute.xlu0 %2370  ;;  %v2466_v40 = vsel %vm1505_vm10, %v2464_v39, %v2465_v10 }
 0x146   : > { %3283 = vmatprep.mubr.bf16.mxu1 %v2675_v22  ;;  %v7056_v16 = vcombine.low %v1095_v13, %v8418_v58  ;;  %v2454_v22 = vsel %vm1505_vm10, %v2452_v25, %v2453_v2  ;;  %v2684_v2 = vsel %vm2482_vm11, %v9316_v63, %v2371_v3  ;;  %v1820_v13 = vrot.slane %v1818_v51, 1  ;;  %v8427_v63 = vld [vmem:[#allocation2 + $0x80] ss:$0 sps:$4 sm:$0x11]  }
 0x147   : > { %v1823_v58 = vshrl.u32 %v11531_v50, 16  ;;  %v1830_v31 = vshll.u32 %v8427_v63, 16  ;;  %v1835_v51 = vshrl.u32 %v11532_v18, 16  ;;  %v1861_v63 = vshll.u32 %v11534_v27, 16 }
 0x148   : > { %7919 = vmatmul.mubr.msk.bf16.gmra.mrb[68].mxu0 %vm2482_vm11, %v2445_v60  ;;  %v2455_v47 = vrot.slane %v7056_v16, 1  ;;  %v1097_v60 = vld [vmem:[#allocation2 + $0x84] sm:$0xe]  ;;  %v1827_v16 = vrot.slane %v1825_v4, 1  ;;  %v7063_v4 = vcombine.low %v1102_v5, %v9456_v62 }
 0x149   : > { %7922 = vmatprep.mubr.msk.bf16.mxu0 %vm2482_vm11, %v2448_v12  ;;  %v2017_v12 = vpop.permute.xlu1 %2016  ;;  %v1832_v32 = vrot.slane %v1830_v31, 1 }
 0x14a   : > { %v2457_v45 = vsel %vm1505_vm10, %v2455_v47, %v2456_v15  ;;  %v2625_v25 = vsel %vm2482_vm11, %v1809_v28, %v2017_v12  ;;  %v1837_v47 = vshll.u32 %v11532_v18, 16  ;;  %v1828_v15 = vor.u32 %v1827_v16, %v1823_v58  ;;  %v1101_v28 = vld [vmem:[#allocation2 + $0xb4] sm:$0xe]  ;;  %v8433_v58 = vld [vmem:[#allocation2 + $0x98] ss:$0 sps:$4 sm:$0x11]  }
 0x14b   : > { %v2471_v12 = vrot.slane %v8431_v53, 1  ;;  %v7062_v54 = vcombine.low %v1101_v28, %v9429_v44  ;;  %v2474_v44 = vrot.slane %v9436_v56, 1  ;;  %v2476_v39 = vrot.slane %v7063_v4, 1 }
 0x14c   : > { %v1854_v16 = vshll.u32 %v8433_v58, 16 }
 0x14d   : > { %3284 = vmatmul.mubr.bf16.gmra.mrb[20].mxu1 %v2617_v20  ;;  %v8423_v20 = vld [vmem:[#allocation2 + $0x88] sm:$0xf]  ;;  %v2019_v34 = vpop.permute.xlu1 %2018 }
 0x14e   : > { %3291 = vmatprep.mubr.bf16.mxu1 %v2678_v46  ;;  %v7058_v7 = vcombine.low %v1097_v60, %v8423_v20  ;;  %v2460_v46 = vsel %vm1505_vm10, %v2458_v23, %v2459_v26  ;;  %v2467_v26 = vrot.slane %v7060_v33, 1  ;;  %v8430_v60 = vld [vmem:[#allocation2 + $0xa4] ss:$0 sps:$4 sm:$0x11]   ;;  %v1856_v43 = vrot.slane %v1854_v16, 1 }
 0x14f   : > { %v2468_v48 = vrot.slane %v8430_v60, 1  ;;  %v1859_v33 = vshrl.u32 %v11534_v27, 16 }
 0x150   : > { %7923 = vmatmul.mubr.msk.bf16.gmra.mrb[72].mxu0 %vm2482_vm11, %v2451_v14  ;;  %v2461_v38 = vrot.slane %v7058_v7, 1  ;;  %v1100_v14 = vld [vmem:[#allocation2 + $0xa8] sm:$0xe]  ;;  %v1833_v7 = vsel %vm1232_vm9, %v1828_v15, %v1832_v32 }
 0x151   : > { %7926 = vmatprep.mubr.msk.bf16.mxu0 %vm2482_vm11, %v2454_v22  ;;  %v1821_v22 = vsel %vm1232_vm9, %v1816_v37, %v1820_v13  ;;  %v2021_v20 = vpop.permute.xlu1 %2020 }
 0x152   : > { %v2463_v55 = vsel %vm1505_vm10, %v2461_v38, %v2462_v41  ;;  %v2629_v49 = vsel %vm2482_vm11, %v1821_v22, %v2019_v34  ;;  %v2473_v41 = vrot.slane %v7062_v54, 1  ;;  %v2478_v22 = vsel %vm1505_vm10, %v2476_v39, %v2477_v35 }
 0x155   : > { %3292 = vmatmul.mubr.bf16.gmra.mrb[24].mxu1 %v2621_v11  ;;  %v2373_v11 = vpop.permute.xlu0 %2372  ;;  %v2023_v42 = vpop.permute.xlu1 %2022 }
 0x156   : > { %3299 = vmatprep.mubr.bf16.mxu1 %v2681_v24  ;;  %v7061_v24 = vcombine.low %v1100_v14, %v8429_v8  ;;  %v2687_v23 = vsel %vm2482_vm11, %v9341_v30, %v2373_v11  ;;  %v8432_v30 = vld [vmem:[#allocation2 + $0x8c] ss:$0 sps:$4 sm:$0x11]   ;;  %v1863_v11 = vrot.slane %v1861_v63, 1 }
 0x157   : > { %v1842_v3 = vshll.u32 %v8432_v30, 16 }
 0x158   : > { %7927 = vmatmul.mubr.msk.bf16.gmra.mrb[76].mxu0 %vm2482_vm11, %v2457_v45  ;;  %v2470_v6 = vrot.slane %v7061_v24, 1  ;;  %v1839_v45 = vrot.slane %v1837_v47, 1  ;;  %v8434_v24 = vld [vmem:[#allocation2 + $0xa4] ss:$0 sps:$4 sm:$0x11]   ;;  %v1864_v32 = vor.u32 %v1863_v11, %v1859_v33 }
 0x159   : > { %7930 = vmatprep.mubr.msk.bf16.mxu0 %vm2482_vm11, %v2460_v46  ;;  %v2469_v46 = vsel %vm1505_vm10, %v2467_v26, %v2468_v48  ;;  %v2375_v29 = vpop.permute.xlu0 %2374  ;;  %v1844_v61 = vrot.slane %v1842_v3, 1  ;;  %v1866_v18 = vshll.u32 %v8434_v24, 16 }
 0x15a   : > { %v2472_v50 = vsel %vm1505_vm10, %v2470_v6, %v2471_v12  ;;  %v1840_v13 = vor.u32 %v1839_v45, %v1835_v51  ;;  %v2690_v38 = vsel %vm2482_vm11, %v9366_v59, %v2375_v29  ;;  %v2475_v59 = vsel %vm1505_vm10, %v2473_v41, %v2474_v44  ;;  %v8435_v12 = vld [vmem:[#allocation2 + $0xb0] ss:$0 sps:$4 sm:$0x11]  }
 0x15b   : > { %v1868_v26 = vrot.slane %v1866_v18, 1  ;;  %v1878_v28 = vshll.u32 %v8435_v12, 16  ;;  %v11536_v51 = vld [vmem:[#allocation17_spill] sm:$0xff]  ;;  %v1890_v29 = vshll.u32 %v9458_v9, 16  ;;  %v1902_v9 = vshll.u32 %v9498_v1, 16 }
 0x15c   : > { %v1845_v14 = vsel %vm1232_vm9, %v1840_v13, %v1844_v61  ;;  %v1885_v45 = vshll.u32 %v11536_v51, 16  ;;  %v1883_v30 = vshrl.u32 %v11536_v51, 16 }
 0x15d   : > { %3300 = vmatmul.mubr.bf16.gmra.mrb[28].mxu1 %v2625_v25  ;;  %v11533_v25 = vld [vmem:[#allocation14_spill] sm:$0xff]  ;;  %v2377_v34 = vpop.permute.xlu0 %2376  ;;  %v2637_v56 = vsel %vm2482_vm11, %v1845_v14, %v2023_v42  ;;  %v1869_v53 = vsel %vm1232_vm9, %v1864_v32, %v1868_v26  ;;  %v1892_v13 = vrot.slane %v1890_v29, 1 }
 0x15e   : > { %3307 = vmatprep.mubr.bf16.mxu1 %v2684_v2  ;;  %v1849_v37 = vshll.u32 %v11533_v25, 16  ;;  %v2633_v2 = vsel %vm2482_vm11, %v1833_v7, %v2021_v20  ;;  %v1847_v62 = vshrl.u32 %v11533_v25, 16  ;;  %v2693_v31 = vsel %vm2482_vm11, %v9388_v52, %v2377_v34  ;;  %v11535_v52 = vld [vmem:[#allocation16_spill] sm:$0xff]  ;;  %v11537_v25 = vld [vmem:[#allocation18_spill] sm:$0xff] }
 0x15f   : > { %v1873_v15 = vshll.u32 %v11535_v52, 16  ;;  %v1871_v60 = vshrl.u32 %v11535_v52, 16  ;;  %v1880_v7 = vrot.slane %v1878_v28, 1  ;;  %v1887_v3 = vrot.slane %v1885_v45, 1 }
 0x160   : > { %7931 = vmatmul.mubr.msk.bf16.gmra.mrb[80].mxu0 %vm2482_vm11, %v2463_v55  ;;  %v1851_v10 = vrot.slane %v1849_v37, 1  ;;  %v1897_v37 = vshll.u32 %v11537_v25, 16 }
 0x161   : > { %7934 = vmatprep.mubr.msk.bf16.mxu0 %vm2482_vm11, %v2466_v40  ;;  %v2025_v40 = vpop.permute.xlu1 %2024  ;;  %v2379_v47 = vpop.permute.xlu0 %2378  ;;  %v1875_v48 = vrot.slane %v1873_v15, 1 }
 0x162   : > { %v1852_v55 = vor.u32 %v1851_v10, %v1847_v62  ;;  %v1899_v61 = vrot.slane %v1897_v37, 1 }
 0x163   : > { %v1876_v20 = vor.u32 %v1875_v48, %v1871_v60 }
 0x164   : > { %v1857_v8 = vsel %vm1232_vm9, %v1852_v55, %v1856_v43 }
 0x165   : > { %3308 = vmatmul.mubr.bf16.gmra.mrb[32].mxu1 %v2629_v49  ;;  %v2641_v49 = vsel %vm2482_vm11, %v1857_v8, %v2025_v40  ;;  %v2027_v6 = vpop.permute.xlu1 %2026  ;;  %v2381_v5 = vpop.permute.xlu0 %2380  ;;  %v1881_v54 = vsel %vm1232_vm9, %v1876_v20, %v1880_v7 }
 0x166   : > { %3315 = vmatprep.mubr.bf16.mxu1 %v2687_v23  ;;  %v2696_v23 = vsel %vm2482_vm11, %v9414_v19, %v2379_v47  ;;  %v2699_v19 = vsel %vm2482_vm11, %v9434_v21, %v2381_v5 }
 0x168   : > { %7935 = vmatmul.mubr.msk.bf16.gmra.mrb[84].mxu0 %vm2482_vm11, %v2469_v46 }
 0x169   : > { %7938 = vmatprep.mubr.msk.bf16.mxu0 %vm2482_vm11, %v2472_v50  ;;  %v2029_v46 = vpop.permute.xlu1 %2028  ;;  %v2383_v50 = vpop.permute.xlu0 %2382 }
 0x16a   : > { %v2649_v4 = vsel %vm2482_vm11, %v1881_v54, %v2029_v46  ;;  %v2702_v21 = vsel %vm2482_vm11, %v9465_v57, %v2383_v50  ;;  %v1904_v57 = vrot.slane %v1902_v9, 1  ;;  %v8179_v54 = vld [vmem:[%s11406_s3 + $0x40] sm:$0xff]  }
 0x16b   : > { %7662 = vmatprep.subr.bf16.mxu1 %v8179_v54  ;;  %v8180_v50 = vld [vmem:[%s11406_s3] sm:$0xff]  }
 0x16c   : > { %7663 = vmatpush3.bf16.msra.mxu1 %v8180_v50 }
 0x16d   : > { %3316 = vmatmul.mubr.bf16.gmra.mrb[36].mxu1 %v2633_v2  ;;  %v1888_v2 = vor.u32 %v1887_v3, %v1883_v30  ;;  %v2031_v41 = vpop.permute.xlu1 %2030  ;;  %v2385_v39 = vpop.permute.xlu0 %2384 }
 0x16e   : > { %3323 = vmatprep.mubr.bf16.mxu1 %v2690_v38  ;;  %v1895_v38 = vshrl.u32 %v11537_v25, 16  ;;  %v2705_v62 = vsel %vm2482_vm11, %v9487_v17, %v2385_v39 }
 0x16f   : > { %v1893_v44 = vsel %vm1232_vm9, %v1888_v2, %v1892_v13 }
 0x170   : > { %7939 = vmatmul.mubr.msk.bf16.gmra.mrb[88].mxu0 %vm2482_vm11, %v2475_v59  ;;  %v2653_v35 = vsel %vm2482_vm11, %v1893_v44, %v2031_v41  ;;  %v1900_v10 = vor.u32 %v1899_v61, %v1895_v38  ;;  %v4092_v38 = vld [vmem:[#allocation2] sm:$0xf]  ;;  %v4093_v41 = vld [vmem:[#allocation2 + $0x4] sm:$0xf] }
 0x171   : > { %7942 = vmatprep.mubr.msk.bf16.mxu0 %vm2482_vm11, %v2478_v22  ;;  %v2033_v58 = vpop.permute.xlu1 %2032  ;;  %v8184_v44 = vld [vmem:[#allocation2 + $0x8] ss:$0 sps:$4 sm:$0x11]   ;;  %v9729_v39 = vcombine.low %v4092_v38, %v4093_v41 }
 0x172   : > { %v1905_v16 = vsel %vm1232_vm9, %v1900_v10, %v1904_v57  ;;  %v4420_v57 = vshll.u32 %v8184_v44, 16 }
 0x175   : > { %3324 = vmatmul.mubr.bf16.gmra.mrb[40].mxu1 %v2637_v56  ;;  %v2657_v56 = vsel %vm2482_vm11, %v1905_v16, %v2033_v58  ;;  %v4415_v58 = vshll.u32 %v9729_v39, 16 }
 0x176   : > { %3331 = vmatprep.mubr.bf16.mxu1 %v2693_v31 }
 0x178   : > { %7943 = vmatmul.mubr.msk.bf16.gmra.mrb[92].mxu0 %vm2482_vm11, %v9541_v36  ;;  %v2645_v36 = vsel %vm2482_vm11, %v1869_v53, %v2027_v6 }
 0x17d   : > { %3332 = vmatmul.mubr.bf16.gmra.mrb[44].mxu1 %v2641_v49 }
 0x17e   : > { %3339 = vmatprep.mubr.bf16.mxu1 %v2696_v23 }
 0x185   : > { %3340 = vmatmul.mubr.bf16.gmra.mrb[48].mxu1 %v2645_v36 }
 0x186   : > { %3347 = vmatprep.mubr.bf16.mxu1 %v2699_v19 }
 0x18d   : > { %3348 = vmatmul.mubr.bf16.gmra.mrb[52].mxu1 %v2649_v4 }
 0x18e   : > { %3355 = vmatprep.mubr.bf16.mxu1 %v2702_v21 }
 0x193   : > { %v7434_v42 = vpop.f32.mrb[0].mxu0 }
 0x194   : > { %v7435_v14 = vpop.f32.mrb[1].mxu0 }
 0x195   : > { %3356 = vmatmul.mubr.bf16.gmra.mrb[56].mxu1 %v2653_v35  ;;  %v9690_v59 = vadd.f32 %v7435_v14, %v7434_v42  ;;  %v7437_v34 = vpop.f32.mrb[2].mxu0  ;;  %v8185_v35 = vld [vmem:[%s11406_s3 + $0x48] sm:$0xff]   ;;  %v4413_v14 = vshrl.u32 %v9729_v39, 16 }
 0x196   : > { %3363 = vmatprep.mubr.bf16.mxu1 %v2705_v62  ;;  %v7438_v22 = vpop.f32.mrb[3].mxu0  ;;  %7664 = vmatprep.subr.bf16.mxu1 %v8185_v35 }
 0x197   : > { %v9692_v1 = vadd.f32 %v7438_v22, %v7437_v34  ;;  %v4417_v34 = vrot.slane %v4415_v58, 1  ;;  %v4422_v22 = vrot.slane %v4420_v57, 1 }
 0x19b   : > { %v7440_v27 = vpop.f32.mrb[4].mxu0 }
 0x19c   : > { %v7441_v17 = vpop.f32.mrb[5].mxu0 }
 0x19d   : > { %3364 = vmatmul.mubr.bf16.gmra.mrb[60].mxu1 %v2657_v56  ;;  %v9695_v63 = vadd.f32 %v7441_v17, %v7440_v27  ;;  %v7443_v31 = vpop.f32.mrb[6].mxu0  ;;  %v8188_v56 = vld [vmem:[%s11406_s3 + $0x8] sm:$0xff]   ;;  %v4418_v27 = vor.u32 %v4417_v34, %v4413_v14 }
 0x19e   : > { %v7444_v55 = vpop.f32.mrb[7].mxu0  ;;  %7665 = vmatpush3.bf16.msra.mxu1 %v8188_v56 }
 0x19f   : > { %v9697_v43 = vadd.f32 %v7444_v55, %v7443_v31  ;;  %v4423_v55 = vsel %vm1232_vm9, %v4418_v27, %v4422_v22 }
 0x1a0   : > { %4604 = vrot.lane.b32.xlu1 %v4423_v55, %s8557_s10 }
 0x1a3   : > { %v7446_v33 = vpop.f32.mrb[8].mxu0 }
 0x1a4   : > { %v7447_v11 = vpop.f32.mrb[9].mxu0 }
 0x1a5   : > { %v9699_v40 = vadd.f32 %v7447_v11, %v7446_v33  ;;  %v7449_v8 = vpop.f32.mrb[10].mxu0 }
 0x1a6   : > { %v7450_v24 = vpop.f32.mrb[11].mxu0 }
 0x1a7   : > { %v9701_v18 = vadd.f32 %v7450_v24, %v7449_v8 }
 0x1ab   : > { %v7452_v47 = vpop.f32.mrb[12].mxu0 }
 0x1ac   : > { %v7453_v49 = vpop.f32.mrb[13].mxu0 }
 0x1ad   : > { %v9703_v52 = vadd.f32 %v7453_v49, %v7452_v47  ;;  %v7455_v15 = vpop.f32.mrb[14].mxu0 }
 0x1ae   : > { %v7456_v23 = vpop.f32.mrb[15].mxu0 }
 0x1af   : > { %v9705_v32 = vadd.f32 %v7456_v23, %v7455_v15 }
 0x1b3   : > { %v7458_v26 = vpop.f32.mrb[16].mxu0 }
 0x1b4   : > { %v7459_v60 = vpop.f32.mrb[17].mxu0 }
 0x1b5   : > { %v9707_v48 = vadd.f32 %v7459_v60, %v7458_v26  ;;  %v7461_v6 = vpop.f32.mrb[18].mxu0 }
 0x1b6   : > { %v7462_v53 = vpop.f32.mrb[19].mxu0 }
 0x1b7   : > { %v9709_v12 = vadd.f32 %v7462_v53, %v7461_v6 }
 0x1bb   : > { %v7464_v28 = vpop.f32.mrb[20].mxu0 }
 0x1bc   : > { %v7465_v5 = vpop.f32.mrb[21].mxu0 }
 0x1bd   : > { %v9711_v36 = vadd.f32 %v7465_v5, %v7464_v28  ;;  %v7467_v51 = vpop.f32.mrb[22].mxu0  ;;  %v8203_v28 = vld [vmem:[%s11406_s3 + $0x50] sm:$0xff]  }
 0x1be   : > { %v7468_v45 = vpop.f32.mrb[23].mxu0  ;;  %7666 = vmatprep.subr.bf16.mxu1 %v8203_v28 }
 0x1bf   : > { %v9713_v19 = vadd.f32 %v7468_v45, %v7467_v51 }
 0x1c3   : > { %v7470_v20 = vpop.f32.mrb[24].mxu0 }
 0x1c4   : > { %v7471_v7 = vpop.f32.mrb[25].mxu0 }
 0x1c5   : > { %v9715_v30 = vadd.f32 %v7471_v7, %v7470_v20  ;;  %v7473_v3 = vpop.f32.mrb[26].mxu0 }
 0x1c6   : > { %v7474_v46 = vpop.f32.mrb[27].mxu0 }
 0x1c7   : > { %v9720_v29 = vadd.f32 %v7474_v46, %v7473_v3  ;;  %v9763_v46 = vld [vmem:[%s11405_s2] ss:$0 sm:$0xff] }
 0x1c8   : > { %v3088_v35 = vadd.f32 %v9692_v1, %v9763_v46 }
 0x1cb   : > { %v7476_v4 = vpop.f32.mrb[28].mxu0 }
 0x1cc   : > { %v7477_v25 = vpop.f32.mrb[29].mxu0 }
 0x1cd   : > { %v9725_v37 = vadd.f32 %v7477_v25, %v7476_v4  ;;  %v7479_v21 = vpop.f32.mrb[30].mxu0  ;;  %v8206_v4 = vld [vmem:[%s11406_s3 + $0x10] sm:$0xff]  }
 0x1ce   : > { %v7480_v2 = vpop.f32.mrb[31].mxu0  ;;  %7667 = vmatpush3.bf16.msra.mxu1 %v8206_v4 }
 0x1cf   : > { %v9727_v13 = vadd.f32 %v7480_v2, %v7479_v21 }
 0x1d3   : > { %v7482_v61 = vpop.f32.mrb[32].mxu0 }
 0x1d4   : > { %v7483_v9 = vpop.f32.mrb[33].mxu0 }
 0x1d5   : > { %v9734_v62 = vadd.f32 %v7483_v9, %v7482_v61  ;;  %v7485_v10 = vpop.f32.mrb[34].mxu0  ;;  %v3085_v61 = vadd.f32 %v9690_v59, %v9763_v46  ;;  %v3093_v59 = vadd.f32 %v9695_v63, %v9763_v46  ;;  %v3101_v63 = vadd.f32 %v9699_v40, %v9763_v46  ;;  %v8220_v40 = vld [vmem:[%s11406_s3 + $0x58] sm:$0xff]  }
 0x1d6   : > { %v7486_v42 = vpop.f32.mrb[35].mxu0  ;;  %7668 = vmatprep.subr.bf16.mxu1 %v8220_v40 }
 0x1d7   : > { %v9738_v16 = vadd.f32 %v7486_v42, %v7485_v10 }
 0x1db   : > { %v7488_v17 = vpop.f32.mrb[36].mxu0 }
 0x1dc   : > { %v7489_v31 = vpop.f32.mrb[37].mxu0 }
 0x1dd   : > { %v9744_v33 = vadd.f32 %v7489_v31, %v7488_v17  ;;  %v7491_v11 = vpop.f32.mrb[38].mxu0 }
 0x1de   : > { %v7492_v8 = vpop.f32.mrb[39].mxu0 }
 0x1df   : > { %v9747_v24 = vadd.f32 %v7492_v8, %v7491_v11  ;;  %v3096_v8 = vadd.f32 %v9697_v43, %v9763_v46  ;;  %v3104_v43 = vadd.f32 %v9701_v18, %v9763_v46  ;;  %v8223_v18 = vld [vmem:[%s11406_s3 + $0x18] sm:$0xff]  }
 0x1e0   : > { %7669 = vmatpush3.bf16.msra.mxu1 %v8223_v18 }
 0x1e3   : > { %v7494_v47 = vpop.f32.mrb[40].mxu0 }
 0x1e4   : > { %v7495_v49 = vpop.f32.mrb[41].mxu0 }
 0x1e5   : > { %v9749_v15 = vadd.f32 %v7495_v49, %v7494_v47  ;;  %v7497_v23 = vpop.f32.mrb[42].mxu0 }
 0x1e6   : > { %v7498_v26 = vpop.f32.mrb[43].mxu0 }
 0x1e7   : > { %v9751_v60 = vadd.f32 %v7498_v26, %v7497_v23 }
 0x1eb   : > { %v7500_v6 = vpop.f32.mrb[44].mxu0 }
 0x1ec   : > { %v7501_v53 = vpop.f32.mrb[45].mxu0 }
 0x1ed   : > { %v9756_v5 = vadd.f32 %v7501_v53, %v7500_v6  ;;  %v7503_v51 = vpop.f32.mrb[46].mxu0 }
 0x1ee   : > { %v7504_v45 = vpop.f32.mrb[47].mxu0 }
 0x1ef   : > { %v9758_v20 = vadd.f32 %v7504_v45, %v7503_v51 }
 0x1f3   : > { %v7506_v7 = vpop.f32.mrb[48].mxu0 }
 0x1f4   : > { %v7507_v3 = vpop.f32.mrb[49].mxu0 }
 0x1f5   : > { %v9765_v54 = vadd.f32 %v7507_v3, %v7506_v7  ;;  %v7509_v50 = vpop.f32.mrb[50].mxu0 }
 0x1f6   : > { %v7510_v21 = vpop.f32.mrb[51].mxu0 }
 0x1f7   : > { %v9770_v38 = vadd.f32 %v7510_v21, %v7509_v50 }
 0x1f8   : > { %v7546_v25 = vpop.f32.mrb[0].mxu1 }
 0x1f9   : > { %v7547_v2 = vpop.f32.mrb[1].mxu1 }
 0x1fa   : > { %v7548_v41 = vadd.f32 %v7547_v2, %v7546_v25  ;;  %v7549_v44 = vpop.f32.mrb[2].mxu1 }
 0x1fb   : > { %v7550_v9 = vpop.f32.mrb[3].mxu1  ;;  %v7512_v42 = vpop.f32.mrb[52].mxu0 }
 0x1fc   : > { %v7551_v10 = vadd.f32 %v7550_v9, %v7549_v44  ;;  %v3246_v57 = vadd.f32 %v7548_v41, %v3085_v61  ;;  %v7513_v14 = vpop.f32.mrb[53].mxu0 }
 0x1fd   : > { %v9778_v34 = vadd.f32 %v7513_v14, %v7512_v42  ;;  %v7515_v22 = vpop.f32.mrb[54].mxu0 }
 0x1fe   : > { %v9776_v58 = vadd.f32 %v7551_v10, %v3088_v35  ;;  %v7516_v27 = vpop.f32.mrb[55].mxu0 }
 0x1ff   : > { %v9780_v31 = vadd.f32 %v7516_v27, %v7515_v22 }
 0x200   : > { %v7552_v56 = vpop.f32.mrb[4].mxu1 }
 0x201   : > { %v7553_v17 = vpop.f32.mrb[5].mxu1 }
 0x202   : > { %v7554_v55 = vadd.f32 %v7553_v17, %v7552_v56  ;;  %v7555_v11 = vpop.f32.mrb[6].mxu1  ;;  %v3109_v56 = vadd.f32 %v9703_v52, %v9763_v46  ;;  %v9818_v52 = vadd.f32 %v9709_v12, %v9763_v46  ;;  %v9831_v12 = vadd.f32 %v9715_v30, %v9763_v46 }
 0x203   : > { %v7556_v1 = vpop.f32.mrb[7].mxu1  ;;  %v7518_v23 = vpop.f32.mrb[56].mxu0 }
 0x204   : > { %v7557_v47 = vadd.f32 %v7556_v1, %v7555_v11  ;;  %v3254_v49 = vadd.f32 %v7554_v55, %v3093_v59  ;;  %v7519_v26 = vpop.f32.mrb[57].mxu0  ;;  %v3112_v55 = vadd.f32 %v9705_v32, %v9763_v46 }
 0x205   : > { %v9786_v53 = vadd.f32 %v7519_v26, %v7518_v23  ;;  %v7521_v28 = vpop.f32.mrb[58].mxu0 }
 0x206   : > { %v3257_v6 = vadd.f32 %v7557_v47, %v3096_v8  ;;  %v7522_v45 = vpop.f32.mrb[59].mxu0 }
 0x207   : > { %v9788_v3 = vadd.f32 %v7522_v45, %v7521_v28  ;;  %v3117_v45 = vadd.f32 %v9707_v48, %v9763_v46 }
 0x208   : > { %v7558_v51 = vpop.f32.mrb[8].mxu1 }
 0x209   : > { %v7559_v7 = vpop.f32.mrb[9].mxu1 }
 0x20a   : > { %v7560_v50 = vadd.f32 %v7559_v7, %v7558_v51  ;;  %v7561_v4 = vpop.f32.mrb[10].mxu1 }
 0x20b   : > { %v7562_v25 = vpop.f32.mrb[11].mxu1  ;;  %v7524_v61 = vpop.f32.mrb[60].mxu0 }
 0x20c   : > { %v7563_v21 = vadd.f32 %v7562_v25, %v7561_v4  ;;  %v9794_v2 = vadd.f32 %v7560_v50, %v3101_v63  ;;  %v7525_v41 = vpop.f32.mrb[61].mxu0  ;;  %v9822_v4 = vadd.f32 %v9711_v36, %v9763_v46  ;;  %v9835_v36 = vadd.f32 %v9720_v29, %v9763_v46 }
 0x20d   : > { %v9798_v9 = vadd.f32 %v7525_v41, %v7524_v61  ;;  %v7527_v35 = vpop.f32.mrb[62].mxu0 }
 0x20e   : > { %v9796_v44 = vadd.f32 %v7563_v21, %v3104_v43  ;;  %v7528_v42 = vpop.f32.mrb[63].mxu0 }
 0x20f   : > { %v9806_v22 = vadd.f32 %v7528_v42, %v7527_v35 }
 0x210   : > { %v7564_v10 = vpop.f32.mrb[12].mxu1 }
 0x211   : > { %v7565_v14 = vpop.f32.mrb[13].mxu1 }
 0x212   : > { %v7566_v27 = vadd.f32 %v7565_v14, %v7564_v10  ;;  %v7567_v17 = vpop.f32.mrb[14].mxu1 }
 0x213   : > { %v7568_v59 = vpop.f32.mrb[15].mxu1  ;;  %v7916_v8 = vpop.f32.mrb[64].mxu0 }
 0x214   : > { %v7569_v11 = vadd.f32 %v7568_v59, %v7567_v17  ;;  %v3270_v1 = vadd.f32 %v7566_v27, %v3109_v56  ;;  %v3415_v47 = vadd.f32 %v7916_v8, %v3254_v49  ;;  %v3406_v23 = vpop.f32.mrb[65].mxu0  ;;  %v9826_v49 = vadd.f32 %v9713_v19, %v9763_v46  ;;  %v3987_v59 = vld [vmem:[#allocation2 + $0x18] sm:$0xf] }
 0x215   : > { %v3407_v28 = vadd.f32 %v3406_v23, %v3246_v57  ;;  %v7917_v51 = vpop.f32.mrb[66].mxu0  ;;  %v9839_v19 = vadd.f32 %v9725_v37, %v9763_v46  ;;  %v3991_v23 = vld [vmem:[#allocation2 + $0x20] sm:$0x1] }
 0x216   : > { %v9812_v26 = vadd.f32 %v7569_v11, %v3112_v55  ;;  %v3535_v63 = vmax.f32 %v3415_v47, 0.0  ;;  %v3418_v50 = vadd.f32 %v7917_v51, %v3257_v6  ;;  %v3409_v32 = vpop.f32.mrb[67].mxu0 }
 0x217   : > { %v3533_v25 = vmax.f32 %v3407_v28, 0.0  ;;  %v3410_v48 = vadd.f32 %v3409_v32, %v9776_v58 }
 0x218   : > { %v7570_v7 = vpop.f32.mrb[16].mxu1  ;;  %v7387_v6 = vpack.c.bf16 %v3535_v63, %v3535_v63  ;;  %v3536_v61 = vmax.f32 %v3418_v50, 0.0 }
 0x219   : > { %v7571_v57 = vpop.f32.mrb[17].mxu1  ;;  %v7385_v35 = vpack.c.bf16 %v3533_v25, %v3533_v25  ;;  %v3534_v40 = vmax.f32 %v3410_v48, 0.0 }
 0x21a   : > { %v7572_v43 = vadd.f32 %v7571_v57, %v7570_v7  ;;  %v7573_v21 = vpop.f32.mrb[18].mxu1  ;;  %v3679_v10 = vshrl.u32 %v7387_v6, 16  ;;  %v3682_v30 = vshll.u32 %v7387_v6, 16  ;;  %v7388_v42 = vpack.c.bf16 %v3536_v61, %v3536_v61 }
 0x21b   : > { %v7574_v41 = vpop.f32.mrb[19].mxu1  ;;  %v3662_v18 = vshrl.u32 %v7385_v35, 16  ;;  %v3665_v14 = vshll.u32 %v7385_v35, 16  ;;  %v7386_v56 = vpack.c.bf16 %v3534_v40, %v3534_v40  ;;  %v7920_v27 = vpop.f32.mrb[68].mxu0 }
 0x21c   : > { %v9841_v58 = vadd.f32 %v7574_v41, %v7573_v21  ;;  %v9843_v17 = vadd.f32 %v7572_v43, %v3117_v45  ;;  %v3681_v29 = vrot.slane %v3679_v10, 7  ;;  %v3687_v55 = vshrl.u32 %v7388_v42, 16  ;;  %v3422_v8 = vpop.f32.mrb[69].mxu0 }
 0x21d   : > { %v3690_v11 = vshll.u32 %v7388_v42, 16  ;;  %v3431_v37 = vadd.f32 %v7920_v27, %v3270_v1  ;;  %v3664_v47 = vrot.slane %v3662_v18, 7  ;;  %v3670_v28 = vshrl.u32 %v7386_v56, 16  ;;  %v7921_v63 = vpop.f32.mrb[70].mxu0  ;;  %v8236_v1 = vld [vmem:[%s11406_s3 + $0x60] sm:$0xff]  }
 0x21e   : > { %v3673_v51 = vshll.u32 %v7386_v56, 16  ;;  %v3423_v7 = vadd.f32 %v3422_v8, %v9794_v2  ;;  %v3684_v32 = vor.u32 %v3682_v30, %v3681_v29  ;;  %v3685_v57 = vrot.slane %v3681_v29, 4  ;;  %v3425_v45 = vpop.f32.mrb[71].mxu0  ;;  %v3984_v18 = vld [vmem:[#allocation2 + $0x14] sm:$0x1]  ;;  %7670 = vmatprep.subr.bf16.mxu1 %v8236_v1 }
 0x21f   : > { %v3689_v25 = vrot.slane %v3687_v55, 7  ;;  %v3539_v48 = vmax.f32 %v3431_v37, 0.0  ;;  %v3667_v21 = vor.u32 %v3665_v14, %v3664_v47  ;;  %v3668_v6 = vrot.slane %v3664_v47, 4  ;;  %v8436_v27 = vld [vmem:[#allocation2 + $0xc] sm:$0xf] }
 0x220   : > { %v7576_v50 = vpop.f32.mrb[20].mxu1  ;;  %v3672_v61 = vrot.slane %v3670_v28, 7  ;;  %v3537_v41 = vmax.f32 %v3423_v7, 0.0  ;;  %v3988_v2 = vsel %vm8695_vm8, %v3684_v32, %v3987_v59  ;;  %v8239_v7 = vld [vmem:[%s11406_s3 + $0x20] sm:$0xff]  }
 0x221   : > { %v7577_v43 = vpop.f32.mrb[21].mxu1  ;;  %v3692_v42 = vor.u32 %v3690_v11, %v3689_v25  ;;  %v3694_v30 = vrot.slane %v3689_v25, 4  ;;  %3989 = vst [vmem:[#allocation2 + $0x18] sm:$0xf] %v3988_v2  ;;  %v3981_v14 = vsel %vm8695_vm8, %v3667_v21, %v8436_v27  ;;  %v7391_v37 = vpack.c.bf16 %v3539_v48, %v3539_v48  ;;  %7671 = vmatpush3.bf16.msra.mxu1 %v8239_v7 }
 0x222   : > { %v7578_v35 = vadd.f32 %v7577_v43, %v7576_v50  ;;  %v7579_v40 = vpop.f32.mrb[22].mxu1  ;;  %v3675_v29 = vor.u32 %v3673_v51, %v3672_v61  ;;  %v3677_v55 = vrot.slane %v3672_v61, 4  ;;  %3982 = vst [vmem:[#allocation2 + $0xc] sm:$0xf] %v3981_v14  ;;  %v7389_v11 = vpack.c.bf16 %v3537_v41, %v3537_v41 }
 0x223   : > { %v7580_v56 = vpop.f32.mrb[23].mxu1  ;;  %v3693_v28 = vsel %vm8687_vm7, %v3685_v57, %v3692_v42  ;;  %v3992_v59 = vsel %vm8642_vm3, %v3694_v30, %v3991_v23  ;;  %v3713_v32 = vshrl.u32 %v7391_v37, 16  ;;  %v3716_v25 = vshll.u32 %v7391_v37, 16  ;;  %v7924_v57 = vpop.f32.mrb[72].mxu0 }
 0x224   : > { %v7581_v8 = vadd.f32 %v7580_v56, %v7579_v40  ;;  %3990 = vst.msk [vmem:[#allocation2 + $0x1c] sm:$0xf] %vm224_vm0, %v3693_v28  ;;  %3993 = vst [vmem:[#allocation2 + $0x20] sm:$0x1] %v3992_v59  ;;  %v3676_v51 = vsel %vm8687_vm7, %v3668_v6, %v3675_v29  ;;  %v3985_v50 = vsel %vm8642_vm3, %v3677_v55, %v3984_v18  ;;  %v3696_v23 = vshrl.u32 %v7389_v11, 16  ;;  %v3438_v61 = vpop.f32.mrb[73].mxu0 }
 0x225   : > { %3983 = vst.msk [vmem:[#allocation2 + $0x10] sm:$0xf] %vm224_vm0, %v3676_v51  ;;  %3986 = vst [vmem:[#allocation2 + $0x14] sm:$0x1] %v3985_v50  ;;  %v3699_v48 = vshll.u32 %v7389_v11, 16  ;;  %v3434_v43 = vadd.f32 %v7921_v63, %v9812_v26  ;;  %v3426_v21 = vadd.f32 %v3425_v45, %v9796_v44  ;;  %v9868_v41 = vrot.slane %v3713_v32, 7 }
 0x226   : > { %v4001_v6 = vld [vmem:[#allocation2 + $0x30] sm:$0xf]  ;;  %v3286_v1 = vadd.f32 %v7578_v35, %v9822_v4  ;;  %v3439_v40 = vadd.f32 %v3438_v61, %v9843_v17  ;;  %v3289_v2 = vadd.f32 %v7581_v8, %v9826_v49  ;;  %v7925_v42 = vpop.f32.mrb[74].mxu0  ;;  %v9873_v18 = vrot.slane %v3696_v23, 7  ;;  %v3994_v4 = vld [vmem:[#allocation2 + $0x24] sm:$0xf] }
 0x227   : > { %v3540_v56 = vmax.f32 %v3434_v43, 0.0  ;;  %v3538_v27 = vmax.f32 %v3426_v21, 0.0  ;;  %v3281_v44 = vadd.f32 %v9841_v58, %v9818_v52  ;;  %v3441_v26 = vpop.f32.mrb[75].mxu0  ;;  %v3718_v45 = vor.u32 %v3716_v25, %v9868_v41  ;;  %v4005_v25 = vld [vmem:[#allocation2 + $0x38] sm:$0x1] }
 0x228   : > { %v7582_v30 = vpop.f32.mrb[24].mxu1  ;;  %v3719_v14 = vrot.slane %v9868_v41, 4  ;;  %v3447_v35 = vadd.f32 %v7924_v57, %v3286_v1  ;;  %v3541_v17 = vmax.f32 %v3439_v40, 0.0  ;;  %v3701_v55 = vor.u32 %v3699_v48, %v9873_v18  ;;  %v3998_v41 = vld [vmem:[#allocation2 + $0x2c] sm:$0x1] }
 0x229   : > { %v7583_v63 = vpop.f32.mrb[25].mxu1  ;;  %v3702_v37 = vrot.slane %v9873_v18, 4  ;;  %v7392_v8 = vpack.c.bf16 %v3540_v56, %v3540_v56  ;;  %v4002_v52 = vsel %vm8695_vm8, %v3718_v45, %v4001_v6  ;;  %v7390_v58 = vpack.c.bf16 %v3538_v27, %v3538_v27  ;;  %v4008_v45 = vld [vmem:[#allocation2 + $0x3c] sm:$0xf] }
 0x22a   : > { %v9879_v29 = vadd.f32 %v7583_v63, %v7582_v30  ;;  %v7585_v49 = vpop.f32.mrb[26].mxu1  ;;  %v3543_v59 = vmax.f32 %v3447_v35, 0.0  ;;  %v7393_v11 = vpack.c.bf16 %v3541_v17, %v3541_v17  ;;  %4003 = vst [vmem:[#allocation2 + $0x30] sm:$0xf] %v4002_v52  ;;  %v3995_v51 = vsel %vm8695_vm8, %v3701_v55, %v3994_v4 }
 0x22b   : > { %v7586_v28 = vpop.f32.mrb[27].mxu1  ;;  %v3721_v50 = vshrl.u32 %v7392_v8, 16  ;;  %v3724_v32 = vshll.u32 %v7392_v8, 16  ;;  %3996 = vst [vmem:[#allocation2 + $0x24] sm:$0xf] %v3995_v51  ;;  %v3704_v57 = vshrl.u32 %v7390_v58, 16  ;;  %v3450_v1 = vadd.f32 %v7925_v42, %v3289_v2 }
 0x22c   : > { %v7587_v7 = vadd.f32 %v7586_v28, %v7585_v49  ;;  %v3707_v23 = vshll.u32 %v7390_v58, 16  ;;  %v7395_v48 = vpack.c.bf16 %v3543_v59, %v3543_v59  ;;  %v3730_v43 = vshrl.u32 %v7393_v11, 16  ;;  %v7928_v21 = vpop.f32.mrb[76].mxu0 }
 0x22d   : > { %v3723_v61 = vrot.slane %v3721_v50, 7  ;;  %v3733_v6 = vshll.u32 %v7393_v11, 16  ;;  %v3442_v40 = vadd.f32 %v3441_v26, %v3281_v44  ;;  %v3454_v30 = vpop.f32.mrb[77].mxu0  ;;  %v3706_v18 = vrot.slane %v3704_v57, 7  ;;  %v8252_v44 = vld [vmem:[%s11406_s3 + $0x68] sm:$0xff]  }
 0x22e   : > { %v3747_v56 = vshrl.u32 %v7395_v48, 16  ;;  %v3750_v27 = vshll.u32 %v7395_v48, 16  ;;  %v9887_v63 = vrot.slane %v3730_v43, 7  ;;  %v9889_v4 = vpop.f32.mrb[78].mxu0  ;;  %v3544_v55 = vmax.f32 %v3450_v1, 0.0  ;;  %7672 = vmatprep.subr.bf16.mxu1 %v8252_v44 }
 0x22f   : > { %v3726_v17 = vor.u32 %v3724_v32, %v3723_v61  ;;  %v3728_v49 = vrot.slane %v3723_v61, 4  ;;  %v3542_v8 = vmax.f32 %v3442_v40, 0.0  ;;  %v3457_v28 = vpop.f32.mrb[79].mxu0  ;;  %v3709_v58 = vor.u32 %v3707_v23, %v3706_v18  ;;  %v4015_v57 = vld [vmem:[#allocation2 + $0x48] sm:$0xf] }
 0x230   : > { %v7588_v35 = vpop.f32.mrb[28].mxu1  ;;  %v3711_v59 = vrot.slane %v3706_v18, 4  ;;  %v9891_v2 = vrot.slane %v3747_v56, 7  ;;  %v3735_v42 = vor.u32 %v3733_v6, %v9887_v63  ;;  %v3144_v26 = vadd.f32 %v9727_v13, %v9763_v46  ;;  %v9919_v56 = vld [vmem:[#allocation2 + $0x10] sm:$0xf] }
 0x231   : > { %v7589_v52 = vpop.f32.mrb[29].mxu1  ;;  %v3727_v50 = vsel %vm8687_vm7, %v3719_v14, %v3726_v17  ;;  %v4006_v32 = vsel %vm8642_vm3, %v3728_v49, %v4005_v25  ;;  %v3710_v48 = vsel %vm8687_vm7, %v3702_v37, %v3709_v58  ;;  %v3736_v61 = vrot.slane %v9887_v63, 4 }
 0x232   : > { %v7590_v11 = vadd.f32 %v7589_v52, %v7588_v35  ;;  %v7591_v51 = vpop.f32.mrb[30].mxu1  ;;  %4004 = vst.msk [vmem:[#allocation2 + $0x34] sm:$0xf] %vm224_vm0, %v3727_v50  ;;  %4007 = vst [vmem:[#allocation2 + $0x38] sm:$0x1] %v4006_v32  ;;  %v3999_v43 = vsel %vm8642_vm3, %v3711_v59, %v3998_v41  ;;  %v3752_v13 = vor.u32 %v3750_v27, %v9891_v2  ;;  %v3753_v63 = vrot.slane %v9891_v2, 4 }
 0x233   : > { %v7592_v23 = vpop.f32.mrb[31].mxu1  ;;  %3997 = vst.msk [vmem:[#allocation2 + $0x28] sm:$0xf] %vm224_vm0, %v3710_v48  ;;  %4000 = vst [vmem:[#allocation2 + $0x2c] sm:$0x1] %v3999_v43  ;;  %v4009_v25 = vsel %vm8695_vm8, %v3735_v42, %v4008_v45  ;;  %v7396_v6 = vpack.c.bf16 %v3544_v55, %v3544_v55  ;;  %v7394_v1 = vpack.c.bf16 %v3542_v8, %v3542_v8  ;;  %v9921_v27 = vpop.f32.mrb[80].mxu0 }
 0x234   : > { %v7593_v14 = vadd.f32 %v7592_v23, %v7591_v51  ;;  %v4016_v37 = vsel %vm8695_vm8, %v3752_v13, %v4015_v57  ;;  %4010 = vst [vmem:[#allocation2 + $0x3c] sm:$0xf] %v4009_v25  ;;  %v3302_v41 = vadd.f32 %v7590_v11, %v9839_v19  ;;  %v3294_v40 = vadd.f32 %v9879_v29, %v9831_v12  ;;  %v9924_v49 = vpop.f32.mrb[81].mxu0  ;;  %v8254_v19 = vld [vmem:[%s11406_s3 + $0x28] sm:$0xff]   ;;  %v4019_v51 = vld [vmem:[#allocation2 + $0x50] sm:$0x1] }
 0x235   : > { %v3297_v18 = vadd.f32 %v7587_v7, %v9835_v36  ;;  %4017 = vst [vmem:[#allocation2 + $0x48] sm:$0xf] %v4016_v37  ;;  %v3755_v45 = vshrl.u32 %v7396_v6, 16  ;;  %v3758_v35 = vshll.u32 %v7396_v6, 16  ;;  %v3738_v17 = vshrl.u32 %v7394_v1, 16  ;;  %v9929_v8 = vpop.f32.mrb[82].mxu0  ;;  %7673 = vmatpush3.bf16.msra.mxu1 %v8254_v19 }
 0x236   : > { %v3463_v55 = vadd.f32 %v7928_v21, %v3302_v41  ;;  %v3455_v12 = vadd.f32 %v3454_v30, %v3294_v40  ;;  %v3305_v29 = vadd.f32 %v7593_v14, %v3144_v26  ;;  %v4156_v7 = vld [vmem:[#allocation2 + $0xc] sm:$0xf]  ;;  %v3741_v2 = vshll.u32 %v7394_v1, 16  ;;  %v9934_v44 = vpop.f32.mrb[83].mxu0  ;;  %v4012_v43 = vld [vmem:[#allocation2 + $0x44] sm:$0x1] }
 0x237   : > { %v3458_v36 = vadd.f32 %v3457_v28, %v3297_v18  ;;  %v3757_v58 = vrot.slane %v3755_v45, 7  ;;  %v3740_v59 = vrot.slane %v3738_v17, 7  ;;  %v9932_v42 = vcombine.low %v4156_v7, %v9919_v56  ;;  %v4159_v18 = vld [vmem:[#allocation2 + $0x1c] sm:$0xf] }
 0x238   : > { %v7594_v52 = vpop.f32.mrb[32].mxu1  ;;  %v3547_v50 = vmax.f32 %v3463_v55, 0.0  ;;  %v3545_v21 = vmax.f32 %v3455_v12, 0.0  ;;  %v3466_v30 = vadd.f32 %v9889_v4, %v3305_v29  ;;  %v4029_v55 = vld [vmem:[#allocation2 + $0x60] sm:$0xf] }
 0x239   : > { %11540 = vst [vmem:[#allocation8_spill] sm:$0xff] %v9932_v42  ;;  %v7595_v11 = vpop.f32.mrb[33].mxu1  ;;  %v3546_v28 = vmax.f32 %v3458_v36, 0.0  ;;  %v3760_v57 = vor.u32 %v3758_v35, %v3757_v58  ;;  %v3762_v23 = vrot.slane %v3757_v58, 4  ;;  %v3743_v48 = vor.u32 %v3741_v2, %v3740_v59  ;;  %4812 = vrot.lane.b32.xlu0 %v9932_v42, %s8557_s10  ;;  %v4158_v36 = vld [vmem:[#allocation2 + $0x18] sm:$0xf] }
 0x23a   : > { %v9937_v26 = vadd.f32 %v7595_v11, %v7594_v52  ;;  %v7597_v32 = vpop.f32.mrb[34].mxu1  ;;  %v3745_v14 = vrot.slane %v3740_v59, 4  ;;  %v7399_v25 = vpack.c.bf16 %v3547_v50, %v3547_v50  ;;  %v7397_v6 = vpack.c.bf16 %v3545_v21, %v3545_v21  ;;  %v4022_v21 = vld [vmem:[#allocation2 + $0x54] sm:$0xf] }
 0x23b   : > { %v7598_v13 = vpop.f32.mrb[35].mxu1  ;;  %v3548_v1 = vmax.f32 %v3466_v30, 0.0  ;;  %v3761_v4 = vsel %vm8687_vm7, %v3753_v63, %v3760_v57  ;;  %v4020_v41 = vsel %vm8642_vm3, %v3762_v23, %v4019_v51  ;;  %v3744_v40 = vsel %vm8687_vm7, %v3736_v61, %v3743_v48  ;;  %v9953_v19 = vpop.f32.mrb[84].mxu0 }
 0x23c   : > { %v9941_v37 = vadd.f32 %v7598_v13, %v7597_v32  ;;  %4018 = vst.msk [vmem:[#allocation2 + $0x4c] sm:$0xf] %vm224_vm0, %v3761_v4  ;;  %4021 = vst [vmem:[#allocation2 + $0x50] sm:$0x1] %v4020_v41  ;;  %v4013_v45 = vsel %vm8642_vm3, %v3745_v14, %v4012_v43  ;;  %v3781_v35 = vshrl.u32 %v7399_v25, 16  ;;  %v3764_v17 = vshrl.u32 %v7397_v6, 16 }
 0x23d   : > { %4011 = vst.msk [vmem:[#allocation2 + $0x40] sm:$0xf] %vm224_vm0, %v3744_v40  ;;  %4014 = vst [vmem:[#allocation2 + $0x44] sm:$0x1] %v4013_v45  ;;  %v3784_v63 = vshll.u32 %v7399_v25, 16  ;;  %v7400_v12 = vpack.c.bf16 %v3548_v1, %v3548_v1  ;;  %v7398_v29 = vpack.c.bf16 %v3546_v28, %v3546_v28  ;;  %v9955_v61 = vpop.f32.mrb[85].mxu0  ;;  %v9957_v59 = vcombine.low %v4158_v36, %v4159_v18 }
 0x23e   : > { %v3783_v7 = vrot.slane %v3781_v35, 7  ;;  %v3766_v52 = vrot.slane %v3764_v17, 7  ;;  %v3767_v58 = vshll.u32 %v7397_v6, 16  ;;  %v9959_v2 = vpop.f32.mrb[86].mxu0  ;;  %v3149_v11 = vadd.f32 %v9734_v62, %v9763_v46  ;;  %v4033_v18 = vld [vmem:[#allocation2 + $0x68] sm:$0x1] }
 0x23f   : > { %11541 = vst [vmem:[#allocation19_spill] sm:$0xff] %v9957_v59  ;;  %v3157_v51 = vadd.f32 %v9744_v33, %v9763_v46  ;;  %v3789_v30 = vshrl.u32 %v7400_v12, 16  ;;  %v3772_v28 = vshrl.u32 %v7398_v29, 16  ;;  %v9965_v32 = vpop.f32.mrb[87].mxu0  ;;  %v3160_v57 = vadd.f32 %v9747_v24, %v9763_v46  ;;  %4814 = vrot.lane.b32.xlu0 %v9957_v59, %s8557_s10  ;;  %v4095_v36 = vld [vmem:[#allocation2 + $0x10] sm:$0xf] }
 0x240   : > { %v7600_v50 = vpop.f32.mrb[36].mxu1  ;;  %v3786_v48 = vor.u32 %v3784_v63, %v3783_v7  ;;  %v3769_v43 = vor.u32 %v3767_v58, %v3766_v52  ;;  %v3792_v13 = vshll.u32 %v7400_v12, 16  ;;  %v3775_v6 = vshll.u32 %v7398_v29, 16  ;;  %v4026_v12 = vld [vmem:[#allocation2 + $0x5c] sm:$0x1]  ;;  %v8266_v29 = vld [vmem:[%s11406_s3 + $0x70] sm:$0xff]  }
 0x241   : > { %v7601_v23 = vpop.f32.mrb[37].mxu1  ;;  %v3791_v25 = vrot.slane %v3789_v30, 7  ;;  %v3774_v33 = vrot.slane %v3772_v28, 7  ;;  %v3787_v4 = vrot.slane %v3783_v7, 4  ;;  %v3770_v40 = vrot.slane %v3766_v52, 4  ;;  %v8268_v30 = vld [vmem:[%s11406_s3 + $0x30] sm:$0xff]   ;;  %7674 = vmatprep.subr.bf16.mxu1 %v8266_v29 }
 0x242   : > { %v7602_v62 = vadd.f32 %v7601_v23, %v7600_v50  ;;  %v7603_v14 = vpop.f32.mrb[38].mxu1  ;;  %v4030_v41 = vsel %vm8695_vm8, %v3786_v48, %v4029_v55  ;;  %v4023_v24 = vsel %vm8695_vm8, %v3769_v43, %v4022_v21  ;;  %v3152_v55 = vadd.f32 %v9738_v16, %v9763_v46  ;;  %v8190_v50 = vld [vmem:[#allocation2 + $0x14] ss:$0 sps:$4 sm:$0x11]   ;;  %7675 = vmatpush3.bf16.msra.mxu1 %v8268_v30 }
 0x243   : > { %v7604_v1 = vpop.f32.mrb[39].mxu1  ;;  %4031 = vst [vmem:[#allocation2 + $0x60] sm:$0xf] %v4030_v41  ;;  %4024 = vst [vmem:[#allocation2 + $0x54] sm:$0xf] %v4023_v24  ;;  %v3794_v35 = vor.u32 %v3792_v13, %v3791_v25  ;;  %v3796_v17 = vrot.slane %v3791_v25, 4  ;;  %v3777_v63 = vor.u32 %v3775_v6, %v3774_v33  ;;  %v3310_v58 = vadd.f32 %v9937_v26, %v3149_v11 }
 0x244   : > { %v7605_v45 = vadd.f32 %v7604_v1, %v7603_v14  ;;  %v3779_v7 = vrot.slane %v3774_v33, 4  ;;  %v3318_v52 = vadd.f32 %v7602_v62, %v3157_v51  ;;  %v9981_v21 = vpop.f32.mrb[88].mxu0  ;;  %v4161_v51 = vld [vmem:[#allocation2 + $0x28] sm:$0xf]  ;;  %v4094_v62 = vld [vmem:[#allocation2 + $0xc] sm:$0xf]  ;;  %v3313_v6 = vadd.f32 %v9941_v37, %v3152_v55 }
 0x245   : > { %v3795_v28 = vsel %vm8687_vm7, %v3787_v4, %v3794_v35  ;;  %v4034_v23 = vsel %vm8642_vm3, %v3796_v17, %v4033_v18  ;;  %v3778_v16 = vsel %vm8687_vm7, %v3770_v40, %v3777_v63  ;;  %v9992_v43 = vpop.f32.mrb[89].mxu0  ;;  %v3471_v13 = vadd.f32 %v9924_v49, %v3310_v58  ;;  %v4160_v1 = vld [vmem:[#allocation2 + $0x24] sm:$0xf] }
 0x246   : > { %v3321_v48 = vadd.f32 %v7605_v45, %v3160_v57  ;;  %4032 = vst.msk [vmem:[#allocation2 + $0x64] sm:$0xf] %vm224_vm0, %v3795_v28  ;;  %4035 = vst [vmem:[#allocation2 + $0x68] sm:$0x1] %v4034_v23  ;;  %v4027_v26 = vsel %vm8642_vm3, %v3779_v7, %v4026_v12  ;;  %v3479_v11 = vadd.f32 %v9921_v27, %v3318_v52  ;;  %v10000_v14 = vpop.f32.mrb[90].mxu0  ;;  %v4432_v17 = vshll.u32 %v8190_v50, 16 }
 0x247   : > { %4025 = vst.msk [vmem:[#allocation2 + $0x58] sm:$0xf] %vm224_vm0, %v3778_v16  ;;  %4028 = vst [vmem:[#allocation2 + $0x5c] sm:$0x1] %v4027_v26  ;;  %v10003_v33 = vcombine.low %v4094_v62, %v4095_v36  ;;  %v10006_v4 = vpop.f32.mrb[91].mxu0  ;;  %v3549_v27 = vmax.f32 %v3471_v13, 0.0  ;;  %v10008_v24 = vcombine.low %v4160_v1, %v4161_v51  ;;  %v3474_v37 = vadd.f32 %v9934_v44, %v3313_v6 }
 0x248   : > { %v7606_v57 = vpop.f32.mrb[40].mxu1  ;;  %v3482_v25 = vadd.f32 %v9929_v8, %v3321_v48  ;;  %v3551_v40 = vmax.f32 %v3479_v11, 0.0  ;;  %v10021_v52 = vadd.f32 %v9749_v15, %v9763_v46  ;;  %v4043_v28 = vld [vmem:[#allocation2 + $0x78] sm:$0xf]  ;;  %v4036_v23 = vld [vmem:[#allocation2 + $0x6c] sm:$0xf] }
 0x249   : > { %v7607_v41 = vpop.f32.mrb[41].mxu1  ;;  %11542 = vst [vmem:[#allocation9_spill] sm:$0xff] %v10008_v24  ;;  %v4427_v35 = vshll.u32 %v10003_v33, 16  ;;  %v7401_v12 = vpack.c.bf16 %v3549_v27, %v3549_v27  ;;  %4816 = vrot.lane.b32.xlu0 %v10008_v24, %s8557_s10  ;;  %v4425_v55 = vshrl.u32 %v10003_v33, 16  ;;  %v4434_v48 = vrot.slane %v4432_v17, 1 }
 0x24a   : > { %v10010_v49 = vadd.f32 %v7607_v41, %v7606_v57  ;;  %v7609_v18 = vpop.f32.mrb[42].mxu1  ;;  %v3552_v45 = vmax.f32 %v3482_v25, 0.0  ;;  %v7403_v63 = vpack.c.bf16 %v3551_v40, %v3551_v40  ;;  %v3550_v51 = vmax.f32 %v3474_v37, 0.0  ;;  %v4097_v26 = vld [vmem:[#allocation2 + $0x1c] sm:$0xf] }
 0x24b   : > { %v7610_v8 = vpop.f32.mrb[43].mxu1  ;;  %v4429_v7 = vrot.slane %v4427_v35, 1  ;;  %v3798_v50 = vshrl.u32 %v7401_v12, 16  ;;  %v10023_v30 = vpop.f32.mrb[92].mxu0  ;;  %v3801_v25 = vshll.u32 %v7401_v12, 16 }
 0x24c   : > { %v10016_v36 = vadd.f32 %v7610_v8, %v7609_v18  ;;  %v7404_v29 = vpack.c.bf16 %v3552_v45, %v3552_v45  ;;  %v3815_v58 = vshrl.u32 %v7403_v63, 16  ;;  %v10025_v11 = vpop.f32.mrb[93].mxu0  ;;  %v3818_v62 = vshll.u32 %v7403_v63, 16  ;;  %v4047_v6 = vld [vmem:[#allocation2 + $0x80] sm:$0x1] }
 0x24d   : > { %v4430_v16 = vor.u32 %v4429_v7, %v4425_v55  ;;  %v3800_v57 = vrot.slane %v3798_v50, 7  ;;  %v10027_v15 = vld [vmem:[#allocation2 + $0x20] ss:$0 sps:$4 sm:$0x11]   ;;  %v10029_v1 = vpop.f32.mrb[94].mxu0  ;;  %v7402_v45 = vpack.c.bf16 %v3550_v51, %v3550_v51  ;;  %v3173_v51 = vadd.f32 %v9756_v5, %v9763_v46 }
 0x24e   : > { %v3823_v44 = vshrl.u32 %v7404_v29, 16  ;;  %v3817_v13 = vrot.slane %v3815_v58, 7  ;;  %v3826_v27 = vshll.u32 %v7404_v29, 16  ;;  %v4096_v35 = vld [vmem:[#allocation2 + $0x18] sm:$0xf]  ;;  %v10032_v17 = vpop.f32.mrb[95].mxu0 }
 0x24f   : > { %v4435_v18 = vsel %vm1232_vm9, %v4430_v16, %v4434_v48  ;;  %v3803_v63 = vor.u32 %v3801_v25, %v3800_v57  ;;  %v10035_v12 = vcombine.low %v4096_v35, %v4097_v26  ;;  %v10037_v7 = vld [vmem:[#allocation2 + $0x34] sm:$0xf]  ;;  %v8280_v29 = vld [vmem:[%s11406_s3 + $0x78] sm:$0xff]   ;;  %v3806_v48 = vshrl.u32 %v7402_v45, 16 }
 0x250   : > { %v7612_v41 = vpop.f32.mrb[44].mxu1  ;;  %v3825_v40 = vrot.slane %v3823_v44, 7  ;;  %v3820_v37 = vor.u32 %v3818_v62, %v3817_v13  ;;  %v3821_v55 = vrot.slane %v3817_v13, 4  ;;  %4606 = vrot.lane.b32.xlu1 %v4435_v18, %s8557_s10  ;;  %v3809_v25 = vshll.u32 %v7402_v45, 16  ;;  %v4040_v18 = vld [vmem:[#allocation2 + $0x74] sm:$0x1]  ;;  %7676 = vmatprep.subr.bf16.mxu1 %v8280_v29 }
 0x251   : > { %v7613_v8 = vpop.f32.mrb[45].mxu1  ;;  %v4037_v26 = vsel %vm8695_vm8, %v3803_v63, %v4036_v23  ;;  %v3808_v5 = vrot.slane %v3806_v48, 7  ;;  %v4439_v23 = vshll.u32 %v10035_v12, 16  ;;  %v4444_v45 = vshll.u32 %v10027_v15, 16 }
 0x252   : > { %v7614_v58 = vadd.f32 %v7613_v8, %v7612_v41  ;;  %v7615_v50 = vpop.f32.mrb[46].mxu1  ;;  %v3828_v44 = vor.u32 %v3826_v27, %v3825_v40  ;;  %v3830_v16 = vrot.slane %v3825_v40, 4  ;;  %v4044_v62 = vsel %vm8695_vm8, %v3820_v37, %v4043_v28  ;;  %4038 = vst [vmem:[#allocation2 + $0x6c] sm:$0xf] %v4037_v26  ;;  %v4162_v27 = vld [vmem:[#allocation2 + $0x30] sm:$0xf] }
 0x253   : > { %v7616_v13 = vpop.f32.mrb[47].mxu1  ;;  %4045 = vst [vmem:[#allocation2 + $0x78] sm:$0xf] %v4044_v62  ;;  %v3176_v28 = vadd.f32 %v9758_v20, %v9763_v46  ;;  %v10058_v8 = vcombine.low %v4162_v27, %v10037_v7  ;;  %v8283_v37 = vld [vmem:[%s11406_s3 + $0x38] sm:$0xff]   ;;  %v3813_v63 = vrot.slane %v3808_v5, 4  ;;  %v4437_v20 = vshrl.u32 %v10035_v12, 16 }
 0x254   : > { %v7617_v35 = vadd.f32 %v7616_v13, %v7615_v50  ;;  %v3829_v41 = vsel %vm8687_vm7, %v3821_v55, %v3828_v44  ;;  %v4048_v40 = vsel %vm8642_vm3, %v3830_v16, %v4047_v6  ;;  %v3804_v6 = vrot.slane %v3800_v57, 4  ;;  %v4099_v50 = vld [vmem:[#allocation2 + $0x28] sm:$0xf]  ;;  %v8198_v16 = vld [vmem:[#allocation2 + $0x2c] ss:$0 sps:$4 sm:$0x11]   ;;  %7677 = vmatpush3.bf16.msra.mxu1 %v8283_v37 }
 0x255   : > { %4046 = vst.msk [vmem:[#allocation2 + $0x7c] sm:$0xf] %vm224_vm0, %v3829_v41  ;;  %4049 = vst [vmem:[#allocation2 + $0x80] sm:$0x1] %v4048_v40  ;;  %v3811_v55 = vor.u32 %v3809_v25, %v3808_v5  ;;  %v3334_v29 = vadd.f32 %v7614_v58, %v3173_v51  ;;  %v4441_v44 = vrot.slane %v4439_v23, 1  ;;  %4818 = vrot.lane.b32.xlu0 %v10058_v8, %s8557_s10  ;;  %v4446_v41 = vrot.slane %v4444_v45, 1 }
 0x256   : > { %v3326_v15 = vadd.f32 %v10010_v49, %v10021_v52  ;;  %v4041_v57 = vsel %vm8642_vm3, %v3813_v63, %v4040_v18  ;;  %v3337_v51 = vadd.f32 %v7617_v35, %v3176_v28  ;;  %v4098_v62 = vld [vmem:[#allocation2 + $0x24] sm:$0xf]  ;;  %v3168_v40 = vadd.f32 %v9751_v60, %v9763_v46  ;;  %v10082_v35 = vld [vmem:[#allocation2 + $0x40] sm:$0xf]  ;;  %v4164_v63 = vld [vmem:[#allocation2 + $0x3c] sm:$0xf] }
 0x257   : > { %v3812_v13 = vsel %vm8687_vm7, %v3804_v6, %v3811_v55  ;;  %v3495_v58 = vadd.f32 %v9953_v19, %v3334_v29  ;;  %4042 = vst [vmem:[#allocation2 + $0x74] sm:$0x1] %v4041_v57  ;;  %v4442_v25 = vor.u32 %v4441_v44, %v4437_v20  ;;  %v10075_v52 = vcombine.low %v4098_v62, %v4099_v50 }
 0x258   : > { %v7618_v48 = vpop.f32.mrb[48].mxu1  ;;  %4039 = vst.msk [vmem:[#allocation2 + $0x70] sm:$0xf] %vm224_vm0, %v3812_v13  ;;  %v3487_v49 = vadd.f32 %v9955_v61, %v3326_v15  ;;  %v3498_v19 = vadd.f32 %v9959_v2, %v3337_v51  ;;  %v4456_v61 = vshll.u32 %v8198_v16, 16  ;;  %v3329_v50 = vadd.f32 %v10016_v36, %v3168_v40  ;;  %v8291_v16 = vld [vmem:[%s11406_s3 + $0xc0] sm:$0xff]  }
 0x259   : > { %v7619_v26 = vpop.f32.mrb[49].mxu1  ;;  %v3555_v27 = vmax.f32 %v3495_v58, 0.0  ;;  %v4447_v23 = vsel %vm1232_vm9, %v4442_v25, %v4446_v41  ;;  %v4451_v45 = vshll.u32 %v10075_v52, 16  ;;  %v4449_v55 = vshrl.u32 %v10075_v52, 16  ;;  %7774 = vmatprep.subr.bf16.mxu0 %v8291_v16  ;;  %v10113_v16 = vld [vmem:[#allocation2 + $0x4c] sm:$0xf] }
 0x25a   : > { %v10079_v5 = vadd.f32 %v7619_v26, %v7618_v48  ;;  %v7621_v18 = vpop.f32.mrb[50].mxu1  ;;  %v3553_v37 = vmax.f32 %v3487_v49, 0.0  ;;  %4608 = vrot.lane.b32.xlu1 %v4447_v23, %s8557_s10  ;;  %v3556_v46 = vmax.f32 %v3498_v19, 0.0  ;;  %v10092_v20 = vcombine.low %v4164_v63, %v10082_v35  ;;  %v4057_v48 = vld [vmem:[#allocation2 + $0x90] sm:$0xf]  ;;  %v8294_v49 = vld [vmem:[%s11406_s3 + $0x80] sm:$0xff]  }
 0x25b   : > { %v7622_v28 = vpop.f32.mrb[51].mxu1  ;;  %v7407_v60 = vpack.c.bf16 %v3555_v27, %v3555_v27  ;;  %v4453_v2 = vrot.slane %v4451_v45, 1  ;;  %v4458_v58 = vrot.slane %v4456_v61, 1  ;;  %v3490_v51 = vadd.f32 %v9965_v32, %v3329_v50  ;;  %v10100_v41 = vld [vmem:[#allocation2 + $0x38] ss:$0 sps:$4 sm:$0x11]   ;;  %7775 = vmatpush3.bf16.msra.mxu0 %v8294_v49 }
 0x25c   : > { %v10086_v6 = vadd.f32 %v7622_v28, %v7621_v18  ;;  %v7405_v29 = vpack.c.bf16 %v3553_v37, %v3553_v37  ;;  %v7408_v15 = vpack.c.bf16 %v3556_v46, %v3556_v46  ;;  %4820 = vrot.lane.b32.xlu0 %v10092_v20, %s8557_s10  ;;  %v4050_v19 = vld [vmem:[#allocation2 + $0x84] sm:$0xf]  ;;  %v4101_v46 = vld [vmem:[#allocation2 + $0x34] sm:$0xf] }
 0x25d   : > { %v3849_v44 = vshrl.u32 %v7407_v60, 16  ;;  %v4454_v57 = vor.u32 %v4453_v2, %v4449_v55  ;;  %v3852_v26 = vshll.u32 %v7407_v60, 16  ;;  %v3554_v28 = vmax.f32 %v3490_v51, 0.0  ;;  %v8297_v55 = vld [vmem:[%s11406_s3 + $0x100] sm:$0xff]   ;;  %v4061_v2 = vld [vmem:[#allocation2 + $0x98] sm:$0x1] }
 0x25e   : > { %v3832_v13 = vshrl.u32 %v7405_v29, 16  ;;  %v3857_v25 = vshrl.u32 %v7408_v15, 16  ;;  %v3835_v27 = vshll.u32 %v7405_v29, 16  ;;  %v3860_v60 = vshll.u32 %v7408_v15, 16  ;;  %v4100_v51 = vld [vmem:[#allocation2 + $0x30] sm:$0xf]  ;;  %7946 = vmatprep.subr.bf16.mxu1 %v8297_v55 }
 0x25f   : > { %v3851_v36 = vrot.slane %v3849_v44, 7  ;;  %v4459_v32 = vsel %vm1232_vm9, %v4454_v57, %v4458_v58  ;;  %v7406_v44 = vpack.c.bf16 %v3554_v28, %v3554_v28  ;;  %v10126_v49 = vcombine.low %v4100_v51, %v4101_v46 }
 0x260   : > { %v7624_v62 = vpop.f32.mrb[52].mxu1  ;;  %v10105_v18 = vrot.slane %v3832_v13, 7  ;;  %v3859_v61 = vrot.slane %v3857_v25, 7  ;;  %4610 = vrot.lane.b32.xlu1 %v4459_v32, %s8557_s10  ;;  %v4054_v32 = vld [vmem:[#allocation2 + $0x8c] sm:$0x1]  ;;  %v4468_v28 = vshll.u32 %v10100_v41, 16 }
 0x261   : > { %v7625_v40 = vpop.f32.mrb[53].mxu1  ;;  %v3854_v37 = vor.u32 %v3852_v26, %v3851_v36  ;;  %v3855_v63 = vrot.slane %v3851_v36, 4  ;;  %v3840_v25 = vshrl.u32 %v7406_v44, 16  ;;  %11543 = vst [vmem:[#allocation20_spill] sm:$0xff] %v10126_v49 }
 0x262   : > { %v7626_v23 = vadd.f32 %v7625_v40, %v7624_v62  ;;  %v7627_v45 = vpop.f32.mrb[54].mxu1  ;;  %v3837_v29 = vor.u32 %v3835_v27, %v10105_v18  ;;  %v3862_v15 = vor.u32 %v3860_v60, %v3859_v61  ;;  %v3864_v57 = vrot.slane %v3859_v61, 4  ;;  %v10120_v62 = vld [vmem:[%s11405_s2] ss:$0 sm:$0xff]  ;;  %v8302_v60 = vld [vmem:[%s11406_s3 + $0xc8] sm:$0xff]  }
 0x263   : > { %v7628_v50 = vpop.f32.mrb[55].mxu1  ;;  %v4058_v13 = vsel %vm8695_vm8, %v3854_v37, %v4057_v48  ;;  %v3189_v36 = vadd.f32 %v10120_v62, %v9778_v34  ;;  %v4166_v48 = vld [vmem:[#allocation2 + $0x48] sm:$0xf]  ;;  %v3842_v37 = vrot.slane %v3840_v25, 7  ;;  %v4463_v61 = vshll.u32 %v10126_v49, 16  ;;  %7776 = vmatprep.subr.bf16.mxu0 %v8302_v60 }
 0x264   : > { %v7629_v58 = vadd.f32 %v7628_v50, %v7627_v45  ;;  %4059 = vst [vmem:[#allocation2 + $0x90] sm:$0xf] %v4058_v13  ;;  %v4051_v26 = vsel %vm8695_vm8, %v3837_v29, %v4050_v19  ;;  %v3863_v40 = vsel %vm8687_vm7, %v3855_v63, %v3862_v15  ;;  %v4062_v27 = vsel %vm8642_vm3, %v3864_v57, %v4061_v2  ;;  %v8208_v29 = vld [vmem:[#allocation2 + $0x44] ss:$0 sps:$4 sm:$0x11]  }
 0x265   : > { %4052 = vst [vmem:[#allocation2 + $0x84] sm:$0xf] %v4051_v26  ;;  %v10134_v34 = vcombine.low %v4166_v48, %v10113_v16  ;;  %v3181_v19 = vadd.f32 %v10120_v62, %v9765_v54  ;;  %4060 = vst.msk [vmem:[#allocation2 + $0x94] sm:$0xf] %vm224_vm0, %v3863_v40  ;;  %v3843_v45 = vshll.u32 %v7406_v44, 16  ;;  %v3184_v41 = vadd.f32 %v10120_v62, %v9770_v38 }
 0x266   : > { %4063 = vst [vmem:[#allocation2 + $0x98] sm:$0x1] %v4062_v27  ;;  %v3192_v46 = vadd.f32 %v10120_v62, %v9780_v31  ;;  %v3838_v55 = vrot.slane %v10105_v18, 4  ;;  %v3350_v63 = vadd.f32 %v7626_v23, %v3189_v36  ;;  %v3847_v50 = vrot.slane %v3842_v37, 4  ;;  %v4103_v57 = vld [vmem:[#allocation2 + $0x40] sm:$0xf] }
 0x267   : > { %4822 = vrot.lane.b32.xlu0 %v10134_v34, %s8557_s10  ;;  %v3845_v2 = vor.u32 %v3843_v45, %v3842_v37  ;;  %v4461_v44 = vshrl.u32 %v10126_v49, 16  ;;  %v4465_v13 = vrot.slane %v4463_v61, 1  ;;  %v4470_v38 = vrot.slane %v4468_v28, 1  ;;  %v8305_v23 = vld [vmem:[%s11406_s3 + $0x88] sm:$0xff]   ;;  %v4102_v27 = vld [vmem:[#allocation2 + $0x3c] sm:$0xf] }
 0x268   : > { %v7630_v54 = vpop.f32.mrb[56].mxu1  ;;  %v3511_v31 = vadd.f32 %v9981_v21, %v3350_v63  ;;  %v3342_v26 = vadd.f32 %v10079_v5, %v3181_v19  ;;  %v4055_v25 = vsel %vm8642_vm3, %v3847_v50, %v4054_v32  ;;  %v3353_v40 = vadd.f32 %v7629_v58, %v3192_v46  ;;  %v10166_v45 = vld [vmem:[#allocation2 + $0x58] sm:$0xf]  ;;  %7777 = vmatpush3.bf16.msra.mxu0 %v8305_v23 }
 0x269   : > { %v7631_v15 = vpop.f32.mrb[57].mxu1  ;;  %v3846_v36 = vsel %vm8687_vm7, %v3838_v55, %v3845_v2  ;;  %v4466_v48 = vor.u32 %v4465_v13, %v4461_v44  ;;  %4056 = vst [vmem:[#allocation2 + $0x8c] sm:$0x1] %v4055_v25  ;;  %v10164_v19 = vcombine.low %v4102_v27, %v4103_v57  ;;  %v4480_v37 = vshll.u32 %v8208_v29, 16  ;;  %v4064_v25 = vld [vmem:[#allocation2 + $0x9c] sm:$0xf] }
 0x26a   : > { %v10151_v51 = vadd.f32 %v7631_v15, %v7630_v54  ;;  %v7633_v18 = vpop.f32.mrb[58].mxu1  ;;  %4053 = vst.msk [vmem:[#allocation2 + $0x88] sm:$0xf] %vm224_vm0, %v3846_v36  ;;  %v3559_v21 = vmax.f32 %v3511_v31, 0.0  ;;  %v3503_v5 = vadd.f32 %v9992_v43, %v3342_v26  ;;  %v3514_v32 = vadd.f32 %v10000_v14, %v3353_v40  ;;  %v4168_v54 = vld [vmem:[#allocation2 + $0x54] sm:$0xf] }
 0x26b   : > { %v7634_v28 = vpop.f32.mrb[59].mxu1  ;;  %11544 = vst [vmem:[#allocation10_spill] sm:$0xff] %v10164_v19  ;;  %v4471_v61 = vsel %vm1232_vm9, %v4466_v48, %v4470_v38  ;;  %v3345_v58 = vadd.f32 %v10086_v6, %v3184_v41  ;;  %v4475_v43 = vshll.u32 %v10164_v19, 16  ;;  %v10177_v2 = vcombine.low %v4168_v54, %v10166_v45  ;;  %v4104_v27 = vld [vmem:[#allocation2 + $0x48] sm:$0xf] }
 0x26c   : > { %v10170_v60 = vadd.f32 %v7634_v28, %v7633_v18  ;;  %4612 = vrot.lane.b32.xlu1 %v4471_v61, %s8557_s10  ;;  %v7411_v46 = vpack.c.bf16 %v3559_v21, %v3559_v21  ;;  %v3557_v55 = vmax.f32 %v3503_v5, 0.0  ;;  %v3560_v63 = vmax.f32 %v3514_v32, 0.0  ;;  %v4105_v28 = vld [vmem:[#allocation2 + $0x4c] sm:$0xf]  ;;  %v4236_v49 = vld [vmem:[#allocation2 + $0x78] sm:$0xf] }
 0x26d   : > { %v3506_v29 = vadd.f32 %v10006_v4, %v3345_v58  ;;  %v4473_v14 = vshrl.u32 %v10164_v19, 16  ;;  %v4477_v13 = vrot.slane %v4475_v43, 1  ;;  %v4482_v41 = vrot.slane %v4480_v37, 1  ;;  %4824 = vrot.lane.b32.xlu0 %v10177_v2, %s8557_s10  ;;  %v4071_v4 = vld [vmem:[#allocation2 + $0xa8] sm:$0xf] }
 0x26e   : > { %v3883_v50 = vshrl.u32 %v7411_v46, 16  ;;  %v7409_v44 = vpack.c.bf16 %v3557_v55, %v3557_v55  ;;  %v7412_v6 = vpack.c.bf16 %v3560_v63, %v3560_v63  ;;  %v3886_v18 = vshll.u32 %v7411_v46, 16  ;;  %v8212_v58 = vld [vmem:[#allocation2 + $0x50] ss:$0 sps:$4 sm:$0x11]  }
 0x26f   : > { %v3558_v57 = vmax.f32 %v3506_v29, 0.0  ;;  %v4478_v23 = vor.u32 %v4477_v13, %v4473_v14  ;;  %v3197_v46 = vadd.f32 %v10120_v62, %v9786_v53  ;;  %v4075_v14 = vld [vmem:[#allocation2 + $0xb0] sm:$0x1]  ;;  %v4068_v13 = vld [vmem:[#allocation2 + $0xa4] sm:$0x1] }
 0x270   : > { %v10180_v15 = vpop.f32.mrb[60].mxu1  ;;  %v3885_v31 = vrot.slane %v3883_v50, 7  ;;  %v3866_v26 = vshrl.u32 %v7409_v44, 16  ;;  %v3891_v48 = vshrl.u32 %v7412_v6, 16  ;;  %v3869_v61 = vshll.u32 %v7409_v44, 16 }
 0x271   : > { %v7637_v38 = vpop.f32.mrb[61].mxu1  ;;  %v7410_v40 = vpack.c.bf16 %v3558_v57, %v3558_v57  ;;  %v4483_v32 = vsel %vm1232_vm9, %v4478_v23, %v4482_v41  ;;  %v3894_v43 = vshll.u32 %v7412_v6, 16  ;;  %v10194_v57 = vcombine.low %v4104_v27, %v4105_v28  ;;  %v4170_v53 = vld [vmem:[#allocation2 + $0x60] sm:$0xf]  ;;  %v10196_v23 = vld [vmem:[#allocation2 + $0x64] sm:$0xf] }
 0x272   : > { %v10184_v36 = vpop.f32.mrb[62].mxu1  ;;  %v3888_v5 = vor.u32 %v3886_v18, %v3885_v31  ;;  %v3868_v37 = vrot.slane %v3866_v26, 7  ;;  %v3893_v55 = vrot.slane %v3891_v48, 7  ;;  %4614 = vrot.lane.b32.xlu1 %v4483_v32, %s8557_s10  ;;  %v3889_v63 = vrot.slane %v3885_v31, 4  ;;  %v8308_v6 = vld [vmem:[%s11406_s3 + $0xd0] sm:$0xff]  }
 0x273   : > { %v10186_v21 = vpop.f32.mrb[63].mxu1  ;;  %v3874_v54 = vshrl.u32 %v7410_v40, 16  ;;  %11545 = vst [vmem:[#allocation21_spill] sm:$0xff] %v10194_v57  ;;  %v3877_v26 = vshll.u32 %v7410_v40, 16  ;;  %v4487_v48 = vshll.u32 %v10194_v57, 16  ;;  %v4492_v27 = vshll.u32 %v8212_v58, 16  ;;  %7778 = vmatprep.subr.bf16.mxu0 %v8308_v6 }
 0x274   : > { %v4072_v29 = vsel %vm8695_vm8, %v3888_v5, %v4071_v4  ;;  %v3871_v50 = vor.u32 %v3869_v61, %v3868_v37  ;;  %v3896_v44 = vor.u32 %v3894_v43, %v3893_v55  ;;  %v3898_v41 = vrot.slane %v3893_v55, 4  ;;  %v8311_v28 = vld [vmem:[%s11406_s3 + $0x90] sm:$0xff]   ;;  %v8313_v6 = vld [vmem:[%s11406_s3 + $0x98] sm:$0xff]  }
 0x275   : > { %4073 = vst [vmem:[#allocation2 + $0xa8] sm:$0xf] %v4072_v29  ;;  %v3876_v18 = vrot.slane %v3874_v54, 7  ;;  %v3872_v31 = vrot.slane %v3868_v37, 4  ;;  %v4107_v37 = vld [vmem:[#allocation2 + $0x58] sm:$0xf]  ;;  %v10216_v43 = vcombine.low %v4170_v53, %v10196_v23  ;;  %7779 = vmatpush3.bf16.msra.mxu0 %v8311_v28 }
 0x276   : > { %v4065_v4 = vsel %vm8695_vm8, %v3871_v50, %v4064_v25  ;;  %v3897_v40 = vsel %vm8687_vm7, %v3889_v63, %v3896_v44  ;;  %v4076_v5 = vsel %vm8642_vm3, %v3898_v41, %v4075_v14  ;;  %v3205_v25 = vadd.f32 %v10120_v62, %v9798_v9  ;;  %v8216_v54 = vld [vmem:[#allocation2 + $0x5c] ss:$0 sps:$4 sm:$0x11]   ;;  %v10229_v41 = vld [vmem:[#allocation2 + $0xc] sm:$0xe] }
 0x277   : > { %4066 = vst [vmem:[#allocation2 + $0x9c] sm:$0xf] %v4065_v4  ;;  %v3879_v61 = vor.u32 %v3877_v26, %v3876_v18  ;;  %v3881_v32 = vrot.slane %v3876_v18, 4  ;;  %4074 = vst.msk [vmem:[#allocation2 + $0xac] sm:$0xf] %vm224_vm0, %v3897_v40  ;;  %v4485_v58 = vshrl.u32 %v10194_v57, 16  ;;  %v7638_v50 = vadd.f32 %v7637_v38, %v10180_v15  ;;  %4826 = vrot.lane.b32.xlu0 %v10216_v43, %s8557_s10 }
 0x278   : > { %4077 = vst [vmem:[#allocation2 + $0xb0] sm:$0x1] %v4076_v5  ;;  %v4489_v55 = vrot.slane %v4487_v48, 1  ;;  %11546 = vst [vmem:[#allocation11_spill] sm:$0xff] %v10216_v43  ;;  %v8312_v63 = vld [vmem:[%s11406_s3 + $0xd8] sm:$0xff]   ;;  %v3358_v14 = vadd.f32 %v10151_v51, %v3197_v46  ;;  %v3200_v44 = vadd.f32 %v10120_v62, %v9788_v3  ;;  %v4494_v26 = vrot.slane %v4492_v27, 1 }
 0x279   : > { %v3880_v29 = vsel %vm8687_vm7, %v3872_v31, %v3879_v61  ;;  %v4069_v9 = vsel %vm8642_vm3, %v3881_v32, %v4068_v13  ;;  %v4106_v53 = vld [vmem:[#allocation2 + $0x54] sm:$0xf]  ;;  %7780 = vmatprep.subr.bf16.mxu0 %v8312_v63  ;;  %v3208_v15 = vadd.f32 %v10120_v62, %v9806_v22  ;;  %v3366_v38 = vadd.f32 %v7638_v50, %v3205_v25  ;;  %v4221_v3 = vld [vmem:[#allocation2 + $0x1c] sm:$0xf]  ;;  %v4220_v22 = vld [vmem:[#allocation2 + $0x18] sm:$0xf] }
 0x27a   : > { %4067 = vst.msk [vmem:[#allocation2 + $0xa0] sm:$0xf] %vm224_vm0, %v3880_v29  ;;  %4070 = vst [vmem:[#allocation2 + $0xa4] sm:$0x1] %v4069_v9  ;;  %v4490_v18 = vor.u32 %v4489_v55, %v4485_v58  ;;  %v3519_v51 = vadd.f32 %v10025_v11, %v3358_v14  ;;  %v10237_v46 = vcombine.low %v4106_v53, %v4107_v37  ;;  %v4504_v4 = vshll.u32 %v8216_v54, 16  ;;  %v8314_v5 = vld [vmem:[%s11406_s3 + $0xe0] sm:$0xff]  }
 0x27b   : > { %v8218_v13 = vld [vmem:[#allocation2 + $0x20] ss:$0 sps:$4 sm:$0x11]   ;;  %v7641_v48 = vadd.f32 %v10186_v21, %v10184_v36  ;;  %v3361_v27 = vadd.f32 %v10170_v60, %v3200_v44  ;;  %v7230_v11 = vcombine.low %v10229_v41, %v9919_v56  ;;  %v3527_v62 = vadd.f32 %v10023_v30, %v3366_v38  ;;  %7781 = vmatpush3.bf16.msra.mxu0 %v8313_v6  ;;  %v8219_v44 = vld [vmem:[#allocation2 + $0x14] ss:$0 sps:$4 sm:$0x11]  }
 0x27c   : > { %11547 = vst [vmem:[#allocation22_spill] sm:$0xff] %v10237_v46  ;;  %v4495_v31 = vsel %vm1232_vm9, %v4490_v18, %v4494_v26  ;;  %v3561_v28 = vmax.f32 %v3519_v51, 0.0  ;;  %v4499_v40 = vshll.u32 %v10237_v46, 16  ;;  %v4497_v36 = vshrl.u32 %v10237_v46, 16  ;;  %7782 = vmatprep.subr.bf16.mxu0 %v8314_v5  ;;  %v8315_v30 = vld [vmem:[%s11406_s3 + $0xa0] sm:$0xff]  }
 0x27d   : > { %4616 = vrot.lane.b32.xlu1 %v4495_v31, %s8557_s10  ;;  %v3369_v21 = vadd.f32 %v7641_v48, %v3208_v15  ;;  %v3522_v60 = vadd.f32 %v10032_v17, %v3361_v27  ;;  %v10256_v61 = vcombine.low %v4220_v22, %v4221_v3  ;;  %v3563_v56 = vmax.f32 %v3527_v62, 0.0  ;;  %v8316_v17 = vld [vmem:[%s11406_s3 + $0xe8] sm:$0xff]   ;;  %v4085_v31 = vld [vmem:[#allocation2 + $0xc0] sm:$0xf]  ;;  %v4082_v5 = vld [vmem:[#allocation2 + $0xbc] sm:$0x1] }
 0x27e   : > { %v7413_v32 = vpack.c.bf16 %v3561_v28, %v3561_v28  ;;  %v4501_v37 = vrot.slane %v4499_v40, 1  ;;  %v5348_v25 = vshll.u32 %v8218_v13, 16  ;;  %v4506_v58 = vrot.slane %v4504_v4, 1  ;;  %v8318_v13 = vld [vmem:[%s11406_s3 + $0xf0] sm:$0xff]   ;;  %v4180_v57 = vld [vmem:[#allocation2 + $0x9c] sm:$0xf] }
 0x27f   : > { %11548 = vst [vmem:[#allocation12_spill] sm:$0xff] %v10256_v61  ;;  %v3530_v55 = vadd.f32 %v10029_v1, %v3369_v21  ;;  %v3562_v54 = vmax.f32 %v3522_v60, 0.0  ;;  %v5343_v63 = vshll.u32 %v10256_v61, 16  ;;  %v7415_v29 = vpack.c.bf16 %v3563_v56, %v3563_v56  ;;  %7783 = vmatpush3.bf16.msra.mxu0 %v8315_v30  ;;  %v8317_v1 = vld [vmem:[%s11406_s3 + $0xa8] sm:$0xff]   ;;  %v4078_v4 = vld [vmem:[#allocation2 + $0xb4] sm:$0xf] }
 0x280   : > { %v3900_v9 = vshrl.u32 %v7413_v32, 16  ;;  %v4502_v50 = vor.u32 %v4501_v37, %v4497_v36  ;;  %v5341_v14 = vshrl.u32 %v10256_v61, 16  ;;  %v3903_v41 = vshll.u32 %v7413_v32, 16  ;;  %7784 = vmatprep.subr.bf16.mxu0 %v8316_v17  ;;  %v4109_v21 = vld [vmem:[#allocation2 + $0x64] sm:$0xf]  ;;  %v8319_v60 = vld [vmem:[%s11406_s3 + $0xb0] sm:$0xff]  }
 0x281   : > { %v3564_v18 = vmax.f32 %v3530_v55, 0.0  ;;  %v7414_v26 = vpack.c.bf16 %v3562_v54, %v3562_v54  ;;  %v5345_v53 = vrot.slane %v5343_v63, 1  ;;  %v3917_v15 = vshrl.u32 %v7415_v29, 16  ;;  %v10279_v30 = vld [vmem:[#allocation2 + $0x70] sm:$0xf] }
 0x282   : > { %v3902_v38 = vrot.slane %v3900_v9, 7  ;;  %v4507_v51 = vsel %vm1232_vm9, %v4502_v50, %v4506_v58  ;;  %v5350_v3 = vrot.slane %v5348_v25, 1  ;;  %v3920_v6 = vshll.u32 %v7415_v29, 16  ;;  %v4108_v58 = vld [vmem:[#allocation2 + $0x60] sm:$0xf] }
 0x283   : > { %4618 = vrot.lane.b32.xlu1 %v4507_v51, %s8557_s10  ;;  %v7416_v48 = vpack.c.bf16 %v3564_v18, %v3564_v18  ;;  %v3908_v27 = vshrl.u32 %v7414_v26, 16  ;;  %v5346_v22 = vor.u32 %v5345_v53, %v5341_v14  ;;  %v3919_v62 = vrot.slane %v3917_v15, 7  ;;  %7785 = vmatpush3.bf16.msra.mxu0 %v8317_v1  ;;  %v8225_v55 = vld [vmem:[#allocation2 + $0x68] ss:$0 sps:$4 sm:$0x11]  }
 0x284   : > { %v3905_v28 = vor.u32 %v3903_v41, %v3902_v38  ;;  %v3911_v40 = vshll.u32 %v7414_v26, 16  ;;  %v5132_v36 = vrot.slane %v7230_v11, 1  ;;  %v3906_v56 = vrot.slane %v3902_v38, 4  ;;  %7786 = vmatprep.subr.bf16.mxu0 %v8318_v13  ;;  %v8320_v11 = vld [vmem:[%s11406_s3 + $0xf8] sm:$0xff]   ;;  %v4172_v18 = vld [vmem:[#allocation2 + $0x6c] sm:$0xf] }
 0x285   : > { %v3925_v32 = vshrl.u32 %v7416_v48, 16  ;;  %v3910_v37 = vrot.slane %v3908_v27, 7  ;;  %v5351_v25 = vsel %vm1232_vm9, %v5346_v22, %v5350_v3  ;;  %v3922_v54 = vor.u32 %v3920_v6, %v3919_v62  ;;  %v4089_v53 = vld [vmem:[#allocation2 + $0xc8] sm:$0x1]  ;;  %v10435_v24 = vld [vmem:[#allocation2 + $0xa0] sm:$0xf] }
 0x286   : > { %v4079_v63 = vsel %vm8695_vm8, %v3905_v28, %v4078_v4  ;;  %v3928_v17 = vshll.u32 %v7416_v48, 16  ;;  %5532 = vrot.lane.b32.xlu0 %v5351_v25, %s8557_s10  ;;  %v5133_v29 = vrot.slane %v8219_v44, 1  ;;  %v3923_v9 = vrot.slane %v3919_v62, 4  ;;  %v8321_v44 = vld [vmem:[%s11406_s3 + $0xb8] sm:$0xff]   ;;  %v4223_v6 = vld [vmem:[#allocation2 + $0x28] sm:$0xf] }
 0x287   : > { %4080 = vst [vmem:[#allocation2 + $0xb4] sm:$0xf] %v4079_v63  ;;  %v3927_v50 = vrot.slane %v3925_v32, 7  ;;  %v3913_v14 = vor.u32 %v3911_v40, %v3910_v37  ;;  %v3915_v41 = vrot.slane %v3910_v37, 4  ;;  %v4086_v26 = vsel %vm8695_vm8, %v3922_v54, %v4085_v31  ;;  %7787 = vmatpush3.bf16.msra.mxu0 %v8319_v60  ;;  %v4205_v48 = vld [vmem:[#allocation2 + $0x18] sm:$0xe] }
 0x288   : > { %v5134_v1 = vsel %vm1505_vm10, %v5132_v36, %v5133_v29  ;;  %v10291_v15 = vcombine.low %v4172_v18, %v10279_v30  ;;  %v10293_v38 = vcombine.low %v4108_v58, %v4109_v21  ;;  %4087 = vst [vmem:[#allocation2 + $0xc0] sm:$0xf] %v4086_v26  ;;  %7788 = vmatprep.subr.bf16.mxu0 %v8320_v11  ;;  %v4931_v31 = vshll.u32 %v10058_v8, 16  ;;  %v8227_v4 = vld [vmem:[#allocation2 + $0x2c] ss:$0 sps:$4 sm:$0x11]  }
 0x289   : > { %v3930_v51 = vor.u32 %v3928_v17, %v3927_v50  ;;  %v3932_v3 = vrot.slane %v3927_v50, 4  ;;  %v3914_v10 = vsel %vm8687_vm7, %v3906_v56, %v3913_v14  ;;  %v4083_v13 = vsel %vm8642_vm3, %v3915_v41, %v4082_v5  ;;  %5180 = vrot.lane.b32.xlu1 %v5134_v1, %s8557_s10  ;;  %v4222_v40 = vld [vmem:[#allocation2 + $0x24] sm:$0xf]  ;;  %v8228_v21 = vld [vmem:[#allocation2 + $0x20] ss:$0 sps:$4 sm:$0x11]  }
 0x28a   : > { %11549 = vst [vmem:[#allocation13_spill] sm:$0xff] %v10291_v15  ;;  %11550 = vst [vmem:[#allocation14_spill] sm:$0xff] %v10293_v38  ;;  %4828 = vrot.lane.b32.xlu0 %v10291_v15, %s8557_s10  ;;  %v4511_v62 = vshll.u32 %v10293_v38, 16  ;;  %v4516_v28 = vshll.u32 %v8225_v55, 16  ;;  %v10314_v36 = vcombine.low %v4222_v40, %v4223_v6  ;;  %v4111_v60 = vld [vmem:[#allocation2 + $0x70] sm:$0xf] }
 0x28b   : > { %4081 = vst.msk [vmem:[#allocation2 + $0xb8] sm:$0xf] %vm224_vm0, %v3914_v10  ;;  %4084 = vst [vmem:[#allocation2 + $0xbc] sm:$0x1] %v4083_v13  ;;  %v3931_v27 = vsel %vm8687_vm7, %v3923_v9, %v3930_v51  ;;  %v4090_v22 = vsel %vm8642_vm3, %v3932_v3, %v4089_v53  ;;  %7789 = vmatpush3.bf16.msra.mxu0 %v8321_v44  ;;  %v8438_v56 = vld [vmem:[#allocation2 + $0x1c] sm:$0xf] }
 0x28c   : > { %4088 = vst.msk [vmem:[#allocation2 + $0xc4] sm:$0xf] %vm224_vm0, %v3931_v27  ;;  %4091 = vst [vmem:[#allocation2 + $0xc8] sm:$0x1] %v4090_v22  ;;  %v7231_v47 = vcombine.low %v4205_v48, %v8438_v56  ;;  %v4209_v32 = vld [vmem:[#allocation2 + $0x48] sm:$0xe] }
 0x28d   : > { %11551 = vst [vmem:[#allocation15_spill] sm:$0xff] %v10314_v36  ;;  %v4509_v0 = vshrl.u32 %v10293_v38, 16  ;;  %v4513_v37 = vrot.slane %v4511_v62, 1  ;;  %v4110_v25 = vld [vmem:[#allocation2 + $0x6c] sm:$0xf]  ;;  %v4943_v58 = vshll.u32 %v10092_v20, 16  ;;  %v7235_v41 = vcombine.low %v4209_v32, %v10113_v16 }
 0x28e   : > { %v5355_v55 = vshll.u32 %v10314_v36, 16  ;;  %v5360_v11 = vshll.u32 %v8227_v4, 16  ;;  %v8232_v54 = vld [vmem:[#allocation2 + $0x74] ss:$0 sps:$4 sm:$0x11]   ;;  %v10319_v63 = vrot.slane %v4931_v31, 1  ;;  %v10321_v9 = vcombine.low %v4110_v25, %v4111_v60 }
 0x28f   : > { %v4514_v17 = vor.u32 %v4513_v37, %v4509_v0  ;;  %v4518_v29 = vrot.slane %v4516_v28, 1  ;;  %v4225_v50 = vld [vmem:[#allocation2 + $0x34] sm:$0xf]  ;;  %v5353_v18 = vshrl.u32 %v10314_v36, 16  ;;  %v5135_v1 = vrot.slane %v7231_v47, 1  ;;  %11564 = vst [vmem:[#allocation30_spill] sm:$0xff] %v10435_v24 }
 0x290   : > { %11552 = vst [vmem:[#allocation16_spill] sm:$0xff] %v10321_v9  ;;  %v5357_v26 = vrot.slane %v5355_v55, 1  ;;  %v5136_v44 = vrot.slane %v8228_v21, 1  ;;  %v4523_v51 = vshll.u32 %v10321_v9, 16  ;;  %v4224_v3 = vld [vmem:[#allocation2 + $0x30] sm:$0xf] }
 0x291   : > { %v4519_v53 = vsel %vm1232_vm9, %v4514_v17, %v4518_v29  ;;  %v4206_v10 = vld [vmem:[#allocation2 + $0x24] sm:$0xe]  ;;  %v10328_v13 = vrot.slane %v4943_v58, 1  ;;  %v5362_v31 = vrot.slane %v5360_v11, 1  ;;  %v10331_v4 = vld [vmem:[#allocation2 + $0x7c] sm:$0xf]  ;;  %v10333_v16 = vcombine.low %v4224_v3, %v4225_v50 }
 0x292   : > { %4620 = vrot.lane.b32.xlu1 %v4519_v53, %s8557_s10  ;;  %v5358_v6 = vor.u32 %v5357_v26, %v5353_v18  ;;  %v8234_v48 = vld [vmem:[#allocation2 + $0x38] ss:$0 sps:$4 sm:$0x11]   ;;  %v4521_v22 = vshrl.u32 %v10321_v9, 16  ;;  %v4525_v62 = vrot.slane %v4523_v51, 1  ;;  %v4528_v28 = vshll.u32 %v8232_v54, 16 }
 0x293   : > { %11553 = vst [vmem:[#allocation17_spill] sm:$0xff] %v10333_v16  ;;  %v4113_v40 = vld [vmem:[#allocation2 + $0x7c] sm:$0xf]  ;;  %v4955_v21 = vshll.u32 %v10134_v34, 16  ;;  %v4174_v56 = vld [vmem:[#allocation2 + $0x78] sm:$0xf]  ;;  %v5137_v11 = vsel %vm1505_vm10, %v5135_v1, %v5136_v44 }
 0x294   : > { %v5363_v60 = vsel %vm1232_vm9, %v5358_v6, %v5362_v31  ;;  %v5367_v47 = vshll.u32 %v10333_v16, 16  ;;  %v4112_v32 = vld [vmem:[#allocation2 + $0x78] sm:$0xf]  ;;  %v4227_v0 = vld [vmem:[#allocation2 + $0x40] sm:$0xf]  ;;  %v10340_v58 = vrot.slane %v7235_v41, 1  ;;  %v4526_v54 = vor.u32 %v4525_v62, %v4521_v22 }
 0x295   : > { %v8439_v37 = vld [vmem:[#allocation2 + $0x28] sm:$0xf]  ;;  %v4210_v55 = vld [vmem:[#allocation2 + $0x54] sm:$0xe]  ;;  %5534 = vrot.lane.b32.xlu0 %v5363_v60, %s8557_s10  ;;  %v5365_v29 = vshrl.u32 %v10333_v16, 16  ;;  %v5372_v18 = vshll.u32 %v8234_v48, 16  ;;  %v10346_v26 = vcombine.low %v4112_v32, %v4113_v40  ;;  %v10349_v41 = vcombine.low %v4174_v56, %v10331_v4 }
 0x296   : > { %v7232_v25 = vcombine.low %v4206_v10, %v8439_v37  ;;  %v8235_v17 = vld [vmem:[#allocation2 + $0x2c] ss:$0 sps:$4 sm:$0x11]   ;;  %5182 = vrot.lane.b32.xlu1 %v5137_v11, %s8557_s10  ;;  %v5369_v50 = vrot.slane %v5367_v47, 1  ;;  %v4226_v53 = vld [vmem:[#allocation2 + $0x3c] sm:$0xf]  ;;  %v7236_v44 = vcombine.low %v4210_v55, %v10166_v45 }
 0x297   : > { %11554 = vst [vmem:[#allocation18_spill] sm:$0xff] %v10346_v26  ;;  %v4207_v51 = vld [vmem:[#allocation2 + $0x30] sm:$0xe]  ;;  %11555 = vst [vmem:[#allocation7_spill] sm:$0xff] %v10349_v41  ;;  %v4530_v3 = vrot.slane %v4528_v28, 1  ;;  %v10351_v6 = vcombine.low %v4226_v53, %v4227_v0  ;;  %v4967_v31 = vshll.u32 %v10177_v2, 16 }
 0x298   : > { %v8241_v10 = vld [vmem:[#allocation2 + $0x80] ss:$0 sps:$4 sm:$0x11]   ;;  %v10353_v1 = vld [vmem:[#allocation2 + $0x3c] sm:$0xe]  ;;  %v5370_v62 = vor.u32 %v5369_v50, %v5365_v29  ;;  %v4535_v48 = vshll.u32 %v10346_v26, 16  ;;  %v7233_v45 = vcombine.low %v4207_v51, %v10037_v7 }
 0x299   : > { %11556 = vst [vmem:[#allocation6_spill] sm:$0xff] %v10351_v6  ;;  %v4211_v22 = vld [vmem:[#allocation2 + $0x60] sm:$0xe]  ;;  %v8243_v40 = vld [vmem:[#allocation2 + $0x44] ss:$0 sps:$4 sm:$0x11]   ;;  %4830 = vrot.lane.b32.xlu0 %v10349_v41, %s8557_s10  ;;  %v4531_v28 = vsel %vm1232_vm9, %v4526_v54, %v4530_v3 }
 0x29a   : > { %v10358_v60 = vld [vmem:[#allocation2 + $0x88] sm:$0xf]  ;;  %v5138_v56 = vrot.slane %v7232_v25, 1  ;;  %v5139_v47 = vrot.slane %v8235_v17, 1  ;;  %v5379_v32 = vshll.u32 %v10351_v6, 16  ;;  %v10365_v0 = vrot.slane %v4955_v21, 1  ;;  %4622 = vrot.lane.b32.xlu1 %v4531_v28, %s8557_s10 }
 0x29b   : > { %v5374_v37 = vrot.slane %v5372_v18, 1  ;;  %v4537_v55 = vrot.slane %v4535_v48, 1  ;;  %v10368_v11 = vld [vmem:[#allocation2 + $0x38] ss:$0 sps:$4 sm:$0x11]   ;;  %v7237_v50 = vcombine.low %v4211_v22, %v10196_v23  ;;  %v4533_v25 = vshrl.u32 %v10346_v26, 16 }
 0x29c   : > { %v10373_v54 = vld [vmem:[#allocation2 + $0x88] sm:$0xf]  ;;  %v4540_v17 = vshll.u32 %v8241_v10, 16  ;;  %v4114_v53 = vld [vmem:[#allocation2 + $0x84] sm:$0xf]  ;;  %v5381_v18 = vrot.slane %v5379_v32, 1  ;;  %v5140_v10 = vsel %vm1505_vm10, %v5138_v56, %v5139_v47 }
 0x29d   : > { %v5375_v21 = vsel %vm1232_vm9, %v5370_v62, %v5374_v37  ;;  %v4176_v51 = vld [vmem:[#allocation2 + $0x84] sm:$0xf]  ;;  %v10379_v3 = vcombine.low %v4114_v53, %v10358_v60  ;;  %v4229_v48 = vld [vmem:[#allocation2 + $0x4c] sm:$0xf]  ;;  %v10381_v28 = vrot.slane %v7236_v44, 1  ;;  %v10383_v27 = vrot.slane %v4967_v31, 1 }
 0x29e   : > { %v4212_v23 = vld [vmem:[#allocation2 + $0x6c] sm:$0xe]  ;;  %5536 = vrot.lane.b32.xlu0 %v5375_v21, %s8557_s10  ;;  %v4538_v22 = vor.u32 %v4537_v55, %v4533_v25  ;;  %v4228_v14 = vld [vmem:[#allocation2 + $0x48] sm:$0xf]  ;;  %v4979_v7 = vshll.u32 %v10216_v43, 16  ;;  %5184 = vrot.lane.b32.xlu1 %v5140_v10, %s8557_s10  ;;  %v5377_v62 = vshrl.u32 %v10351_v6, 16  ;;  %v10396_v53 = vcombine.low %v4176_v51, %v10373_v54 }
 0x29f   : > { %11557 = vst [vmem:[#allocation23_spill] sm:$0xff] %v10379_v3  ;;  %v5384_v32 = vshll.u32 %v8243_v40, 16  ;;  %v4547_v37 = vshll.u32 %v10379_v3, 16  ;;  %v10391_v44 = vld [vmem:[#allocation2 + $0x94] sm:$0xf]  ;;  %v10393_v31 = vrot.slane %v7237_v50, 1  ;;  %v10400_v47 = vcombine.low %v4228_v14, %v4229_v48 }
 0x2a0   : > { %11558 = vst [vmem:[#allocation24_spill] sm:$0xff] %v10396_v53  ;;  %v4542_v21 = vrot.slane %v4540_v17, 1  ;;  %v10398_v56 = vld [vmem:[#allocation2 + $0x8c] ss:$0 sps:$4 sm:$0x11]   ;;  %v7238_v55 = vcombine.low %v4212_v23, %v10279_v30  ;;  %v5382_v25 = vor.u32 %v5381_v18, %v5377_v62  ;;  %v5141_v10 = vrot.slane %v7233_v45, 1 }
 0x2a1   : > { %11559 = vst [vmem:[#allocation25_spill] sm:$0xff] %v10400_v47  ;;  %v5142_v40 = vrot.slane %v10368_v11, 1  ;;  %v8250_v5 = vld [vmem:[#allocation2 + $0x50] ss:$0 sps:$4 sm:$0x11]   ;;  %v4549_v51 = vrot.slane %v4547_v37, 1 }
 0x2a2   : > { %v4116_v29 = vld [vmem:[#allocation2 + $0x90] sm:$0xf]  ;;  %v4213_v6 = vld [vmem:[#allocation2 + $0x78] sm:$0xe]  ;;  %4832 = vrot.lane.b32.xlu0 %v10396_v53, %s8557_s10  ;;  %v4543_v50 = vsel %vm1232_vm9, %v4538_v22, %v4542_v21  ;;  %v5391_v17 = vshll.u32 %v10400_v47, 16  ;;  %v10412_v45 = vrot.slane %v4979_v7, 1 }
 0x2a3   : > { %v10409_v14 = vcombine.low %v4116_v29, %v10391_v44  ;;  %v4231_v48 = vld [vmem:[#allocation2 + $0x58] sm:$0xf]  ;;  %v4991_v18 = vshll.u32 %v10291_v15, 16  ;;  %4624 = vrot.lane.b32.xlu1 %v4543_v50, %s8557_s10  ;;  %v5386_v23 = vrot.slane %v5384_v32, 1  ;;  %v10416_v62 = vld [vmem:[#allocation2 + $0x94] sm:$0xf]  ;;  %v7239_v22 = vcombine.low %v4213_v6, %v10331_v4 }
 0x2a4   : > { %11561 = vst [vmem:[#allocation27_spill] sm:$0xff] %v10412_v45  ;;  %v5003_v37 = vshll.u32 %v10349_v41, 16  ;;  %v4545_v21 = vshrl.u32 %v10379_v3, 16  ;;  %v4552_v29 = vshll.u32 %v10398_v56, 16  ;;  %v4230_v26 = vld [vmem:[#allocation2 + $0x54] sm:$0xf]  ;;  %v5143_v6 = vsel %vm1505_vm10, %v5141_v10, %v5142_v40 }
 0x2a5   : > { %11560 = vst [vmem:[#allocation26_spill] sm:$0xff] %v10409_v14  ;;  %v10422_v16 = vrot.slane %v7238_v55, 1  ;;  %v5387_v7 = vsel %vm1232_vm9, %v5382_v25, %v5386_v23  ;;  %v4178_v30 = vld [vmem:[#allocation2 + $0x90] sm:$0xf]  ;;  %v5393_v9 = vrot.slane %v5391_v17, 1  ;;  %v10427_v32 = vcombine.low %v4230_v26, %v4231_v48 }
 0x2a6   : > { %v10425_v36 = vld [vmem:[#allocation2 + $0x44] ss:$0 sps:$4 sm:$0x11]   ;;  %v4214_v4 = vld [vmem:[#allocation2 + $0x84] sm:$0xe]  ;;  %5538 = vrot.lane.b32.xlu0 %v5387_v7, %s8557_s10  ;;  %v4550_v3 = vor.u32 %v4549_v51, %v4545_v21  ;;  %v4559_v55 = vshll.u32 %v10409_v14, 16  ;;  %v10447_v40 = vcombine.low %v4178_v30, %v10416_v62  ;;  %v11568_v17 = vcombine.low %v10353_v1, %v10082_v35 }
 0x2a7   : > { %11562 = vst [vmem:[#allocation28_spill] sm:$0xff] %v10427_v32  ;;  %v10432_v38 = vld [vmem:[#allocation2 + $0x98] ss:$0 sps:$4 sm:$0x11]   ;;  %v10437_v25 = vrot.slane %v4991_v18, 1  ;;  %5186 = vrot.lane.b32.xlu1 %v5143_v6, %s8557_s10  ;;  %v5389_v26 = vshrl.u32 %v10400_v47, 16  ;;  %v7240_v21 = vcombine.low %v4214_v4, %v10373_v54 }
 0x2a8   : > { %11563 = vst [vmem:[#allocation29_spill] sm:$0xff] %v10432_v38  ;;  %v5396_v48 = vshll.u32 %v8250_v5, 16  ;;  %v4233_v23 = vld [vmem:[#allocation2 + $0x64] sm:$0xf]  ;;  %v10442_v7 = vrot.slane %v7239_v22, 1  ;;  %v10444_v10 = vrot.slane %v5003_v37, 1 }
 0x2a9   : > { %11565 = vst [vmem:[#allocation31_spill] sm:$0xff] %v10437_v25  ;;  %11567 = vst [vmem:[#allocation33_spill] sm:$0xff] %v10447_v40  ;;  %v4554_v51 = vrot.slane %v4552_v29, 1  ;;  %v4215_v18 = vld [vmem:[#allocation2 + $0x90] sm:$0xe]  ;;  %v5394_v50 = vor.u32 %v5393_v9, %v5389_v26  ;;  %v5144_v6 = vrot.slane %v11568_v17, 1 }
 0x2aa   : > { %11566 = vst [vmem:[#allocation32_spill] sm:$0xff] %v10444_v10  ;;  %v8258_v46 = vld [vmem:[#allocation2 + $0x5c] ss:$0 sps:$4 sm:$0x11]   ;;  %v5403_v5 = vshll.u32 %v10427_v32, 16  ;;  %4834 = vrot.lane.b32.xlu0 %v10447_v40, %s8557_s10  ;;  %v5145_v30 = vrot.slane %v10425_v36, 1 }
 0x2ab   : > { %v4118_v47 = vld [vmem:[#allocation2 + $0x9c] sm:$0xf]  ;;  %v4555_v22 = vsel %vm1232_vm9, %v4550_v3, %v4554_v51  ;;  %v4561_v37 = vrot.slane %v4559_v55, 1  ;;  %v4232_v9 = vld [vmem:[#allocation2 + $0x60] sm:$0xf]  ;;  %v5398_v1 = vrot.slane %v5396_v48, 1 }
 0x2ac   : > { %v10459_v54 = vcombine.low %v4118_v47, %v10435_v24  ;;  %v10461_v29 = vld [vmem:[#allocation2 + $0xac] sm:$0xf]  ;;  %4626 = vrot.lane.b32.xlu1 %v4555_v22, %s8557_s10  ;;  %v10465_v4 = vld [vmem:[#allocation2 + $0xa0] sm:$0xf]  ;;  %v10471_v3 = vcombine.low %v4232_v9, %v4233_v23  ;;  %v5015_v55 = vshll.u32 %v10396_v53, 16  ;;  %v7241_v47 = vcombine.low %v4215_v18, %v10416_v62 }
 0x2ad   : > { %11570 = vst [vmem:[#allocation35_spill] sm:$0xff] %v10461_v29  ;;  %v10467_v17 = vld [vmem:[#allocation2 + $0x50] ss:$0 sps:$4 sm:$0x11]   ;;  %v4557_v51 = vshrl.u32 %v10409_v14, 16  ;;  %v4564_v59 = vshll.u32 %v10432_v38, 16  ;;  %v5399_v22 = vsel %vm1232_vm9, %v5394_v50, %v5398_v1  ;;  %v5146_v23 = vsel %vm1505_vm10, %v5144_v6, %v5145_v30 }
 0x2ae   : > { %11569 = vst [vmem:[#allocation34_spill] sm:$0xff] %v10459_v54  ;;  %v10469_v26 = vld [vmem:[#allocation2 + $0xa4] ss:$0 sps:$4 sm:$0x11]   ;;  %11572 = vst [vmem:[#allocation37_spill] sm:$0xff] %v10471_v3  ;;  %v10477_v61 = vrot.slane %v7240_v21, 1  ;;  %5540 = vrot.lane.b32.xlu0 %v5399_v22, %s8557_s10 }
 0x2af   : > { %11571 = vst [vmem:[#allocation36_spill] sm:$0xff] %v10469_v26  ;;  %v4235_v35 = vld [vmem:[#allocation2 + $0x70] sm:$0xf]  ;;  %v5027_v48 = vshll.u32 %v10447_v40, 16  ;;  %v5405_v42 = vrot.slane %v5403_v5, 1  ;;  %v4562_v9 = vor.u32 %v4561_v37, %v4557_v51  ;;  %v4571_v18 = vshll.u32 %v10459_v54, 16 }
 0x2b0   : > { %v4120_v19 = vld [vmem:[#allocation2 + $0xa8] sm:$0xf]  ;;  %v10483_v62 = vld [vmem:[#allocation2 + $0xac] sm:$0xf]  ;;  %5188 = vrot.lane.b32.xlu1 %v5146_v23, %s8557_s10  ;;  %v5401_v50 = vshrl.u32 %v10427_v32, 16  ;;  %v5408_v5 = vshll.u32 %v8258_v46, 16  ;;  %v10501_v51 = vcombine.low %v4180_v57, %v10465_v4 }
 0x2b1   : > { %v8264_v14 = vld [vmem:[#allocation2 + $0x68] ss:$0 sps:$4 sm:$0x11]   ;;  %v10487_v21 = vcombine.low %v4120_v19, %v10461_v29  ;;  %v4234_v53 = vld [vmem:[#allocation2 + $0x6c] sm:$0xf]  ;;  %v5415_v1 = vshll.u32 %v10471_v3, 16 }
 0x2b2   : > { %v10492_v22 = vld [vmem:[#allocation2 + $0x5c] ss:$0 sps:$4 sm:$0x11]   ;;  %v10494_v6 = vcombine.low %v4234_v53, %v4235_v35  ;;  %v10496_v30 = vrot.slane %v5015_v55, 1  ;;  %v10498_v37 = vrot.slane %v7241_v47, 1  ;;  %11576 = vst [vmem:[#allocation41_spill] sm:$0xff] %v10501_v51  ;;  %v5406_v46 = vor.u32 %v5405_v42, %v5401_v50  ;;  %4836 = vrot.lane.b32.xlu0 %v10501_v51, %s8557_s10 }
 0x2b3   : > { %11573 = vst [vmem:[#allocation38_spill] sm:$0xff] %v10487_v21  ;;  %v4566_v19 = vrot.slane %v4564_v59, 1  ;;  %v4182_v10 = vld [vmem:[#allocation2 + $0xa8] sm:$0xf]  ;;  %v5148_v32 = vrot.slane %v10467_v17, 1  ;;  %v4576_v29 = vshll.u32 %v10469_v26, 16 }
 0x2b4   : > { %11574 = vst [vmem:[#allocation39_spill] sm:$0xff] %v10494_v6  ;;  %11575 = vst [vmem:[#allocation40_spill] sm:$0xff] %v10496_v30  ;;  %v10503_v41 = vld [vmem:[#allocation2 + $0xb0] ss:$0 sps:$4 sm:$0x11]   ;;  %v10510_v47 = vrot.slane %v5027_v48, 1  ;;  %v10520_v23 = vcombine.low %v4182_v10, %v10483_v62 }
 0x2b5   : > { %11577 = vst [vmem:[#allocation42_spill] sm:$0xff] %v10503_v41  ;;  %v8272_v53 = vld [vmem:[#allocation2 + $0x74] ss:$0 sps:$4 sm:$0x11]   ;;  %v10508_v55 = vld [vmem:[#allocation2 + $0xb8] sm:$0xf]  ;;  %v4567_v59 = vsel %vm1232_vm9, %v4562_v9, %v4566_v19  ;;  %v5149_v10 = vsel %vm1505_vm10, %v10340_v58, %v5148_v32 }
 0x2b6   : > { %v4122_v35 = vld [vmem:[#allocation2 + $0xb4] sm:$0xf]  ;;  %11578 = vst [vmem:[#allocation43_spill] sm:$0xff] %v10508_v55  ;;  %11579 = vst [vmem:[#allocation44_spill] sm:$0xff] %v10510_v47  ;;  %v4573_v57 = vrot.slane %v4571_v18, 1  ;;  %v4583_v42 = vshll.u32 %v10487_v21, 16  ;;  %4628 = vrot.lane.b32.xlu1 %v4567_v59, %s8557_s10 }
 0x2b7   : > { %v10515_v30 = vld [vmem:[#allocation2 + $0xb8] sm:$0xf]  ;;  %v5410_v50 = vrot.slane %v5408_v5, 1  ;;  %11580 = vst [vmem:[#allocation45_spill] sm:$0xff] %v10520_v23  ;;  %v5417_v40 = vrot.slane %v5415_v1, 1  ;;  %v5427_v48 = vshll.u32 %v10494_v6, 16  ;;  %v10528_v19 = vcombine.low %v4122_v35, %v10508_v55 }
 0x2b8   : > { %v10523_v47 = vld [vmem:[#allocation2 + $0x68] ss:$0 sps:$4 sm:$0x11]   ;;  %v4237_v25 = vld [vmem:[#allocation2 + $0x7c] sm:$0xf]  ;;  %v4569_v51 = vshrl.u32 %v10459_v54, 16 }
 0x2b9   : > { %11581 = vst [vmem:[#allocation46_spill] sm:$0xff] %v10523_v47  ;;  %v5420_v9 = vshll.u32 %v8264_v14, 16  ;;  %v5151_v18 = vrot.slane %v10492_v22, 1  ;;  %11582 = vst [vmem:[#allocation47_spill] sm:$0xff] %v10528_v19  ;;  %v5411_v5 = vsel %vm1232_vm9, %v5406_v46, %v5410_v50  ;;  %v4578_v1 = vrot.slane %v4576_v29, 1 }
 0x2ba   : > { %v10530_v15 = vld [vmem:[#allocation2 + $0xbc] ss:$0 sps:$4 sm:$0x11]   ;;  %v5413_v59 = vshrl.u32 %v10471_v3, 16  ;;  %5542 = vrot.lane.b32.xlu0 %v5411_v5, %s8557_s10  ;;  %v4574_v14 = vor.u32 %v4573_v57, %v4569_v51  ;;  %v4184_v54 = vld [vmem:[#allocation2 + $0xb4] sm:$0xf]  ;;  %v10538_v55 = vcombine.low %v4236_v49, %v4237_v25  ;;  %5190 = vrot.lane.b32.xlu1 %v5149_v10, %s8557_s10 }
 0x2bb   : > { %11583 = vst [vmem:[#allocation48_spill] sm:$0xff] %v10530_v15  ;;  %v8278_v26 = vld [vmem:[#allocation2 + $0x80] ss:$0 sps:$4 sm:$0x11]   ;;  %v4585_v24 = vrot.slane %v4583_v42, 1  ;;  %v4588_v35 = vshll.u32 %v10503_v41, 16  ;;  %v10544_v32 = vcombine.low %v4184_v54, %v10515_v30  ;;  %v5152_v42 = vsel %vm1505_vm10, %v10381_v28, %v5151_v18 }
 0x2bc   : > { %11584 = vst [vmem:[#allocation49_spill] sm:$0xff] %v10538_v55  ;;  %v10540_v45 = vld [vmem:[#allocation2 + $0x74] ss:$0 sps:$4 sm:$0x11]   ;;  %v4239_v46 = vld [vmem:[#allocation2 + $0x88] sm:$0xf]  ;;  %v5418_v58 = vor.u32 %v5417_v40, %v5413_v59  ;;  %v4579_v28 = vsel %vm1232_vm9, %v4574_v14, %v4578_v1 }
 0x2bd   : > { %11585 = vst [vmem:[#allocation50_spill] sm:$0xff] %v10540_v45  ;;  %11586 = vst [vmem:[#allocation51_spill] sm:$0xff] %v10544_v32  ;;  %v5429_v29 = vrot.slane %v5427_v48, 1  ;;  %v5432_v50 = vshll.u32 %v8272_v53, 16  ;;  %v10546_v3 = vld [vmem:[#allocation2 + $0xc4] sm:$0xf] }
 0x2be   : > { %v4238_v51 = vld [vmem:[#allocation2 + $0x84] sm:$0xf]  ;;  %v5422_v57 = vrot.slane %v5420_v9, 1  ;;  %v4581_v49 = vshrl.u32 %v10487_v21, 16  ;;  %v4595_v25 = vshll.u32 %v10528_v19, 16  ;;  %v5425_v40 = vshrl.u32 %v10494_v6, 16  ;;  %4838 = vrot.lane.b32.xlu0 %v10520_v23, %s8557_s10  ;;  %4630 = vrot.lane.b32.xlu1 %v4579_v28, %s8557_s10 }
 0x2bf   : > { %v8282_v5 = vld [vmem:[#allocation2 + $0x8c] ss:$0 sps:$4 sm:$0x11]   ;;  %v10552_v41 = vld [vmem:[#allocation2 + $0x80] ss:$0 sps:$4 sm:$0x11]   ;;  %v10557_v48 = vcombine.low %v4238_v51, %v4239_v46 }
 0x2c0   : > { %11587 = vst [vmem:[#allocation52_spill] sm:$0xff] %v10552_v41  ;;  %v5154_v54 = vrot.slane %v10523_v47, 1  ;;  %v4600_v53 = vshll.u32 %v10530_v15, 16  ;;  %v4241_v10 = vld [vmem:[#allocation2 + $0x94] sm:$0xf]  ;;  %v4586_v9 = vor.u32 %v4585_v24, %v4581_v49  ;;  %v4590_v18 = vrot.slane %v4588_v35, 1 }
 0x2c1   : > { %11588 = vst [vmem:[#allocation53_spill] sm:$0xff] %v10557_v48  ;;  %v5439_v59 = vshll.u32 %v10538_v55, 16  ;;  %v5423_v6 = vsel %vm1232_vm9, %v5418_v58, %v5422_v57  ;;  %v5430_v21 = vor.u32 %v5429_v29, %v5425_v40  ;;  %v5434_v47 = vrot.slane %v5432_v50, 1  ;;  %v4186_v43 = vld [vmem:[#allocation2 + $0xc0] sm:$0xf] }
 0x2c2   : > { %v5444_v15 = vshll.u32 %v8278_v26, 16  ;;  %v4240_v46 = vld [vmem:[#allocation2 + $0x90] sm:$0xf]  ;;  %v10566_v51 = vcombine.low %v4186_v43, %v10546_v3  ;;  %v4597_v38 = vrot.slane %v4595_v25, 1  ;;  %v5157_v23 = vrot.slane %v10540_v45, 1  ;;  %5544 = vrot.lane.b32.xlu0 %v5423_v6, %s8557_s10  ;;  %5192 = vrot.lane.b32.xlu1 %v5152_v42, %s8557_s10 }
 0x2c3   : > { %v10569_v1 = vcombine.low %v4240_v46, %v4241_v10  ;;  %v4140_v24 = vld [vmem:[#allocation2] sm:$0xe]  ;;  %v10573_v14 = vsel %vm1505_vm10, %v10393_v31, %v5154_v54  ;;  %v4593_v35 = vshrl.u32 %v10528_v19, 16  ;;  %v4602_v58 = vrot.slane %v4600_v53, 1  ;;  %v4813_v10 = vpop.permute.xlu0 %4812  ;;  %v8440_v28 = vld [vmem:[#allocation2 + $0x4] sm:$0xf] }
 0x2c4   : > { %v5451_v29 = vshll.u32 %v10557_v48, 16  ;;  %v8286_v26 = vld [vmem:[#allocation2 + $0x98] ss:$0 sps:$4 sm:$0x11]   ;;  %v4591_v43 = vsel %vm1232_vm9, %v4586_v9, %v4590_v18  ;;  %v5441_v50 = vrot.slane %v5439_v59, 1  ;;  %v5456_v57 = vshll.u32 %v8282_v5, 16 }
 0x2c5   : > { %11589 = vst [vmem:[#allocation54_spill] sm:$0xff] %v10569_v1  ;;  %v5160_v49 = vrot.slane %v10552_v41, 1  ;;  %v4243_v25 = vld [vmem:[#allocation2 + $0xa0] sm:$0xf]  ;;  %v5435_v31 = vsel %vm1232_vm9, %v5430_v21, %v5434_v47  ;;  %v5437_v40 = vshrl.u32 %v10538_v55, 16  ;;  %v5446_v54 = vrot.slane %v5444_v15, 1  ;;  %v4605_v21 = vpop.permute.xlu1 %4604 }
 0x2c6   : > { %v10583_v53 = vld [vmem:[#allocation2 + $0x8c] ss:$0 sps:$4 sm:$0x11]   ;;  %v7182_v46 = vcombine.low %v4140_v24, %v8440_v28  ;;  %v4598_v6 = vor.u32 %v4597_v38, %v4593_v35  ;;  %v10587_v9 = vsel %vm1505_vm10, %v10422_v16, %v5157_v23  ;;  %v5449_v5 = vshrl.u32 %v10557_v48, 16  ;;  %v4242_v42 = vld [vmem:[#allocation2 + $0x9c] sm:$0xf]  ;;  %4840 = vrot.lane.b32.xlu0 %v10544_v32, %s8557_s10  ;;  %4632 = vrot.lane.b32.xlu1 %v4591_v43, %s8557_s10 }
 0x2c7   : > { %v5463_v18 = vshll.u32 %v10569_v1, 16  ;;  %v4245_v59 = vld [vmem:[#allocation2 + $0xac] sm:$0xf]  ;;  %v5453_v47 = vrot.slane %v5451_v29, 1  ;;  %v10591_v55 = vcombine.low %v4242_v42, %v4243_v25  ;;  %v5442_v38 = vor.u32 %v5441_v50, %v5437_v40  ;;  %v4244_v35 = vld [vmem:[#allocation2 + $0xa8] sm:$0xf] }
 0x2c8   : > { %v8289_v15 = vld [vmem:[#allocation2 + $0xa4] ss:$0 sps:$4 sm:$0x11]   ;;  %v4684_v19 = vrot.slane %v7182_v46, 1  ;;  %v5458_v16 = vrot.slane %v5456_v57, 1  ;;  %v10597_v23 = vsel %vm1505_vm10, %v10442_v7, %v5160_v49  ;;  %v5468_v24 = vshll.u32 %v8286_v26, 16 }
 0x2c9   : > { %11590 = vst [vmem:[#allocation55_spill] sm:$0xff] %v10591_v55  ;;  %v8441_v41 = vld [vmem:[#allocation2 + $0x8] ss:$0 sps:$4 sm:$0x11]   ;;  %v5163_v29 = vrot.slane %v10583_v53, 1  ;;  %v10603_v28 = vcombine.low %v4244_v35, %v4245_v59  ;;  %v4603_v7 = vsel %vm1232_vm9, %v4598_v6, %v4602_v58  ;;  %v5461_v26 = vshrl.u32 %v10569_v1, 16 }
 0x2ca   : > { %v4685_v45 = vrot.slane %v8441_v41, 1  ;;  %v10601_v25 = vld [vmem:[#allocation2 + $0x98] ss:$0 sps:$4 sm:$0x11]   ;;  %v5661_v41 = vsel %vm2482_vm11, %v9729_v39, %v4605_v21  ;;  %v5465_v49 = vrot.slane %v5463_v18, 1  ;;  %v8322_v46 = vld [vmem:[%s11406_s3 + $0x108] sm:$0xff]   ;;  %v5454_v42 = vor.u32 %v5453_v47, %v5449_v5  ;;  %5546 = vrot.lane.b32.xlu0 %v5435_v31, %s8557_s10  ;;  %5194 = vrot.lane.b32.xlu1 %v10573_v14, %s8557_s10 }
 0x2cb   : > { %11591 = vst [vmem:[#allocation56_spill] sm:$0xff] %v10601_v25  ;;  %11592 = vst [vmem:[#allocation57_spill] sm:$0xff] %v10603_v28  ;;  %v10608_v57 = vld [vmem:[#allocation2 + $0xb8] sm:$0xf]  ;;  %v4141_v40 = vld [vmem:[#allocation2 + $0xc] sm:$0xe] }
 0x2cc   : > { %v4686_v50 = vsel %vm1505_vm10, %v4684_v19, %v4685_v45  ;;  %11593 = vst [vmem:[#allocation58_spill] sm:$0xff] %v10608_v57  ;;  %v5475_v59 = vshll.u32 %v10591_v55, 16  ;;  %v5480_v39 = vshll.u32 %v8289_v15, 16  ;;  %v4246_v45 = vld [vmem:[#allocation2 + $0xb4] sm:$0xf]  ;;  %v4815_v19 = vpop.permute.xlu0 %4814  ;;  %v5470_v18 = vrot.slane %v5468_v24, 1 }
 0x2cd   : > { %v5710_v43 = vsel %vm2482_vm11, %v4686_v50, %v4813_v10  ;;  %v10617_v21 = vld [vmem:[#allocation2 + $0xc4] sm:$0xf]  ;;  %v8442_v58 = vld [vmem:[#allocation2 + $0x10] sm:$0xf]  ;;  %v5447_v10 = vsel %vm1232_vm9, %v5442_v38, %v5446_v54  ;;  %v10624_v50 = vcombine.low %v4246_v45, %v10608_v57  ;;  %v4248_v5 = vld [vmem:[#allocation2 + $0xc0] sm:$0xf]  ;;  %v10649_v1 = vsel %vm1232_vm9, %v5454_v42, %v5458_v16 }
 0x2ce   : > { %6259 = vmatprep.mubr.bf16.mxu1 %v5710_v43  ;;  %v7183_v6 = vcombine.low %v4141_v40, %v8442_v58  ;;  %v10621_v35 = vld [vmem:[#allocation2 + $0xb0] ss:$0 sps:$4 sm:$0x11]   ;;  %v8443_v47 = vld [vmem:[#allocation2 + $0x14] ss:$0 sps:$4 sm:$0x11]   ;;  %v10630_v43 = vsel %vm1505_vm10, %v10477_v61, %v5163_v29  ;;  %v5466_v40 = vor.u32 %v5465_v49, %v5461_v26  ;;  %v10646_v45 = vcombine.low %v4248_v5, %v10617_v21 }
 0x2cf   : > { %6260 = vmatmul.mubr.bf16.vlgmr.msra.gmra.mrb[64].mxu1 %v5661_v41  ;;  %v4688_v15 = vrot.slane %v8443_v47, 1  ;;  %v5473_v31 = vshrl.u32 %v10591_v55, 16  ;;  %v5166_v54 = vrot.slane %v10601_v25, 1  ;;  %v5487_v38 = vshll.u32 %v10603_v28, 16  ;;  %v8444_v24 = vld [vmem:[%s11406_s3 + $0x100] sm:$0xff]   ;;  %v10641_v14 = vld [vmem:[%s11406_s3 + $0x110] sm:$0xff]   ;;  %4842 = vrot.lane.b32.xlu0 %v10566_v51, %s8557_s10 }
 0x2d0   : > { %7947 = vmatpush3.bf16.msra.mxu1 %v8444_v24  ;;  %v4142_v41 = vld [vmem:[#allocation2 + $0x18] sm:$0xe]  ;;  %v4216_v61 = vld [vmem:[#allocation2 + $0x9c] sm:$0xe]  ;;  %v4687_v58 = vrot.slane %v7183_v6, 1  ;;  %v5477_v24 = vrot.slane %v5475_v59, 1  ;;  %4634 = vrot.lane.b32.xlu1 %v4603_v7, %s8557_s10 }
 0x2d1   : > { %v10643_v29 = vld [vmem:[#allocation2 + $0xa4] ss:$0 sps:$4 sm:$0x11]   ;;  %v8445_v47 = vld [vmem:[#allocation2 + $0x1c] sm:$0xf]  ;;  %7948 = vmatprep.subr.bf16.mxu1 %v8322_v46  ;;  %v5482_v48 = vrot.slane %v5480_v39, 1  ;;  %v7242_v26 = vcombine.low %v4216_v61, %v10465_v4  ;;  %v10661_v16 = vsel %vm1505_vm10, %v10498_v37, %v5166_v54  ;;  %v4817_v39 = vpop.permute.xlu0 %4816  ;;  %v10668_v61 = vsel %vm1232_vm9, %v5466_v40, %v5470_v18 }
 0x2d2   : > { %v7184_v55 = vcombine.low %v4142_v41, %v8445_v47  ;;  %v10651_v57 = vld [vmem:[#allocation2 + $0xbc] ss:$0 sps:$4 sm:$0x11]   ;;  %v8446_v32 = vld [vmem:[#allocation2 + $0x20] ss:$0 sps:$4 sm:$0x11]   ;;  %v4689_v5 = vsel %vm1505_vm10, %v4687_v58, %v4688_v15  ;;  %v4607_v41 = vpop.permute.xlu1 %4606  ;;  %v5478_v54 = vor.u32 %v5477_v24, %v5473_v31 }
 0x2d3   : > { %v4691_v25 = vrot.slane %v8446_v32, 1  ;;  %v5499_v49 = vshll.u32 %v10624_v50, 16  ;;  %v4217_v6 = vld [vmem:[#allocation2 + $0xa8] sm:$0xe]  ;;  %v5489_v42 = vrot.slane %v5487_v38, 1  ;;  %v5714_v4 = vsel %vm2482_vm11, %v4689_v5, %v4815_v19  ;;  %5548 = vrot.lane.b32.xlu0 %v5447_v10, %s8557_s10 }
 0x2d4   : > { %v4690_v47 = vrot.slane %v7184_v55, 1  ;;  %v10663_v32 = vld [vmem:[#allocation2 + $0xb0] ss:$0 sps:$4 sm:$0x11]   ;;  %v7243_v59 = vcombine.low %v4217_v6, %v10483_v62  ;;  %7949 = vmatpush3.bf16.msra.mxu1 %v8322_v46  ;;  %v5485_v55 = vshrl.u32 %v10603_v28, 16  ;;  %v5492_v7 = vshll.u32 %v10621_v35, 16  ;;  %6267 = vmatprep.mubr.bf16.mxu1 %v5714_v4 }
 0x2d5   : > { %v5511_v15 = vshll.u32 %v10646_v45, 16  ;;  %v4143_v37 = vld [vmem:[#allocation2 + $0x24] sm:$0xe]  ;;  %7950 = vmatprep.subr.bf16.mxu1 %v10641_v14  ;;  %v10674_v38 = vld [vmem:[#allocation2 + $0xc8] ss:$0 sps:$4 sm:$0x11]   ;;  %v5664_v46 = vsel %vm2482_vm11, %v10003_v33, %v4607_v41  ;;  %5196 = vrot.lane.b32.xlu1 %v10587_v9, %s8557_s10  ;;  %v5483_v9 = vsel %vm1232_vm9, %v5478_v54, %v5482_v48 }
 0x2d6   : > { %v4218_v62 = vld [vmem:[#allocation2 + $0xb4] sm:$0xe]  ;;  %v4692_v19 = vsel %vm1505_vm10, %v4690_v47, %v4691_v25  ;;  %v8447_v18 = vld [vmem:[#allocation2 + $0x28] sm:$0xf]  ;;  %v8331_v35 = vld [vmem:[%s11406_s3 + $0x118] sm:$0xff]   ;;  %v5168_v58 = vrot.slane %v7242_v26, 1  ;;  %v5490_v25 = vor.u32 %v5489_v42, %v5485_v55  ;;  %v4819_v42 = vpop.permute.xlu0 %4818 }
 0x2d7   : > { %v7185_v40 = vcombine.low %v4143_v37, %v8447_v18  ;;  %v5169_v6 = vrot.slane %v10643_v29, 1  ;;  %v5501_v31 = vrot.slane %v5499_v49, 1  ;;  %v10684_v24 = vld [vmem:[#allocation2 + $0xbc] ss:$0 sps:$4 sm:$0x11]   ;;  %6268 = vmatmul.mubr.bf16.gmra.mrb[68].mxu1 %v5664_v46  ;;  %v5718_v5 = vsel %vm2482_vm11, %v4692_v19, %v4817_v39  ;;  %5550 = vrot.lane.b32.xlu0 %v10649_v1, %s8557_s10 }
 0x2d8   : > { %v4144_v33 = vld [vmem:[#allocation2 + $0x30] sm:$0xe]  ;;  %v5504_v41 = vshll.u32 %v10651_v57, 16  ;;  %v5171_v47 = vrot.slane %v7243_v59, 1  ;;  %v5172_v4 = vrot.slane %v10663_v32, 1  ;;  %6275 = vmatprep.mubr.bf16.mxu1 %v5718_v5  ;;  %v5494_v26 = vrot.slane %v5492_v7, 1  ;;  %7951 = vmatpush3.bf16.msra.mxu1 %v10641_v14 }
 0x2d9   : > { %v4250_v10 = vld [vmem:[#allocation2 + $0xcc] sm:$0xf]  ;;  %v5497_v49 = vshrl.u32 %v10624_v50, 16  ;;  %v5513_v37 = vrot.slane %v5511_v15, 1  ;;  %v7244_v46 = vcombine.low %v4218_v62, %v10515_v30  ;;  %v10693_v18 = vld [vmem:[#allocation2 + $0xd0] sm:$0xf]  ;;  %7952 = vmatprep.subr.bf16.mxu1 %v8331_v35  ;;  %v10700_v7 = vsel %vm1505_vm10, %v5168_v58, %v5169_v6  ;;  %v4609_v62 = vpop.permute.xlu1 %4608  ;;  %5198 = vrot.lane.b32.xlu1 %v10597_v23, %s8557_s10 }
 0x2da   : > { %v4693_v39 = vrot.slane %v7185_v40, 1  ;;  %v8448_v55 = vld [vmem:[#allocation2 + $0x2c] ss:$0 sps:$4 sm:$0x11]   ;;  %v8449_v19 = vld [vmem:[#allocation2 + $0x34] sm:$0xf]  ;;  %v10707_v48 = vsel %vm1232_vm9, %v5490_v25, %v5494_v26  ;;  %v10710_v40 = vsel %vm1505_vm10, %v5171_v47, %v5172_v4  ;;  %v10713_v58 = vcombine.low %v4250_v10, %v10693_v18 }
 0x2db   : > { %v4694_v59 = vrot.slane %v8448_v55, 1  ;;  %v7186_v28 = vcombine.low %v4144_v33, %v8449_v19  ;;  %v5502_v30 = vor.u32 %v5501_v31, %v5497_v49  ;;  %v5509_v15 = vshrl.u32 %v10646_v45, 16  ;;  %v4219_v1 = vld [vmem:[#allocation2 + $0xc0] sm:$0xe]  ;;  %v4145_v26 = vld [vmem:[#allocation2 + $0x3c] sm:$0xe]  ;;  %5552 = vrot.lane.b32.xlu0 %v10668_v61, %s8557_s10 }
 0x2dc   : > { %v5516_v14 = vshll.u32 %v10674_v38, 16  ;;  %v5506_v54 = vrot.slane %v5504_v41, 1  ;;  %v10715_v6 = vld [vmem:[#allocation2 + $0xd4] ss:$0 sps:$4 sm:$0x11]   ;;  %v5174_v5 = vrot.slane %v7244_v46, 1  ;;  %v7245_v23 = vcombine.low %v4219_v1, %v10546_v3  ;;  %7953 = vmatpush3.bf16.msra.mxu1 %v8331_v35 }
 0x2dd   : > { %v5514_v31 = vor.u32 %v5513_v37, %v5509_v15  ;;  %v5175_v33 = vrot.slane %v10684_v24, 1  ;;  %v10718_v49 = vld [vmem:[#allocation2 + $0xc8] ss:$0 sps:$4 sm:$0x11]   ;;  %v5667_v25 = vsel %vm2482_vm11, %v10035_v12, %v4609_v62  ;;  %v4695_v41 = vsel %vm1505_vm10, %v4693_v39, %v4694_v59  ;;  %v8451_v35 = vld [vmem:[#allocation2 + $0x40] sm:$0xf]  ;;  %5200 = vrot.lane.b32.xlu1 %v10630_v43, %s8557_s10  ;;  %v4821_v12 = vpop.permute.xlu0 %4820  ;;  %v4611_v62 = vpop.permute.xlu1 %4610 }
 0x2de   : > { %v4696_v47 = vrot.slane %v7186_v28, 1  ;;  %v8450_v4 = vld [vmem:[#allocation2 + $0x38] ss:$0 sps:$4 sm:$0x11]   ;;  %v10727_v37 = vsel %vm1232_vm9, %v5502_v30, %v5506_v54  ;;  %v5518_v46 = vrot.slane %v5516_v14, 1  ;;  %v5722_v3 = vsel %vm2482_vm11, %v4695_v41, %v4819_v42 }
 0x2df   : > { %v4697_v10 = vrot.slane %v8450_v4, 1  ;;  %6276 = vmatmul.mubr.bf16.gmra.mrb[72].mxu1 %v5667_v25  ;;  %v7187_v55 = vcombine.low %v4145_v26, %v8451_v35  ;;  %v5523_v28 = vshll.u32 %v10713_v58, 16  ;;  %v5528_v39 = vshll.u32 %v10715_v6, 16  ;;  %v10747_v14 = vld [vmem:[#allocation2 + $0x48] sm:$0xe]  ;;  %5554 = vrot.lane.b32.xlu0 %v5483_v9, %s8557_s10 }
 0x2e0   : > { %6283 = vmatprep.mubr.bf16.mxu1 %v5722_v3  ;;  %v11594_v61 = vshrl.u32 %v10058_v8, 16  ;;  %v4936_v19 = vshll.u32 %v10368_v11, 16  ;;  %v10739_v30 = vsel %vm1232_vm9, %v5514_v31, %v5518_v46  ;;  %v10742_v42 = vsel %vm1505_vm10, %v5174_v5, %v5175_v33  ;;  %v8452_v8 = vld [vmem:[#allocation2 + $0x44] ss:$0 sps:$4 sm:$0x11]  }
 0x2e1   : > { %v10744_v15 = vrot.slane %v7245_v23, 1  ;;  %v5178_v43 = vrot.slane %v10718_v49, 1  ;;  %v4698_v54 = vsel %vm1505_vm10, %v4696_v47, %v4697_v10  ;;  %v4700_v1 = vrot.slane %v8452_v8, 1  ;;  %5202 = vrot.lane.b32.xlu1 %v10661_v16, %s8557_s10  ;;  %v4151_v9 = vld [vmem:[#allocation2 + $0x84] sm:$0xe] }
 0x2e2   : > { %v4934_v59 = vor.u32 %v10319_v63, %v11594_v61  ;;  %v10750_v63 = vld [vmem:[#allocation2 + $0x4c] sm:$0xf]  ;;  %v4938_v31 = vrot.slane %v4936_v19, 1  ;;  %v5726_v5 = vsel %vm2482_vm11, %v4698_v54, %v4821_v12  ;;  %v4699_v33 = vrot.slane %v7187_v55, 1  ;;  %v11601_v54 = vld [vmem:[#allocation27_spill] sm:$0xff] }
 0x2e3   : > { %v7188_v11 = vcombine.low %v10747_v14, %v10750_v63  ;;  %v11595_v23 = vshrl.u32 %v10092_v20, 16  ;;  %v4948_v41 = vshll.u32 %v10425_v36, 16  ;;  %v5521_v47 = vshrl.u32 %v10713_v58, 16  ;;  %5556 = vrot.lane.b32.xlu0 %v10707_v48, %s8557_s10  ;;  %v11625_v63 = vld [vmem:[#allocation41_spill] sm:$0xff] }
 0x2e4   : > { %v5525_v4 = vrot.slane %v5523_v28, 1  ;;  %v10763_v10 = vrot.slane %v5528_v39, 1  ;;  %v10766_v26 = vsel %vm1232_vm9, %v4934_v59, %v4938_v31  ;;  %v11596_v3 = vshrl.u32 %v10134_v34, 16  ;;  %v4152_v39 = vld [vmem:[#allocation2 + $0x90] sm:$0xe] }
 0x2e5   : > { %v4946_v25 = vor.u32 %v10328_v13, %v11595_v23  ;;  %v4950_v46 = vrot.slane %v4948_v41, 1  ;;  %v4960_v13 = vshll.u32 %v10467_v17, 16  ;;  %v7193_v36 = vcombine.low %v4151_v9, %v10358_v60  ;;  %5204 = vrot.lane.b32.xlu1 %v10700_v7, %s8557_s10  ;;  %v4153_v7 = vld [vmem:[#allocation2 + $0x9c] sm:$0xe] }
 0x2e6   : > { %v4958_v20 = vor.u32 %v10365_v0, %v11596_v3  ;;  %v5670_v16 = vsel %vm2482_vm11, %v10075_v52, %v4611_v62  ;;  %v4718_v35 = vrot.slane %v10398_v56, 1  ;;  %v11597_v55 = vshrl.u32 %v10177_v2, 16  ;;  %v4613_v2 = vpop.permute.xlu1 %4612  ;;  %v11599_v62 = vld [vmem:[#allocation11_spill] sm:$0xff] }
 0x2e7   : > { %v4972_v28 = vshll.u32 %v10492_v22, 16  ;;  %6284 = vmatmul.mubr.bf16.gmra.mrb[76].mxu1 %v5670_v16  ;;  %v10783_v34 = vsel %vm1232_vm9, %v4946_v25, %v4950_v46  ;;  %v4962_v60 = vrot.slane %v4960_v13, 1  ;;  %v4717_v0 = vrot.slane %v7193_v36, 1  ;;  %v11598_v22 = vld [vmem:[#allocation29_spill] sm:$0xff]  ;;  %v11604_v25 = vld [vmem:[#allocation36_spill] sm:$0xff]  ;;  %5558 = vrot.lane.b32.xlu0 %v10727_v37, %s8557_s10  ;;  %v11609_v36 = vld [vmem:[#allocation50_spill] sm:$0xff] }
 0x2e8   : > { %v4970_v12 = vor.u32 %v10383_v27, %v11597_v55  ;;  %v7194_v52 = vcombine.low %v4152_v39, %v10391_v44  ;;  %6291 = vmatprep.mubr.bf16.mxu1 %v5726_v5  ;;  %v4701_v27 = vsel %vm1505_vm10, %v4699_v33, %v4700_v1  ;;  %v5526_v56 = vor.u32 %v5525_v4, %v5521_v47  ;;  %v11602_v1 = vld [vmem:[#allocation46_spill] sm:$0xff]  ;;  %v11605_v47 = vld [vmem:[#allocation20_spill] sm:$0xff]  ;;  %v11606_v46 = vld [vmem:[#allocation13_spill] sm:$0xff]  ;;  %v4823_v55 = vpop.permute.xlu0 %4822 }
 0x2e9   : > { %v4974_v17 = vrot.slane %v4972_v28, 1  ;;  %v4721_v61 = vrot.slane %v11598_v22, 1  ;;  %v10791_v48 = vsel %vm1232_vm9, %v4958_v20, %v4962_v60  ;;  %v10794_v59 = vsel %vm1505_vm10, %v4717_v0, %v4718_v35  ;;  %v11603_v33 = vld [vmem:[#allocation30_spill] sm:$0xff]  ;;  %v11608_v20 = vld [vmem:[#allocation31_spill] sm:$0xff]  ;;  %v4154_v35 = vld [vmem:[#allocation2 + $0xa8] sm:$0xe]  ;;  %5206 = vrot.lane.b32.xlu1 %v10710_v40, %s8557_s10 }
 0x2ea   : > { %v4720_v19 = vrot.slane %v7194_v52, 1  ;;  %v11600_v44 = vshrl.u32 %v11599_v62, 16  ;;  %v4984_v5 = vshll.u32 %v11602_v1, 16  ;;  %v7195_v23 = vcombine.low %v4153_v7, %v11603_v33  ;;  %v11610_v37 = vld [vmem:[#allocation35_spill] sm:$0xff]  ;;  %v11611_v60 = vld [vmem:[#allocation42_spill] sm:$0xff]  ;;  %v11615_v62 = vld [vmem:[#allocation52_spill] sm:$0xff]  ;;  %v4615_v14 = vpop.permute.xlu1 %4614 }
 0x2eb   : > { %v10800_v31 = vsel %vm1232_vm9, %v4970_v12, %v4974_v17  ;;  %v4724_v41 = vrot.slane %v11604_v25, 1  ;;  %v5673_v4 = vsel %vm2482_vm11, %v11605_v47, %v4613_v2  ;;  %v11607_v3 = vshrl.u32 %v11606_v46, 16  ;;  %v4155_v52 = vld [vmem:[#allocation2 + $0xb4] sm:$0xe]  ;;  %v11612_v17 = vld [vmem:[#allocation7_spill] sm:$0xff]  ;;  %v11617_v33 = vld [vmem:[#allocation48_spill] sm:$0xff]  ;;  %5560 = vrot.lane.b32.xlu0 %v10739_v30, %s8557_s10 }
 0x2ec   : > { %v4982_v8 = vor.u32 %v11601_v54, %v11600_v44  ;;  %v10810_v9 = vsel %vm1505_vm10, %v4720_v19, %v4721_v61  ;;  %v4996_v16 = vshll.u32 %v11609_v36, 16  ;;  %v4986_v12 = vrot.slane %v4984_v5, 1  ;;  %v11614_v61 = vld [vmem:[#allocation32_spill] sm:$0xff]  ;;  %v11616_v54 = vld [vmem:[#allocation43_spill] sm:$0xff] }
 0x2ed   : > { %v4994_v13 = vor.u32 %v11608_v20, %v11607_v3  ;;  %v4723_v28 = vrot.slane %v7195_v23, 1  ;;  %v7196_v39 = vcombine.low %v4154_v35, %v11610_v37  ;;  %v4727_v0 = vrot.slane %v11611_v60, 1  ;;  %5208 = vrot.lane.b32.xlu1 %v10742_v42, %s8557_s10  ;;  %v11618_v20 = vld [vmem:[#allocation24_spill] sm:$0xff] }
 0x2ee   : > { %v4998_v2 = vrot.slane %v4996_v16, 1  ;;  %v11613_v22 = vshrl.u32 %v11612_v17, 16  ;;  %v5008_v44 = vshll.u32 %v11615_v62, 16  ;;  %v7197_v7 = vcombine.low %v4155_v52, %v11616_v54  ;;  %v4147_v52 = vld [vmem:[#allocation2 + $0x54] sm:$0xe] }
 0x2ef   : > { %v10826_v1 = vsel %vm1232_vm9, %v4982_v8, %v4986_v12  ;;  %v10829_v40 = vsel %vm1505_vm10, %v4723_v28, %v4724_v41  ;;  %v4726_v5 = vrot.slane %v7196_v39, 1  ;;  %v4730_v23 = vrot.slane %v11617_v33, 1  ;;  %6292 = vmatmul.mubr.bf16.gmra.mrb[80].mxu1 %v5673_v4  ;;  %v11620_v4 = vld [vmem:[#allocation40_spill] sm:$0xff] }
 0x2f0   : > { %v5006_v19 = vor.u32 %v11614_v61, %v11613_v22  ;;  %v5730_v25 = vsel %vm2482_vm11, %v4701_v27, %v4823_v55  ;;  %v10836_v47 = vsel %vm1232_vm9, %v4994_v13, %v4998_v2  ;;  %v5010_v46 = vrot.slane %v5008_v44, 1  ;;  %v11621_v55 = vld [vmem:[#allocation33_spill] sm:$0xff]  ;;  %v11623_v28 = vld [vmem:[#allocation44_spill] sm:$0xff]  ;;  %v8455_v22 = vld [vmem:[#allocation2 + $0x58] sm:$0xf] }
 0x2f1   : > { %v4729_v3 = vrot.slane %v7197_v7, 1  ;;  %6299 = vmatprep.mubr.bf16.mxu1 %v5730_v25  ;;  %v5531_v8 = vsel %vm1232_vm9, %v5526_v56, %v10763_v10  ;;  %v10843_v41 = vsel %vm1505_vm10, %v4726_v5, %v4727_v0  ;;  %v11619_v30 = vshrl.u32 %v11618_v20, 16  ;;  %v8454_v10 = vld [vmem:[#allocation2 + $0x50] ss:$0 sps:$4 sm:$0x11]   ;;  %v11624_v39 = vld [vmem:[#allocation56_spill] sm:$0xff]  ;;  %v4825_v0 = vpop.permute.xlu0 %4824  ;;  %v4617_v20 = vpop.permute.xlu1 %4616 }
 0x2f2   : > { %v5020_v27 = vshll.u32 %v10583_v53, 16  ;;  %v4702_v13 = vrot.slane %v7188_v11, 1  ;;  %v10853_v16 = vsel %vm1232_vm9, %v5006_v19, %v5010_v46  ;;  %v4703_v56 = vrot.slane %v8454_v10, 1  ;;  %5562 = vrot.lane.b32.xlu0 %v5531_v8, %s8557_s10  ;;  %v11627_v25 = vld [vmem:[#allocation8_spill] sm:$0xff] }
 0x2f3   : > { %v5018_v36 = vor.u32 %v11620_v4, %v11619_v30  ;;  %v10856_v42 = vsel %vm1505_vm10, %v4729_v3, %v4730_v23  ;;  %v11622_v12 = vshrl.u32 %v11621_v55, 16  ;;  %v5032_v60 = vshll.u32 %v11624_v39, 16  ;;  %v11628_v3 = vld [vmem:[#allocation45_spill] sm:$0xff]  ;;  %v8456_v30 = vld [vmem:[#allocation2 + $0x5c] ss:$0 sps:$4 sm:$0x11]  }
 0x2f4   : > { %v5022_v35 = vrot.slane %v5020_v27, 1  ;;  %v5179_v53 = vsel %vm1505_vm10, %v10744_v15, %v5178_v43  ;;  %v5039_v11 = vshll.u32 %v11625_v63, 16  ;;  %v7189_v61 = vcombine.low %v4147_v52, %v8455_v22  ;;  %v11626_v43 = vld [vmem:[#allocation10_spill] sm:$0xff] }
 0x2f5   : > { %v5030_v37 = vor.u32 %v11623_v28, %v11622_v12  ;;  %5210 = vrot.lane.b32.xlu1 %v5179_v53, %s8557_s10  ;;  %v5034_v17 = vrot.slane %v5032_v60, 1  ;;  %v5037_v19 = vshrl.u32 %v11625_v63, 16  ;;  %v5044_v15 = vshll.u32 %v10643_v29, 16  ;;  %v11629_v28 = vld [vmem:[#allocation51_spill] sm:$0xff] }
 0x2f6   : > { %v10870_v2 = vsel %vm1232_vm9, %v5018_v36, %v5022_v35  ;;  %v5041_v62 = vrot.slane %v5039_v11, 1  ;;  %v5676_v44 = vsel %vm2482_vm11, %v11626_v43, %v4615_v14  ;;  %v4704_v54 = vsel %vm1505_vm10, %v4702_v13, %v4703_v56  ;;  %v4827_v56 = vpop.permute.xlu0 %4826  ;;  %v4148_v35 = vld [vmem:[#allocation2 + $0x60] sm:$0xe]  ;;  %v8457_v53 = vld [vmem:[#allocation2 + $0x64] sm:$0xf]  ;;  %v11630_v11 = vld [vmem:[#allocation21_spill] sm:$0xff] }
 0x2f7   : > { %v10878_v7 = vsel %vm1232_vm9, %v5030_v37, %v5034_v17  ;;  %6300 = vmatmul.mubr.bf16.gmra.mrb[84].mxu1 %v5676_v44  ;;  %v5734_v5 = vsel %vm2482_vm11, %v4704_v54, %v4825_v0  ;;  %v5046_v23 = vrot.slane %v5044_v15, 1  ;;  %v4895_v46 = vshll.u32 %v11627_v25, 16 }
 0x2f8   : > { %v5042_v33 = vor.u32 %v5041_v62, %v5037_v19  ;;  %6307 = vmatprep.mubr.bf16.mxu1 %v5734_v5  ;;  %v5051_v8 = vshll.u32 %v11628_v3, 16  ;;  %v4705_v29 = vrot.slane %v7189_v61, 1  ;;  %v4706_v4 = vrot.slane %v8456_v30, 1  ;;  %v4619_v61 = vpop.permute.xlu1 %4618  ;;  %v8458_v19 = vld [vmem:[#allocation2 + $0x14] ss:$0 sps:$4 sm:$0x11]  }
 0x2f9   : > { %v5056_v27 = vshll.u32 %v10663_v32, 16  ;;  %v5049_v13 = vshrl.u32 %v11628_v3, 16  ;;  %v5063_v37 = vshll.u32 %v11629_v28, 16  ;;  %v4897_v39 = vrot.slane %v4895_v46, 1 }
 0x2fa   : > { %v10884_v36 = vsel %vm1232_vm9, %v5042_v33, %v5046_v23  ;;  %v5053_v10 = vrot.slane %v5051_v8, 1  ;;  %v4707_v60 = vsel %vm1505_vm10, %v4705_v29, %v4706_v4  ;;  %v7190_v14 = vcombine.low %v4148_v35, %v8457_v53  ;;  %v5533_v33 = vpop.permute.xlu0 %5532  ;;  %v8459_v46 = vld [vmem:[#allocation2 + $0x68] ss:$0 sps:$4 sm:$0x11]   ;;  %v11634_v53 = vld [vmem:[#allocation58_spill] sm:$0xff] }
 0x2fb   : > { %v5058_v12 = vrot.slane %v5056_v27, 1  ;;  %v5068_v63 = vshll.u32 %v10684_v24, 16  ;;  %v5679_v0 = vsel %vm2482_vm11, %v11630_v11, %v4617_v20  ;;  %v5061_v52 = vshrl.u32 %v11629_v28, 16  ;;  %v11631_v8 = vld [vmem:[#allocation12_spill] sm:$0xff]  ;;  %v11632_v27 = vld [vmem:[#allocation19_spill] sm:$0xff] }
 0x2fc   : > { %v5054_v55 = vor.u32 %v5053_v10, %v5049_v13  ;;  %v5065_v17 = vrot.slane %v5063_v37, 1  ;;  %v4893_v22 = vshrl.u32 %v11627_v25, 16  ;;  %v4900_v62 = vshll.u32 %v8458_v19, 16  ;;  %v11633_v37 = vld [vmem:[#allocation22_spill] sm:$0xff] }
 0x2fd   : > { %v5738_v15 = vsel %vm2482_vm11, %v4707_v60, %v4827_v56  ;;  %v5070_v24 = vrot.slane %v5068_v63, 1  ;;  %v5075_v54 = vshll.u32 %v10566_v51, 16  ;;  %v5080_v5 = vshll.u32 %v10718_v49, 16  ;;  %v5181_v49 = vpop.permute.xlu1 %5180 }
 0x2fe   : > { %v10894_v32 = vsel %vm1232_vm9, %v5054_v55, %v5058_v12  ;;  %v5066_v43 = vor.u32 %v5065_v17, %v5061_v52  ;;  %v4898_v44 = vor.u32 %v4897_v39, %v4893_v22  ;;  %v4708_v23 = vrot.slane %v7190_v14, 1  ;;  %v4281_v55 = vld [vmem:[#allocation2 + $0xb4] sm:$0xe]  ;;  %v4829_v28 = vpop.permute.xlu0 %4828  ;;  %v4283_v14 = vld [vmem:[#allocation2 + $0xcc] sm:$0xe] }
 0x2ff   : > { %6308 = vmatmul.mubr.bf16.gmra.mrb[88].mxu1 %v5679_v0  ;;  %v4709_v3 = vrot.slane %v8459_v46, 1  ;;  %v5837_v20 = vsel %vm2482_vm11, %v11631_v8, %v5533_v33  ;;  %v4902_v29 = vrot.slane %v4900_v62, 1  ;;  %v5073_v30 = vshrl.u32 %v10566_v51, 16  ;;  %v4282_v52 = vld [vmem:[#allocation2 + $0xc0] sm:$0xe] }
 0x300   : > { %6315 = vmatprep.mubr.bf16.mxu1 %v5738_v15  ;;  %v10902_v25 = vsel %vm1232_vm9, %v5066_v43, %v5070_v24  ;;  %v5077_v4 = vrot.slane %v5075_v54, 1  ;;  %6420 = vmatprep.mubr.bf16.mxu0 %v5837_v20  ;;  %v4907_v13 = vshll.u32 %v11632_v27, 16  ;;  %v5082_v35 = vrot.slane %v5080_v5, 1  ;;  %v4149_v33 = vld [vmem:[#allocation2 + $0x6c] sm:$0xe]  ;;  %v11636_v20 = vld [vmem:[#allocation14_spill] sm:$0xff] }
 0x301   : > { %v4903_v10 = vsel %vm1232_vm9, %v4898_v44, %v4902_v29  ;;  %v5682_v39 = vsel %vm2482_vm11, %v11633_v37, %v4619_v61  ;;  %v4710_v60 = vsel %vm1505_vm10, %v4708_v23, %v4709_v3  ;;  %v7291_v51 = vcombine.low %v4281_v55, %v11634_v53  ;;  %v4150_v53 = vld [vmem:[#allocation2 + $0x78] sm:$0xe] }
 0x302   : > { %v5078_v56 = vor.u32 %v5077_v4, %v5073_v30  ;;  %v5774_v12 = vsel %vm2482_vm11, %v4903_v10, %v5181_v49  ;;  %v5742_v63 = vsel %vm2482_vm11, %v4710_v60, %v4829_v28  ;;  %v5652_v0 = vrot.slane %v10651_v57, 1  ;;  %v8460_v57 = vld [vmem:[#allocation2 + $0x20] ss:$0 sps:$4 sm:$0x11]  }
 0x303   : > { %6421 = vmatmul.mubr.bf16.vlgmr.msra.gmra.mrb[96].mxu0 %v5774_v12  ;;  %v5651_v17 = vrot.slane %v7291_v51, 1  ;;  %v7292_v22 = vcombine.low %v4282_v52, %v10617_v21  ;;  %v5655_v61 = vrot.slane %v10674_v38, 1  ;;  %v7293_v19 = vcombine.low %v4283_v14, %v10693_v18  ;;  %v8461_v21 = vld [vmem:[#allocation2 + $0x70] sm:$0xf] }
 0x304   : > { %v10916_v11 = vsel %vm1232_vm9, %v5078_v56, %v5082_v35  ;;  %v5658_v62 = vrot.slane %v10715_v6, 1  ;;  %v4909_v15 = vrot.slane %v4907_v13, 1  ;;  %v4905_v54 = vshrl.u32 %v11632_v27, 16  ;;  %v11635_v6 = vld [vmem:[#allocation9_spill] sm:$0xff]  ;;  %v4621_v3 = vpop.permute.xlu1 %4620  ;;  %v11637_v56 = vld [vmem:[#allocation15_spill] sm:$0xff] }
 0x305   : > { %v10924_v43 = vsel %vm1505_vm10, %v5651_v17, %v5652_v0  ;;  %v5654_v24 = vrot.slane %v7292_v22, 1  ;;  %v5657_v44 = vrot.slane %v7293_v19, 1  ;;  %v4912_v5 = vshll.u32 %v8460_v57, 16  ;;  %v8462_v13 = vld [vmem:[#allocation2 + $0x74] ss:$0 sps:$4 sm:$0x11]  }
 0x306   : > { %v7191_v38 = vcombine.low %v4149_v33, %v8461_v21  ;;  %v4919_v46 = vshll.u32 %v11635_v6, 16  ;;  %v4910_v8 = vor.u32 %v4909_v15, %v4905_v54  ;;  %v5685_v29 = vsel %vm2482_vm11, %v11636_v20, %v4621_v3  ;;  %v11639_v57 = vld [vmem:[#allocation17_spill] sm:$0xff]  ;;  %v11640_v20 = vld [vmem:[#allocation18_spill] sm:$0xff] }
 0x307   : > { %6316 = vmatmul.mubr.bf16.gmra.mrb[92].mxu1 %v5682_v39  ;;  %v10928_v23 = vsel %vm1505_vm10, %v5654_v24, %v5655_v61  ;;  %v10931_v18 = vsel %vm1505_vm10, %v5657_v44, %v5658_v62  ;;  %v4914_v30 = vrot.slane %v4912_v5, 1  ;;  %v5535_v4 = vpop.permute.xlu0 %5534  ;;  %v4712_v10 = vrot.slane %v8462_v13, 1  ;;  %v8463_v39 = vld [vmem:[#allocation2 + $0x2c] ss:$0 sps:$4 sm:$0x11]  }
 0x308   : > { %6323 = vmatprep.mubr.bf16.mxu1 %v5742_v63  ;;  %v4711_v27 = vrot.slane %v7191_v38, 1  ;;  %v4921_v49 = vrot.slane %v4919_v46, 1  ;;  %v5840_v35 = vsel %vm2482_vm11, %v11637_v56, %v5535_v4  ;;  %v5183_v55 = vpop.permute.xlu1 %5182  ;;  %v4917_v37 = vshrl.u32 %v11635_v6, 16  ;;  %v8464_v63 = vld [vmem:[#allocation2 + $0x7c] sm:$0xf]  ;;  %v11638_v61 = vld [vmem:[#allocation16_spill] sm:$0xff] }
 0x309   : > { %v4915_v12 = vsel %vm1232_vm9, %v4910_v8, %v4914_v30  ;;  %6428 = vmatprep.mubr.bf16.mxu0 %v5840_v35  ;;  %v4924_v60 = vshll.u32 %v8463_v39, 16  ;;  %v7192_v0 = vcombine.low %v4150_v53, %v8464_v63  ;;  %v8465_v44 = vld [vmem:[#allocation2 + $0x80] ss:$0 sps:$4 sm:$0x11]   ;;  %v11641_v4 = vld [vmem:[#allocation6_spill] sm:$0xff] }
 0x30a   : > { %v5778_v28 = vsel %vm2482_vm11, %v4915_v12, %v5183_v55  ;;  %v4713_v14 = vsel %vm1505_vm10, %v4711_v27, %v4712_v10  ;;  %v4922_v17 = vor.u32 %v4921_v49, %v4917_v37  ;;  %v4715_v54 = vrot.slane %v8465_v44, 1  ;;  %v11642_v55 = vld [vmem:[#allocation23_spill] sm:$0xff]  ;;  %v11643_v37 = vld [vmem:[#allocation25_spill] sm:$0xff] }
 0x30b   : > { %6429 = vmatmul.mubr.bf16.gmra.mrb[100].mxu0 %v5778_v28  ;;  %v4831_v51 = vpop.permute.xlu0 %4830  ;;  %v4926_v62 = vrot.slane %v4924_v60, 1  ;;  %v4714_v24 = vrot.slane %v7192_v0, 1  ;;  %v11647_v44 = vld [vmem:[#allocation37_spill] sm:$0xff] }
 0x30c   : > { %v4623_v52 = vpop.permute.xlu1 %4622  ;;  %v5746_v22 = vsel %vm2482_vm11, %v4713_v14, %v4831_v51  ;;  %v11644_v14 = vld [vmem:[#allocation26_spill] sm:$0xff] }
 0x30d   : > { %v5688_v19 = vsel %vm2482_vm11, %v11638_v61, %v4623_v52  ;;  %v4927_v21 = vsel %vm1232_vm9, %v4922_v17, %v4926_v62  ;;  %v4716_v46 = vsel %vm1505_vm10, %v4714_v24, %v4715_v54  ;;  %v11645_v52 = vld [vmem:[#allocation28_spill] sm:$0xff]  ;;  %v11646_v62 = vld [vmem:[#allocation34_spill] sm:$0xff] }
 0x30f   : > { %6324 = vmatmul.mubr.bf16.gmra.mrb[96].mxu1 %v5685_v29 }
 0x310   : > { %6331 = vmatprep.mubr.bf16.mxu1 %v5746_v22  ;;  %v5537_v15 = vpop.permute.xlu0 %5536  ;;  %v5185_v33 = vpop.permute.xlu1 %5184 }
 0x311   : > { %v5843_v5 = vsel %vm2482_vm11, %v11639_v57, %v5537_v15  ;;  %v5782_v38 = vsel %vm2482_vm11, %v4927_v21, %v5185_v33  ;;  %v11648_v21 = vld [vmem:[#allocation38_spill] sm:$0xff] }
 0x312   : > { %6436 = vmatprep.mubr.bf16.mxu0 %v5843_v5 }
 0x313   : > { %6437 = vmatmul.mubr.bf16.gmra.mrb[104].mxu0 %v5782_v38 }
 0x314   : > { %v4833_v6 = vpop.permute.xlu0 %4832 }
 0x315   : > { %v4625_v3 = vpop.permute.xlu1 %4624  ;;  %v5750_v8 = vsel %vm2482_vm11, %v4716_v46, %v4833_v6  ;;  %v4268_v6 = vld [vmem:[#allocation2 + $0x18] sm:$0xe]  ;;  %v8466_v46 = vld [vmem:[#allocation2 + $0x1c] sm:$0xf] }
 0x316   : > { %v5691_v29 = vsel %vm2482_vm11, %v11640_v20, %v4625_v3  ;;  %v7278_v3 = vcombine.low %v4268_v6, %v8466_v46  ;;  %v11649_v20 = vld [vmem:[#allocation39_spill] sm:$0xff]  ;;  %v11653_v6 = vld [vmem:[#allocation54_spill] sm:$0xff] }
 0x317   : > { %6332 = vmatmul.mubr.bf16.gmra.mrb[100].mxu1 %v5688_v19 }
 0x318   : > { %6339 = vmatprep.mubr.bf16.mxu1 %v5750_v8  ;;  %v5539_v30 = vpop.permute.xlu0 %5538 }
 0x319   : > { %v5846_v27 = vsel %vm2482_vm11, %v11641_v4, %v5539_v30  ;;  %v5187_v13 = vpop.permute.xlu1 %5186  ;;  %v5612_v4 = vrot.slane %v7278_v3, 1 }
 0x31a   : > { %6444 = vmatprep.mubr.bf16.mxu0 %v5846_v27  ;;  %v5786_v10 = vsel %vm2482_vm11, %v10766_v26, %v5187_v13 }
 0x31b   : > { %6445 = vmatmul.mubr.bf16.gmra.mrb[108].mxu0 %v5786_v10 }
 0x31c   : > { %v4835_v49 = vpop.permute.xlu0 %4834 }
 0x31d   : > { %v5754_v35 = vsel %vm2482_vm11, %v10794_v59, %v4835_v49 }
 0x31e   : > { %v4627_v56 = vpop.permute.xlu1 %4626 }
 0x31f   : > { %6340 = vmatmul.mubr.bf16.gmra.mrb[104].mxu1 %v5691_v29  ;;  %v5694_v12 = vsel %vm2482_vm11, %v11642_v55, %v4627_v56  ;;  %v4269_v56 = vld [vmem:[#allocation2 + $0x24] sm:$0xe] }
 0x320   : > { %6347 = vmatprep.mubr.bf16.mxu1 %v5754_v35  ;;  %v5541_v28 = vpop.permute.xlu0 %5540  ;;  %v11650_v35 = vld [vmem:[#allocation47_spill] sm:$0xff] }
 0x321   : > { %v5849_v39 = vsel %vm2482_vm11, %v11643_v37, %v5541_v28  ;;  %v4270_v37 = vld [vmem:[#allocation2 + $0x30] sm:$0xe] }
 0x322   : > { %v5189_v60 = vpop.permute.xlu1 %5188  ;;  %6452 = vmatprep.mubr.bf16.mxu0 %v5849_v39  ;;  %v8469_v39 = vld [vmem:[#allocation2 + $0x34] sm:$0xf] }
 0x323   : > { %v5790_v26 = vsel %vm2482_vm11, %v10783_v34, %v5189_v60  ;;  %v7280_v60 = vcombine.low %v4270_v37, %v8469_v39  ;;  %v8479_v39 = vld [vmem:[#allocation2 + $0x68] ss:$0 sps:$4 sm:$0x11]  }
 0x324   : > { %6453 = vmatmul.mubr.bf16.gmra.mrb[112].mxu0 %v5790_v26  ;;  %v4837_v53 = vpop.permute.xlu0 %4836 }
 0x325   : > { %v5758_v59 = vsel %vm2482_vm11, %v10810_v9, %v4837_v53  ;;  %v11651_v53 = vld [vmem:[#allocation49_spill] sm:$0xff] }
 0x327   : > { %6348 = vmatmul.mubr.bf16.gmra.mrb[108].mxu1 %v5694_v12  ;;  %v8468_v12 = vld [vmem:[#allocation2 + $0x28] sm:$0xf] }
 0x328   : > { %v4629_v51 = vpop.permute.xlu1 %4628  ;;  %6355 = vmatprep.mubr.bf16.mxu1 %v5758_v59  ;;  %v7279_v28 = vcombine.low %v4269_v56, %v8468_v12  ;;  %v8470_v59 = vld [vmem:[#allocation2 + $0x2c] ss:$0 sps:$4 sm:$0x11]  }
 0x329   : > { %v5697_v63 = vsel %vm2482_vm11, %v11644_v14, %v4629_v51  ;;  %v5616_v14 = vrot.slane %v8470_v59, 1  ;;  %v4276_v59 = vld [vmem:[#allocation2 + $0x78] sm:$0xe] }
 0x32c   : > { %v5543_v0 = vpop.permute.xlu0 %5542  ;;  %v5191_v22 = vpop.permute.xlu1 %5190 }
 0x32d   : > { %v5852_v17 = vsel %vm2482_vm11, %v11645_v52, %v5543_v0  ;;  %v5794_v34 = vsel %vm2482_vm11, %v10791_v48, %v5191_v22  ;;  %v5615_v0 = vrot.slane %v7279_v28, 1  ;;  %v5618_v52 = vrot.slane %v7280_v60, 1  ;;  %v11654_v28 = vld [vmem:[#allocation55_spill] sm:$0xff] }
 0x32e   : > { %6460 = vmatprep.mubr.bf16.mxu0 %v5852_v17  ;;  %v8471_v17 = vld [vmem:[#allocation2 + $0x38] ss:$0 sps:$4 sm:$0x11]   ;;  %v5631_v60 = vrot.slane %v8479_v39, 1 }
 0x32f   : > { %6356 = vmatmul.mubr.bf16.gmra.mrb[112].mxu1 %v5697_v63  ;;  %6461 = vmatmul.mubr.bf16.gmra.mrb[116].mxu0 %v5794_v34  ;;  %v5619_v22 = vrot.slane %v8471_v17, 1 }
 0x330   : > { %v4839_v61 = vpop.permute.xlu0 %4838  ;;  %v4631_v19 = vpop.permute.xlu1 %4630 }
 0x331   : > { %v5762_v9 = vsel %vm2482_vm11, %v10829_v40, %v4839_v61  ;;  %v5700_v15 = vsel %vm2482_vm11, %v11646_v62, %v4631_v19  ;;  %v11652_v61 = vld [vmem:[#allocation53_spill] sm:$0xff]  ;;  %v5617_v62 = vsel %vm1505_vm10, %v5615_v0, %v5616_v14 }
 0x332   : > { %6363 = vmatprep.mubr.bf16.mxu1 %v5762_v9  ;;  %v4271_v9 = vld [vmem:[#allocation2 + $0x3c] sm:$0xe] }
 0x334   : > { %v5545_v24 = vpop.permute.xlu0 %5544  ;;  %v5193_v57 = vpop.permute.xlu1 %5192 }
 0x335   : > { %v5855_v54 = vsel %vm2482_vm11, %v11647_v44, %v5545_v24  ;;  %v5798_v48 = vsel %vm2482_vm11, %v10800_v31, %v5193_v57  ;;  %v4272_v44 = vld [vmem:[#allocation2 + $0x48] sm:$0xe]  ;;  %v8473_v57 = vld [vmem:[#allocation2 + $0x4c] sm:$0xf] }
 0x336   : > { %6468 = vmatprep.mubr.bf16.mxu0 %v5855_v54 }
 0x337   : > { %6364 = vmatmul.mubr.bf16.gmra.mrb[116].mxu1 %v5700_v15  ;;  %6469 = vmatmul.mubr.bf16.gmra.mrb[120].mxu0 %v5798_v48  ;;  %v8472_v15 = vld [vmem:[#allocation2 + $0x40] sm:$0xf]  ;;  %v7282_v48 = vcombine.low %v4272_v44, %v8473_v57  ;;  %v4277_v44 = vld [vmem:[#allocation2 + $0x84] sm:$0xe] }
 0x338   : > { %v4841_v5 = vpop.permute.xlu0 %4840  ;;  %v4633_v33 = vpop.permute.xlu1 %4632  ;;  %v7281_v24 = vcombine.low %v4271_v9, %v8472_v15  ;;  %v8483_v15 = vld [vmem:[#allocation2 + $0x80] ss:$0 sps:$4 sm:$0x11]  }
 0x339   : > { %v5766_v40 = vsel %vm2482_vm11, %v10843_v41, %v4841_v5  ;;  %v5703_v38 = vsel %vm2482_vm11, %v11648_v21, %v4633_v33  ;;  %v8467_v41 = vld [vmem:[#allocation2 + $0x20] ss:$0 sps:$4 sm:$0x11]   ;;  %v8474_v21 = vld [vmem:[#allocation2 + $0x44] ss:$0 sps:$4 sm:$0x11]  }
 0x33a   : > { %6371 = vmatprep.mubr.bf16.mxu1 %v5766_v40  ;;  %v5613_v27 = vrot.slane %v8467_v41, 1  ;;  %v5621_v40 = vrot.slane %v7281_v24, 1  ;;  %v5624_v3 = vrot.slane %v7282_v48, 1  ;;  %v4274_v41 = vld [vmem:[#allocation2 + $0x60] sm:$0xe]  ;;  %v5637_v24 = vrot.slane %v8483_v15, 1 }
 0x33b   : > { %v4278_v48 = vld [vmem:[#allocation2 + $0x90] sm:$0xe] }
 0x33c   : > { %v5547_v8 = vpop.permute.xlu0 %5546  ;;  %v5195_v30 = vpop.permute.xlu1 %5194 }
 0x33d   : > { %v5858_v29 = vsel %vm2482_vm11, %v11649_v20, %v5547_v8  ;;  %v5802_v31 = vsel %vm2482_vm11, %v10826_v1, %v5195_v30  ;;  %v5614_v1 = vsel %vm1505_vm10, %v5612_v4, %v5613_v27  ;;  %v8475_v8 = vld [vmem:[#allocation2 + $0x50] ss:$0 sps:$4 sm:$0x11]  }
 0x33e   : > { %6476 = vmatprep.mubr.bf16.mxu0 %v5858_v29  ;;  %v5625_v20 = vrot.slane %v8475_v8, 1  ;;  %v4273_v29 = vld [vmem:[#allocation2 + $0x54] sm:$0xe] }
 0x33f   : > { %6372 = vmatmul.mubr.bf16.gmra.mrb[120].mxu1 %v5703_v38  ;;  %6477 = vmatmul.mubr.bf16.gmra.mrb[124].mxu0 %v5802_v31  ;;  %v5622_v38 = vrot.slane %v8474_v21, 1  ;;  %v8476_v31 = vld [vmem:[#allocation2 + $0x58] sm:$0xf] }
 0x340   : > { %v7283_v4 = vcombine.low %v4273_v29, %v8476_v31  ;;  %v8487_v29 = vld [vmem:[#allocation2 + $0x98] ss:$0 sps:$4 sm:$0x11]   ;;  %v4279_v31 = vld [vmem:[#allocation2 + $0x9c] sm:$0xe] }
 0x341   : > { %v4843_v13 = vpop.permute.xlu0 %4842  ;;  %v5623_v30 = vsel %vm1505_vm10, %v5621_v40, %v5622_v38 }
 0x342   : > { %v4635_v10 = vpop.permute.xlu1 %4634  ;;  %v5770_v49 = vsel %vm2482_vm11, %v10856_v42, %v4843_v13  ;;  %v8477_v13 = vld [vmem:[#allocation2 + $0x64] sm:$0xf] }
 0x343   : > { %6379 = vmatprep.mubr.bf16.mxu1 %v5770_v49  ;;  %v5706_v55 = vsel %vm2482_vm11, %v11650_v35, %v4635_v10  ;;  %v7284_v10 = vcombine.low %v4274_v41, %v8477_v13  ;;  %v5627_v35 = vrot.slane %v7283_v4, 1  ;;  %v8488_v41 = vld [vmem:[#allocation2 + $0xa0] sm:$0xf] }
 0x345   : > { %v5549_v26 = vpop.permute.xlu0 %5548 }
 0x346   : > { %v5861_v51 = vsel %vm2482_vm11, %v11651_v53, %v5549_v26  ;;  %v4275_v26 = vld [vmem:[#allocation2 + $0x6c] sm:$0xe] }
 0x347   : > { %6380 = vmatmul.mubr.bf16.gmra.mrb[124].mxu1 %v5706_v55  ;;  %v5197_v42 = vpop.permute.xlu1 %5196  ;;  %6484 = vmatprep.mubr.bf16.mxu0 %v5861_v51  ;;  %v8478_v55 = vld [vmem:[#allocation2 + $0x5c] ss:$0 sps:$4 sm:$0x11]   ;;  %v8480_v51 = vld [vmem:[#allocation2 + $0x70] sm:$0xf] }
 0x348   : > { %7954 = vmatprep.mubr.msk.bf16.mxu1 %vm2482_vm11, %v5614_v1  ;;  %v5806_v63 = vsel %vm2482_vm11, %v10836_v47, %v5197_v42  ;;  %v5620_v47 = vsel %vm1505_vm10, %v5618_v52, %v5619_v22  ;;  %v5628_v12 = vrot.slane %v8478_v55, 1  ;;  %v5630_v1 = vrot.slane %v7284_v10, 1  ;;  %v8489_v10 = vld [vmem:[#allocation2 + $0xac] sm:$0xf] }
 0x349   : > { %6485 = vmatmul.mubr.bf16.gmra.mrb[128].mxu0 %v5806_v63  ;;  %v5551_v34 = vpop.permute.xlu0 %5550  ;;  %v7285_v42 = vcombine.low %v4275_v26, %v8480_v51  ;;  %v8481_v63 = vld [vmem:[#allocation2 + $0x7c] sm:$0xf]  ;;  %v8490_v55 = vld [vmem:[#allocation2 + $0xa4] ss:$0 sps:$4 sm:$0x11]  }
 0x34a   : > { %v5864_v19 = vsel %vm2482_vm11, %v11652_v61, %v5551_v34  ;;  %v5629_v53 = vsel %vm1505_vm10, %v5627_v35, %v5628_v12  ;;  %v7286_v0 = vcombine.low %v4276_v59, %v8481_v63  ;;  %v8482_v34 = vld [vmem:[#allocation2 + $0x74] ss:$0 sps:$4 sm:$0x11]   ;;  %v5646_v12 = vrot.slane %v8490_v55, 1 }
 0x34b   : > { %6492 = vmatprep.mubr.bf16.mxu0 %v5864_v19  ;;  %v5199_v54 = vpop.permute.xlu1 %5198  ;;  %v5633_v22 = vrot.slane %v7285_v42, 1  ;;  %v5634_v61 = vrot.slane %v8482_v34, 1  ;;  %v11655_v19 = vld [vmem:[#allocation57_spill] sm:$0xff] }
 0x34c   : > { %v5810_v33 = vsel %vm2482_vm11, %v10853_v16, %v5199_v54  ;;  %v5626_v16 = vsel %vm1505_vm10, %v5624_v3, %v5625_v20 }
 0x34d   : > { %v5553_v5 = vpop.permute.xlu0 %5552  ;;  %v5635_v54 = vsel %vm1505_vm10, %v5633_v22, %v5634_v61 }
 0x34e   : > { %v5867_v46 = vsel %vm2482_vm11, %v11653_v6, %v5553_v5 }
 0x34f   : > { %7955 = vmatmul.mubr.msk.bf16.vlgmr.msra.gmra.mrb[128].mxu1 %vm2482_vm11, %v5617_v62  ;;  %v5201_v27 = vpop.permute.xlu1 %5200  ;;  %v5636_v62 = vrot.slane %v7286_v0, 1 }
 0x350   : > { %7958 = vmatprep.mubr.msk.bf16.mxu1 %vm2482_vm11, %v5620_v47  ;;  %v5814_v56 = vsel %vm2482_vm11, %v10870_v2, %v5201_v27  ;;  %v5632_v2 = vsel %vm1505_vm10, %v5630_v1, %v5631_v60  ;;  %v8484_v47 = vld [vmem:[#allocation2 + $0x88] sm:$0xf]  ;;  %v7289_v27 = vcombine.low %v4279_v31, %v8488_v41  ;;  %v8491_v1 = vld [vmem:[#allocation2 + $0xb0] ss:$0 sps:$4 sm:$0x11]  }
 0x351   : > { %6493 = vmatmul.mubr.bf16.gmra.mrb[132].mxu0 %v5810_v33  ;;  %v5555_v49 = vpop.permute.xlu0 %5554  ;;  %v7287_v57 = vcombine.low %v4277_v44, %v8484_v47  ;;  %v8485_v33 = vld [vmem:[#allocation2 + $0x94] sm:$0xf]  ;;  %v5649_v39 = vrot.slane %v8491_v1, 1 }
 0x352   : > { %6500 = vmatprep.mubr.bf16.mxu0 %v5867_v46  ;;  %v5870_v37 = vsel %vm2482_vm11, %v11654_v28, %v5555_v49  ;;  %v7288_v40 = vcombine.low %v4278_v48, %v8485_v33  ;;  %v8486_v46 = vld [vmem:[#allocation2 + $0x8c] ss:$0 sps:$4 sm:$0x11]   ;;  %v5645_v35 = vrot.slane %v7289_v27, 1 }
 0x353   : > { %v5203_v14 = vpop.permute.xlu1 %5202  ;;  %v5639_v6 = vrot.slane %v7287_v57, 1  ;;  %v5640_v3 = vrot.slane %v8486_v46, 1 }
 0x354   : > { %v5818_v17 = vsel %vm2482_vm11, %v10878_v7, %v5203_v14  ;;  %v5638_v7 = vsel %vm1505_vm10, %v5636_v62, %v5637_v24  ;;  %v5642_v20 = vrot.slane %v7288_v40, 1  ;;  %v5647_v26 = vsel %vm1505_vm10, %v5645_v35, %v5646_v12 }
 0x355   : > { %v5557_v52 = vpop.permute.xlu0 %5556  ;;  %v5641_v4 = vsel %vm1505_vm10, %v5639_v6, %v5640_v3 }
 0x356   : > { %v5873_v9 = vsel %vm2482_vm11, %v11655_v19, %v5557_v52 }
 0x357   : > { %7959 = vmatmul.mubr.msk.bf16.gmra.mrb[132].mxu1 %vm2482_vm11, %v5623_v30  ;;  %v5205_v5 = vpop.permute.xlu1 %5204  ;;  %v5643_v30 = vrot.slane %v8487_v29, 1 }
 0x358   : > { %7962 = vmatprep.mubr.msk.bf16.mxu1 %vm2482_vm11, %v5626_v16  ;;  %v5822_v38 = vsel %vm2482_vm11, %v10884_v36, %v5205_v5  ;;  %v4280_v16 = vld [vmem:[#allocation2 + $0xa8] sm:$0xe] }
 0x359   : > { %6501 = vmatmul.mubr.bf16.gmra.mrb[136].mxu0 %v5814_v56  ;;  %v5559_v21 = vpop.permute.xlu0 %5558  ;;  %v5644_v36 = vsel %vm1505_vm10, %v5642_v20, %v5643_v30  ;;  %v7290_v49 = vcombine.low %v4280_v16, %v8489_v10  ;;  %v11080_v16 = vld [vmem:[%s11407_s4] ss:$0 sm:$0xff] }
 0x35a   : > { %6508 = vmatprep.mubr.bf16.mxu0 %v5870_v37  ;;  %v5876_v8 = vsel %vm2482_vm11, %v10624_v50, %v5559_v21 }
 0x35b   : > { %v5207_v13 = vpop.permute.xlu1 %5206  ;;  %v5648_v37 = vrot.slane %v7290_v49, 1 }
 0x35c   : > { %v5826_v50 = vsel %vm2482_vm11, %v10894_v32, %v5207_v13 }
 0x35d   : > { %v5561_v56 = vpop.permute.xlu0 %5560  ;;  %v5650_v51 = vsel %vm1505_vm10, %v5648_v37, %v5649_v39 }
 0x35e   : > { %v5879_v28 = vsel %vm2482_vm11, %v10646_v45, %v5561_v56 }
 0x35f   : > { %7963 = vmatmul.mubr.msk.bf16.gmra.mrb[136].mxu1 %vm2482_vm11, %v5629_v53  ;;  %v5209_v53 = vpop.permute.xlu1 %5208 }
 0x360   : > { %7966 = vmatprep.mubr.msk.bf16.mxu1 %vm2482_vm11, %v5632_v2  ;;  %v5830_v45 = vsel %vm2482_vm11, %v10902_v25, %v5209_v53 }
 0x361   : > { %6509 = vmatmul.mubr.bf16.gmra.mrb[140].mxu0 %v5818_v17 }
 0x362   : > { %6516 = vmatprep.mubr.bf16.mxu0 %v5873_v9 }
 0x364   : > { %v5563_v60 = vpop.permute.xlu0 %5562 }
 0x365   : > { %v5882_v32 = vsel %vm2482_vm11, %v10713_v58, %v5563_v60 }
 0x367   : > { %7967 = vmatmul.mubr.msk.bf16.gmra.mrb[140].mxu1 %vm2482_vm11, %v5635_v54  ;;  %v5211_v42 = vpop.permute.xlu1 %5210 }
 0x368   : > { %7970 = vmatprep.mubr.msk.bf16.mxu1 %vm2482_vm11, %v5638_v7  ;;  %v5834_v59 = vsel %vm2482_vm11, %v10916_v11, %v5211_v42 }
 0x369   : > { %6517 = vmatmul.mubr.bf16.gmra.mrb[144].mxu0 %v5822_v38 }
 0x36a   : > { %6524 = vmatprep.mubr.bf16.mxu0 %v5876_v8 }
 0x36f   : > { %7971 = vmatmul.mubr.msk.bf16.gmra.mrb[144].mxu1 %vm2482_vm11, %v5641_v4 }
 0x370   : > { %7974 = vmatprep.mubr.msk.bf16.mxu1 %vm2482_vm11, %v5644_v36 }
 0x371   : > { %6525 = vmatmul.mubr.bf16.gmra.mrb[148].mxu0 %v5826_v50 }
 0x372   : > { %6532 = vmatprep.mubr.bf16.mxu0 %v5879_v28 }
 0x377   : > { %7975 = vmatmul.mubr.msk.bf16.gmra.mrb[148].mxu1 %vm2482_vm11, %v5647_v26 }
 0x378   : > { %7978 = vmatprep.mubr.msk.bf16.mxu1 %vm2482_vm11, %v5650_v51 }
 0x379   : > { %6533 = vmatmul.mubr.bf16.gmra.mrb[152].mxu0 %v5830_v45 }
 0x37a   : > { %6540 = vmatprep.mubr.bf16.mxu0 %v5882_v32 }
 0x37f   : > { %7979 = vmatmul.mubr.msk.bf16.gmra.mrb[152].mxu1 %vm2482_vm11, %v10924_v43 }
 0x380   : > { %7982 = vmatprep.mubr.msk.bf16.mxu1 %vm2482_vm11, %v10928_v23 }
 0x381   : > { %6541 = vmatmul.mubr.bf16.gmra.mrb[156].mxu0 %v5834_v59 }
 0x387   : > { %7983 = vmatmul.mubr.msk.bf16.gmra.mrb[156].mxu1 %vm2482_vm11, %v10931_v18 }
 0x3a2   : > { %v7678_v58 = vpop.f32.mrb[64].mxu1 }
 0x3a3   : > { %v7679_v14 = vpop.f32.mrb[65].mxu1 }
 0x3a4   : > { %v7680_v2 = vadd.f32 %v7679_v14, %v7678_v58  ;;  %v7681_v25 = vpop.f32.mrb[66].mxu1 }
 0x3a5   : > { %v7682_v63 = vpop.f32.mrb[67].mxu1 }
 0x3a6   : > { %v7683_v0 = vadd.f32 %v7682_v63, %v7681_v25  ;;  %v6262_v56 = vadd.f32 %v7680_v2, %v11080_v16 }
 0x3a8   : > { %v6265_v1 = vadd.f32 %v7683_v0, %v11080_v16 }
 0x3aa   : > { %v7684_v52 = vpop.f32.mrb[68].mxu1 }
 0x3ab   : > { %v7685_v17 = vpop.f32.mrb[69].mxu1 }
 0x3ac   : > { %v7686_v22 = vadd.f32 %v7685_v17, %v7684_v52  ;;  %v7687_v43 = vpop.f32.mrb[70].mxu1 }
 0x3ad   : > { %v7688_v34 = vpop.f32.mrb[71].mxu1 }
 0x3ae   : > { %v7689_v61 = vadd.f32 %v7688_v34, %v7687_v43  ;;  %v6270_v25 = vadd.f32 %v7686_v22, %v11080_v16 }
 0x3b0   : > { %v6273_v17 = vadd.f32 %v7689_v61, %v11080_v16 }
 0x3b2   : > { %v7690_v23 = vpop.f32.mrb[72].mxu1 }
 0x3b3   : > { %v7691_v19 = vpop.f32.mrb[73].mxu1 }
 0x3b4   : > { %v11057_v9 = vadd.f32 %v7691_v19, %v7690_v23  ;;  %v7693_v11 = vpop.f32.mrb[74].mxu1 }
 0x3b5   : > { %v7694_v62 = vpop.f32.mrb[75].mxu1 }
 0x3b6   : > { %v11059_v15 = vadd.f32 %v7694_v62, %v7693_v11 }
 0x3ba   : > { %v7696_v18 = vpop.f32.mrb[76].mxu1 }
 0x3bb   : > { %v7697_v24 = vpop.f32.mrb[77].mxu1 }
 0x3bc   : > { %v11061_v44 = vadd.f32 %v7697_v24, %v7696_v18  ;;  %v7699_v54 = vpop.f32.mrb[78].mxu1 }
 0x3bd   : > { %v7700_v47 = vpop.f32.mrb[79].mxu1 }
 0x3be   : > { %v11063_v57 = vadd.f32 %v7700_v47, %v7699_v54 }
 0x3c2   : > { %v7702_v48 = vpop.f32.mrb[80].mxu1 }
 0x3c3   : > { %v7703_v5 = vpop.f32.mrb[81].mxu1 }
 0x3c4   : > { %v11065_v7 = vadd.f32 %v7703_v5, %v7702_v48  ;;  %v7705_v33 = vpop.f32.mrb[82].mxu1  ;;  %v6278_v48 = vadd.f32 %v11057_v9, %v11080_v16 }
 0x3c5   : > { %v7706_v40 = vpop.f32.mrb[83].mxu1 }
 0x3c6   : > { %v11067_v21 = vadd.f32 %v7706_v40, %v7705_v33  ;;  %v6281_v40 = vadd.f32 %v11059_v15, %v11080_v16 }
 0x3ca   : > { %v7708_v38 = vpop.f32.mrb[84].mxu1 }
 0x3cb   : > { %v7709_v6 = vpop.f32.mrb[85].mxu1 }
 0x3cc   : > { %v11069_v46 = vadd.f32 %v7709_v6, %v7708_v38  ;;  %v7711_v3 = vpop.f32.mrb[86].mxu1 }
 0x3cd   : > { %v7712_v8 = vpop.f32.mrb[87].mxu1 }
 0x3ce   : > { %v11071_v20 = vadd.f32 %v7712_v8, %v7711_v3 }
 0x3d2   : > { %v7714_v29 = vpop.f32.mrb[88].mxu1 }
 0x3d3   : > { %v7715_v30 = vpop.f32.mrb[89].mxu1 }
 0x3d4   : > { %v11073_v31 = vadd.f32 %v7715_v30, %v7714_v29  ;;  %v7717_v4 = vpop.f32.mrb[90].mxu1 }
 0x3d5   : > { %v7718_v41 = vpop.f32.mrb[91].mxu1 }
 0x3d6   : > { %v11075_v27 = vadd.f32 %v7718_v41, %v7717_v4  ;;  %v7790_v13 = vpop.f32.mrb[96].mxu0 }
 0x3d7   : > { %v7791_v10 = vpop.f32.mrb[97].mxu0 }
 0x3d8   : > { %v7792_v50 = vadd.f32 %v7791_v10, %v7790_v13  ;;  %v7793_v35 = vpop.f32.mrb[98].mxu0  ;;  %v6286_v10 = vadd.f32 %v11061_v44, %v11080_v16 }
 0x3d9   : > { %v7794_v28 = vpop.f32.mrb[99].mxu0 }
 0x3da   : > { %v7720_v36 = vpop.f32.mrb[92].mxu1  ;;  %v7795_v39 = vadd.f32 %v7794_v28, %v7793_v35  ;;  %v11088_v26 = vadd.f32 %v7792_v50, %v6262_v56  ;;  %v6289_v50 = vadd.f32 %v11063_v57, %v11080_v16 }
 0x3db   : > { %v7721_v49 = vpop.f32.mrb[93].mxu1 }
 0x3dc   : > { %v11083_v55 = vadd.f32 %v7721_v49, %v7720_v36  ;;  %v7723_v12 = vpop.f32.mrb[94].mxu1  ;;  %v11090_v53 = vadd.f32 %v7795_v39, %v6265_v1 }
 0x3dd   : > { %v7724_v37 = vpop.f32.mrb[95].mxu1 }
 0x3de   : > { %v11086_v60 = vadd.f32 %v7724_v37, %v7723_v12  ;;  %v7796_v58 = vpop.f32.mrb[100].mxu0 }
 0x3df   : > { %v7797_v2 = vpop.f32.mrb[101].mxu0 }
 0x3e0   : > { %v7798_v63 = vadd.f32 %v7797_v2, %v7796_v58  ;;  %v7799_v0 = vpop.f32.mrb[102].mxu0  ;;  %v6294_v58 = vadd.f32 %v11065_v7, %v11080_v16 }
 0x3e1   : > { %v7800_v52 = vpop.f32.mrb[103].mxu0 }
 0x3e2   : > { %v7726_v51 = vpop.f32.mrb[96].mxu1  ;;  %v7801_v43 = vadd.f32 %v7800_v52, %v7799_v0  ;;  %v11098_v23 = vadd.f32 %v7798_v63, %v6270_v25  ;;  %v6297_v63 = vadd.f32 %v11067_v21, %v11080_v16 }
 0x3e3   : > { %v7727_v32 = vpop.f32.mrb[97].mxu1 }
 0x3e4   : > { %v11092_v45 = vadd.f32 %v7727_v32, %v7726_v51  ;;  %v7729_v42 = vpop.f32.mrb[98].mxu1  ;;  %v11102_v18 = vadd.f32 %v7801_v43, %v6273_v17 }
 0x3e5   : > { %v7730_v59 = vpop.f32.mrb[99].mxu1 }
 0x3e6   : > { %v11094_v14 = vadd.f32 %v7730_v59, %v7729_v42  ;;  %v7802_v54 = vpop.f32.mrb[104].mxu0 }
 0x3e7   : > { %v7803_v22 = vpop.f32.mrb[105].mxu0 }
 0x3e8   : > { %v7804_v5 = vadd.f32 %v7803_v22, %v7802_v54  ;;  %v7805_v61 = vpop.f32.mrb[106].mxu0 }
 0x3e9   : > { %v7806_v33 = vpop.f32.mrb[107].mxu0 }
 0x3ea   : > { %v7732_v34 = vpop.f32.mrb[100].mxu1  ;;  %v7807_v38 = vadd.f32 %v7806_v33, %v7805_v61  ;;  %v11110_v3 = vadd.f32 %v7804_v5, %v6278_v48  ;;  %v6302_v48 = vadd.f32 %v11069_v46, %v11080_v16  ;;  %v6305_v33 = vadd.f32 %v11071_v20, %v11080_v16 }
 0x3eb   : > { %v7733_v19 = vpop.f32.mrb[101].mxu1 }
 0x3ec   : > { %v11100_v11 = vadd.f32 %v7733_v19, %v7732_v34  ;;  %v7735_v62 = vpop.f32.mrb[102].mxu1  ;;  %v11114_v4 = vadd.f32 %v7807_v38, %v6281_v40 }
 0x3ed   : > { %v7736_v24 = vpop.f32.mrb[103].mxu1 }
 0x3ee   : > { %v11104_v47 = vadd.f32 %v7736_v24, %v7735_v62  ;;  %v7808_v13 = vpop.f32.mrb[108].mxu0 }
 0x3ef   : > { %v7809_v9 = vpop.f32.mrb[109].mxu0 }
 0x3f0   : > { %v7810_v49 = vadd.f32 %v7809_v9, %v7808_v13  ;;  %v7811_v15 = vpop.f32.mrb[110].mxu0 }
 0x3f1   : > { %v7812_v56 = vpop.f32.mrb[111].mxu0 }
 0x3f2   : > { %v7738_v6 = vpop.f32.mrb[104].mxu1  ;;  %v7813_v35 = vadd.f32 %v7812_v56, %v7811_v15  ;;  %v11122_v28 = vadd.f32 %v7810_v49, %v6286_v10  ;;  %v6310_v15 = vadd.f32 %v11073_v31, %v11080_v16 }
 0x3f3   : > { %v7739_v8 = vpop.f32.mrb[105].mxu1 }
 0x3f4   : > { %v11112_v29 = vadd.f32 %v7739_v8, %v7738_v6  ;;  %v7741_v30 = vpop.f32.mrb[106].mxu1  ;;  %v11126_v51 = vadd.f32 %v7813_v35, %v6289_v50  ;;  %v6313_v35 = vadd.f32 %v11075_v27, %v11080_v16 }
 0x3f5   : > { %v7742_v41 = vpop.f32.mrb[107].mxu1 }
 0x3f6   : > { %v11116_v36 = vadd.f32 %v7742_v41, %v7741_v30 }
 0x3f7   : > { %v7814_v42 = vpop.f32.mrb[112].mxu0 }
 0x3f8   : > { %v7815_v44 = vpop.f32.mrb[113].mxu0 }
 0x3f9   : > { %v7816_v2 = vadd.f32 %v7815_v44, %v7814_v42  ;;  %v7817_v57 = vpop.f32.mrb[114].mxu0 }
 0x3fa   : > { %v7744_v12 = vpop.f32.mrb[108].mxu1  ;;  %v7818_v25 = vpop.f32.mrb[115].mxu0 }
 0x3fb   : > { %v7745_v37 = vpop.f32.mrb[109].mxu1  ;;  %v7819_v0 = vadd.f32 %v7818_v25, %v7817_v57  ;;  %v11134_v17 = vadd.f32 %v7816_v2, %v6294_v58 }
 0x3fc   : > { %v11124_v1 = vadd.f32 %v7745_v37, %v7744_v12  ;;  %v7747_v39 = vpop.f32.mrb[110].mxu1 }
 0x3fd   : > { %v7748_v32 = vpop.f32.mrb[111].mxu1  ;;  %v11138_v62 = vadd.f32 %v7819_v0, %v6297_v63  ;;  %v6318_v63 = vadd.f32 %v11083_v55, %v11080_v16 }
 0x3fe   : > { %v11128_v59 = vadd.f32 %v7748_v32, %v7747_v39 }
 0x402   : > { %v7750_v52 = vpop.f32.mrb[112].mxu1  ;;  %v7820_v54 = vpop.f32.mrb[116].mxu0 }
 0x403   : > { %v7751_v43 = vpop.f32.mrb[113].mxu1  ;;  %v7821_v7 = vpop.f32.mrb[117].mxu0 }
 0x404   : > { %v11136_v34 = vadd.f32 %v7751_v43, %v7750_v52  ;;  %v7753_v19 = vpop.f32.mrb[114].mxu1  ;;  %v7822_v5 = vadd.f32 %v7821_v7, %v7820_v54  ;;  %v7823_v21 = vpop.f32.mrb[118].mxu0  ;;  %v6321_v43 = vadd.f32 %v11086_v60, %v11080_v16  ;;  %v6326_v60 = vadd.f32 %v11092_v45, %v11080_v16 }
 0x405   : > { %v7754_v24 = vpop.f32.mrb[115].mxu1  ;;  %v7824_v61 = vpop.f32.mrb[119].mxu0 }
 0x406   : > { %v11140_v22 = vadd.f32 %v7754_v24, %v7753_v19  ;;  %v7825_v40 = vadd.f32 %v7824_v61, %v7823_v21  ;;  %v11146_v6 = vadd.f32 %v7822_v5, %v6302_v48 }
 0x408   : > { %v11150_v13 = vadd.f32 %v7825_v40, %v6305_v33 }
 0x40a   : > { %v7756_v38 = vpop.f32.mrb[116].mxu1  ;;  %v7826_v10 = vpop.f32.mrb[120].mxu0 }
 0x40b   : > { %v7757_v8 = vpop.f32.mrb[117].mxu1  ;;  %v7827_v46 = vpop.f32.mrb[121].mxu0 }
 0x40c   : > { %v11148_v30 = vadd.f32 %v7757_v8, %v7756_v38  ;;  %v7759_v41 = vpop.f32.mrb[118].mxu1  ;;  %v7828_v56 = vadd.f32 %v7827_v46, %v7826_v10  ;;  %v7829_v20 = vpop.f32.mrb[122].mxu0 }
 0x40d   : > { %v7760_v9 = vpop.f32.mrb[119].mxu1  ;;  %v7830_v50 = vpop.f32.mrb[123].mxu0 }
 0x40e   : > { %v11152_v49 = vadd.f32 %v7760_v9, %v7759_v41  ;;  %v7831_v12 = vadd.f32 %v7830_v50, %v7829_v20  ;;  %v11158_v39 = vadd.f32 %v7828_v56, %v6310_v15  ;;  %v6329_v9 = vadd.f32 %v11094_v14, %v11080_v16  ;;  %v6712_v15 = vld [vmem:[%s8666_s9 + $0x10] sm:$0xff]  ;;  %v6711_v14 = vld [vmem:[%s8666_s9 + $0x8] sm:$0xff] }
 0x410   : > { %v11162_v58 = vadd.f32 %v7831_v12, %v6313_v35  ;;  %v6710_v35 = vld [vmem:[%s8666_s9] sm:$0xff] }
 0x412   : > { %v7762_v37 = vpop.f32.mrb[120].mxu1  ;;  %v7832_v57 = vpop.f32.mrb[124].mxu0 }
 0x413   : > { %v7763_v32 = vpop.f32.mrb[121].mxu1  ;;  %v7833_v31 = vpop.f32.mrb[125].mxu0 }
 0x414   : > { %v11160_v42 = vadd.f32 %v7763_v32, %v7762_v37  ;;  %v7765_v44 = vpop.f32.mrb[122].mxu1  ;;  %v7834_v27 = vadd.f32 %v7833_v31, %v7832_v57  ;;  %v7835_v0 = vpop.f32.mrb[126].mxu0  ;;  %v6713_v37 = vld [vmem:[%s8666_s9 + $0x18] sm:$0xff] }
 0x415   : > { %v7766_v2 = vpop.f32.mrb[123].mxu1  ;;  %v7836_v52 = vpop.f32.mrb[127].mxu0 }
 0x416   : > { %v11164_v25 = vadd.f32 %v7766_v2, %v7765_v44  ;;  %v7837_v19 = vadd.f32 %v7836_v52, %v7835_v0  ;;  %v11170_v54 = vadd.f32 %v7834_v27, %v6318_v63 }
 0x418   : > { %v11174_v21 = vadd.f32 %v7837_v19, %v6321_v43  ;;  %v6337_v19 = vadd.f32 %v11104_v47, %v11080_v16 }
 0x41a   : > { %v7768_v24 = vpop.f32.mrb[124].mxu1 }
 0x41b   : > { %v7769_v7 = vpop.f32.mrb[125].mxu1 }
 0x41c   : > { %v11172_v48 = vadd.f32 %v7769_v7, %v7768_v24  ;;  %v7771_v5 = vpop.f32.mrb[126].mxu1  ;;  %v7838_v55 = vpop.f32.mrb[128].mxu0 }
 0x41d   : > { %v7772_v61 = vpop.f32.mrb[127].mxu1  ;;  %v7839_v40 = vpop.f32.mrb[129].mxu0 }
 0x41e   : > { %v11176_v33 = vadd.f32 %v7772_v61, %v7771_v5  ;;  %v7840_v38 = vadd.f32 %v7839_v40, %v7838_v55  ;;  %v7841_v8 = vpop.f32.mrb[130].mxu0  ;;  %v6716_v5 = vld [vmem:[%s8666_s9 + $0x30] sm:$0xff]  ;;  %v6714_v40 = vld [vmem:[%s8666_s9 + $0x20] sm:$0xff] }
 0x41f   : > { %v7842_v41 = vpop.f32.mrb[131].mxu0 }
 0x420   : > { %v7843_v10 = vadd.f32 %v7842_v41, %v7841_v8  ;;  %v11186_v56 = vadd.f32 %v7840_v38, %v6326_v60  ;;  %v6717_v8 = vld [vmem:[%s8666_s9 + $0x38] sm:$0xff] }
 0x422   : > { %v7956_v46 = vpop.f32.mrb[128].mxu1  ;;  %v11192_v32 = vadd.f32 %v7843_v10, %v6329_v9 }
 0x423   : > { %v6592_v20 = vadd.f32 %v7956_v46, %v11098_v23  ;;  %v6583_v50 = vpop.f32.mrb[129].mxu1  ;;  %v6334_v23 = vadd.f32 %v11100_v11, %v11080_v16  ;;  %v6715_v46 = vld [vmem:[%s8666_s9 + $0x28] sm:$0xff] }
 0x424   : > { %v6584_v45 = vadd.f32 %v6583_v50, %v11088_v26  ;;  %v7957_v12 = vpop.f32.mrb[130].mxu1  ;;  %v7844_v31 = vpop.f32.mrb[132].mxu0 }
 0x425   : > { %v6744_v44 = vadd.f32 %v6712_v15, %v6592_v20  ;;  %v6595_v2 = vadd.f32 %v7957_v12, %v11102_v18  ;;  %v6586_v57 = vpop.f32.mrb[131].mxu1  ;;  %v7845_v0 = vpop.f32.mrb[133].mxu0 }
 0x426   : > { %v6742_v63 = vadd.f32 %v6710_v35, %v6584_v45  ;;  %v6587_v27 = vadd.f32 %v6586_v57, %v11090_v53  ;;  %v7846_v18 = vadd.f32 %v7845_v0, %v7844_v31  ;;  %v7847_v52 = vpop.f32.mrb[134].mxu0  ;;  %v6342_v35 = vadd.f32 %v11112_v29, %v11080_v16  ;;  %v6720_v57 = vld [vmem:[%s8666_s9 + $0x50] sm:$0xff] }
 0x427   : > { %6776 = vst.msk [vmem:[%s11197_s8 + $0x10] sm:$0xff] %vm2482_vm11, %v6744_v44  ;;  %v6745_v26 = vadd.f32 %v6713_v37, %v6595_v2  ;;  %v7848_v43 = vpop.f32.mrb[135].mxu0 }
 0x428   : > { %6774 = vst.msk [vmem:[%s11197_s8] sm:$0xff] %vm2482_vm11, %v6742_v63  ;;  %v6743_v53 = vadd.f32 %v6711_v14, %v6587_v27  ;;  %v7849_v24 = vadd.f32 %v7848_v43, %v7847_v52  ;;  %v11212_v61 = vadd.f32 %v7846_v18, %v6334_v23  ;;  %v6718_v63 = vld [vmem:[%s8666_s9 + $0x40] sm:$0xff] }
 0x429   : > { %6777 = vst.msk [vmem:[%s11197_s8 + $0x18] sm:$0xff] %vm2482_vm11, %v6745_v26  ;;  %v6721_v26 = vld [vmem:[%s8666_s9 + $0x58] sm:$0xff] }
 0x42a   : > { %6775 = vst.msk [vmem:[%s11197_s8 + $0x8] sm:$0xff] %vm2482_vm11, %v6743_v53  ;;  %v7960_v7 = vpop.f32.mrb[132].mxu1  ;;  %v11218_v41 = vadd.f32 %v7849_v24, %v6337_v19  ;;  %v6719_v53 = vld [vmem:[%s8666_s9 + $0x48] sm:$0xff] }
 0x42b   : > { %v6608_v11 = vadd.f32 %v7960_v7, %v11122_v28  ;;  %v6599_v55 = vpop.f32.mrb[133].mxu1  ;;  %v6350_v7 = vadd.f32 %v11124_v1, %v11080_v16 }
 0x42c   : > { %v6600_v60 = vadd.f32 %v6599_v55, %v11110_v3  ;;  %v7961_v38 = vpop.f32.mrb[134].mxu1  ;;  %v7850_v15 = vpop.f32.mrb[136].mxu0 }
 0x42d   : > { %v6748_v47 = vadd.f32 %v6716_v5, %v6608_v11  ;;  %v6611_v9 = vadd.f32 %v7961_v38, %v11126_v51  ;;  %v6602_v10 = vpop.f32.mrb[135].mxu1  ;;  %v7851_v50 = vpop.f32.mrb[137].mxu0  ;;  %v6724_v38 = vld [vmem:[%s8666_s9 + $0x70] sm:$0xff] }
 0x42e   : > { %v6746_v20 = vadd.f32 %v6714_v40, %v6600_v60  ;;  %v6603_v28 = vadd.f32 %v6602_v10, %v11114_v4  ;;  %v7852_v45 = vadd.f32 %v7851_v50, %v7850_v15  ;;  %v7853_v12 = vpop.f32.mrb[138].mxu0  ;;  %v6345_v4 = vadd.f32 %v11116_v36, %v11080_v16  ;;  %v6725_v15 = vld [vmem:[%s8666_s9 + $0x78] sm:$0xff] }
 0x42f   : > { %6780 = vst.msk [vmem:[%s11197_s8 + $0x30] sm:$0xff] %vm2482_vm11, %v6748_v47  ;;  %v6749_v3 = vadd.f32 %v6717_v8, %v6611_v9  ;;  %v7854_v37 = vpop.f32.mrb[139].mxu0  ;;  %v6722_v9 = vld [vmem:[%s8666_s9 + $0x60] sm:$0xff] }
 0x430   : > { %6778 = vst.msk [vmem:[%s11197_s8 + $0x20] sm:$0xff] %vm2482_vm11, %v6746_v20  ;;  %v6747_v51 = vadd.f32 %v6715_v46, %v6603_v28  ;;  %v7855_v44 = vadd.f32 %v7854_v37, %v7853_v12  ;;  %v11236_v14 = vadd.f32 %v7852_v45, %v6342_v35 }
 0x431   : > { %6781 = vst.msk [vmem:[%s11197_s8 + $0x38] sm:$0xff] %vm2482_vm11, %v6749_v3  ;;  %v6723_v3 = vld [vmem:[%s8666_s9 + $0x68] sm:$0xff] }
 0x432   : > { %6779 = vst.msk [vmem:[%s11197_s8 + $0x28] sm:$0xff] %vm2482_vm11, %v6747_v51  ;;  %v7964_v2 = vpop.f32.mrb[136].mxu1  ;;  %v11242_v23 = vadd.f32 %v7855_v44, %v6345_v4  ;;  %v6358_v51 = vadd.f32 %v11136_v34, %v11080_v16 }
 0x433   : > { %v6624_v29 = vadd.f32 %v7964_v2, %v11146_v6  ;;  %v6615_v31 = vpop.f32.mrb[137].mxu1 }
 0x434   : > { %v6616_v27 = vadd.f32 %v6615_v31, %v11134_v17  ;;  %v7965_v0 = vpop.f32.mrb[138].mxu1  ;;  %v7856_v43 = vpop.f32.mrb[140].mxu0 }
 0x435   : > { %v6752_v36 = vadd.f32 %v6720_v57, %v6624_v29  ;;  %v6627_v18 = vadd.f32 %v7965_v0, %v11150_v13  ;;  %v6618_v52 = vpop.f32.mrb[139].mxu1  ;;  %v7857_v24 = vpop.f32.mrb[141].mxu0  ;;  %v6728_v29 = vld [vmem:[%s8666_s9 + $0x90] sm:$0xff] }
 0x436   : > { %v6750_v19 = vadd.f32 %v6718_v63, %v6616_v27  ;;  %v6619_v6 = vadd.f32 %v6618_v52, %v11138_v62  ;;  %v7858_v5 = vadd.f32 %v7857_v24, %v7856_v43  ;;  %v7859_v11 = vpop.f32.mrb[142].mxu0  ;;  %v6353_v62 = vadd.f32 %v11128_v59, %v11080_v16  ;;  %v6726_v27 = vld [vmem:[%s8666_s9 + $0x80] sm:$0xff]  ;;  %v6727_v43 = vld [vmem:[%s8666_s9 + $0x88] sm:$0xff] }
 0x437   : > { %6784 = vst.msk [vmem:[%s11197_s8 + $0x50] sm:$0xff] %vm2482_vm11, %v6752_v36  ;;  %v6753_v17 = vadd.f32 %v6721_v26, %v6627_v18  ;;  %v7860_v55 = vpop.f32.mrb[143].mxu0  ;;  %v6729_v36 = vld [vmem:[%s8666_s9 + $0x98] sm:$0xff] }
 0x438   : > { %6782 = vst.msk [vmem:[%s11197_s8 + $0x40] sm:$0xff] %vm2482_vm11, %v6750_v19  ;;  %v6751_v13 = vadd.f32 %v6719_v53, %v6619_v6  ;;  %v7861_v40 = vadd.f32 %v7860_v55, %v7859_v11  ;;  %v6511_v8 = vadd.f32 %v7858_v5, %v6350_v7 }
 0x439   : > { %6785 = vst.msk [vmem:[%s11197_s8 + $0x58] sm:$0xff] %vm2482_vm11, %v6753_v17  ;;  %v6366_v17 = vadd.f32 %v11148_v30, %v11080_v16 }
 0x43a   : > { %6783 = vst.msk [vmem:[%s11197_s8 + $0x48] sm:$0xff] %vm2482_vm11, %v6751_v13  ;;  %v7968_v60 = vpop.f32.mrb[140].mxu1  ;;  %v6514_v20 = vadd.f32 %v7861_v40, %v6353_v62  ;;  %v6732_v62 = vld [vmem:[%s8666_s9 + $0xb0] sm:$0xff] }
 0x43b   : > { %v6640_v1 = vadd.f32 %v7968_v60, %v11170_v54  ;;  %v6631_v47 = vpop.f32.mrb[141].mxu1 }
 0x43c   : > { %v6632_v10 = vadd.f32 %v6631_v47, %v11158_v39  ;;  %v7969_v46 = vpop.f32.mrb[142].mxu1  ;;  %v7862_v35 = vpop.f32.mrb[144].mxu0 }
 0x43d   : > { %v6756_v28 = vadd.f32 %v6724_v38, %v6640_v1  ;;  %v6643_v59 = vadd.f32 %v7969_v46, %v11174_v21  ;;  %v6634_v50 = vpop.f32.mrb[143].mxu1  ;;  %v7863_v12 = vpop.f32.mrb[145].mxu0  ;;  %v6730_v38 = vld [vmem:[%s8666_s9 + $0xa0] sm:$0xff] }
 0x43e   : > { %v6754_v45 = vadd.f32 %v6722_v9, %v6632_v10  ;;  %v6635_v54 = vadd.f32 %v6634_v50, %v11162_v58  ;;  %v7864_v37 = vadd.f32 %v7863_v12, %v7862_v35  ;;  %v7865_v4 = vpop.f32.mrb[146].mxu0  ;;  %v6361_v58 = vadd.f32 %v11140_v22, %v11080_v16  ;;  %v6733_v9 = vld [vmem:[%s8666_s9 + $0xb8] sm:$0xff] }
 0x43f   : > { %6788 = vst.msk [vmem:[%s11197_s8 + $0x70] sm:$0xff] %vm2482_vm11, %v6756_v28  ;;  %v6757_v39 = vadd.f32 %v6725_v15, %v6643_v59  ;;  %v7866_v44 = vpop.f32.mrb[147].mxu0  ;;  %v6731_v28 = vld [vmem:[%s8666_s9 + $0xa8] sm:$0xff] }
 0x440   : > { %6786 = vst.msk [vmem:[%s11197_s8 + $0x60] sm:$0xff] %vm2482_vm11, %v6754_v45  ;;  %v6755_v21 = vadd.f32 %v6723_v3, %v6635_v54  ;;  %v7867_v2 = vadd.f32 %v7866_v44, %v7865_v4  ;;  %v11280_v31 = vadd.f32 %v7864_v37, %v6358_v51  ;;  %v6736_v37 = vld [vmem:[%s8666_s9 + $0xd0] sm:$0xff]  ;;  %v6734_v44 = vld [vmem:[%s8666_s9 + $0xc0] sm:$0xff] }
 0x441   : > { %6789 = vst.msk [vmem:[%s11197_s8 + $0x78] sm:$0xff] %vm2482_vm11, %v6757_v39 }
 0x442   : > { %6787 = vst.msk [vmem:[%s11197_s8 + $0x68] sm:$0xff] %vm2482_vm11, %v6755_v21  ;;  %v7972_v57 = vpop.f32.mrb[144].mxu1  ;;  %v11286_v18 = vadd.f32 %v7867_v2, %v6361_v58 }
 0x443   : > { %v6656_v34 = vadd.f32 %v7972_v57, %v11212_v61  ;;  %v6647_v63 = vpop.f32.mrb[145].mxu1  ;;  %v6737_v57 = vld [vmem:[%s8666_s9 + $0xd8] sm:$0xff] }
 0x444   : > { %v6648_v0 = vadd.f32 %v6647_v63, %v11186_v56  ;;  %v7973_v26 = vpop.f32.mrb[146].mxu1  ;;  %v7868_v19 = vpop.f32.mrb[148].mxu0 }
 0x445   : > { %v6760_v22 = vadd.f32 %v6728_v29, %v6656_v34  ;;  %v6659_v52 = vadd.f32 %v7973_v26, %v11218_v41  ;;  %v6650_v53 = vpop.f32.mrb[147].mxu1  ;;  %v7869_v24 = vpop.f32.mrb[149].mxu0 }
 0x446   : > { %v6758_v6 = vadd.f32 %v6726_v27, %v6648_v0  ;;  %v6651_v61 = vadd.f32 %v6650_v53, %v11192_v32  ;;  %v7870_v7 = vadd.f32 %v7869_v24, %v7868_v19  ;;  %v7871_v5 = vpop.f32.mrb[150].mxu0  ;;  %v6369_v32 = vadd.f32 %v11152_v49, %v11080_v16  ;;  %v6735_v27 = vld [vmem:[%s8666_s9 + $0xc8] sm:$0xff] }
 0x447   : > { %6792 = vst.msk [vmem:[%s11197_s8 + $0x90] sm:$0xff] %vm2482_vm11, %v6760_v22  ;;  %v6761_v56 = vadd.f32 %v6729_v36, %v6659_v52  ;;  %v7872_v11 = vpop.f32.mrb[151].mxu0  ;;  %v6382_v52 = vadd.f32 %v11172_v48, %v11080_v16 }
 0x448   : > { %6790 = vst.msk [vmem:[%s11197_s8 + $0x80] sm:$0xff] %vm2482_vm11, %v6758_v6  ;;  %v6759_v41 = vadd.f32 %v6727_v43, %v6651_v61  ;;  %v7873_v13 = vadd.f32 %v7872_v11, %v7871_v5  ;;  %v6527_v40 = vadd.f32 %v7870_v7, %v6366_v17  ;;  %v6738_v7 = vld [vmem:[%s8666_s9 + $0xe0] sm:$0xff] }
 0x449   : > { %6793 = vst.msk [vmem:[%s11197_s8 + $0x98] sm:$0xff] %vm2482_vm11, %v6761_v56  ;;  %v6740_v56 = vld [vmem:[%s8666_s9 + $0xf0] sm:$0xff] }
 0x44a   : > { %6791 = vst.msk [vmem:[%s11197_s8 + $0x88] sm:$0xff] %vm2482_vm11, %v6759_v41  ;;  %v7976_v55 = vpop.f32.mrb[148].mxu1  ;;  %v6530_v10 = vadd.f32 %v7873_v13, %v6369_v32  ;;  %v6739_v13 = vld [vmem:[%s8666_s9 + $0xe8] sm:$0xff] }
 0x44b   : > { %v6672_v30 = vadd.f32 %v7976_v55, %v6511_v8  ;;  %v6663_v60 = vpop.f32.mrb[149].mxu1 }
 0x44c   : > { %v6664_v1 = vadd.f32 %v6663_v60, %v11236_v14  ;;  %v7977_v47 = vpop.f32.mrb[150].mxu1  ;;  %v7874_v59 = vpop.f32.mrb[152].mxu0  ;;  %v6374_v14 = vadd.f32 %v11160_v42, %v11080_v16 }
 0x44d   : > { %v6764_v46 = vadd.f32 %v6732_v62, %v6672_v30  ;;  %v6675_v49 = vadd.f32 %v7977_v47, %v6514_v20  ;;  %v6666_v15 = vpop.f32.mrb[151].mxu1  ;;  %v7875_v8 = vpop.f32.mrb[153].mxu0 }
 0x44e   : > { %v6762_v50 = vadd.f32 %v6730_v38, %v6664_v1  ;;  %v6667_v3 = vadd.f32 %v6666_v15, %v11242_v23  ;;  %v7876_v45 = vadd.f32 %v7875_v8, %v7874_v59  ;;  %v7877_v54 = vpop.f32.mrb[154].mxu0  ;;  %v6377_v23 = vadd.f32 %v11164_v25, %v11080_v16 }
 0x44f   : > { %6796 = vst.msk [vmem:[%s11197_s8 + $0xb0] sm:$0xff] %vm2482_vm11, %v6764_v46  ;;  %v6765_v35 = vadd.f32 %v6733_v9, %v6675_v49  ;;  %v7878_v12 = vpop.f32.mrb[155].mxu0 }
 0x450   : > { %6794 = vst.msk [vmem:[%s11197_s8 + $0xa0] sm:$0xff] %vm2482_vm11, %v6762_v50  ;;  %v6763_v20 = vadd.f32 %v6731_v28, %v6667_v3  ;;  %v7879_v39 = vadd.f32 %v7878_v12, %v7877_v54  ;;  %v6535_v4 = vadd.f32 %v7876_v45, %v6374_v14 }
 0x451   : > { %6797 = vst.msk [vmem:[%s11197_s8 + $0xb8] sm:$0xff] %vm2482_vm11, %v6765_v35 }
 0x452   : > { %6795 = vst.msk [vmem:[%s11197_s8 + $0xa8] sm:$0xff] %vm2482_vm11, %v6763_v20  ;;  %v7980_v51 = vpop.f32.mrb[152].mxu1  ;;  %v6538_v29 = vadd.f32 %v7879_v39, %v6377_v23 }
 0x453   : > { %v6688_v42 = vadd.f32 %v7980_v51, %v6527_v40  ;;  %v6679_v21 = vpop.f32.mrb[153].mxu1 }
 0x454   : > { %v6680_v58 = vadd.f32 %v6679_v21, %v11280_v31  ;;  %v7981_v2 = vpop.f32.mrb[154].mxu1  ;;  %v7880_v0 = vpop.f32.mrb[156].mxu0 }
 0x455   : > { %v6768_v34 = vadd.f32 %v6736_v37, %v6688_v42  ;;  %v6691_v25 = vadd.f32 %v7981_v2, %v6530_v10  ;;  %v6682_v63 = vpop.f32.mrb[155].mxu1  ;;  %v7881_v22 = vpop.f32.mrb[157].mxu0 }
 0x456   : > { %v6766_v26 = vadd.f32 %v6734_v44, %v6680_v58  ;;  %v6683_v36 = vadd.f32 %v6682_v63, %v11286_v18  ;;  %v7882_v53 = vadd.f32 %v7881_v22, %v7880_v0  ;;  %v7883_v43 = vpop.f32.mrb[158].mxu0  ;;  %v6385_v18 = vadd.f32 %v11176_v33, %v11080_v16  ;;  %v6741_v16 = vld [vmem:[%s8666_s9 + $0xf8] sm:$0xff]  ;;  %s8492_s9 = scalar_lea.vmem %s11350_s12, 4096 }
 0x457   : > { %6800 = vst.msk [vmem:[%s11197_s8 + $0xd0] sm:$0xff] %vm2482_vm11, %v6768_v34  ;;  %v6769_v31 = vadd.f32 %v6737_v57, %v6691_v25  ;;  %v7884_v6 = vpop.f32.mrb[159].mxu0  ;;  %p8493_p11 = scmp.ne.s32.totalorder %s11350_s12, %s8492_s9  ;;  %p8500_p1 = scmp.lt.s32.totalorder %s8498_s23, %s8492_s9 }
 0x458   : > { %6798 = vst.msk [vmem:[%s11197_s8 + $0xc0] sm:$0xff] %vm2482_vm11, %v6766_v26  ;;  %v6767_v19 = vadd.f32 %v6735_v27, %v6683_v36  ;;  %v7885_v61 = vadd.f32 %v7884_v6, %v7883_v43  ;;  %v6543_v24 = vadd.f32 %v7882_v53, %v6382_v52 }
 0x459   : > { %6801 = vst.msk [vmem:[%s11197_s8 + $0xd8] sm:$0xff] %vm2482_vm11, %v6769_v31  ;;  %p8494_p12 = pnand %p8493_p11, %p8629_p5  ;;  %p8501_p2 = por %p8500_p1, %p8499_p0 }
 0x45a   : > { %6799 = vst.msk [vmem:[%s11197_s8 + $0xc8] sm:$0xff] %vm2482_vm11, %v6767_v19  ;;  %v7984_v48 = vpop.f32.mrb[156].mxu1  ;;  %v6546_v11 = vadd.f32 %v7885_v61, %v6385_v18 }
 0x45b   : > { %v6695_v17 = vpop.f32.mrb[157].mxu1  ;;  %v6704_v5 = vadd.f32 %v7984_v48, %v6543_v24  ;;  %p8495_p13 = pneg %p8494_p12 }
 0x45c   : > { %v6696_v41 = vadd.f32 %v6695_v17, %v6535_v4  ;;  %v7985_v32 = vpop.f32.mrb[158].mxu1 }
 0x45d   : > { %v6698_v33 = vpop.f32.mrb[159].mxu1  ;;  %v6772_v55 = vadd.f32 %v6740_v56, %v6704_v5  ;;  %v6707_v40 = vadd.f32 %v7985_v32, %v6546_v11  ;;  %p8502_p3 = pnand %p8501_p2, %p8495_p13 }
 0x45e   : > { %v6770_v62 = vadd.f32 %v6738_v7, %v6696_v41  ;;  %v6699_v30 = vadd.f32 %v6698_v33, %v6538_v29 }
 0x45f   : > { %6804 = vst.msk [vmem:[%s11197_s8 + $0xf0] sm:$0xff] %vm2482_vm11, %v6772_v55  ;;  %v6773_v60 = vadd.f32 %v6741_v16, %v6707_v40 }
 0x460   : > { %6802 = vst.msk [vmem:[%s11197_s8 + $0xe0] sm:$0xff] %vm2482_vm11, %v6770_v62  ;;  %v6771_v38 = vadd.f32 %v6739_v13, %v6699_v30 }
 0x461   : > { %6805 = vst.msk [vmem:[%s11197_s8 + $0xf8] sm:$0xff] %vm2482_vm11, %v6773_v60 }
 0x462   : > { %6803 = vst.msk [vmem:[%s11197_s8 + $0xe8] sm:$0xff] %vm2482_vm11, %v6771_v38 }
 0x463   : > { %8505 = shalt.err (!%p8502_p3)
}
 0x464   : > { %s8506_s25 = scalar_lea.hbm %s11348_s15, 4096  ;;  %s8510_s30 = scalar_lea.hbm %s11408_s5, 8192 }
 0x465   : > { %p8507_p4 = scmp.ne.s32.totalorder %s11348_s15, %s8506_s25  ;;  %p8511_p9 = scmp.lt.u32.totalorder %s11348_s15, %s11408_s5 }
 0x466   : > { %p8512_p10 = scmp.lt.u32.totalorder %s8510_s30, %s8506_s25  ;;  %p8514_p12 = scmp.lt.u32.totalorder %s8506_s25, %s11348_s15 }
 0x467   : > { %p8508_p7 = pnand %p8507_p4, %p8629_p5 }
 0x468   : > { %p8513_p11 = por %p8512_p10, %p8511_p9 }
 0x469   : > { %p8509_p8 = pneg %p8508_p7 }
 0x46a   : > { %p8515_p13 = por %p8514_p12, %p8513_p11 }
 0x46c   : > { %p8516_p0 = pnand %p8515_p13, %p8509_p8 }
 0x46e   : > { %8519 = shalt.err (!%p8516_p0)
}
 0x46f   : > { %s8559_s8 = smov 128   ;;  %s8560_s11 = smov 8  }
 0x470   : > { %7986 = dma.vmem_to_hbm [thread:$0]  (%p8629_p5), %s11350_s12, 4096, %s11348_s15, %s11362_s22, %s8559_s8, %s8559_s8, %s8560_s11  }
 0x471 PF: > { %p7992_p1 = scmp.ge.s32.totalorder %s8554_s21, 2  ;;  %s6835_s13 = sand.u32 1, %s8542_s18  }
 0x472   : > { %s6836_s14 = scalar_lea.sflag [#allocation4], %s6835_s13 }
 0x473   : > { %p7989_p2 = pnand %p7992_p1, %p8633_p6 }
 0x475   : > { %8537 = dma.done.wait (!%p7989_p2), %s6836_s14, 4096  }
 0x476   : > { %8539 = vsyncadd (!%p7989_p2), %s6836_s14, 4294963200  ;;  %p15_p3 = scmp.ge.s32.totalorder %s8616_s24, 4   ;;  %s11656_s18 = smov %s8546_s19 }
 0x477   : > { %s11657_s19 = smov %s8550_s20  ;;  %s11658_s20 = smov %s8627_s27 }
 0x478   : > { %s11659_s21 = smov %s8616_s24  ;;  %17 = sbr.rel (!%p15_p3) target bundleno = 3 (0x3), region = 78 }
 0x47f   :  { %6841 = vsyncpa [#allocation4], 1 }
 0x480   :  { %6843 = vsyncpa [#allocation4 + $0x1], 1 }

</bundles_post_ra>
